<compile_context>
chip_gen: v7x
topology: tpu7x:2x2x1
jax: 0.10.0
libtpu: 0.0.40
codegen_flags: <defaults>
</compile_context>

<pallas_src>
import functools
import math

import jax
import jax.numpy as jnp
from jax.experimental import pallas as pl
from jax.experimental.pallas import tpu as pltpu


# --------------------------------------------------------------------------
# shared in-kernel helper: channel-mixing matmul  [Cout,Cin] x [Cin,T]
# --------------------------------------------------------------------------
def _cmatmul(w, x):
    # Degenerate (size-1) contraction / output dims: VPU mul + reduce,
    # otherwise MXU matmul with f32 accumulation.
    if w.shape[0] == 1 or w.shape[1] == 1:
        return jnp.sum(w[:, :, None] * x[None, :, :], axis=1)
    return jnp.dot(w, x, preferred_element_type=jnp.float32)


# --------------------------------------------------------------------------
# One-time probe of pltpu.roll's lane-shift convention (tiny kernel).
#   +1 : matches jnp.roll (out[i] = in[(i - shift) mod N])
#   -1 : opposite convention
#    0 : roll unavailable -> fall back to concat-based tap construction
# Keeps the fused kernel correct regardless of backend revision.
# --------------------------------------------------------------------------
@functools.lru_cache(maxsize=None)
def _roll_direction():
    try:
        def k(o_ref):
            i = jax.lax.broadcasted_iota(jnp.int32, (8, 128), 1)
            o_ref[...] = pltpu.roll(i, 1, axis=1)

        r = jax.device_get(
            pl.pallas_call(k, out_shape=jax.ShapeDtypeStruct((8, 128),
                                                             jnp.int32))())
        if int(r[0, 0]) == 127 and int(r[0, 1]) == 0:
            return 1
        if int(r[0, 0]) == 1 and int(r[0, 1]) == 2:
            return -1
        return 0
    except Exception:
        return 0


def _shifted_taps(xp, dil, roll_dir, masks):
    """Return x(t-dil) and x(t+dil) with zero padding at the boundaries."""
    C, T = xp.shape
    if roll_dir == 0:
        # Fallback: lane-concat construction (always available).
        zeros = jnp.zeros((C, dil), xp.dtype)
        x_lo = jnp.concatenate([zeros, xp[:, :T - dil]], axis=1)
        x_hi = jnp.concatenate([xp[:, dil:], zeros], axis=1)
        return x_lo, x_hi
    lo_mask, hi_mask = masks[dil]
    sh_lo = dil if roll_dir > 0 else T - dil  # shift giving out[t] = xp[t-dil]
    x_lo = jnp.where(lo_mask, pltpu.roll(xp, sh_lo, axis=1), 0.0)
    x_hi = jnp.where(hi_mask, pltpu.roll(xp, T - sh_lo, axis=1), 0.0)
    return x_lo, x_hi


# --------------------------------------------------------------------------
# Fully fused DiffWave body.  One grid step = one batch element.
# --------------------------------------------------------------------------
def _diffwave_kernel(audio_ref, d_ref, w_in_ref, b_in_ref,
                     wcat_ref, bc_ref, wo_ref, bo_ref,
                     ws_ref, bs_ref, wout_ref, bout_ref,
                     out_ref, x_sc, skip_sc, *, dilations, roll_dir):
    C = w_in_ref.shape[0]
    T = audio_ref.shape[-1]
    n_layers = len(dilations)
    inv_sqrt2 = 1.0 / math.sqrt(2.0)
    cdt = wcat_ref.dtype                      # matmul operand dtype (bf16/f32)

    # ---- input projection (1x1 conv) + ReLU (f32, kept in VMEM scratch) ----
    x_sc[...] = jnp.maximum(
        _cmatmul(w_in_ref[...], audio_ref[0]) + b_in_ref[...], 0.0)   # [C, T]
    skip_sc[...] = jnp.zeros(skip_sc.shape, skip_sc.dtype)

    d_all = d_ref[0]                                                  # [C, L]

    masks = None
    if roll_dir != 0:
        t_idx = jax.lax.broadcasted_iota(jnp.int32, (C, T), 1)
        masks = {d: (t_idx >= d, t_idx < T - d) for d in sorted(set(dilations))}

    # ---- residual stack (unrolled; dilation is static per layer) ----------
    for l, dil in enumerate(dilations):
        x = x_sc[...]                                                 # f32 [C,T]
        xp = x + d_all[:, l:l + 1]                                    # bcast add
        x_lo, x_hi = _shifted_taps(xp, dil, roll_dir, masks)

        # fused 3-tap dilated conv: single [2C,3C] x [3C,T] MXU matmul.
        # Activations are cast to the weight dtype only at the matmul input.
        xcat = jnp.concatenate(
            [x_lo.astype(cdt), xp.astype(cdt), x_hi.astype(cdt)], axis=0)
        y = jnp.dot(wcat_ref[l], xcat,
                    preferred_element_type=jnp.float32) + bc_ref[l]   # [2C,T]

        # sigmoid(gate)*tanh(filter); sigmoid expressed through tanh (1 EUP
        # push per element instead of exp + divide).  Kept in f32.
        z = (0.5 * (1.0 + jnp.tanh(0.5 * y[:C]))) * jnp.tanh(y[C:])   # [C,T]

        o = jnp.dot(wo_ref[l], z.astype(cdt),
                    preferred_element_type=jnp.float32) + bo_ref[l]   # [2C,T]
        x_sc[...] = (x + o[:C]) * inv_sqrt2                           # residual
        skip_sc[...] = skip_sc[...] + o[C:]                           # skip acc

    # ---- head: skip/sqrt(L) -> 1x1 + ReLU -> 1x1 --------------------------
    s = skip_sc[...] * (1.0 / math.sqrt(n_layers))
    s = jnp.maximum(
        jnp.dot(ws_ref[...], s.astype(cdt),
                preferred_element_type=jnp.float32) + bs_ref[...], 0.0)
    out = _cmatmul(wout_ref[...], s) + bout_ref[...]                  # [Cin,T]
    out_ref[0] = out.astype(out_ref.dtype)


def _vmem_limit_bytes():
    """~75% of physical VMEM: ~48 MiB on v7x (64 MiB), ~96 MiB on v5e/v6e."""
    cap = 128 * 1024 * 1024
    try:
        cap = int(getattr(pltpu.get_tpu_info(), "vmem_capacity_bytes", cap)) or cap
    except Exception:
        pass
    return max(32 * 1024 * 1024, min((cap * 3) // 4, 112 * 1024 * 1024))


def diffwave_fused(audio, d_all, p):
    B, Cin, T = audio.shape
    C = p["in_w"].shape[0]
    L = d_all.shape[-1]
    assert T % 128 == 0, "time axis must be a multiple of 128 (lane-dense)"

    weights = (p["in_w"], p["in_b"], p["wcat"], p["bc"], p["wo_all"],
               p["bo"], p["skip_w"], p["skip_b"], p["out_w"], p["out_b"])

    def weight_spec(a):
        idx = lambda b, zeros=(0,) * a.ndim: zeros
        # Weights never change across the batch grid: single-buffer them so
        # the [L,2C,3C]/[L,2C,C] stacks aren't allocated twice (VMEM headroom,
        # matters most on v7x's 64 MiB VMEM).
        try:
            return pl.BlockSpec(a.shape, idx, pipeline_mode=pl.Buffered(1))
        except (TypeError, AttributeError):
            return pl.BlockSpec(a.shape, idx)

    kernel = functools.partial(_diffwave_kernel, dilations=p["dilations"],
                               roll_dir=_roll_direction())
    return pl.pallas_call(
        kernel,
        out_shape=jax.ShapeDtypeStruct((B, Cin, T), audio.dtype),
        grid=(B,),
        in_specs=[
            pl.BlockSpec((1, Cin, T), lambda b: (b, 0, 0)),
            pl.BlockSpec((1, C, L), lambda b: (b, 0, 0)),
        ] + [weight_spec(w) for w in weights],
        out_specs=pl.BlockSpec((1, Cin, T), lambda b: (b, 0, 0)),
        scratch_shapes=[pltpu.VMEM((C, T), jnp.float32),    # x
                        pltpu.VMEM((C, T), jnp.float32)],   # skip accumulator
        compiler_params=pltpu.CompilerParams(
            # NOTE(v7x): keep B even (or add a parallel T-chunk axis) so both
            # TensorCores stay busy.
            dimension_semantics=("parallel",),
            vmem_limit_bytes=_vmem_limit_bytes()),
    )(audio, d_all, *weights)


# --------------------------------------------------------------------------
# Full forward: conditioning (plain XLA, tiny) + the fused Pallas kernel.
# --------------------------------------------------------------------------
def diffwave_forward(packed, audio, diffusion_step):
    emb = packed["embedding_table"][diffusion_step]                   # [B,128]
    h = jnp.dot(emb, packed["emb_w1t"]) + packed["emb_b1"]
    h = h * jax.nn.sigmoid(h)                                         # silu
    h = jnp.dot(h, packed["emb_w2t"]) + packed["emb_b2"]
    h = h * jax.nn.sigmoid(h)                                         # silu
    d_flat = jnp.dot(h, packed["wd_t"]) + packed["bd_row"]            # [B,C*L]

    B = audio.shape[0]
    C = packed["in_w"].shape[0]
    L = len(packed["dilations"])
    d_all = d_flat.reshape(B, C, L)
    return diffwave_fused(audio, d_all, packed)


# --------------------------------------------------------------------------
# Deterministic parameters (PyTorch layouts) + kernel-friendly packing
# --------------------------------------------------------------------------
def build_params(key, *, input_channels, residual_channels, residual_layers,
                 dilation_cycle_length, max_steps):
    C = residual_channels
    k_iter = iter(jax.random.split(key, 16 + 6 * residual_layers))

    def kaiming(k, shape, fan_in):
        return (jax.random.normal(k, shape) *
                math.sqrt(2.0 / fan_in)).astype(jnp.float32)

    def uniform(k, shape, fan_in):
        bound = 1.0 / math.sqrt(fan_in)
        return jax.random.uniform(k, shape, minval=-bound, maxval=bound,
                                  dtype=jnp.float32)

    steps = jnp.arange(max_steps, dtype=jnp.float32)[:, None]
    dims = jnp.arange(64, dtype=jnp.float32)[None, :]
    table = steps * 10.0 ** (dims * 4.0 / 63.0)
    table = jnp.concatenate([jnp.sin(table), jnp.cos(table)], axis=1)

    params = {
        "embedding_table": table,
        "in_w": kaiming(next(k_iter), (C, input_channels), input_channels),
        "in_b": uniform(next(k_iter), (C,), input_channels),
        "emb_w1": uniform(next(k_iter), (512, 128), 128),
        "emb_b1": uniform(next(k_iter), (512,), 128),
        "emb_w2": uniform(next(k_iter), (512, 512), 512),
        "emb_b2": uniform(next(k_iter), (512,), 512),
    }
    layers = []
    for i in range(residual_layers):
        layers.append({
            "dilation": 2 ** (i % dilation_cycle_length),
            "wd": uniform(next(k_iter), (C, 512), 512),
            "bd": uniform(next(k_iter), (C,), 512),
            "wconv": kaiming(next(k_iter), (2 * C, C, 3), C * 3),
            "bc": uniform(next(k_iter), (2 * C,), C * 3),
            "wo": kaiming(next(k_iter), (2 * C, C), C),
            "bo": uniform(next(k_iter), (2 * C,), C),
        })
    params["layers"] = layers
    params["skip_w"] = kaiming(next(k_iter), (C, C), C)
    params["skip_b"] = uniform(next(k_iter), (C,), C)
    params["out_w"] = jnp.zeros((input_channels, C), jnp.float32)  # zeros_
    params["out_b"] = uniform(next(k_iter), (input_channels,), C)
    return params


def pack_params(raw, compute_dtype=jnp.bfloat16):
    """Pack weights for the fused kernel.

    compute_dtype is the MXU operand dtype for the per-layer / skip matmuls
    (bf16 by default; accumulation stays f32).  Biases, the degenerate
    input/output 1x1 convs and the conditioning MLP stay f32.
    """
    C = raw["in_w"].shape[0]
    layers = raw["layers"]
    L = len(layers)

    # all diffusion projections as one [512, C*L] matrix, columns (c-major, l)
    wd_all = jnp.stack([lp["wd"] for lp in layers], axis=0)        # [L, C, 512]
    bd_all = jnp.stack([lp["bd"] for lp in layers], axis=0)        # [L, C]
    wd_t = jnp.transpose(wd_all, (1, 0, 2)).reshape(C * L, 512).T  # [512, C*L]
    bd_row = jnp.transpose(bd_all, (1, 0)).reshape(1, C * L)

    # 3-tap dilated conv weights fused along the input-channel axis
    wcat = jnp.stack(
        [jnp.concatenate([lp["wconv"][:, :, 0], lp["wconv"][:, :, 1],
                          lp["wconv"][:, :, 2]], axis=1)
         for lp in layers], axis=0)                                # [L, 2C, 3C]
    bc = jnp.stack([lp["bc"] for lp in layers], axis=0)[:, :, None]
    wo_all = jnp.stack([lp["wo"] for lp in layers], axis=0)        # [L, 2C, C]
    bo = jnp.stack([lp["bo"] for lp in layers], axis=0)[:, :, None]

    return {
        "embedding_table": raw["embedding_table"],
        "dilations": tuple(int(lp["dilation"]) for lp in layers),
        "in_w": raw["in_w"], "in_b": raw["in_b"][:, None],
        "emb_w1t": raw["emb_w1"].T, "emb_b1": raw["emb_b1"][None, :],
        "emb_w2t": raw["emb_w2"].T, "emb_b2": raw["emb_b2"][None, :],
        "wd_t": wd_t, "bd_row": bd_row,
        "wcat": wcat.astype(compute_dtype), "bc": bc,
        "wo_all": wo_all.astype(compute_dtype), "bo": bo,
        "skip_w": raw["skip_w"].astype(compute_dtype),
        "skip_b": raw["skip_b"][:, None],
        "out_w": raw["out_w"], "out_b": raw["out_b"][:, None],
    }


# --------------------------------------------------------------------------
# Pure-JAX reference (for correctness check) -- returns the model output only,
# matching the PyTorch module's forward.
# --------------------------------------------------------------------------
def ref_forward(params, audio, diffusion_step):
    def pconv(x, w, b):
        return jnp.einsum("oc,bct->bot", w, x) + b[None, :, None]

    x = jax.nn.relu(pconv(audio, params["in_w"], params["in_b"]))

    emb = params["embedding_table"][diffusion_step]
    h = emb @ params["emb_w1"].T + params["emb_b1"]
    h = h * jax.nn.sigmoid(h)
    h = h @ params["emb_w2"].T + params["emb_b2"]
    h = h * jax.nn.sigmoid(h)

    C = x.shape[1]
    skip_total = None
    for lp in params["layers"]:
        dil = lp["dilation"]
        d = h @ lp["wd"].T + lp["bd"]
        xp = x + d[:, :, None]
        y = jax.lax.conv_general_dilated(
            xp, lp["wconv"], window_strides=(1,), padding=[(dil, dil)],
            rhs_dilation=(dil,), dimension_numbers=("NCH", "OIH", "NCH"))
        y = y + lp["bc"][None, :, None]
        gate, filt = y[:, :C], y[:, C:]
        z = jax.nn.sigmoid(gate) * jnp.tanh(filt)
        o = pconv(z, lp["wo"], lp["bo"])
        residual, skip = o[:, :C], o[:, C:]
        x = (x + residual) / math.sqrt(2.0)
        skip_total = skip if skip_total is None else skip_total + skip

    s = skip_total / math.sqrt(len(params["layers"]))
    s = jax.nn.relu(pconv(s, params["skip_w"], params["skip_b"]))
    return pconv(s, params["out_w"], params["out_b"])


if __name__ == "__main__":
    key = jax.random.PRNGKey(0)
    B, Cin, T = 2, 1, 256                   # T multiple of 128 (lane-dense)
    RC, L, cycle, max_steps = 64, 6, 3, 50  # C multiple of 8

    pkey, xkey, skey, okey = jax.random.split(key, 4)
    raw = build_params(pkey, input_channels=Cin, residual_channels=RC,
                       residual_layers=L, dilation_cycle_length=cycle,
                       max_steps=max_steps)
    # DiffWave zero-inits output_projection.weight; for the correctness check
    # use a nonzero out_w so the whole output path is numerically exercised.
    raw_chk = dict(raw)
    raw_chk["out_w"] = (jax.random.normal(okey, raw["out_w"].shape) *
                        math.sqrt(2.0 / RC)).astype(jnp.float32)

    audio = jax.random.normal(xkey, (B, Cin, T), dtype=jnp.float32)
    diffusion_step = jax.random.randint(skey, (B,), 0, max_steps,
                                        dtype=jnp.int32)

    ref_out = ref_forward(raw_chk, audio, diffusion_step)

    # 1) f32 matmul weights: tight check of the kernel logic.
    out_f32 = diffwave_forward(pack_params(raw_chk, compute_dtype=jnp.float32),
                               audio, diffusion_step)
    out_f32 = jax.block_until_ready(out_f32)
    assert out_f32.shape == (B, Cin, T), out_f32.shape
    assert jnp.allclose(out_f32, ref_out, atol=2e-3, rtol=2e-3), \
        float(jnp.max(jnp.abs(out_f32 - ref_out)))

    # 2) bf16 matmul weights (production config): looser sanity bound.
    out_bf16 = diffwave_forward(pack_params(raw_chk, compute_dtype=jnp.bfloat16),
                                audio, diffusion_step)
    out_bf16 = jax.block_until_ready(out_bf16)
    max_abs = float(jnp.max(jnp.abs(out_bf16 - ref_out)))
    rel = float(jnp.linalg.norm(out_bf16 - ref_out) /
                (jnp.linalg.norm(ref_out) + 1e-12))
    assert max_abs < 2e-1 and rel < 5e-2, (max_abs, rel)

    print("KERNEL_OK")
</pallas_src>

<mosaic_0001>
module attributes {stable_mosaic.version = 11 : i64} {
  func.func @_diffwave_kernel(%arg0: i32, %arg1: memref<1x1x256xf32, #tpu.memory_space<vmem>>, %arg2: memref<1x64x6xf32, #tpu.memory_space<vmem>>, %arg3: memref<64x1xf32, #tpu.memory_space<vmem>>, %arg4: memref<64x1xf32, #tpu.memory_space<vmem>>, %arg5: memref<6x128x192xf32, #tpu.memory_space<vmem>>, %arg6: memref<6x128x1xf32, #tpu.memory_space<vmem>>, %arg7: memref<6x128x64xf32, #tpu.memory_space<vmem>>, %arg8: memref<6x128x1xf32, #tpu.memory_space<vmem>>, %arg9: memref<64x64xf32, #tpu.memory_space<vmem>>, %arg10: memref<64x1xf32, #tpu.memory_space<vmem>>, %arg11: memref<1x64xf32, #tpu.memory_space<vmem>>, %arg12: memref<1x1xf32, #tpu.memory_space<vmem>>, %arg13: memref<1x1x256xf32, #tpu.memory_space<vmem>>, %arg14: memref<64x256xf32, #tpu.memory_space<vmem>>, %arg15: memref<64x256xf32, #tpu.memory_space<vmem>>) attributes {dimension_semantics = [#tpu.dimension_semantics<parallel>], iteration_bounds = array<i64: 2>, scalar_prefetch = 0 : i64, scratch_operands = 2 : i64, tpu.core_type = #tpu.core_type<tc>, window_params = [{transform_indices = @transform_0, window_bounds = array<i64: 1, 1, 256>}, {transform_indices = @transform_1, window_bounds = array<i64: 1, 64, 6>}, {pipeline_mode = #tpu.pipeline_mode<synchronous>, transform_indices = @transform_2, window_bounds = array<i64: 64, 1>}, {pipeline_mode = #tpu.pipeline_mode<synchronous>, transform_indices = @transform_3, window_bounds = array<i64: 64, 1>}, {pipeline_mode = #tpu.pipeline_mode<synchronous>, transform_indices = @transform_4, window_bounds = array<i64: 6, 128, 192>}, {pipeline_mode = #tpu.pipeline_mode<synchronous>, transform_indices = @transform_5, window_bounds = array<i64: 6, 128, 1>}, {pipeline_mode = #tpu.pipeline_mode<synchronous>, transform_indices = @transform_6, window_bounds = array<i64: 6, 128, 64>}, {pipeline_mode = #tpu.pipeline_mode<synchronous>, transform_indices = @transform_7, window_bounds = array<i64: 6, 128, 1>}, {pipeline_mode = #tpu.pipeline_mode<synchronous>, transform_indices = @transform_8, window_bounds = array<i64: 64, 64>}, {pipeline_mode = #tpu.pipeline_mode<synchronous>, transform_indices = @transform_9, window_bounds = array<i64: 64, 1>}, {pipeline_mode = #tpu.pipeline_mode<synchronous>, transform_indices = @transform_10, window_bounds = array<i64: 1, 64>}, {pipeline_mode = #tpu.pipeline_mode<synchronous>, transform_indices = @transform_11, window_bounds = array<i64: 1, 1>}, {transform_indices = @transform_12, window_bounds = array<i64: 1, 1, 256>}]} {
    %c0 = arith.constant 0 : index
    %c0_0 = arith.constant 0 : index
    %0 = vector.load %arg3[%c0, %c0_0] : memref<64x1xf32, #tpu.memory_space<vmem>>, vector<64x1xf32>
    %c0_1 = arith.constant 0 : index
    %c0_2 = arith.constant 0 : index
    %c0_3 = arith.constant 0 : index
    %1 = vector.load %arg1[%c0_1, %c0_2, %c0_3] : memref<1x1x256xf32, #tpu.memory_space<vmem>>, vector<1x1x256xf32>
    %2 = vector.shape_cast %1 : vector<1x1x256xf32> to vector<1x256xf32>
    %3 = vector.shape_cast %0 : vector<64x1xf32> to vector<64x1x1xf32>
    %4 = vector.shape_cast %2 : vector<1x256xf32> to vector<1x1x256xf32>
    %5 = vector.broadcast %3 : vector<64x1x1xf32> to vector<64x1x256xf32>
    %6 = vector.broadcast %4 : vector<1x1x256xf32> to vector<64x1x256xf32>
    %7 = arith.mulf %5, %6 : vector<64x1x256xf32>
    %cst = arith.constant dense<0.000000e+00> : vector<64x256xf32>
    %8 = vector.multi_reduction <add>, %7, %cst [1] : vector<64x1x256xf32> to vector<64x256xf32>
    %c0_4 = arith.constant 0 : index
    %c0_5 = arith.constant 0 : index
    %9 = vector.load %arg4[%c0_4, %c0_5] : memref<64x1xf32, #tpu.memory_space<vmem>>, vector<64x1xf32>
    %10 = vector.broadcast %9 : vector<64x1xf32> to vector<64x256xf32>
    %11 = arith.addf %8, %10 : vector<64x256xf32>
    %cst_6 = arith.constant 0.000000e+00 : f32
    %12 = vector.broadcast %cst_6 : f32 to vector<64x256xf32>
    %13 = arith.maximumf %11, %12 : vector<64x256xf32>
    %c0_7 = arith.constant 0 : index
    %c0_8 = arith.constant 0 : index
    %14 = vector.load %arg14[%c0_7, %c0_8] : memref<64x256xf32, #tpu.memory_space<vmem>>, vector<64x256xf32>
    tpu.vector_store %arg14[%c0_7, %c0_8], %13 {strides = array<i32>} : memref<64x256xf32, #tpu.memory_space<vmem>>, vector<64x256xf32>,
    %cst_9 = arith.constant 0.000000e+00 : f32
    %15 = vector.broadcast %cst_9 : f32 to vector<64x256xf32>
    %c0_10 = arith.constant 0 : index
    %c0_11 = arith.constant 0 : index
    %16 = vector.load %arg15[%c0_10, %c0_11] : memref<64x256xf32, #tpu.memory_space<vmem>>, vector<64x256xf32>
    tpu.vector_store %arg15[%c0_10, %c0_11], %15 {strides = array<i32>} : memref<64x256xf32, #tpu.memory_space<vmem>>, vector<64x256xf32>,
    %c0_12 = arith.constant 0 : index
    %c0_13 = arith.constant 0 : index
    %c0_14 = arith.constant 0 : index
    %17 = vector.load %arg2[%c0_12, %c0_13, %c0_14] : memref<1x64x6xf32, #tpu.memory_space<vmem>>, vector<1x64x6xf32>
    %18 = vector.shape_cast %17 : vector<1x64x6xf32> to vector<64x6xf32>
    %c0_15 = arith.constant 0 : index
    %c0_16 = arith.constant 0 : index
    %19 = vector.load %arg14[%c0_15, %c0_16] : memref<64x256xf32, #tpu.memory_space<vmem>>, vector<64x256xf32>
    %20 = vector.extract_strided_slice %18 {offsets = [0, 0], sizes = [64, 1], strides = [1, 1]} : vector<64x6xf32> to vector<64x1xf32>
    %21 = vector.broadcast %20 : vector<64x1xf32> to vector<64x256xf32>
    %22 = arith.addf %19, %21 : vector<64x256xf32>
    %cst_17 = arith.constant 0.000000e+00 : f32
    %23 = vector.broadcast %cst_17 : f32 to vector<64x1xf32>
    %24 = vector.extract_strided_slice %22 {offsets = [0, 0], sizes = [64, 255], strides = [1, 1]} : vector<64x256xf32> to vector<64x255xf32>
    %25 = tpu.concatenate %23, %24 in 1 : vector<64x1xf32>, vector<64x255xf32> -> vector<64x256xf32>
    %26 = vector.extract_strided_slice %22 {offsets = [0, 1], sizes = [64, 255], strides = [1, 1]} : vector<64x256xf32> to vector<64x255xf32>
    %27 = tpu.concatenate %26, %23 in 1 : vector<64x255xf32>, vector<64x1xf32> -> vector<64x256xf32>
    %28 = tpu.concatenate %25, %22, %27 in 0 : vector<64x256xf32>, vector<64x256xf32>, vector<64x256xf32> -> vector<192x256xf32>
    %c0_18 = arith.constant 0 : index
    %c0_19 = arith.constant 0 : index
    %c0_20 = arith.constant 0 : index
    %29 = vector.load %arg5[%c0_18, %c0_19, %c0_20] : memref<6x128x192xf32, #tpu.memory_space<vmem>>, vector<1x128x192xf32>
    %30 = vector.shape_cast %29 : vector<1x128x192xf32> to vector<128x192xf32>
    %cst_21 = arith.constant dense<0.000000e+00> : vector<128x256xf32>
    %31 = tpu.matmul %30, %28, %cst_21 {dimension_numbers = #tpu.dot_dimension_numbers<[1], [0], [0], [1], [0, 0, 1, 1], [], []>} : vector<128x192xf32>, vector<192x256xf32>, vector<128x256xf32> -> vector<128x256xf32>
    %c0_22 = arith.constant 0 : index
    %c0_23 = arith.constant 0 : index
    %c0_24 = arith.constant 0 : index
    %32 = vector.load %arg6[%c0_22, %c0_23, %c0_24] : memref<6x128x1xf32, #tpu.memory_space<vmem>>, vector<1x128x1xf32>
    %33 = vector.shape_cast %32 : vector<1x128x1xf32> to vector<128x1xf32>
    %34 = vector.broadcast %33 : vector<128x1xf32> to vector<128x256xf32>
    %35 = arith.addf %31, %34 : vector<128x256xf32>
    %36 = vector.extract_strided_slice %35 {offsets = [0, 0], sizes = [64, 256], strides = [1, 1]} : vector<128x256xf32> to vector<64x256xf32>
    %cst_25 = arith.constant 5.000000e-01 : f32
    %37 = vector.broadcast %cst_25 : f32 to vector<64x256xf32>
    %38 = arith.mulf %37, %36 : vector<64x256xf32>
    %39 = math.tanh %38 : vector<64x256xf32>
    %cst_26 = arith.constant 1.000000e+00 : f32
    %40 = vector.broadcast %cst_26 : f32 to vector<64x256xf32>
    %41 = arith.addf %40, %39 : vector<64x256xf32>
    %cst_27 = arith.constant 5.000000e-01 : f32
    %42 = vector.broadcast %cst_27 : f32 to vector<64x256xf32>
    %43 = arith.mulf %42, %41 : vector<64x256xf32>
    %44 = vector.extract_strided_slice %35 {offsets = [64, 0], sizes = [64, 256], strides = [1, 1]} : vector<128x256xf32> to vector<64x256xf32>
    %45 = math.tanh %44 : vector<64x256xf32>
    %46 = arith.mulf %43, %45 : vector<64x256xf32>
    %c0_28 = arith.constant 0 : index
    %c0_29 = arith.constant 0 : index
    %c0_30 = arith.constant 0 : index
    %47 = vector.load %arg7[%c0_28, %c0_29, %c0_30] : memref<6x128x64xf32, #tpu.memory_space<vmem>>, vector<1x128x64xf32>
    %48 = vector.shape_cast %47 : vector<1x128x64xf32> to vector<128x64xf32>
    %cst_31 = arith.constant dense<0.000000e+00> : vector<128x256xf32>
    %49 = tpu.matmul %48, %46, %cst_31 {dimension_numbers = #tpu.dot_dimension_numbers<[1], [0], [0], [1], [0, 0, 1, 1], [], []>} : vector<128x64xf32>, vector<64x256xf32>, vector<128x256xf32> -> vector<128x256xf32>
    %c0_32 = arith.constant 0 : index
    %c0_33 = arith.constant 0 : index
    %c0_34 = arith.constant 0 : index
    %50 = vector.load %arg8[%c0_32, %c0_33, %c0_34] : memref<6x128x1xf32, #tpu.memory_space<vmem>>, vector<1x128x1xf32>
    %51 = vector.shape_cast %50 : vector<1x128x1xf32> to vector<128x1xf32>
    %52 = vector.broadcast %51 : vector<128x1xf32> to vector<128x256xf32>
    %53 = arith.addf %49, %52 : vector<128x256xf32>
    %54 = vector.extract_strided_slice %53 {offsets = [0, 0], sizes = [64, 256], strides = [1, 1]} : vector<128x256xf32> to vector<64x256xf32>
    %55 = arith.addf %19, %54 : vector<64x256xf32>
    %cst_35 = arith.constant 0.707106769 : f32
    %56 = vector.broadcast %cst_35 : f32 to vector<64x256xf32>
    %57 = arith.mulf %55, %56 : vector<64x256xf32>
    %c0_36 = arith.constant 0 : index
    %c0_37 = arith.constant 0 : index
    %58 = vector.load %arg14[%c0_36, %c0_37] : memref<64x256xf32, #tpu.memory_space<vmem>>, vector<64x256xf32>
    tpu.vector_store %arg14[%c0_36, %c0_37], %57 {strides = array<i32>} : memref<64x256xf32, #tpu.memory_space<vmem>>, vector<64x256xf32>,
    %c0_38 = arith.constant 0 : index
    %c0_39 = arith.constant 0 : index
    %59 = vector.load %arg15[%c0_38, %c0_39] : memref<64x256xf32, #tpu.memory_space<vmem>>, vector<64x256xf32>
    %60 = vector.extract_strided_slice %53 {offsets = [64, 0], sizes = [64, 256], strides = [1, 1]} : vector<128x256xf32> to vector<64x256xf32>
    %61 = arith.addf %59, %60 : vector<64x256xf32>
    %c0_40 = arith.constant 0 : index
    %c0_41 = arith.constant 0 : index
    %62 = vector.load %arg15[%c0_40, %c0_41] : memref<64x256xf32, #tpu.memory_space<vmem>>, vector<64x256xf32>
    tpu.vector_store %arg15[%c0_40, %c0_41], %61 {strides = array<i32>} : memref<64x256xf32, #tpu.memory_space<vmem>>, vector<64x256xf32>,
    %c0_42 = arith.constant 0 : index
    %c0_43 = arith.constant 0 : index
    %63 = vector.load %arg14[%c0_42, %c0_43] : memref<64x256xf32, #tpu.memory_space<vmem>>, vector<64x256xf32>
    %64 = vector.extract_strided_slice %18 {offsets = [0, 1], sizes = [64, 1], strides = [1, 1]} : vector<64x6xf32> to vector<64x1xf32>
    %65 = vector.broadcast %64 : vector<64x1xf32> to vector<64x256xf32>
    %66 = arith.addf %63, %65 : vector<64x256xf32>
    %cst_44 = arith.constant 0.000000e+00 : f32
    %67 = vector.broadcast %cst_44 : f32 to vector<64x2xf32>
    %68 = vector.extract_strided_slice %66 {offsets = [0, 0], sizes = [64, 254], strides = [1, 1]} : vector<64x256xf32> to vector<64x254xf32>
    %69 = tpu.concatenate %67, %68 in 1 : vector<64x2xf32>, vector<64x254xf32> -> vector<64x256xf32>
    %70 = vector.extract_strided_slice %66 {offsets = [0, 2], sizes = [64, 254], strides = [1, 1]} : vector<64x256xf32> to vector<64x254xf32>
    %71 = tpu.concatenate %70, %67 in 1 : vector<64x254xf32>, vector<64x2xf32> -> vector<64x256xf32>
    %72 = tpu.concatenate %69, %66, %71 in 0 : vector<64x256xf32>, vector<64x256xf32>, vector<64x256xf32> -> vector<192x256xf32>
    %c1 = arith.constant 1 : index
    %c0_45 = arith.constant 0 : index
    %c0_46 = arith.constant 0 : index
    %73 = vector.load %arg5[%c1, %c0_45, %c0_46] : memref<6x128x192xf32, #tpu.memory_space<vmem>>, vector<1x128x192xf32>
    %74 = vector.shape_cast %73 : vector<1x128x192xf32> to vector<128x192xf32>
    %cst_47 = arith.constant dense<0.000000e+00> : vector<128x256xf32>
    %75 = tpu.matmul %74, %72, %cst_47 {dimension_numbers = #tpu.dot_dimension_numbers<[1], [0], [0], [1], [0, 0, 1, 1], [], []>} : vector<128x192xf32>, vector<192x256xf32>, vector<128x256xf32> -> vector<128x256xf32>
    %c1_48 = arith.constant 1 : index
    %c0_49 = arith.constant 0 : index
    %c0_50 = arith.constant 0 : index
    %76 = vector.load %arg6[%c1_48, %c0_49, %c0_50] : memref<6x128x1xf32, #tpu.memory_space<vmem>>, vector<1x128x1xf32>
    %77 = vector.shape_cast %76 : vector<1x128x1xf32> to vector<128x1xf32>
    %78 = vector.broadcast %77 : vector<128x1xf32> to vector<128x256xf32>
    %79 = arith.addf %75, %78 : vector<128x256xf32>
    %80 = vector.extract_strided_slice %79 {offsets = [0, 0], sizes = [64, 256], strides = [1, 1]} : vector<128x256xf32> to vector<64x256xf32>
    %cst_51 = arith.constant 5.000000e-01 : f32
    %81 = vector.broadcast %cst_51 : f32 to vector<64x256xf32>
    %82 = arith.mulf %81, %80 : vector<64x256xf32>
    %83 = math.tanh %82 : vector<64x256xf32>
    %cst_52 = arith.constant 1.000000e+00 : f32
    %84 = vector.broadcast %cst_52 : f32 to vector<64x256xf32>
    %85 = arith.addf %84, %83 : vector<64x256xf32>
    %cst_53 = arith.constant 5.000000e-01 : f32
    %86 = vector.broadcast %cst_53 : f32 to vector<64x256xf32>
    %87 = arith.mulf %86, %85 : vector<64x256xf32>
    %88 = vector.extract_strided_slice %79 {offsets = [64, 0], sizes = [64, 256], strides = [1, 1]} : vector<128x256xf32> to vector<64x256xf32>
    %89 = math.tanh %88 : vector<64x256xf32>
    %90 = arith.mulf %87, %89 : vector<64x256xf32>
    %c1_54 = arith.constant 1 : index
    %c0_55 = arith.constant 0 : index
    %c0_56 = arith.constant 0 : index
    %91 = vector.load %arg7[%c1_54, %c0_55, %c0_56] : memref<6x128x64xf32, #tpu.memory_space<vmem>>, vector<1x128x64xf32>
    %92 = vector.shape_cast %91 : vector<1x128x64xf32> to vector<128x64xf32>
    %cst_57 = arith.constant dense<0.000000e+00> : vector<128x256xf32>
    %93 = tpu.matmul %92, %90, %cst_57 {dimension_numbers = #tpu.dot_dimension_numbers<[1], [0], [0], [1], [0, 0, 1, 1], [], []>} : vector<128x64xf32>, vector<64x256xf32>, vector<128x256xf32> -> vector<128x256xf32>
    %c1_58 = arith.constant 1 : index
    %c0_59 = arith.constant 0 : index
    %c0_60 = arith.constant 0 : index
    %94 = vector.load %arg8[%c1_58, %c0_59, %c0_60] : memref<6x128x1xf32, #tpu.memory_space<vmem>>, vector<1x128x1xf32>
    %95 = vector.shape_cast %94 : vector<1x128x1xf32> to vector<128x1xf32>
    %96 = vector.broadcast %95 : vector<128x1xf32> to vector<128x256xf32>
    %97 = arith.addf %93, %96 : vector<128x256xf32>
    %98 = vector.extract_strided_slice %97 {offsets = [0, 0], sizes = [64, 256], strides = [1, 1]} : vector<128x256xf32> to vector<64x256xf32>
    %99 = arith.addf %63, %98 : vector<64x256xf32>
    %cst_61 = arith.constant 0.707106769 : f32
    %100 = vector.broadcast %cst_61 : f32 to vector<64x256xf32>
    %101 = arith.mulf %99, %100 : vector<64x256xf32>
    %c0_62 = arith.constant 0 : index
    %c0_63 = arith.constant 0 : index
    %102 = vector.load %arg14[%c0_62, %c0_63] : memref<64x256xf32, #tpu.memory_space<vmem>>, vector<64x256xf32>
    tpu.vector_store %arg14[%c0_62, %c0_63], %101 {strides = array<i32>} : memref<64x256xf32, #tpu.memory_space<vmem>>, vector<64x256xf32>,
    %c0_64 = arith.constant 0 : index
    %c0_65 = arith.constant 0 : index
    %103 = vector.load %arg15[%c0_64, %c0_65] : memref<64x256xf32, #tpu.memory_space<vmem>>, vector<64x256xf32>
    %104 = vector.extract_strided_slice %97 {offsets = [64, 0], sizes = [64, 256], strides = [1, 1]} : vector<128x256xf32> to vector<64x256xf32>
    %105 = arith.addf %103, %104 : vector<64x256xf32>
    %c0_66 = arith.constant 0 : index
    %c0_67 = arith.constant 0 : index
    %106 = vector.load %arg15[%c0_66, %c0_67] : memref<64x256xf32, #tpu.memory_space<vmem>>, vector<64x256xf32>
    tpu.vector_store %arg15[%c0_66, %c0_67], %105 {strides = array<i32>} : memref<64x256xf32, #tpu.memory_space<vmem>>, vector<64x256xf32>,
    %c0_68 = arith.constant 0 : index
    %c0_69 = arith.constant 0 : index
    %107 = vector.load %arg14[%c0_68, %c0_69] : memref<64x256xf32, #tpu.memory_space<vmem>>, vector<64x256xf32>
    %108 = vector.extract_strided_slice %18 {offsets = [0, 2], sizes = [64, 1], strides = [1, 1]} : vector<64x6xf32> to vector<64x1xf32>
    %109 = vector.broadcast %108 : vector<64x1xf32> to vector<64x256xf32>
    %110 = arith.addf %107, %109 : vector<64x256xf32>
    %cst_70 = arith.constant 0.000000e+00 : f32
    %111 = vector.broadcast %cst_70 : f32 to vector<64x4xf32>
    %112 = vector.extract_strided_slice %110 {offsets = [0, 0], sizes = [64, 252], strides = [1, 1]} : vector<64x256xf32> to vector<64x252xf32>
    %113 = tpu.concatenate %111, %112 in 1 : vector<64x4xf32>, vector<64x252xf32> -> vector<64x256xf32>
    %114 = vector.extract_strided_slice %110 {offsets = [0, 4], sizes = [64, 252], strides = [1, 1]} : vector<64x256xf32> to vector<64x252xf32>
    %115 = tpu.concatenate %114, %111 in 1 : vector<64x252xf32>, vector<64x4xf32> -> vector<64x256xf32>
    %116 = tpu.concatenate %113, %110, %115 in 0 : vector<64x256xf32>, vector<64x256xf32>, vector<64x256xf32> -> vector<192x256xf32>
    %c2 = arith.constant 2 : index
    %c0_71 = arith.constant 0 : index
    %c0_72 = arith.constant 0 : index
    %117 = vector.load %arg5[%c2, %c0_71, %c0_72] : memref<6x128x192xf32, #tpu.memory_space<vmem>>, vector<1x128x192xf32>
    %118 = vector.shape_cast %117 : vector<1x128x192xf32> to vector<128x192xf32>
    %cst_73 = arith.constant dense<0.000000e+00> : vector<128x256xf32>
    %119 = tpu.matmul %118, %116, %cst_73 {dimension_numbers = #tpu.dot_dimension_numbers<[1], [0], [0], [1], [0, 0, 1, 1], [], []>} : vector<128x192xf32>, vector<192x256xf32>, vector<128x256xf32> -> vector<128x256xf32>
    %c2_74 = arith.constant 2 : index
    %c0_75 = arith.constant 0 : index
    %c0_76 = arith.constant 0 : index
    %120 = vector.load %arg6[%c2_74, %c0_75, %c0_76] : memref<6x128x1xf32, #tpu.memory_space<vmem>>, vector<1x128x1xf32>
    %121 = vector.shape_cast %120 : vector<1x128x1xf32> to vector<128x1xf32>
    %122 = vector.broadcast %121 : vector<128x1xf32> to vector<128x256xf32>
    %123 = arith.addf %119, %122 : vector<128x256xf32>
    %124 = vector.extract_strided_slice %123 {offsets = [0, 0], sizes = [64, 256], strides = [1, 1]} : vector<128x256xf32> to vector<64x256xf32>
    %cst_77 = arith.constant 5.000000e-01 : f32
    %125 = vector.broadcast %cst_77 : f32 to vector<64x256xf32>
    %126 = arith.mulf %125, %124 : vector<64x256xf32>
    %127 = math.tanh %126 : vector<64x256xf32>
    %cst_78 = arith.constant 1.000000e+00 : f32
    %128 = vector.broadcast %cst_78 : f32 to vector<64x256xf32>
    %129 = arith.addf %128, %127 : vector<64x256xf32>
    %cst_79 = arith.constant 5.000000e-01 : f32
    %130 = vector.broadcast %cst_79 : f32 to vector<64x256xf32>
    %131 = arith.mulf %130, %129 : vector<64x256xf32>
    %132 = vector.extract_strided_slice %123 {offsets = [64, 0], sizes = [64, 256], strides = [1, 1]} : vector<128x256xf32> to vector<64x256xf32>
    %133 = math.tanh %132 : vector<64x256xf32>
    %134 = arith.mulf %131, %133 : vector<64x256xf32>
    %c2_80 = arith.constant 2 : index
    %c0_81 = arith.constant 0 : index
    %c0_82 = arith.constant 0 : index
    %135 = vector.load %arg7[%c2_80, %c0_81, %c0_82] : memref<6x128x64xf32, #tpu.memory_space<vmem>>, vector<1x128x64xf32>
    %136 = vector.shape_cast %135 : vector<1x128x64xf32> to vector<128x64xf32>
    %cst_83 = arith.constant dense<0.000000e+00> : vector<128x256xf32>
    %137 = tpu.matmul %136, %134, %cst_83 {dimension_numbers = #tpu.dot_dimension_numbers<[1], [0], [0], [1], [0, 0, 1, 1], [], []>} : vector<128x64xf32>, vector<64x256xf32>, vector<128x256xf32> -> vector<128x256xf32>
    %c2_84 = arith.constant 2 : index
    %c0_85 = arith.constant 0 : index
    %c0_86 = arith.constant 0 : index
    %138 = vector.load %arg8[%c2_84, %c0_85, %c0_86] : memref<6x128x1xf32, #tpu.memory_space<vmem>>, vector<1x128x1xf32>
    %139 = vector.shape_cast %138 : vector<1x128x1xf32> to vector<128x1xf32>
    %140 = vector.broadcast %139 : vector<128x1xf32> to vector<128x256xf32>
    %141 = arith.addf %137, %140 : vector<128x256xf32>
    %142 = vector.extract_strided_slice %141 {offsets = [0, 0], sizes = [64, 256], strides = [1, 1]} : vector<128x256xf32> to vector<64x256xf32>
    %143 = arith.addf %107, %142 : vector<64x256xf32>
    %cst_87 = arith.constant 0.707106769 : f32
    %144 = vector.broadcast %cst_87 : f32 to vector<64x256xf32>
    %145 = arith.mulf %143, %144 : vector<64x256xf32>
    %c0_88 = arith.constant 0 : index
    %c0_89 = arith.constant 0 : index
    %146 = vector.load %arg14[%c0_88, %c0_89] : memref<64x256xf32, #tpu.memory_space<vmem>>, vector<64x256xf32>
    tpu.vector_store %arg14[%c0_88, %c0_89], %145 {strides = array<i32>} : memref<64x256xf32, #tpu.memory_space<vmem>>, vector<64x256xf32>,
    %c0_90 = arith.constant 0 : index
    %c0_91 = arith.constant 0 : index
    %147 = vector.load %arg15[%c0_90, %c0_91] : memref<64x256xf32, #tpu.memory_space<vmem>>, vector<64x256xf32>
    %148 = vector.extract_strided_slice %141 {offsets = [64, 0], sizes = [64, 256], strides = [1, 1]} : vector<128x256xf32> to vector<64x256xf32>
    %149 = arith.addf %147, %148 : vector<64x256xf32>
    %c0_92 = arith.constant 0 : index
    %c0_93 = arith.constant 0 : index
    %150 = vector.load %arg15[%c0_92, %c0_93] : memref<64x256xf32, #tpu.memory_space<vmem>>, vector<64x256xf32>
    tpu.vector_store %arg15[%c0_92, %c0_93], %149 {strides = array<i32>} : memref<64x256xf32, #tpu.memory_space<vmem>>, vector<64x256xf32>,
    %c0_94 = arith.constant 0 : index
    %c0_95 = arith.constant 0 : index
    %151 = vector.load %arg14[%c0_94, %c0_95] : memref<64x256xf32, #tpu.memory_space<vmem>>, vector<64x256xf32>
    %152 = vector.extract_strided_slice %18 {offsets = [0, 3], sizes = [64, 1], strides = [1, 1]} : vector<64x6xf32> to vector<64x1xf32>
    %153 = vector.broadcast %152 : vector<64x1xf32> to vector<64x256xf32>
    %154 = arith.addf %151, %153 : vector<64x256xf32>
    %cst_96 = arith.constant 0.000000e+00 : f32
    %155 = vector.broadcast %cst_96 : f32 to vector<64x1xf32>
    %156 = vector.extract_strided_slice %154 {offsets = [0, 0], sizes = [64, 255], strides = [1, 1]} : vector<64x256xf32> to vector<64x255xf32>
    %157 = tpu.concatenate %155, %156 in 1 : vector<64x1xf32>, vector<64x255xf32> -> vector<64x256xf32>
    %158 = vector.extract_strided_slice %154 {offsets = [0, 1], sizes = [64, 255], strides = [1, 1]} : vector<64x256xf32> to vector<64x255xf32>
    %159 = tpu.concatenate %158, %155 in 1 : vector<64x255xf32>, vector<64x1xf32> -> vector<64x256xf32>
    %160 = tpu.concatenate %157, %154, %159 in 0 : vector<64x256xf32>, vector<64x256xf32>, vector<64x256xf32> -> vector<192x256xf32>
    %c3 = arith.constant 3 : index
    %c0_97 = arith.constant 0 : index
    %c0_98 = arith.constant 0 : index
    %161 = vector.load %arg5[%c3, %c0_97, %c0_98] : memref<6x128x192xf32, #tpu.memory_space<vmem>>, vector<1x128x192xf32>
    %162 = vector.shape_cast %161 : vector<1x128x192xf32> to vector<128x192xf32>
    %cst_99 = arith.constant dense<0.000000e+00> : vector<128x256xf32>
    %163 = tpu.matmul %162, %160, %cst_99 {dimension_numbers = #tpu.dot_dimension_numbers<[1], [0], [0], [1], [0, 0, 1, 1], [], []>} : vector<128x192xf32>, vector<192x256xf32>, vector<128x256xf32> -> vector<128x256xf32>
    %c3_100 = arith.constant 3 : index
    %c0_101 = arith.constant 0 : index
    %c0_102 = arith.constant 0 : index
    %164 = vector.load %arg6[%c3_100, %c0_101, %c0_102] : memref<6x128x1xf32, #tpu.memory_space<vmem>>, vector<1x128x1xf32>
    %165 = vector.shape_cast %164 : vector<1x128x1xf32> to vector<128x1xf32>
    %166 = vector.broadcast %165 : vector<128x1xf32> to vector<128x256xf32>
    %167 = arith.addf %163, %166 : vector<128x256xf32>
    %168 = vector.extract_strided_slice %167 {offsets = [0, 0], sizes = [64, 256], strides = [1, 1]} : vector<128x256xf32> to vector<64x256xf32>
    %cst_103 = arith.constant 5.000000e-01 : f32
    %169 = vector.broadcast %cst_103 : f32 to vector<64x256xf32>
    %170 = arith.mulf %169, %168 : vector<64x256xf32>
    %171 = math.tanh %170 : vector<64x256xf32>
    %cst_104 = arith.constant 1.000000e+00 : f32
    %172 = vector.broadcast %cst_104 : f32 to vector<64x256xf32>
    %173 = arith.addf %172, %171 : vector<64x256xf32>
    %cst_105 = arith.constant 5.000000e-01 : f32
    %174 = vector.broadcast %cst_105 : f32 to vector<64x256xf32>
    %175 = arith.mulf %174, %173 : vector<64x256xf32>
    %176 = vector.extract_strided_slice %167 {offsets = [64, 0], sizes = [64, 256], strides = [1, 1]} : vector<128x256xf32> to vector<64x256xf32>
    %177 = math.tanh %176 : vector<64x256xf32>
    %178 = arith.mulf %175, %177 : vector<64x256xf32>
    %c3_106 = arith.constant 3 : index
    %c0_107 = arith.constant 0 : index
    %c0_108 = arith.constant 0 : index
    %179 = vector.load %arg7[%c3_106, %c0_107, %c0_108] : memref<6x128x64xf32, #tpu.memory_space<vmem>>, vector<1x128x64xf32>
    %180 = vector.shape_cast %179 : vector<1x128x64xf32> to vector<128x64xf32>
    %cst_109 = arith.constant dense<0.000000e+00> : vector<128x256xf32>
    %181 = tpu.matmul %180, %178, %cst_109 {dimension_numbers = #tpu.dot_dimension_numbers<[1], [0], [0], [1], [0, 0, 1, 1], [], []>} : vector<128x64xf32>, vector<64x256xf32>, vector<128x256xf32> -> vector<128x256xf32>
    %c3_110 = arith.constant 3 : index
    %c0_111 = arith.constant 0 : index
    %c0_112 = arith.constant 0 : index
    %182 = vector.load %arg8[%c3_110, %c0_111, %c0_112] : memref<6x128x1xf32, #tpu.memory_space<vmem>>, vector<1x128x1xf32>
    %183 = vector.shape_cast %182 : vector<1x128x1xf32> to vector<128x1xf32>
    %184 = vector.broadcast %183 : vector<128x1xf32> to vector<128x256xf32>
    %185 = arith.addf %181, %184 : vector<128x256xf32>
    %186 = vector.extract_strided_slice %185 {offsets = [0, 0], sizes = [64, 256], strides = [1, 1]} : vector<128x256xf32> to vector<64x256xf32>
    %187 = arith.addf %151, %186 : vector<64x256xf32>
    %cst_113 = arith.constant 0.707106769 : f32
    %188 = vector.broadcast %cst_113 : f32 to vector<64x256xf32>
    %189 = arith.mulf %187, %188 : vector<64x256xf32>
    %c0_114 = arith.constant 0 : index
    %c0_115 = arith.constant 0 : index
    %190 = vector.load %arg14[%c0_114, %c0_115] : memref<64x256xf32, #tpu.memory_space<vmem>>, vector<64x256xf32>
    tpu.vector_store %arg14[%c0_114, %c0_115], %189 {strides = array<i32>} : memref<64x256xf32, #tpu.memory_space<vmem>>, vector<64x256xf32>,
    %c0_116 = arith.constant 0 : index
    %c0_117 = arith.constant 0 : index
    %191 = vector.load %arg15[%c0_116, %c0_117] : memref<64x256xf32, #tpu.memory_space<vmem>>, vector<64x256xf32>
    %192 = vector.extract_strided_slice %185 {offsets = [64, 0], sizes = [64, 256], strides = [1, 1]} : vector<128x256xf32> to vector<64x256xf32>
    %193 = arith.addf %191, %192 : vector<64x256xf32>
    %c0_118 = arith.constant 0 : index
    %c0_119 = arith.constant 0 : index
    %194 = vector.load %arg15[%c0_118, %c0_119] : memref<64x256xf32, #tpu.memory_space<vmem>>, vector<64x256xf32>
    tpu.vector_store %arg15[%c0_118, %c0_119], %193 {strides = array<i32>} : memref<64x256xf32, #tpu.memory_space<vmem>>, vector<64x256xf32>,
    %c0_120 = arith.constant 0 : index
    %c0_121 = arith.constant 0 : index
    %195 = vector.load %arg14[%c0_120, %c0_121] : memref<64x256xf32, #tpu.memory_space<vmem>>, vector<64x256xf32>
    %196 = vector.extract_strided_slice %18 {offsets = [0, 4], sizes = [64, 1], strides = [1, 1]} : vector<64x6xf32> to vector<64x1xf32>
    %197 = vector.broadcast %196 : vector<64x1xf32> to vector<64x256xf32>
    %198 = arith.addf %195, %197 : vector<64x256xf32>
    %cst_122 = arith.constant 0.000000e+00 : f32
    %199 = vector.broadcast %cst_122 : f32 to vector<64x2xf32>
    %200 = vector.extract_strided_slice %198 {offsets = [0, 0], sizes = [64, 254], strides = [1, 1]} : vector<64x256xf32> to vector<64x254xf32>
    %201 = tpu.concatenate %199, %200 in 1 : vector<64x2xf32>, vector<64x254xf32> -> vector<64x256xf32>
    %202 = vector.extract_strided_slice %198 {offsets = [0, 2], sizes = [64, 254], strides = [1, 1]} : vector<64x256xf32> to vector<64x254xf32>
    %203 = tpu.concatenate %202, %199 in 1 : vector<64x254xf32>, vector<64x2xf32> -> vector<64x256xf32>
    %204 = tpu.concatenate %201, %198, %203 in 0 : vector<64x256xf32>, vector<64x256xf32>, vector<64x256xf32> -> vector<192x256xf32>
    %c4 = arith.constant 4 : index
    %c0_123 = arith.constant 0 : index
    %c0_124 = arith.constant 0 : index
    %205 = vector.load %arg5[%c4, %c0_123, %c0_124] : memref<6x128x192xf32, #tpu.memory_space<vmem>>, vector<1x128x192xf32>
    %206 = vector.shape_cast %205 : vector<1x128x192xf32> to vector<128x192xf32>
    %cst_125 = arith.constant dense<0.000000e+00> : vector<128x256xf32>
    %207 = tpu.matmul %206, %204, %cst_125 {dimension_numbers = #tpu.dot_dimension_numbers<[1], [0], [0], [1], [0, 0, 1, 1], [], []>} : vector<128x192xf32>, vector<192x256xf32>, vector<128x256xf32> -> vector<128x256xf32>
    %c4_126 = arith.constant 4 : index
    %c0_127 = arith.constant 0 : index
    %c0_128 = arith.constant 0 : index
    %208 = vector.load %arg6[%c4_126, %c0_127, %c0_128] : memref<6x128x1xf32, #tpu.memory_space<vmem>>, vector<1x128x1xf32>
    %209 = vector.shape_cast %208 : vector<1x128x1xf32> to vector<128x1xf32>
    %210 = vector.broadcast %209 : vector<128x1xf32> to vector<128x256xf32>
    %211 = arith.addf %207, %210 : vector<128x256xf32>
    %212 = vector.extract_strided_slice %211 {offsets = [0, 0], sizes = [64, 256], strides = [1, 1]} : vector<128x256xf32> to vector<64x256xf32>
    %cst_129 = arith.constant 5.000000e-01 : f32
    %213 = vector.broadcast %cst_129 : f32 to vector<64x256xf32>
    %214 = arith.mulf %213, %212 : vector<64x256xf32>
    %215 = math.tanh %214 : vector<64x256xf32>
    %cst_130 = arith.constant 1.000000e+00 : f32
    %216 = vector.broadcast %cst_130 : f32 to vector<64x256xf32>
    %217 = arith.addf %216, %215 : vector<64x256xf32>
    %cst_131 = arith.constant 5.000000e-01 : f32
    %218 = vector.broadcast %cst_131 : f32 to vector<64x256xf32>
    %219 = arith.mulf %218, %217 : vector<64x256xf32>
    %220 = vector.extract_strided_slice %211 {offsets = [64, 0], sizes = [64, 256], strides = [1, 1]} : vector<128x256xf32> to vector<64x256xf32>
    %221 = math.tanh %220 : vector<64x256xf32>
    %222 = arith.mulf %219, %221 : vector<64x256xf32>
    %c4_132 = arith.constant 4 : index
    %c0_133 = arith.constant 0 : index
    %c0_134 = arith.constant 0 : index
    %223 = vector.load %arg7[%c4_132, %c0_133, %c0_134] : memref<6x128x64xf32, #tpu.memory_space<vmem>>, vector<1x128x64xf32>
    %224 = vector.shape_cast %223 : vector<1x128x64xf32> to vector<128x64xf32>
    %cst_135 = arith.constant dense<0.000000e+00> : vector<128x256xf32>
    %225 = tpu.matmul %224, %222, %cst_135 {dimension_numbers = #tpu.dot_dimension_numbers<[1], [0], [0], [1], [0, 0, 1, 1], [], []>} : vector<128x64xf32>, vector<64x256xf32>, vector<128x256xf32> -> vector<128x256xf32>
    %c4_136 = arith.constant 4 : index
    %c0_137 = arith.constant 0 : index
    %c0_138 = arith.constant 0 : index
    %226 = vector.load %arg8[%c4_136, %c0_137, %c0_138] : memref<6x128x1xf32, #tpu.memory_space<vmem>>, vector<1x128x1xf32>
    %227 = vector.shape_cast %226 : vector<1x128x1xf32> to vector<128x1xf32>
    %228 = vector.broadcast %227 : vector<128x1xf32> to vector<128x256xf32>
    %229 = arith.addf %225, %228 : vector<128x256xf32>
    %230 = vector.extract_strided_slice %229 {offsets = [0, 0], sizes = [64, 256], strides = [1, 1]} : vector<128x256xf32> to vector<64x256xf32>
    %231 = arith.addf %195, %230 : vector<64x256xf32>
    %cst_139 = arith.constant 0.707106769 : f32
    %232 = vector.broadcast %cst_139 : f32 to vector<64x256xf32>
    %233 = arith.mulf %231, %232 : vector<64x256xf32>
    %c0_140 = arith.constant 0 : index
    %c0_141 = arith.constant 0 : index
    %234 = vector.load %arg14[%c0_140, %c0_141] : memref<64x256xf32, #tpu.memory_space<vmem>>, vector<64x256xf32>
    tpu.vector_store %arg14[%c0_140, %c0_141], %233 {strides = array<i32>} : memref<64x256xf32, #tpu.memory_space<vmem>>, vector<64x256xf32>,
    %c0_142 = arith.constant 0 : index
    %c0_143 = arith.constant 0 : index
    %235 = vector.load %arg15[%c0_142, %c0_143] : memref<64x256xf32, #tpu.memory_space<vmem>>, vector<64x256xf32>
    %236 = vector.extract_strided_slice %229 {offsets = [64, 0], sizes = [64, 256], strides = [1, 1]} : vector<128x256xf32> to vector<64x256xf32>
    %237 = arith.addf %235, %236 : vector<64x256xf32>
    %c0_144 = arith.constant 0 : index
    %c0_145 = arith.constant 0 : index
    %238 = vector.load %arg15[%c0_144, %c0_145] : memref<64x256xf32, #tpu.memory_space<vmem>>, vector<64x256xf32>
    tpu.vector_store %arg15[%c0_144, %c0_145], %237 {strides = array<i32>} : memref<64x256xf32, #tpu.memory_space<vmem>>, vector<64x256xf32>,
    %c0_146 = arith.constant 0 : index
    %c0_147 = arith.constant 0 : index
    %239 = vector.load %arg14[%c0_146, %c0_147] : memref<64x256xf32, #tpu.memory_space<vmem>>, vector<64x256xf32>
    %240 = vector.extract_strided_slice %18 {offsets = [0, 5], sizes = [64, 1], strides = [1, 1]} : vector<64x6xf32> to vector<64x1xf32>
    %241 = vector.broadcast %240 : vector<64x1xf32> to vector<64x256xf32>
    %242 = arith.addf %239, %241 : vector<64x256xf32>
    %cst_148 = arith.constant 0.000000e+00 : f32
    %243 = vector.broadcast %cst_148 : f32 to vector<64x4xf32>
    %244 = vector.extract_strided_slice %242 {offsets = [0, 0], sizes = [64, 252], strides = [1, 1]} : vector<64x256xf32> to vector<64x252xf32>
    %245 = tpu.concatenate %243, %244 in 1 : vector<64x4xf32>, vector<64x252xf32> -> vector<64x256xf32>
    %246 = vector.extract_strided_slice %242 {offsets = [0, 4], sizes = [64, 252], strides = [1, 1]} : vector<64x256xf32> to vector<64x252xf32>
    %247 = tpu.concatenate %246, %243 in 1 : vector<64x252xf32>, vector<64x4xf32> -> vector<64x256xf32>
    %248 = tpu.concatenate %245, %242, %247 in 0 : vector<64x256xf32>, vector<64x256xf32>, vector<64x256xf32> -> vector<192x256xf32>
    %c5 = arith.constant 5 : index
    %c0_149 = arith.constant 0 : index
    %c0_150 = arith.constant 0 : index
    %249 = vector.load %arg5[%c5, %c0_149, %c0_150] : memref<6x128x192xf32, #tpu.memory_space<vmem>>, vector<1x128x192xf32>
    %250 = vector.shape_cast %249 : vector<1x128x192xf32> to vector<128x192xf32>
    %cst_151 = arith.constant dense<0.000000e+00> : vector<128x256xf32>
    %251 = tpu.matmul %250, %248, %cst_151 {dimension_numbers = #tpu.dot_dimension_numbers<[1], [0], [0], [1], [0, 0, 1, 1], [], []>} : vector<128x192xf32>, vector<192x256xf32>, vector<128x256xf32> -> vector<128x256xf32>
    %c5_152 = arith.constant 5 : index
    %c0_153 = arith.constant 0 : index
    %c0_154 = arith.constant 0 : index
    %252 = vector.load %arg6[%c5_152, %c0_153, %c0_154] : memref<6x128x1xf32, #tpu.memory_space<vmem>>, vector<1x128x1xf32>
    %253 = vector.shape_cast %252 : vector<1x128x1xf32> to vector<128x1xf32>
    %254 = vector.broadcast %253 : vector<128x1xf32> to vector<128x256xf32>
    %255 = arith.addf %251, %254 : vector<128x256xf32>
    %256 = vector.extract_strided_slice %255 {offsets = [0, 0], sizes = [64, 256], strides = [1, 1]} : vector<128x256xf32> to vector<64x256xf32>
    %cst_155 = arith.constant 5.000000e-01 : f32
    %257 = vector.broadcast %cst_155 : f32 to vector<64x256xf32>
    %258 = arith.mulf %257, %256 : vector<64x256xf32>
    %259 = math.tanh %258 : vector<64x256xf32>
    %cst_156 = arith.constant 1.000000e+00 : f32
    %260 = vector.broadcast %cst_156 : f32 to vector<64x256xf32>
    %261 = arith.addf %260, %259 : vector<64x256xf32>
    %cst_157 = arith.constant 5.000000e-01 : f32
    %262 = vector.broadcast %cst_157 : f32 to vector<64x256xf32>
    %263 = arith.mulf %262, %261 : vector<64x256xf32>
    %264 = vector.extract_strided_slice %255 {offsets = [64, 0], sizes = [64, 256], strides = [1, 1]} : vector<128x256xf32> to vector<64x256xf32>
    %265 = math.tanh %264 : vector<64x256xf32>
    %266 = arith.mulf %263, %265 : vector<64x256xf32>
    %c5_158 = arith.constant 5 : index
    %c0_159 = arith.constant 0 : index
    %c0_160 = arith.constant 0 : index
    %267 = vector.load %arg7[%c5_158, %c0_159, %c0_160] : memref<6x128x64xf32, #tpu.memory_space<vmem>>, vector<1x128x64xf32>
    %268 = vector.shape_cast %267 : vector<1x128x64xf32> to vector<128x64xf32>
    %cst_161 = arith.constant dense<0.000000e+00> : vector<128x256xf32>
    %269 = tpu.matmul %268, %266, %cst_161 {dimension_numbers = #tpu.dot_dimension_numbers<[1], [0], [0], [1], [0, 0, 1, 1], [], []>} : vector<128x64xf32>, vector<64x256xf32>, vector<128x256xf32> -> vector<128x256xf32>
    %c5_162 = arith.constant 5 : index
    %c0_163 = arith.constant 0 : index
    %c0_164 = arith.constant 0 : index
    %270 = vector.load %arg8[%c5_162, %c0_163, %c0_164] : memref<6x128x1xf32, #tpu.memory_space<vmem>>, vector<1x128x1xf32>
    %271 = vector.shape_cast %270 : vector<1x128x1xf32> to vector<128x1xf32>
    %272 = vector.broadcast %271 : vector<128x1xf32> to vector<128x256xf32>
    %273 = arith.addf %269, %272 : vector<128x256xf32>
    %274 = vector.extract_strided_slice %273 {offsets = [0, 0], sizes = [64, 256], strides = [1, 1]} : vector<128x256xf32> to vector<64x256xf32>
    %275 = arith.addf %239, %274 : vector<64x256xf32>
    %cst_165 = arith.constant 0.707106769 : f32
    %276 = vector.broadcast %cst_165 : f32 to vector<64x256xf32>
    %277 = arith.mulf %275, %276 : vector<64x256xf32>
    %c0_166 = arith.constant 0 : index
    %c0_167 = arith.constant 0 : index
    %278 = vector.load %arg14[%c0_166, %c0_167] : memref<64x256xf32, #tpu.memory_space<vmem>>, vector<64x256xf32>
    tpu.vector_store %arg14[%c0_166, %c0_167], %277 {strides = array<i32>} : memref<64x256xf32, #tpu.memory_space<vmem>>, vector<64x256xf32>,
    %c0_168 = arith.constant 0 : index
    %c0_169 = arith.constant 0 : index
    %279 = vector.load %arg15[%c0_168, %c0_169] : memref<64x256xf32, #tpu.memory_space<vmem>>, vector<64x256xf32>
    %280 = vector.extract_strided_slice %273 {offsets = [64, 0], sizes = [64, 256], strides = [1, 1]} : vector<128x256xf32> to vector<64x256xf32>
    %281 = arith.addf %279, %280 : vector<64x256xf32>
    %c0_170 = arith.constant 0 : index
    %c0_171 = arith.constant 0 : index
    %282 = vector.load %arg15[%c0_170, %c0_171] : memref<64x256xf32, #tpu.memory_space<vmem>>, vector<64x256xf32>
    tpu.vector_store %arg15[%c0_170, %c0_171], %281 {strides = array<i32>} : memref<64x256xf32, #tpu.memory_space<vmem>>, vector<64x256xf32>,
    %c0_172 = arith.constant 0 : index
    %c0_173 = arith.constant 0 : index
    %283 = vector.load %arg15[%c0_172, %c0_173] : memref<64x256xf32, #tpu.memory_space<vmem>>, vector<64x256xf32>
    %cst_174 = arith.constant 0.408248305 : f32
    %284 = vector.broadcast %cst_174 : f32 to vector<64x256xf32>
    %285 = arith.mulf %283, %284 : vector<64x256xf32>
    %c0_175 = arith.constant 0 : index
    %c0_176 = arith.constant 0 : index
    %286 = vector.load %arg9[%c0_175, %c0_176] : memref<64x64xf32, #tpu.memory_space<vmem>>, vector<64x64xf32>
    %cst_177 = arith.constant dense<0.000000e+00> : vector<64x256xf32>
    %287 = tpu.matmul %286, %285, %cst_177 {dimension_numbers = #tpu.dot_dimension_numbers<[1], [0], [0], [1], [0, 0, 1, 1], [], []>} : vector<64x64xf32>, vector<64x256xf32>, vector<64x256xf32> -> vector<64x256xf32>
    %c0_178 = arith.constant 0 : index
    %c0_179 = arith.constant 0 : index
    %288 = vector.load %arg10[%c0_178, %c0_179] : memref<64x1xf32, #tpu.memory_space<vmem>>, vector<64x1xf32>
    %289 = vector.broadcast %288 : vector<64x1xf32> to vector<64x256xf32>
    %290 = arith.addf %287, %289 : vector<64x256xf32>
    %cst_180 = arith.constant 0.000000e+00 : f32
    %291 = vector.broadcast %cst_180 : f32 to vector<64x256xf32>
    %292 = arith.maximumf %290, %291 : vector<64x256xf32>
    %c0_181 = arith.constant 0 : index
    %c0_182 = arith.constant 0 : index
    %293 = vector.load %arg11[%c0_181, %c0_182] : memref<1x64xf32, #tpu.memory_space<vmem>>, vector<1x64xf32>
    %294 = vector.shape_cast %293 : vector<1x64xf32> to vector<1x64x1xf32>
    %295 = vector.shape_cast %292 : vector<64x256xf32> to vector<1x64x256xf32>
    %296 = vector.broadcast %294 : vector<1x64x1xf32> to vector<1x64x256xf32>
    %297 = arith.mulf %296, %295 : vector<1x64x256xf32>
    %cst_183 = arith.constant dense<0.000000e+00> : vector<1x256xf32>
    %298 = vector.multi_reduction <add>, %297, %cst_183 [1] : vector<1x64x256xf32> to vector<1x256xf32>
    %c0_184 = arith.constant 0 : index
    %c0_185 = arith.constant 0 : index
    %299 = vector.load %arg12[%c0_184, %c0_185] : memref<1x1xf32, #tpu.memory_space<vmem>>, vector<1x1xf32>
    %300 = vector.broadcast %299 : vector<1x1xf32> to vector<1x256xf32>
    %301 = arith.addf %298, %300 : vector<1x256xf32>
    %c0_186 = arith.constant 0 : index
    %c0_187 = arith.constant 0 : index
    %c0_188 = arith.constant 0 : index
    %302 = vector.load %arg13[%c0_186, %c0_187, %c0_188] : memref<1x1x256xf32, #tpu.memory_space<vmem>>, vector<1x1x256xf32>
    %303 = vector.shape_cast %302 : vector<1x1x256xf32> to vector<1x256xf32>
    %304 = vector.shape_cast %301 : vector<1x256xf32> to vector<1x1x256xf32>
    tpu.vector_store %arg13[%c0_186, %c0_187, %c0_188], %304 {strides = array<i32>} : memref<1x1x256xf32, #tpu.memory_space<vmem>>, vector<1x1x256xf32>,
    return
  }
  func.func @transform_0(%arg0: i32) -> (i32, i32, i32) {
    %c0_i32 = arith.constant 0 : i32
    %c0_i32_0 = arith.constant 0 : i32
    %c0_i32_1 = arith.constant 0 : i32
    return %arg0, %c0_i32, %c0_i32_0 : i32, i32, i32
  }
  func.func @transform_1(%arg0: i32) -> (i32, i32, i32) {
    %c0_i32 = arith.constant 0 : i32
    %c0_i32_0 = arith.constant 0 : i32
    %c0_i32_1 = arith.constant 0 : i32
    return %arg0, %c0_i32, %c0_i32_0 : i32, i32, i32
  }
  func.func @transform_2(%arg0: i32) -> (i32, i32) {
    %c0_i32 = arith.constant 0 : i32
    %c0_i32_0 = arith.constant 0 : i32
    %c0_i32_1 = arith.constant 0 : i32
    return %c0_i32, %c0_i32_0 : i32, i32
  }
  func.func @transform_3(%arg0: i32) -> (i32, i32) {
    %c0_i32 = arith.constant 0 : i32
    %c0_i32_0 = arith.constant 0 : i32
    %c0_i32_1 = arith.constant 0 : i32
    return %c0_i32, %c0_i32_0 : i32, i32
  }
  func.func @transform_4(%arg0: i32) -> (i32, i32, i32) {
    %c0_i32 = arith.constant 0 : i32
    %c0_i32_0 = arith.constant 0 : i32
    %c0_i32_1 = arith.constant 0 : i32
    %c0_i32_2 = arith.constant 0 : i32
    return %c0_i32, %c0_i32_0, %c0_i32_1 : i32, i32, i32
  }
  func.func @transform_5(%arg0: i32) -> (i32, i32, i32) {
    %c0_i32 = arith.constant 0 : i32
    %c0_i32_0 = arith.constant 0 : i32
    %c0_i32_1 = arith.constant 0 : i32
    %c0_i32_2 = arith.constant 0 : i32
    return %c0_i32, %c0_i32_0, %c0_i32_1 : i32, i32, i32
  }
  func.func @transform_6(%arg0: i32) -> (i32, i32, i32) {
    %c0_i32 = arith.constant 0 : i32
    %c0_i32_0 = arith.constant 0 : i32
    %c0_i32_1 = arith.constant 0 : i32
    %c0_i32_2 = arith.constant 0 : i32
    return %c0_i32, %c0_i32_0, %c0_i32_1 : i32, i32, i32
  }
  func.func @transform_7(%arg0: i32) -> (i32, i32, i32) {
    %c0_i32 = arith.constant 0 : i32
    %c0_i32_0 = arith.constant 0 : i32
    %c0_i32_1 = arith.constant 0 : i32
    %c0_i32_2 = arith.constant 0 : i32
    return %c0_i32, %c0_i32_0, %c0_i32_1 : i32, i32, i32
  }
  func.func @transform_8(%arg0: i32) -> (i32, i32) {
    %c0_i32 = arith.constant 0 : i32
    %c0_i32_0 = arith.constant 0 : i32
    %c0_i32_1 = arith.constant 0 : i32
    return %c0_i32, %c0_i32_0 : i32, i32
  }
  func.func @transform_9(%arg0: i32) -> (i32, i32) {
    %c0_i32 = arith.constant 0 : i32
    %c0_i32_0 = arith.constant 0 : i32
    %c0_i32_1 = arith.constant 0 : i32
    return %c0_i32, %c0_i32_0 : i32, i32
  }
  func.func @transform_10(%arg0: i32) -> (i32, i32) {
    %c0_i32 = arith.constant 0 : i32
    %c0_i32_0 = arith.constant 0 : i32
    %c0_i32_1 = arith.constant 0 : i32
    return %c0_i32, %c0_i32_0 : i32, i32
  }
  func.func @transform_11(%arg0: i32) -> (i32, i32) {
    %c0_i32 = arith.constant 0 : i32
    %c0_i32_0 = arith.constant 0 : i32
    %c0_i32_1 = arith.constant 0 : i32
    return %c0_i32, %c0_i32_0 : i32, i32
  }
  func.func @transform_12(%arg0: i32) -> (i32, i32, i32) {
    %c0_i32 = arith.constant 0 : i32
    %c0_i32_0 = arith.constant 0 : i32
    %c0_i32_1 = arith.constant 0 : i32
    return %arg0, %c0_i32, %c0_i32_0 : i32, i32, i32
  }
}

</mosaic_0001>

<bundles_post_ra>
// kernel: tpu_custom_call.1
= control target key start
LH: loop header
LB: loop body
LE: loop exit
PB: predicated region body
PF: predicated region fallthrough
CT: control target
= control target key end

     0   :  { %s15103_s0 = inlined_call_operand.hbm [shape: f32[2,1,256], index: 0, kind: input, shape index: {}]   ;;  %s15104_s1 = inlined_call_operand.hbm [shape: f32[2,64,6], index: 1, kind: input, shape index: {}]   ;;  %s15105_s2 = inlined_call_operand.hbm [shape: f32[64,1], index: 2, kind: input, shape index: {}]   ;;  %s15106_s3 = inlined_call_operand.hbm [shape: f32[64,1], index: 3, kind: input, shape index: {}]   ;;  %s15107_s4 = inlined_call_operand.hbm [shape: f32[6,128,192], index: 4, kind: input, shape index: {}]   ;;  %s15108_s5 = inlined_call_operand.hbm [shape: f32[6,128,1], index: 5, kind: input, shape index: {}]   ;;  %s15109_s6 = inlined_call_operand.hbm [shape: f32[6,128,64], index: 6, kind: input, shape index: {}]   ;;  %s15110_s7 = inlined_call_operand.hbm [shape: f32[6,128,1], index: 7, kind: input, shape index: {}]   ;;  %s15111_s8 = inlined_call_operand.hbm [shape: f32[64,64], index: 8, kind: input, shape index: {}]   ;;  %s15112_s9 = inlined_call_operand.hbm [shape: f32[64,1], index: 9, kind: input, shape index: {}]   ;;  %s15113_s10 = inlined_call_operand.hbm [shape: f32[1,64], index: 10, kind: input, shape index: {}]   ;;  %s15114_s11 = inlined_call_operand.<no memory space> [shape: f32[1,1], index: 11, kind: input, shape index: {}]   ;;  %s15115_s12 = inlined_call_operand.hbm [shape: f32[2,1,256], index: 12, kind: output, shape index: {}]  }
   0x1   :  { %15130 = sst [smem:[#allocation33_spill]] %s15103_s0  ;;  %v17_v0 = vstv %s15114_s11 }
   0x2   :  { %15131 = sst [smem:[#allocation34_spill]] %s15104_s1  ;;  %18 = vst [vmem:[#allocation4] sm:$0x1] %v17_v0 }
   0x3   :  { %15132 = sst [smem:[#allocation35_spill]] %s15105_s2 }
   0x4   :  { %15133 = sst [smem:[#allocation36_spill]] %s15106_s3 }
   0x5   :  { %15134 = sst [smem:[#allocation37_spill]] %s15107_s4 }
   0x6   :  { %15135 = sst [smem:[#allocation38_spill]] %s15108_s5 }
   0x7   :  { %15136 = sst [smem:[#allocation39_spill]] %s15109_s6 }
   0x8   :  { %15137 = sst [smem:[#allocation40_spill]] %s15115_s12 }
   0x9   :  { %19 = vsyncpa [#allocation6], 0 }
   0xa   :  { %21 = vsyncpa [#allocation6 + $0x1], 0 }
   0xb   :  { %22 = vsyncpa [#allocation9], 0 }
   0xc   :  { %24 = vsyncpa [#allocation9 + $0x1], 0 }
   0xd   :  { %25 = vsyncpa [#allocation12], 0 }
   0xe   :  { %26 = vsyncpa [#allocation15], 0 }
   0xf   :  { %27 = vsyncpa [#allocation18], 0 }
  0x10   :  { %28 = vsyncpa [#allocation21], 0 }
  0x11   :  { %29 = vsyncpa [#allocation7], 0 }
  0x12   :  { %31 = vsyncpa [#allocation7 + $0x1], 0  ;;  %s12357_s23 = smov 0   ;;  %s12359_s24 = smov 0  }
  0x13   :  { %s12361_s25 = smov 0   ;;  %s12363_s26 = smov 0  }
  0x14 LB: > { %s12259_s11 = smov [#allocation10]   ;;  %s12378_s28 = sadd.s32 4294967295, %s12257_s26   ;;  %s12257_s26 = sphi %s12363_s26, %s15199_s26   ;;  %s12253_s25 = sphi %s12361_s25, %s15198_s25   ;;  %s12249_s24 = sphi %s12359_s24, %s15197_s24   ;;  %s12245_s23 = sphi %s12357_s23, %s15196_s23  }
  0x15   : > { %s342_s27 = sshll.u32 %s12259_s11, 4  ;;  %p9716_p0 = scmp.ge.s32.totalorder %s12257_s26, 1  ;;  %s12383_s27 = int_to_ptr.vmem [resolvable:$true] %s342_s27 }
  0x16   : > { %p15119_p1 = scmp.eq.s32.totalorder %s12378_s28, 0  ;;  %p330_p2 = scmp.lt.s32.totalorder %s12257_s26, 3 }
  0x17   : > { %s12260_s30 = smov [#allocation11]   ;;  %s12261_s15 = smov [#allocation14]  }
  0x18   : > { %p12385_p3 = pnand %p9716_p0, %p330_p2  ;;  %s355_s13 = sshll.u32 %s12260_s30, 4  ;;  %s12398_s13 = int_to_ptr.vmem [resolvable:$true] %s355_s13 }
  0x19   : > { %s381_s16 = sshll.u32 %s12261_s15, 4  ;;  %s15141_s2 = sld [smem:[#allocation35_spill]]  ;;  %s12400_s16 = int_to_ptr.vmem [resolvable:$true] %s381_s16 }
  0x1a   : > { %s15138_s29 = scalar_select %p12385_p3, 1, 0 }
  0x1b   : > { %p10773_p5 = pneg %p12385_p3 }
  0x1c   : > { %15139 = sst [smem:[#allocation32_spill]] %s15138_s29 }
  0x1d   : > { %p12394_p6 = pnand %p10773_p5, %p15119_p1 }
  0x1f   : > { %s11855_s19 = scalar_lea.hbm %s15141_s2, 1024  ;;  %p12410_p8 = pneg %p12394_p6 }
  0x20   : > { %p11856_p7 = scmp.ne.s32.totalorder %s15141_s2, %s11855_s19  ;;  %p11862_p11 = scmp.lt.u32.totalorder %s11855_s19, %s15141_s2 }
  0x22   : > { %p11858_p9 = pnand %p12410_p8, %p11856_p7 }
  0x24   : > { %p11859_p10 = pneg %p11858_p9 }
  0x26   : > { %p11864_p12 = pnand %p11862_p11, %p11859_p10 }
  0x28   : > { %11867 = shalt.err (!%p11864_p12)
}
  0x29   : > { %s11868_s15 = scalar_lea.vmem %s12383_s27, 1024  ;;  %p11876_p5 = scmp.lt.s32.totalorder %s12383_s27, %s12383_s27 }
  0x2a   : > { %p11869_p13 = scmp.ne.s32.totalorder %s12383_s27, %s11868_s15  ;;  %p11877_p4 = scmp.lt.s32.totalorder %s11868_s15, %s11868_s15 }
  0x2c   : > { %p11871_p0 = pnand %p11869_p13, %p12410_p8  ;;  %p11878_p7 = por %p11877_p4, %p11876_p5 }
  0x2e   : > { %p11872_p2 = pneg %p11871_p0 }
  0x30   : > { %p11879_p9 = pnand %p11878_p7, %p11872_p2 }
  0x32   : > { %11882 = shalt.err (!%p11879_p9)
}
  0x33   : > { %s15121_s17 = smov 128   ;;  %s15123_s18 = smov 8  }
  0x34   : > { %10776 = dma.hbm_to_vmem [thread:$0]  (!%p12394_p6), %s15141_s2, 1024, %s12383_s27, [#allocation9], %s15121_s17, %s15121_s17, %s15123_s18  }
  0x35   : > { %s15143_s3 = sld [smem:[#allocation36_spill]] }
  0x3b   : > { %s11883_s30 = scalar_lea.hbm %s15143_s3, 1024 }
  0x3c   : > { %p11884_p4 = scmp.ne.s32.totalorder %s15143_s3, %s11883_s30  ;;  %p11890_p12 = scmp.lt.u32.totalorder %s11883_s30, %s15143_s3 }
  0x3e   : > { %p11886_p10 = pnand %p11884_p4, %p12410_p8 }
  0x40   : > { %p11887_p11 = pneg %p11886_p10 }
  0x42   : > { %p11892_p13 = pnand %p11890_p12, %p11887_p11 }
  0x44   : > { %11895 = shalt.err (!%p11892_p13)
}
  0x45   : > { %s11896_s27 = scalar_lea.vmem %s12398_s13, 1024  ;;  %p11904_p7 = scmp.lt.s32.totalorder %s12398_s13, %s12398_s13 }
  0x46   : > { %p11897_p0 = scmp.ne.s32.totalorder %s12398_s13, %s11896_s27  ;;  %p11905_p9 = scmp.lt.s32.totalorder %s11896_s27, %s11896_s27 }
  0x48   : > { %p11899_p2 = pnand %p11897_p0, %p12410_p8  ;;  %p11906_p4 = por %p11905_p9, %p11904_p7 }
  0x4a   : > { %p11900_p5 = pneg %p11899_p2 }
  0x4c   : > { %p11907_p10 = pnand %p11906_p4, %p11900_p5 }
  0x4e   : > { %11910 = shalt.err (!%p11907_p10)
}
  0x4f   : > { %10779 = dma.hbm_to_vmem [thread:$0]  (!%p12394_p6), %s15143_s3, 1024, %s12398_s13, [#allocation12], %s15121_s17, %s15121_s17, %s15123_s18  }
  0x50   : > { %s15144_s5 = sld [smem:[#allocation38_spill]] }
  0x56   : > { %s11911_s20 = scalar_lea.hbm %s15144_s5, 12288 }
  0x57   : > { %p11912_p11 = scmp.ne.s32.totalorder %s15144_s5, %s11911_s20  ;;  %p11918_p0 = scmp.lt.u32.totalorder %s11911_s20, %s15144_s5 }
  0x59   : > { %p11914_p12 = pnand %p11912_p11, %p12410_p8 }
  0x5b   : > { %p11915_p13 = pneg %p11914_p12 }
  0x5d   : > { %p11920_p2 = pnand %p11918_p0, %p11915_p13 }
  0x5f   : > { %11923 = shalt.err (!%p11920_p2)
}
  0x60   : > { %s11924_s13 = scalar_lea.vmem %s12400_s16, 12288  ;;  %p11932_p4 = scmp.lt.s32.totalorder %s12400_s16, %s12400_s16 }
  0x61   : > { %p11925_p5 = scmp.ne.s32.totalorder %s12400_s16, %s11924_s13  ;;  %p11933_p10 = scmp.lt.s32.totalorder %s11924_s13, %s11924_s13 }
  0x63   : > { %p11927_p7 = pnand %p11925_p5, %p12410_p8  ;;  %p11934_p11 = por %p11933_p10, %p11932_p4 }
  0x65   : > { %p11928_p9 = pneg %p11927_p7 }
  0x67   : > { %p11935_p12 = pnand %p11934_p11, %p11928_p9 }
  0x69   : > { %11938 = shalt.err (!%p11935_p12)
}
  0x6a   : > { %10785 = dma.hbm_to_vmem [thread:$0]  (!%p12394_p6), %s15144_s5, 12288, %s12400_s16, [#allocation15], %s15121_s17, %s15121_s17, %s15123_s18  }
  0x6b   : > { %s12264_s12 = smov [#allocation17]   ;;  %s12265_s19 = smov [#allocation20]  }
  0x6c   : > { %s407_s29 = sshll.u32 %s12264_s12, 4  ;;  %s433_s20 = sshll.u32 %s12265_s19, 4  ;;  %s408_s29 = int_to_ptr.vmem [resolvable:$true] %s407_s29  ;;  %s434_s20 = int_to_ptr.vmem [resolvable:$true] %s433_s20 }
  0x6d   : > { %s11939_s30 = scalar_lea.hbm %s15110_s7, 12288 }
  0x6e   : > { %p11940_p13 = scmp.ne.s32.totalorder %s15110_s7, %s11939_s30  ;;  %p11946_p5 = scmp.lt.u32.totalorder %s11939_s30, %s15110_s7 }
  0x70   : > { %p11942_p0 = pnand %p11940_p13, %p12410_p8 }
  0x72   : > { %p11943_p2 = pneg %p11942_p0 }
  0x74   : > { %p11948_p7 = pnand %p11946_p5, %p11943_p2 }
  0x76   : > { %11951 = shalt.err (!%p11948_p7)
}
  0x77   : > { %s11952_s16 = scalar_lea.vmem %s408_s29, 12288  ;;  %p11960_p11 = scmp.lt.s32.totalorder %s408_s29, %s408_s29 }
  0x78   : > { %p11953_p9 = scmp.ne.s32.totalorder %s408_s29, %s11952_s16  ;;  %p11961_p12 = scmp.lt.s32.totalorder %s11952_s16, %s11952_s16 }
  0x7a   : > { %p11955_p4 = pnand %p11953_p9, %p12410_p8  ;;  %p11962_p1 = por %p11961_p12, %p11960_p11 }
  0x7c   : > { %p11956_p10 = pneg %p11955_p4 }
  0x7e   : > { %p11963_p3 = pnand %p11962_p1, %p11956_p10 }
  0x80   : > { %11966 = shalt.err (!%p11963_p3)
}
  0x81   : > { %10791 = dma.hbm_to_vmem [thread:$0]  (!%p12394_p6), %s15110_s7, 12288, %s408_s29, [#allocation18], %s15121_s17, %s15121_s17, %s15123_s18  }
  0x82   : > { %s11967_s21 = scalar_lea.hbm %s15112_s9, 1024 }
  0x83   : > { %p11968_p1 = scmp.ne.s32.totalorder %s15112_s9, %s11967_s21  ;;  %p11974_p0 = scmp.lt.u32.totalorder %s11967_s21, %s15112_s9 }
  0x85   : > { %p11970_p3 = pnand %p11968_p1, %p12410_p8 }
  0x87   : > { %p11971_p13 = pneg %p11970_p3 }
  0x89   : > { %p11976_p2 = pnand %p11974_p0, %p11971_p13 }
  0x8b   : > { %11979 = shalt.err (!%p11976_p2)
}
  0x8c   : > { %s11980_s27 = scalar_lea.vmem %s434_s20, 1024  ;;  %p11988_p4 = scmp.lt.s32.totalorder %s434_s20, %s434_s20 }
  0x8d   : > { %p11981_p5 = scmp.ne.s32.totalorder %s434_s20, %s11980_s27  ;;  %p11989_p10 = scmp.lt.s32.totalorder %s11980_s27, %s11980_s27 }
  0x8f   : > { %p11983_p7 = pnand %p11981_p5, %p12410_p8  ;;  %p11990_p11 = por %p11989_p10, %p11988_p4 }
  0x91   : > { %p11984_p9 = pneg %p11983_p7 }
  0x93   : > { %p11991_p12 = pnand %p11990_p11, %p11984_p9 }
  0x95   : > { %11994 = shalt.err (!%p11991_p12)
}
  0x96   : > { %10797 = dma.hbm_to_vmem [thread:$0]  (!%p12394_p6), %s15112_s9, 1024, %s434_s20, [#allocation21], %s15121_s17, %s15121_s17, %s15123_s18  }
  0x97   : > { %s12266_s2 = smov [#allocation13]   ;;  %s15145_s4 = sld [smem:[#allocation37_spill]] }
  0x98   : > { %s368_s1 = sshll.u32 %s12266_s2, 4  ;;  %s369_s1 = int_to_ptr.vmem [resolvable:$true] %s368_s1 }
  0x9d   : > { %s11995_s21 = scalar_lea.hbm %s15145_s4, 24576 }
  0x9e   : > { %p11996_p1 = scmp.ne.s32.totalorder %s15145_s4, %s11995_s21  ;;  %p12002_p0 = scmp.lt.u32.totalorder %s11995_s21, %s15145_s4 }
  0xa0   : > { %p11998_p3 = pnand %p11996_p1, %p12410_p8 }
  0xa2   : > { %p11999_p13 = pneg %p11998_p3 }
  0xa4   : > { %p12004_p2 = pnand %p12002_p0, %p11999_p13 }
  0xa6   : > { %12007 = shalt.err (!%p12004_p2)
}
  0xa7   : > { %s12008_s20 = scalar_lea.vmem %s369_s1, 24576  ;;  %p12016_p4 = scmp.lt.s32.totalorder %s369_s1, %s369_s1 }
  0xa8   : > { %p12009_p5 = scmp.ne.s32.totalorder %s369_s1, %s12008_s20  ;;  %p12017_p10 = scmp.lt.s32.totalorder %s12008_s20, %s12008_s20 }
  0xaa   : > { %p12011_p7 = pnand %p12009_p5, %p12410_p8  ;;  %p12018_p11 = por %p12017_p10, %p12016_p4 }
  0xac   : > { %p12012_p9 = pneg %p12011_p7 }
  0xae   : > { %p12019_p12 = pnand %p12018_p11, %p12012_p9 }
  0xb0   : > { %12022 = shalt.err (!%p12019_p12)
}
  0xb1   : > { %s12267_s27 = smov 256   ;;  %s12268_s29 = smov 16  }
  0xb2   : > { %10782 = dma.hbm_to_vmem [thread:$0]  (!%p12394_p6), %s15145_s4, 24576, %s369_s1, [#allocation12], %s12267_s27, %s12267_s27, %s12268_s29  }
  0xb3   : > { %s12269_s12 = smov [#allocation16]   ;;  %s12270_s21 = smov [#allocation19]  }
  0xb4   : > { %s394_s19 = sshll.u32 %s12269_s12, 4  ;;  %s420_s11 = sshll.u32 %s12270_s21, 4  ;;  %s395_s19 = int_to_ptr.vmem [resolvable:$true] %s394_s19  ;;  %s12546_s11 = int_to_ptr.vmem [resolvable:$true] %s420_s11 }
  0xb5   : > { %s15146_s6 = sld [smem:[#allocation39_spill]] }
  0xbb   : > { %s12023_s13 = scalar_lea.hbm %s15146_s6, 12288 }
  0xbc   : > { %p12024_p1 = scmp.ne.s32.totalorder %s15146_s6, %s12023_s13  ;;  %p12030_p0 = scmp.lt.u32.totalorder %s12023_s13, %s15146_s6 }
  0xbe   : > { %p12026_p3 = pnand %p12024_p1, %p12410_p8 }
  0xc0   : > { %p12027_p13 = pneg %p12026_p3 }
  0xc2   : > { %p12032_p2 = pnand %p12030_p0, %p12027_p13 }
  0xc4   : > { %12035 = shalt.err (!%p12032_p2)
}
  0xc5   : > { %s12036_s27 = scalar_lea.vmem %s395_s19, 12288  ;;  %p12044_p4 = scmp.lt.s32.totalorder %s395_s19, %s395_s19 }
  0xc6   : > { %p12037_p5 = scmp.ne.s32.totalorder %s395_s19, %s12036_s27  ;;  %p12045_p10 = scmp.lt.s32.totalorder %s12036_s27, %s12036_s27 }
  0xc8   : > { %p12039_p7 = pnand %p12037_p5, %p12410_p8  ;;  %p12046_p11 = por %p12045_p10, %p12044_p4 }
  0xca   : > { %p12040_p9 = pneg %p12039_p7 }
  0xcc   : > { %p12047_p12 = pnand %p12046_p11, %p12040_p9 }
  0xce   : > { %12050 = shalt.err (!%p12047_p12)
}
  0xcf   : > { %s15147_s17 = smov 128   ;;  %s12051_s30 = scalar_lea.hbm %s15111_s8, 1024 }
  0xd0   : > { %10788 = dma.hbm_to_vmem [thread:$0]  (!%p12394_p6), %s15146_s6, 12288, %s395_s19, [#allocation15], %s15147_s17, %s15147_s17, %s15123_s18  }
  0xd1   : > { %p12052_p1 = scmp.ne.s32.totalorder %s15111_s8, %s12051_s30  ;;  %p12058_p0 = scmp.lt.u32.totalorder %s12051_s30, %s15111_s8 }
  0xd3   : > { %p12054_p3 = pnand %p12052_p1, %p12410_p8 }
  0xd5   : > { %p12055_p13 = pneg %p12054_p3 }
  0xd7   : > { %p12060_p2 = pnand %p12058_p0, %p12055_p13 }
  0xd9   : > { %12063 = shalt.err (!%p12060_p2)
}
  0xda   : > { %s12064_s19 = scalar_lea.vmem %s12546_s11, 1024  ;;  %p12072_p4 = scmp.lt.s32.totalorder %s12546_s11, %s12546_s11 }
  0xdb   : > { %p12065_p5 = scmp.ne.s32.totalorder %s12546_s11, %s12064_s19  ;;  %p12073_p10 = scmp.lt.s32.totalorder %s12064_s19, %s12064_s19 }
  0xdd   : > { %p12067_p7 = pnand %p12065_p5, %p12410_p8  ;;  %p12074_p11 = por %p12073_p10, %p12072_p4 }
  0xdf   : > { %p12068_p9 = pneg %p12067_p7 }
  0xe1   : > { %p12075_p12 = pnand %p12074_p11, %p12068_p9 }
  0xe3   : > { %12078 = shalt.err (!%p12075_p12)
}
  0xe4   : > { %10794 = dma.hbm_to_vmem [thread:$0]  (!%p12394_p6), %s15111_s8, 1024, %s12546_s11, [#allocation18], %s15147_s17, %s15147_s17, %s15123_s18  }
  0xe5   : > { %s12271_s29 = smov [#allocation22]   ;;  %s12079_s30 = scalar_lea.hbm %s15113_s10, 16 }
  0xe6   : > { %s447_s2 = sshll.u32 %s12271_s29, 4  ;;  %p12080_p1 = scmp.ne.s32.totalorder %s15113_s10, %s12079_s30  ;;  %s448_s2 = int_to_ptr.vmem [resolvable:$true] %s447_s2 }
  0xe7   : > { %p12086_p0 = scmp.lt.u32.totalorder %s12079_s30, %s15113_s10 }
  0xe8   : > { %p12082_p3 = pnand %p12080_p1, %p12410_p8 }
  0xea   : > { %p12083_p13 = pneg %p12082_p3 }
  0xec   : > { %p12088_p2 = pnand %p12086_p0, %p12083_p13 }
  0xee   : > { %12091 = shalt.err (!%p12088_p2)
}
  0xef   : > { %s12092_s11 = scalar_lea.vmem %s448_s2, 16  ;;  %s12099_s19 = scalar_lea.vmem %s448_s2, 32 }
  0xf0   : > { %p12093_p5 = scmp.ne.s32.totalorder %s448_s2, %s12092_s11  ;;  %p12100_p4 = scmp.lt.s32.totalorder %s448_s2, %s448_s2 }
  0xf1   : > { %p12101_p10 = scmp.lt.s32.totalorder %s12099_s19, %s12092_s11 }
  0xf2   : > { %p12095_p7 = pnand %p12093_p5, %p12410_p8 }
  0xf3   : > { %p12102_p11 = por %p12101_p10, %p12100_p4 }
  0xf4   : > { %p12096_p9 = pneg %p12095_p7 }
  0xf6   : > { %p12103_p12 = pnand %p12102_p11, %p12096_p9 }
  0xf8   : > { %12106 = shalt.err (!%p12103_p12)
}
  0xf9   : > { %10800 = dma.hbm_to_vmem [thread:$0]  (!%p12394_p6), %s15113_s10, 16, %s448_s2, [#allocation21]  }
  0xfa   : > { %s9715_s22 = sadd.s32 4294967294, %s12257_s26   ;;  %s12615_s14 = sadd.s32 1, %s12257_s26  }
  0xfb   : > { %s44_s29 = sadd.s32 1, %s12253_s25  ;;  %s41_s12 = ssub.s32 %s12257_s26, %s12615_s14 }
  0xfc   : > { %p51_p8 = scmp.ne.s32.totalorder %s12253_s25, %s12249_s24  ;;  %p42_p1 = scmp.eq.s32.totalorder %s41_s12, 0 }
  0xfd   : > { %p52_p3 = scmp.eq.s32.totalorder %s12257_s26, 0  ;;  %p57_p13 = scmp.ne.s32.totalorder %s12249_s24, %s12245_s23 }
  0xfe   : > { %p317_p0 = scmp.eq.s32.totalorder %s12378_s28, 1  ;;  %p15148_p5 = scmp.eq.s32.totalorder %s12378_s28, 0 }
  0xff   : > { %s12627_s21 = scalar_select %p42_p1, %s12253_s25, %s44_s29  }
 0x100   : > { %p53_p2 = por %p52_p3, %p51_p8  ;;  %p12631_p7 = por %p15148_p5, %p57_p13 }
 0x101   : > { %p12635_p6 = por %p317_p0, %p51_p8  ;;  %p323_p9 = scmp.eq.s32.totalorder %s9715_s22, 1 }
 0x102   : > { %p10821_p4 = scmp.lt.s32.totalorder %s12257_s26, 2  ;;  %s12641_s15 = sand.u32 1, %s12253_s25  }
 0x103   : > { %s15150_s2 = scalar_select %p12635_p6, 1, 0 }
 0x104   : > { %p12643_p10 = por %p323_p9, %p57_p13  ;;  %s9727_s20 = sshll.u32 %s12641_s15, 1 }
 0x105   : > { %s10096_s16 = sshll.u32 %s12257_s26, 5  ;;  %s15152_s0 = sld [smem:[#allocation33_spill]] }
 0x106   : > { %s15151_s13 = scalar_select %p12643_p10, 1, 0 }
 0x107   : > { %s465_s27 = scalar_lea.vmem [#allocation5], %s9727_s20  ;;  %p12654_p11 = pnand %p10821_p4, %p53_p2 }
 0x108   : > { %s473_s22 = sshll.u32 %s465_s27, 4  ;;  %s462_s18 = scalar_lea.sflag [#allocation6], %s12641_s15  ;;  %s12658_s22 = int_to_ptr.vmem [resolvable:$true] %s473_s22 }
 0x109   : > { %p12109_p8 = pneg %p12654_p11 }
 0x10b   : > { %s12652_s1 = scalar_lea.hbm %s15152_s0, %s10096_s16  ;;  %s12112_s11 = scalar_lea.hbm %s15152_s0, 64 }
 0x10c   : > { %s12107_s3 = scalar_lea.hbm %s12652_s1, 32  ;;  %p12113_p13 = scmp.lt.u32.totalorder %s12652_s1, %s15152_s0 }
 0x10d   : > { %p12108_p12 = scmp.ne.s32.totalorder %s12652_s1, %s12107_s3  ;;  %p12114_p0 = scmp.lt.u32.totalorder %s12112_s11, %s12107_s3 }
 0x10e   : > { %p12116_p5 = scmp.lt.u32.totalorder %s12107_s3, %s12652_s1 }
 0x10f   : > { %p12110_p1 = pnand %p12109_p8, %p12108_p12  ;;  %p12115_p2 = por %p12114_p0, %p12113_p13 }
 0x111   : > { %p12111_p3 = pneg %p12110_p1  ;;  %p12117_p9 = por %p12116_p5, %p12115_p2 }
 0x113   : > { %p12118_p4 = pnand %p12117_p9, %p12111_p3 }
 0x115   : > { %12121 = shalt.err (!%p12118_p4)
}
 0x116   : > { %s12122_s12 = scalar_lea.vmem %s12658_s22, 32  ;;  %s12272_s20 = smov [#allocation5]  }
 0x117   : > { %p12123_p12 = scmp.ne.s32.totalorder %s12658_s22, %s12122_s12  ;;  %s12127_s16 = sshll.u32 %s12272_s20, 4  ;;  %s12128_s16 = int_to_ptr.vmem [resolvable:$false] %s12127_s16 }
 0x118   : > { %s12129_s19 = scalar_lea.vmem %s12128_s16, 64  ;;  %p12130_p6 = scmp.lt.s32.totalorder %s12658_s22, %s12128_s16 }
 0x119   : > { %p12125_p1 = pnand %p12123_p12, %p12109_p8  ;;  %p12131_p13 = scmp.lt.s32.totalorder %s12129_s19, %s12122_s12 }
 0x11b   : > { %p12126_p10 = pneg %p12125_p1  ;;  %p12132_p0 = por %p12131_p13, %p12130_p6 }
 0x11d   : > { %p12133_p2 = pnand %p12132_p0, %p12126_p10 }
 0x11f   : > { %12136 = shalt.err (!%p12133_p2)
}
 0x120   : > { %10804 = dma.hbm_to_vmem [thread:$0]  (!%p12654_p11), %s12652_s1, 32, %s12658_s22, %s462_s18  }
 0x121   : > { %s15154_s3 = sshll.u32 %s12641_s15, 6  ;;  %s480_s20 = sand.u32 1, %s12257_s26  }
 0x122   : > { %s484_s11 = scalar_lea.vmem [#allocation8], %s15154_s3  ;;  %s10097_s16 = sshll.u32 %s12257_s26, 10 }
 0x123   : > { %s491_s27 = sshll.u32 %s484_s11, 4  ;;  %s15155_s0 = sld [smem:[#allocation34_spill]]  ;;  %s12690_s27 = int_to_ptr.vmem [resolvable:$true] %s491_s27 }
 0x124   : > { %s12698_s5 = scalar_lea.sflag [#allocation9], %s480_s20 }
 0x129   : > { %s12696_s4 = scalar_lea.hbm %s15155_s0, %s10097_s16  ;;  %s12142_s1 = scalar_lea.hbm %s15155_s0, 2048 }
 0x12a   : > { %s12137_s6 = scalar_lea.hbm %s12696_s4, 1024  ;;  %p12143_p5 = scmp.lt.u32.totalorder %s12696_s4, %s15155_s0 }
 0x12b   : > { %p12138_p6 = scmp.ne.s32.totalorder %s12696_s4, %s12137_s6  ;;  %p12144_p9 = scmp.lt.u32.totalorder %s12142_s1, %s12137_s6 }
 0x12c   : > { %p12146_p12 = scmp.lt.u32.totalorder %s12137_s6, %s12696_s4 }
 0x12d   : > { %p12140_p10 = pnand %p12138_p6, %p12109_p8  ;;  %p12145_p4 = por %p12144_p9, %p12143_p5 }
 0x12f   : > { %p12141_p3 = pneg %p12140_p10  ;;  %p12147_p1 = por %p12146_p12, %p12145_p4 }
 0x131   : > { %p12148_p13 = pnand %p12147_p1, %p12141_p3 }
 0x133   : > { %12151 = shalt.err (!%p12148_p13)
}
 0x134   : > { %s12152_s11 = scalar_lea.vmem %s12690_s27, 1024  ;;  %s12273_s20 = smov [#allocation8]  }
 0x135   : > { %p12153_p0 = scmp.ne.s32.totalorder %s12690_s27, %s12152_s11  ;;  %s12157_s16 = sshll.u32 %s12273_s20, 4  ;;  %s12158_s16 = int_to_ptr.vmem [resolvable:$false] %s12157_s16 }
 0x136   : > { %s12159_s12 = scalar_lea.vmem %s12158_s16, 2048  ;;  %p12160_p10 = scmp.lt.s32.totalorder %s12690_s27, %s12158_s16 }
 0x137   : > { %p12155_p2 = pnand %p12153_p0, %p12109_p8  ;;  %p12161_p5 = scmp.lt.s32.totalorder %s12159_s12, %s12152_s11 }
 0x139   : > { %p12156_p6 = pneg %p12155_p2  ;;  %p12162_p9 = por %p12161_p5, %p12160_p10 }
 0x13b   : > { %p12163_p4 = pnand %p12162_p9, %p12156_p6 }
 0x13d   : > { %12166 = shalt.err (!%p12163_p4)
}
 0x13e   : > { %s15156_s6 = smov 8   ;;  %s15157_s19 = sld [smem:[#allocation32_spill]] }
 0x13f   : > { %10807 = dma.hbm_to_vmem [thread:$0]  (!%p12654_p11), %s12696_s4, 1024, %s12690_s27, %s12698_s5, %s15147_s17, %s15147_s17, %s15156_s6  }
 0x144   : > { %p15158_p8 = scmp.ne.s32.totalorder %s15157_s19, 0 }
 0x145   : > { %s12730_s18 = sand.u32 (!%p15158_p8), 1, %s12249_s24  }
 0x146   : > { %503 = sbr.rel (%p15158_p8) target bundleno = 5158 (0x1426), region = 68  ;;  %s9734_s15 = sshll.u32 (!%p15158_p8), %s12730_s18, 1 }
 0x147   : > { %s506_s1 = scalar_lea.sflag (!%p15158_p8), [#allocation6], %s12730_s18  ;;  %s12736_s29 = scalar_lea.vmem (!%p15158_p8), [#allocation5], %s9734_s15 }
 0x14d   : > { %12212 = dma.done.wait (%p12631_p7), %s506_s1, 32  }
 0x14e   : > { %12214 = vsyncadd (%p12631_p7), %s506_s1, 4294967264  ;;  %s514_s4 = sand.u32 1, %s12378_s28   ;;  %s9735_s5 = sshll.u32 %s12730_s18, 6 }
 0x14f   : > { %s515_s17 = scalar_lea.sflag [#allocation9], %s514_s4  ;;  %s12744_s27 = scalar_lea.vmem [#allocation8], %s9735_s5 }
 0x150   : > { %12216 = dma.done.wait (%p12631_p7), %s515_s17, 1024  }
 0x151   : > { %12218 = vsyncadd (%p12631_p7), %s515_s17, 4294966272  ;;  %p15159_p11 = scmp.eq.s32.totalorder %s12378_s28, 0 }
 0x153   : > { %12220 = dma.done.wait (%p15159_p11), [#allocation9], 1024   ;;  %p15160_p3 = pmov %p15159_p11 }
 0x155   : > { %12222 = vsyncadd (%p15160_p3), [#allocation9], 4294966272  ;;  %p15161_p12 = pmov %p15160_p3 }
 0x156   : > { %p15162_p1 = pmov %p15160_p3 }
 0x157   : > { %12224 = dma.done.wait (%p15161_p12), [#allocation12], 25600  }
 0x158   : > { %12226 = vsyncadd (%p15162_p1), [#allocation12], 4294941696  ;;  %p15163_p13 = pmov %p15162_p1 }
 0x159   : > { %p15164_p0 = pmov %p15162_p1 }
 0x15a   : > { %12228 = dma.done.wait (%p15163_p13), [#allocation15], 24576  }
 0x15b   : > { %12230 = vsyncadd (%p15164_p0), [#allocation15], 4294942720  ;;  %p15165_p7 = pmov %p15164_p0 }
 0x15c   : > { %p15166_p2 = pmov %p15164_p0 }
 0x15d   : > { %12232 = dma.done.wait (%p15165_p7), [#allocation18], 13312  }
 0x15e   : > { %12234 = vsyncadd (%p15166_p2), [#allocation18], 4294953984  ;;  %p15167_p6 = pmov %p15164_p0 }
 0x15f   : > { %p15168_p10 = pmov %p15164_p0 }
 0x160   : > { %12236 = dma.done.wait (%p15167_p6), [#allocation21], 1040  }
 0x161   : > { %12238 = vsyncadd (%p15168_p10), [#allocation21], 4294966256  ;;  %v15125_v1 = vlaneseq  ;;  %v15126_v2 = vmov 0   ;;  %v12275_v3 = vmov 1966171168   ;;  %v600_v8 = vld [vmem:[#allocation10] sm:$0xff] }
 0x162   : > { %10891 = vset.pattern.permute.xlu0 %v15126_v2  ;;  %v619_v4 = vunpack.c.l.s4 %v12275_v3  ;;  %10892 = vset.pattern.permute.xlu1 %v15126_v2  ;;  %v601_v9 = vld [vmem:[#allocation10 + $0x8] sm:$0xff]  ;;  %v617_v13 = vcombine.high %v600_v8, %v600_v8  ;;  %v602_v34 = vld [vmem:[#allocation10 + $0x10] sm:$0xff]  ;;  %v1649_v38 = vld [vmem:[#allocation11] sm:$0xff]  ;;  %s12276_s30 = smov 1   ;;  %s12277_s22 = smov 127   ;;  %vm3131_vm0 = vcmask 523264  }
 0x163   : > { %v12773_v5 = vshrl.u32 %v15125_v1, 7  ;;  %v666_v25 = vcombine.high %v601_v9, %v601_v9  ;;  %v715_v40 = vcombine.high %v602_v34, %v602_v34  ;;  %v1650_v41 = vld [vmem:[#allocation11 + $0x8] sm:$0xff]  ;;  %v603_v48 = vld [vmem:[#allocation10 + $0x18] sm:$0xff]  ;;  %v604_v0 = vld [vmem:[#allocation10 + $0x20] sm:$0xff]  ;;  %vm2905_vm1 = vcmask 7168   ;;  %s12280_s3 = smov 2  }
 0x164   : > { %v620_v6 = vunpack.c.0.s8 %v619_v4  ;;  %v764_v55 = vcombine.high %v603_v48, %v603_v48  ;;  %vm9746_vm2 = vmneg %vm2905_vm1  ;;  %vm2970_vm4 = vcmask 1039360   ;;  %s12281_s11 = smov 126   ;;  %vm3966_vm6 = vcmask 15360   ;;  %s12283_s20 = smov 4  }
 0x165   : > { %vm13559_vm3 = vmpackc.low %vm9746_vm2, %vm9746_vm2  ;;  %vm4031_vm9 = vcmask 1031168   ;;  %s12284_s16 = smov 124   ;;  %vm5030_vm11 = vcmask 31744   ;;  %vm5095_vm14 = vcmask 1014784   ;;  %s10098_s12 = sshll.u32 %s12378_s28, 5 }
 0x166   : > { %v12776_v7 = vsub.s32 %v620_v6, %v12773_v5  ;;  %vm13600_vm5 = vmpackc.low %vm2970_vm4, %vm2970_vm4  ;;  %s599_s6 = scalar_lea.vmem [#allocation23], %s9734_s15  ;;  %s15192_s4 = sld [smem:[#allocation40_spill]] }
 0x167   : > { %vm9802_vm7 = vmneg %vm3966_vm6  ;;  %s9537_s19 = sshll.u32 %s599_s6, 4  ;;  %s9523_s28 = scalar_lea.sflag [#allocation7], %s12730_s18  ;;  %s15061_s19 = int_to_ptr.vmem [resolvable:$true] %s9537_s19 }
 0x168   : > { %v624_v10 = vrot.slane %v600_v8, %v12776_v7  ;;  %v673_v11 = vrot.slane %v601_v9, %v12776_v7  ;;  %v631_v20 = vrot.slane %v617_v13, %v12776_v7  ;;  %v680_v28 = vrot.slane %v666_v25, %v12776_v7  ;;  %v1651_v8 = vld [vmem:[#allocation11 + $0x10] sm:$0xff]  ;;  %vm13849_vm8 = vmpackc.low %vm9802_vm7, %vm9802_vm7  ;;  %s12167_s15 = scalar_lea.vmem %s15061_s19, 32  ;;  %p15193_p9 = scmp.ne.s32.totalorder %s15150_s2, 0 }
 0x169   : > { %v722_v37 = vrot.slane %v602_v34, %v12776_v7  ;;  %v729_v44 = vrot.slane %v715_v40, %v12776_v7  ;;  %v771_v51 = vrot.slane %v603_v48, %v12776_v7  ;;  %v778_v58 = vrot.slane %v764_v55, %v12776_v7  ;;  %v606_v34 = vld [vmem:[#allocation10 + $0x30] sm:$0xff]  ;;  %v607_v48 = vld [vmem:[#allocation10 + $0x38] sm:$0xff]  ;;  %vm13890_vm10 = vmpackc.low %vm4031_vm9, %vm4031_vm9  ;;  %p12168_p5 = scmp.ne.s32.totalorder %s15061_s19, %s12167_s15  ;;  %s12288_s17 = smov [#allocation23]  }
 0x16a   : > { %v640_v12 = vrot.slane %v624_v10, %v12776_v7  ;;  %v632_v14 = vcombine.high %v624_v10, %v624_v10  ;;  %v681_v15 = vcombine.high %v673_v11, %v673_v11  ;;  %v689_v17 = vrot.slane %v673_v11, %v12776_v7  ;;  %v1652_v11 = vld [vmem:[#allocation11 + $0x18] sm:$0xff]  ;;  %vm9858_vm12 = vmneg %vm5030_vm11 }
 0x16b   : > { %v633_v22 = vcombine.high %v631_v20, %v631_v20  ;;  %v647_v23 = vrot.slane %v631_v20, %v12776_v7  ;;  %v682_v31 = vcombine.high %v680_v28, %v680_v28  ;;  %v696_v32 = vrot.slane %v680_v28, %v12776_v7  ;;  %vm14120_vm13 = vmpackc.low %vm9858_vm12, %vm9858_vm12  ;;  %p12169_p4 = pnand %p12168_p5, %p15193_p9 }
 0x16c   : > { %1010 = vperm.xlu0 %10891, %v640_v12   ;;  %v662_v16 = vcombine.high %v640_v12, %v640_v12  ;;  %v703_v18 = vrot.slane %v681_v15, %v12776_v7  ;;  %v654_v19 = vrot.slane %v632_v14, %v12776_v7  ;;  %v711_v29 = vcombine.high %v689_v17, %v689_v17  ;;  %vm14161_vm15 = vmpackc.low %vm5095_vm14, %vm5095_vm14  ;;  %s15059_s5 = scalar_lea.hbm %s15192_s4, %s10098_s12 }
 0x16d   : > { %v661_v24 = vrot.slane %v633_v22, %v12776_v7  ;;  %v663_v26 = vcombine.high %v647_v23, %v647_v23  ;;  %v710_v33 = vrot.slane %v682_v31, %v12776_v7  ;;  %v712_v35 = vcombine.high %v696_v32, %v696_v32  ;;  %p12170_p8 = pneg %p12169_p4 }
 0x16e   : > { %1026 = vperm.xlu1 %10892, %v662_v16   ;;  %v664_v21 = vcombine.high %v654_v19, %v654_v19  ;;  %v713_v30 = vcombine.high %v703_v18, %v703_v18  ;;  %v730_v39 = vcombine.high %v722_v37, %v722_v37  ;;  %v738_v42 = vrot.slane %v722_v37, %v12776_v7 }
 0x16f   : > { %v665_v27 = vcombine.high %v661_v24, %v661_v24  ;;  %v714_v36 = vcombine.high %v710_v33, %v710_v33  ;;  %v731_v47 = vcombine.high %v729_v44, %v729_v44  ;;  %v745_v49 = vrot.slane %v729_v44, %v12776_v7 }
 0x170   : > { %1074 = vperm.xlu0 %10891, %v689_v17   ;;  %v752_v43 = vrot.slane %v730_v39, %v12776_v7  ;;  %v760_v45 = vcombine.high %v738_v42, %v738_v42  ;;  %v779_v54 = vcombine.high %v771_v51, %v771_v51  ;;  %v787_v56 = vrot.slane %v771_v51, %v12776_v7 }
 0x171   : > { %v759_v50 = vrot.slane %v731_v47, %v12776_v7  ;;  %v761_v52 = vcombine.high %v745_v49, %v745_v49  ;;  %v780_v61 = vcombine.high %v778_v58, %v778_v58  ;;  %v794_v62 = vrot.slane %v778_v58, %v12776_v7 }
 0x172   : > { %1082 = vperm.xlu1 %10892, %v703_v18   ;;  %v762_v46 = vcombine.high %v752_v43, %v752_v43  ;;  %v801_v57 = vrot.slane %v779_v54, %v12776_v7  ;;  %v809_v59 = vcombine.high %v787_v56, %v787_v56  ;;  %v820_v6 = vrot.slane %v604_v0, %v12776_v7  ;;  %v605_v18 = vld [vmem:[#allocation10 + $0x28] sm:$0xff] }
 0x173   : > { %v763_v53 = vcombine.high %v759_v50, %v759_v50  ;;  %v808_v63 = vrot.slane %v780_v61, %v12776_v7  ;;  %v810_v3 = vcombine.high %v794_v62, %v794_v62  ;;  %v813_v10 = vcombine.high %v604_v0, %v604_v0 }
 0x174   : > { %1018 = vperm.xlu0 %10891, %v654_v19   ;;  %v811_v60 = vcombine.high %v801_v57, %v801_v57  ;;  %v828_v9 = vcombine.high %v820_v6, %v820_v6  ;;  %v836_v12 = vrot.slane %v820_v6, %v12776_v7  ;;  %v862_v25 = vcombine.high %v605_v18, %v605_v18 }
 0x175   : > { %v812_v4 = vcombine.high %v808_v63, %v808_v63  ;;  %v827_v14 = vrot.slane %v813_v10, %v12776_v7  ;;  %v918_v37 = vrot.slane %v606_v34, %v12776_v7  ;;  %v911_v40 = vcombine.high %v606_v34, %v606_v34 }
 0x176   : > { %1034 = vperm.xlu1 %10892, %v664_v21   ;;  %v850_v13 = vrot.slane %v828_v9, %v12776_v7  ;;  %v858_v15 = vcombine.high %v836_v12, %v836_v12  ;;  %v869_v21 = vrot.slane %v605_v18, %v12776_v7  ;;  %v876_v28 = vrot.slane %v862_v25, %v12776_v7  ;;  %v2778_v18 = vld [vmem:[%s12744_s27 + $0x8] sm:$0xff] }
 0x177   : > { %v829_v17 = vcombine.high %v827_v14, %v827_v14  ;;  %v843_v19 = vrot.slane %v827_v14, %v12776_v7  ;;  %v926_v39 = vcombine.high %v918_v37, %v918_v37  ;;  %v925_v44 = vrot.slane %v911_v40, %v12776_v7  ;;  %v1656_v14 = vld [vmem:[#allocation11 + $0x38] sm:$0xff] }
 0x178   : > { %1042 = vperm.xlu0 %10891, %v647_v23   ;;  %v860_v16 = vcombine.high %v850_v13, %v850_v13  ;;  %v878_v31 = vcombine.high %v876_v28, %v876_v28  ;;  %v967_v51 = vrot.slane %v607_v48, %v12776_v7  ;;  %v960_v55 = vcombine.high %v607_v48, %v607_v48 }
 0x179   : > { %v857_v20 = vrot.slane %v829_v17, %v12776_v7  ;;  %v859_v22 = vcombine.high %v843_v19, %v843_v19  ;;  %v927_v47 = vcombine.high %v925_v44, %v925_v44  ;;  %v12882_v40 = vsub.s32 1, %v12773_v5 }
 0x17a   : > { %1050 = vperm.xlu1 %10892, %v661_v24   ;;  %v877_v24 = vcombine.high %v869_v21, %v869_v21  ;;  %v975_v54 = vcombine.high %v967_v51, %v967_v51  ;;  %v974_v58 = vrot.slane %v960_v55, %v12776_v7 }
 0x17b   : > { %v861_v23 = vcombine.high %v857_v20, %v857_v20 }
 0x17c   : > { %1058 = vperm.xlu0 %10891, %v663_v26   ;;  %v885_v26 = vrot.slane %v869_v21, %v12776_v7  ;;  %v976_v61 = vcombine.high %v974_v58, %v974_v58 }
 0x17e   : > { %1066 = vperm.xlu1 %10892, %v665_v27   ;;  %v899_v27 = vrot.slane %v877_v24, %v12776_v7  ;;  %v2781_v24 = vld [vmem:[%s12744_s27 + $0x20] sm:$0xff] }
 0x180   : > { %1090 = vperm.xlu0 %10891, %v711_v29   ;;  %v907_v29 = vcombine.high %v885_v26, %v885_v26 }
 0x182   : > { %1098 = vperm.xlu1 %10892, %v713_v30   ;;  %v909_v30 = vcombine.high %v899_v27, %v899_v27 }
 0x184   : > { %1106 = vperm.xlu0 %10891, %v696_v32   ;;  %v892_v32 = vrot.slane %v876_v28, %v12776_v7  ;;  %v2783_v28 = vld [vmem:[%s12744_s27 + $0x30] sm:$0xff] }
 0x186   : > { %1114 = vperm.xlu1 %10892, %v710_v33   ;;  %v906_v33 = vrot.slane %v878_v31, %v12776_v7 }
 0x188   : > { %1122 = vperm.xlu0 %10891, %v712_v35   ;;  %v908_v35 = vcombine.high %v892_v32, %v892_v32 }
 0x18a   : > { %1130 = vperm.xlu1 %10892, %v714_v36   ;;  %v910_v36 = vcombine.high %v906_v33, %v906_v33 }
 0x18c   : > { %1659 = vperm.xlu0 %10891, %v1649_v38   ;;  %v1653_v38 = vld [vmem:[#allocation11 + $0x20] sm:$0xff] }
 0x18e   : > { %1663 = vperm.xlu1 %10892, %v1650_v41   ;;  %v1654_v41 = vld [vmem:[#allocation11 + $0x28] sm:$0xff] }
 0x190   : > { %1138 = vperm.xlu0 %10891, %v738_v42   ;;  %v934_v42 = vrot.slane %v918_v37, %v12776_v7  ;;  %v12875_v37 = vsub.s32 0, %v12773_v5 }
 0x192   : > { %1146 = vperm.xlu1 %10892, %v752_v43   ;;  %v948_v43 = vrot.slane %v926_v39, %v12776_v7 }
 0x194   : > { %1154 = vperm.xlu0 %10891, %v760_v45   ;;  %v956_v45 = vcombine.high %v934_v42, %v934_v42 }
 0x196   : > { %1162 = vperm.xlu1 %10892, %v762_v46   ;;  %v958_v46 = vcombine.high %v948_v43, %v948_v43 }
 0x198   : > { %1170 = vperm.xlu0 %10891, %v745_v49   ;;  %v941_v49 = vrot.slane %v925_v44, %v12776_v7  ;;  %v12894_v44 = vsub.s32 5, %v12773_v5 }
 0x19a   : > { %1178 = vperm.xlu1 %10892, %v759_v50   ;;  %v955_v50 = vrot.slane %v927_v47, %v12776_v7 }
 0x19c   : > { %1186 = vperm.xlu0 %10891, %v761_v52   ;;  %v957_v52 = vcombine.high %v941_v49, %v941_v49 }
 0x19e   : > { %1194 = vperm.xlu1 %10892, %v763_v53   ;;  %v959_v53 = vcombine.high %v955_v50, %v955_v50 }
 0x1a0   : > { %1202 = vperm.xlu0 %10891, %v787_v56   ;;  %v983_v56 = vrot.slane %v967_v51, %v12776_v7 }
 0x1a2   : > { %1210 = vperm.xlu1 %10892, %v801_v57   ;;  %v997_v57 = vrot.slane %v975_v54, %v12776_v7 }
 0x1a4   : > { %1218 = vperm.xlu0 %10891, %v809_v59   ;;  %v1005_v59 = vcombine.high %v983_v56, %v983_v56 }
 0x1a6   : > { %1226 = vperm.xlu1 %10892, %v811_v60   ;;  %v1007_v60 = vcombine.high %v997_v57, %v997_v57 }
 0x1a8   : > { %1234 = vperm.xlu0 %10891, %v794_v62  }
 0x1aa   : > { %1242 = vperm.xlu1 %10892, %v808_v63   ;;  %v990_v63 = vrot.slane %v974_v58, %v12776_v7 }
 0x1ac   : > { %1250 = vperm.xlu0 %10891, %v810_v3   ;;  %v1004_v3 = vrot.slane %v976_v61, %v12776_v7  ;;  %v1006_v6 = vcombine.high %v990_v63, %v990_v63 }
 0x1ae   : > { %1258 = vperm.xlu1 %10892, %v812_v4   ;;  %v1008_v9 = vcombine.high %v1004_v3, %v1004_v3 }
 0x1b0   : > { %1667 = vperm.xlu0 %10891, %v1651_v8  }
 0x1b2   : > { %1671 = vperm.xlu1 %10892, %v1652_v11  }
 0x1b4   : > { %1266 = vperm.xlu0 %10891, %v836_v12   ;;  %v1655_v12 = vld [vmem:[#allocation11 + $0x30] sm:$0xff] }
 0x1b6   : > { %1274 = vperm.xlu1 %10892, %v850_v13  }
 0x1b8   : > { %1282 = vperm.xlu0 %10891, %v858_v15  }
 0x1ba   : > { %1290 = vperm.xlu1 %10892, %v860_v16   ;;  %v2777_v16 = vld [vmem:[%s12744_s27] sm:$0xff] }
 0x1bc   : > { %1298 = vperm.xlu0 %10891, %v843_v19  }
 0x1be   : > { %1306 = vperm.xlu1 %10892, %v857_v20   ;;  %v2779_v20 = vld [vmem:[%s12744_s27 + $0x10] sm:$0xff] }
 0x1c0   : > { %1314 = vperm.xlu0 %10891, %v859_v22   ;;  %v2780_v22 = vld [vmem:[%s12744_s27 + $0x18] sm:$0xff] }
 0x1c2   : > { %1322 = vperm.xlu1 %10892, %v861_v23  }
 0x1c4   : > { %1330 = vperm.xlu0 %10891, %v885_v26   ;;  %v2782_v26 = vld [vmem:[%s12744_s27 + $0x28] sm:$0xff] }
 0x1c6   : > { %1338 = vperm.xlu1 %10892, %v899_v27  }
 0x1c8   : > { %1346 = vperm.xlu0 %10891, %v907_v29  }
 0x1ca   : > { %1354 = vperm.xlu1 %10892, %v909_v30   ;;  %v2784_v30 = vld [vmem:[%s12744_s27 + $0x38] sm:$0xff] }
 0x1cc   : > { %1362 = vperm.xlu0 %10891, %v892_v32  }
 0x1ce   : > { %1370 = vperm.xlu1 %10892, %v906_v33  }
 0x1d0   : > { %1378 = vperm.xlu0 %10891, %v908_v35  }
 0x1d2   : > { %1386 = vperm.xlu1 %10892, %v910_v36  }
 0x1d4   : > { %1675 = vperm.xlu0 %10891, %v1653_v38  }
 0x1d6   : > { %1679 = vperm.xlu1 %10892, %v1654_v41   ;;  %v12885_v41 = vsub.s32 2, %v12773_v5 }
 0x1d8   : > { %1394 = vperm.xlu0 %10891, %v934_v42   ;;  %v12888_v42 = vsub.s32 3, %v12773_v5 }
 0x1da   : > { %1402 = vperm.xlu1 %10892, %v948_v43   ;;  %v12891_v43 = vsub.s32 4, %v12773_v5 }
 0x1dc   : > { %1410 = vperm.xlu0 %10891, %v956_v45   ;;  %v12897_v45 = vsub.s32 6, %v12773_v5 }
 0x1de   : > { %1418 = vperm.xlu1 %10892, %v958_v46   ;;  %v12900_v46 = vsub.s32 7, %v12773_v5 }
 0x1e0   : > { %1426 = vperm.xlu0 %10891, %v941_v49  }
 0x1e2   : > { %1434 = vperm.xlu1 %10892, %v955_v50  }
 0x1e4   : > { %1442 = vperm.xlu0 %10891, %v957_v52   ;;  %v12913_v52 = vld [vmem:[%s12736_s29] sm:$0x3] }
 0x1e6   : > { %1450 = vperm.xlu1 %10892, %v959_v53  }
 0x1e8   : > { %1458 = vperm.xlu0 %10891, %v983_v56  }
 0x1ea   : > { %1466 = vperm.xlu1 %10892, %v997_v57  }
 0x1eb   : > { %v12824_v62 = vpop.permute.xlu0 %1010 }
 0x1ec   : > { %1474 = vperm.xlu0 %10891, %v1005_v59   ;;  %v1016_v47 = vrot.slane %v12824_v62, %v12875_v37 }
 0x1ed   : > { %v12827_v0 = vpop.permute.xlu1 %1026 }
 0x1ee   : > { %1482 = vperm.xlu1 %10892, %v1007_v60   ;;  %v1032_v48 = vrot.slane %v12827_v0, %v12875_v37 }
 0x1ef   : > { %v12830_v4 = vpop.permute.xlu0 %1074 }
 0x1f0   : > { %1490 = vperm.xlu0 %10891, %v990_v63  }
 0x1f1   : > { %v12832_v8 = vpop.permute.xlu1 %1082 }
 0x1f2   : > { %1498 = vperm.xlu1 %10892, %v1004_v3   ;;  %v1521_v3 = vmul.f32 %v1016_v47, %v12913_v52 }
 0x1f3   : > { %v12834_v10 = vpop.permute.xlu0 %1018 }
 0x1f4   : > { %1506 = vperm.xlu0 %10891, %v1006_v6   ;;  %v1024_v49 = vrot.slane %v12834_v10, %v12875_v37  ;;  %v1523_v6 = vmul.f32 %v1032_v48, %v12913_v52 }
 0x1f5   : > { %v12836_v11 = vpop.permute.xlu1 %1034 }
 0x1f6   : > { %1514 = vperm.xlu1 %10892, %v1008_v9   ;;  %v1040_v50 = vrot.slane %v12836_v11, %v12875_v37  ;;  %v1522_v9 = vmul.f32 %v1024_v49, %v12913_v52 }
 0x1f7   : > { %v12838_v13 = vpop.permute.xlu0 %1042 }
 0x1f8   : > { %1683 = vperm.xlu0 %10891, %v1655_v12   ;;  %v1048_v5 = vrot.slane %v12838_v13, %v12875_v37  ;;  %v1524_v10 = vmul.f32 %v1040_v50, %v12913_v52 }
 0x1f9   : > { %v12840_v15 = vpop.permute.xlu1 %1050 }
 0x1fa   : > { %1687 = vperm.xlu1 %10892, %v1656_v14   ;;  %v1056_v53 = vrot.slane %v12840_v15, %v12875_v37  ;;  %v1525_v12 = vmul.f32 %v1048_v5, %v12913_v52 }
 0x1fb   : > { %v12843_v17 = vpop.permute.xlu0 %1058 }
 0x1fc   : > { %2803 = vperm.xlu0 %10891, %v2777_v16   ;;  %v1064_v54 = vrot.slane %v12843_v17, %v12875_v37  ;;  %v1526_v13 = vmul.f32 %v1056_v53, %v12913_v52 }
 0x1fd   : > { %v12846_v19 = vpop.permute.xlu1 %1066 }
 0x1fe   : > { %2808 = vperm.xlu1 %10892, %v2778_v18   ;;  %v1072_v55 = vrot.slane %v12846_v19, %v12875_v37  ;;  %v1527_v14 = vmul.f32 %v1064_v54, %v12913_v52 }
 0x1ff   : > { %v12849_v21 = vpop.permute.xlu0 %1090 }
 0x200   : > { %2813 = vperm.xlu0 %10891, %v2779_v20   ;;  %v1528_v15 = vmul.f32 %v1072_v55, %v12913_v52  ;;  %v1096_v47 = vrot.slane %v12849_v21, %v12875_v37 }
 0x201   : > { %v12852_v23 = vpop.permute.xlu1 %1098 }
 0x202   : > { %2818 = vperm.xlu1 %10892, %v2780_v22   ;;  %v1104_v49 = vrot.slane %v12852_v23, %v12875_v37 }
 0x203   : > { %v12855_v25 = vpop.permute.xlu0 %1106 }
 0x204   : > { %2823 = vperm.xlu0 %10891, %v2781_v24   ;;  %v1112_v50 = vrot.slane %v12855_v25, %v12875_v37 }
 0x205   : > { %v12858_v27 = vpop.permute.xlu1 %1114 }
 0x206   : > { %2828 = vperm.xlu1 %10892, %v2782_v26   ;;  %v1120_v5 = vrot.slane %v12858_v27, %v12875_v37 }
 0x207   : > { %v12861_v29 = vpop.permute.xlu0 %1122 }
 0x208   : > { %2833 = vperm.xlu0 %10891, %v2783_v28  }
 0x209   : > { %v12864_v31 = vpop.permute.xlu1 %1130 }
 0x20a   : > { %2838 = vperm.xlu1 %10892, %v2784_v30   ;;  %v1080_v30 = vrot.slane %v12830_v4, %v12875_v37  ;;  %v1128_v4 = vrot.slane %v12861_v29, %v12875_v37  ;;  %v1136_v27 = vrot.slane %v12864_v31, %v12875_v37 }
 0x20b   : > { %v1660_v32 = vpop.permute.xlu0 %1659 }
 0x20c   : > { %v1692_v57 = vrot.slane %v1660_v32, %v12875_v37  ;;  %v1696_v58 = vrot.slane %v1660_v32, %v12882_v40  ;;  %v1700_v59 = vrot.slane %v1660_v32, %v12885_v41  ;;  %v1704_v60 = vrot.slane %v1660_v32, %v12888_v42 }
 0x20d   : > { %v12866_v33 = vpop.permute.xlu1 %1663  ;;  %v1708_v61 = vrot.slane %v1660_v32, %v12891_v43  ;;  %v1712_v62 = vrot.slane %v1660_v32, %v12894_v44  ;;  %v1716_v63 = vrot.slane %v1660_v32, %v12897_v45  ;;  %v1720_v0 = vrot.slane %v1660_v32, %v12900_v46 }
 0x20e   : > { %v2009_v17 = vadd.f32 %v1692_v57, %v1521_v3  ;;  %v2010_v18 = vadd.f32 %v1696_v58, %v1522_v9  ;;  %v2011_v19 = vadd.f32 %v1700_v59, %v1523_v6  ;;  %v2012_v20 = vadd.f32 %v1704_v60, %v1524_v10 }
 0x20f   : > { %v12868_v34 = vpop.permute.xlu0 %1138  ;;  %v2013_v22 = vadd.f32 %v1708_v61, %v1525_v12  ;;  %v2015_v24 = vadd.f32 %v1716_v63, %v1527_v14  ;;  %v2014_v26 = vadd.f32 %v1712_v62, %v1526_v13  ;;  %v2016_v28 = vadd.f32 %v1720_v0, %v1528_v15 }
 0x210   : > { %v1088_v32 = vrot.slane %v12832_v8, %v12875_v37  ;;  %v2073_v8 = vmax.f32 %v2009_v17, 0.0  ;;  %v2074_v54 = vmax.f32 %v2010_v18, 0.0  ;;  %v2075_v55 = vmax.f32 %v2011_v19, 0.0 }
 0x211   : > { %v12870_v35 = vpop.permute.xlu1 %1146  ;;  %v2076_v21 = vmax.f32 %v2012_v20, 0.0  ;;  %v2077_v57 = vmax.f32 %v2013_v22, 0.0  ;;  %v2079_v58 = vmax.f32 %v2015_v24, 0.0  ;;  %v2078_v59 = vmax.f32 %v2014_v26, 0.0 }
 0x212   : > { %v2080_v60 = vmax.f32 %v2016_v28, 0.0  ;;  %v1529_v23 = vmul.f32 %v1080_v30, %v12913_v52  ;;  %v1530_v25 = vmul.f32 %v1088_v32, %v12913_v52  ;;  %v1531_v61 = vmul.f32 %v1096_v47, %v12913_v52 }
 0x213   : > { %v12872_v36 = vpop.permute.xlu0 %1154  ;;  %v1532_v62 = vmul.f32 %v1104_v49, %v12913_v52  ;;  %v1533_v63 = vmul.f32 %v1112_v50, %v12913_v52  ;;  %v1534_v0 = vmul.f32 %v1120_v5, %v12913_v52  ;;  %v1535_v3 = vmul.f32 %v1128_v4, %v12913_v52 }
 0x214   : > { %v2201_v9 = vcombine.low %v2073_v8, %v2074_v54  ;;  %v2202_v10 = vcombine.low %v2075_v55, %v2076_v21  ;;  %v1724_v12 = vrot.slane %v12866_v33, %v12875_v37  ;;  %v1728_v31 = vrot.slane %v12866_v33, %v12882_v40 }
 0x215   : > { %v12877_v38 = vpop.permute.xlu1 %1162  ;;  %v1144_v13 = vrot.slane %v12868_v34, %v12875_v37  ;;  %v1152_v14 = vrot.slane %v12870_v35, %v12875_v37  ;;  %v2203_v15 = vcombine.low %v2077_v57, %v2078_v59  ;;  %v2204_v17 = vcombine.low %v2079_v58, %v2080_v60 }
 0x216   : > { %v1536_v18 = vmul.f32 %v1136_v27, %v12913_v52  ;;  %v1160_v19 = vrot.slane %v12872_v36, %v12875_v37  ;;  %v1732_v22 = vrot.slane %v12866_v33, %v12885_v41  ;;  %v1736_v24 = vrot.slane %v12866_v33, %v12888_v42 }
 0x217   : > { %v12879_v39 = vpop.permute.xlu0 %1170  ;;  %v1740_v34 = vrot.slane %v12866_v33, %v12891_v43  ;;  %v1744_v35 = vrot.slane %v12866_v33, %v12894_v44  ;;  %v1748_v26 = vrot.slane %v12866_v33, %v12897_v45  ;;  %v1752_v36 = vrot.slane %v12866_v33, %v12900_v46 }
 0x218   : > { %v2211_v30 = vrot.slane %v2201_v9, %v12776_v7  ;;  %v2218_v32 = vrot.slane %v2202_v10, %v12776_v7  ;;  %v2017_v47 = vadd.f32 %v1724_v12, %v1529_v23  ;;  %v2018_v49 = vadd.f32 %v1728_v31, %v1530_v25 }
 0x219   : > { %v12910_v51 = vpop.permute.xlu1 %1178  ;;  %v1537_v50 = vmul.f32 %v1144_v13, %v12913_v52  ;;  %v1538_v5 = vmul.f32 %v1152_v14, %v12913_v52  ;;  %v2225_v4 = vrot.slane %v2203_v15, %v12776_v7  ;;  %v2232_v8 = vrot.slane %v2204_v17, %v12776_v7 }
 0x21a   : > { %v1539_v54 = vmul.f32 %v1160_v19, %v12913_v52  ;;  %v1168_v33 = vrot.slane %v12877_v38, %v12875_v37  ;;  %v2019_v21 = vadd.f32 %v1732_v22, %v1531_v61  ;;  %v2020_v57 = vadd.f32 %v1736_v24, %v1532_v62 }
 0x21b   : > { %v12923_v56 = vpop.permute.xlu0 %1186  ;;  %v2021_v58 = vadd.f32 %v1740_v34, %v1533_v63  ;;  %v2022_v59 = vadd.f32 %v1744_v35, %v1534_v0  ;;  %v2023_v60 = vadd.f32 %v1748_v26, %v1535_v3  ;;  %v2024_v23 = vadd.f32 %v1752_v36, %v1536_v18 }
 0x21c   : > { %v2233_v27 = vcombine.low %v2211_v30, %v2218_v32  ;;  %v2234_v9 = vcombine.high %v2211_v30, %v2218_v32  ;;  %v2081_v10 = vmax.f32 %v2017_v47, 0.0  ;;  %v2082_v12 = vmax.f32 %v2018_v49, 0.0 }
 0x21d   : > { %v12937_v11 = vpop.permute.xlu1 %1194  ;;  %v1176_v31 = vrot.slane %v12879_v39, %v12875_v37  ;;  %v1184_v38 = vrot.slane %v12910_v51, %v12875_v37  ;;  %v2235_v13 = vcombine.low %v2225_v4, %v2232_v8  ;;  %v2236_v14 = vcombine.high %v2225_v4, %v2232_v8 }
 0x21e   : > { %v1540_v61 = vmul.f32 %v1168_v33, %v12913_v52  ;;  %v1192_v62 = vrot.slane %v12923_v56, %v12875_v37  ;;  %v2083_v0 = vmax.f32 %v2019_v21, 0.0  ;;  %v2084_v3 = vmax.f32 %v2020_v57, 0.0 }
 0x21f   : > { %v12943_v16 = vpop.permute.xlu0 %1202  ;;  %v2085_v15 = vmax.f32 %v2021_v58, 0.0  ;;  %v2086_v17 = vmax.f32 %v2022_v59, 0.0  ;;  %v2087_v18 = vmax.f32 %v2023_v60, 0.0  ;;  %v2088_v19 = vmax.f32 %v2024_v23, 0.0 }
 0x220   : > { %v1200_v39 = vrot.slane %v12937_v11, %v12875_v37  ;;  %v2243_v51 = vrot.slane %v2233_v27, %v12776_v7  ;;  %v13031_v24 = vrot.slane %v2234_v9, %v12776_v7  ;;  %v2267_v34 = vcombine.low %v2081_v10, %v2082_v12 }
 0x221   : > { %v12951_v48 = vpop.permute.xlu1 %1210  ;;  %v1541_v56 = vmul.f32 %v1176_v31, %v12913_v52  ;;  %v1542_v35 = vmul.f32 %v1184_v38, %v12913_v52  ;;  %v2257_v26 = vrot.slane %v2235_v13, %v12776_v7  ;;  %v13037_v36 = vrot.slane %v2236_v14, %v12776_v7 }
 0x222   : > { %v1543_v4 = vmul.f32 %v1192_v62, %v12913_v52  ;;  %v2268_v8 = vcombine.low %v2083_v0, %v2084_v3  ;;  %v2269_v33 = vcombine.low %v2085_v15, %v2086_v17  ;;  %v2270_v21 = vcombine.low %v2087_v18, %v2088_v19 }
 0x223   : > { %v12961_v53 = vpop.permute.xlu0 %1218  ;;  %v1544_v57 = vmul.f32 %v1200_v39, %v12913_v52  ;;  %v1208_v58 = vrot.slane %v12943_v16, %v12875_v37  ;;  %v1216_v59 = vrot.slane %v12951_v48, %v12875_v37  ;;  %v13058_v23 = vrot.slane %v2267_v34, %v12776_v7 }
 0x224   : > { %v1224_v14 = vrot.slane %v12961_v53, %v12875_v37  ;;  %v13073_v62 = vrot.slane %v2268_v8, %v12776_v7  ;;  %v13076_v0 = vrot.slane %v2269_v33, %v12776_v7  ;;  %v13079_v3 = vrot.slane %v2270_v21, %v12776_v7 }
 0x225   : > { %v12968_v29 = vpop.permute.xlu1 %1226  ;;  %v1546_v15 = vmul.f32 %v1216_v59, %v12913_v52 }
 0x226   : > { %v2302_v8 = vcombine.high %v13076_v0, %v13079_v3 }
 0x227   : > { %v12974_v6 = vpop.permute.xlu0 %1234 }
 0x229   : > { %v12987_v20 = vpop.permute.xlu1 %1242 }
 0x22b   : > { %v13001_v28 = vpop.permute.xlu0 %1250 }
 0x22c   : > { %v1256_v59 = vrot.slane %v13001_v28, %v12875_v37 }
 0x22d   : > { %v13012_v55 = vpop.permute.xlu1 %1258 }
 0x22f   : > { %v13014_v25 = vpop.permute.xlu0 %1667 }
 0x230   : > { %v1756_v11 = vrot.slane %v13014_v25, %v12875_v37  ;;  %v1760_v32 = vrot.slane %v13014_v25, %v12882_v40  ;;  %v1764_v47 = vrot.slane %v13014_v25, %v12885_v41  ;;  %v1768_v49 = vrot.slane %v13014_v25, %v12888_v42 }
 0x231   : > { %v13023_v63 = vpop.permute.xlu1 %1671  ;;  %v1772_v27 = vrot.slane %v13014_v25, %v12891_v43  ;;  %v1776_v9 = vrot.slane %v13014_v25, %v12894_v44  ;;  %v1780_v10 = vrot.slane %v13014_v25, %v12897_v45  ;;  %v1784_v16 = vrot.slane %v13014_v25, %v12900_v46 }
 0x232   : > { %v2025_v48 = vadd.f32 %v1756_v11, %v1537_v50  ;;  %v2027_v31 = vadd.f32 %v1764_v47, %v1539_v54  ;;  %v2026_v38 = vadd.f32 %v1760_v32, %v1538_v5  ;;  %v2028_v13 = vadd.f32 %v1768_v49, %v1540_v61 }
 0x233   : > { %v13027_v22 = vpop.permute.xlu0 %1266  ;;  %v1545_v25 = vmul.f32 %v1208_v58, %v12913_v52  ;;  %v1232_v50 = vrot.slane %v12968_v29, %v12875_v37  ;;  %v13087_v54 = vcombine.low %v2243_v51, %v2257_v26  ;;  %v2029_v53 = vadd.f32 %v1772_v27, %v1541_v56 }
 0x234   : > { %v2031_v61 = vadd.f32 %v1780_v10, %v1543_v4  ;;  %v2030_v17 = vadd.f32 %v1776_v9, %v1542_v35  ;;  %v2032_v18 = vadd.f32 %v1784_v16, %v1544_v57  ;;  %v2089_v39 = vmax.f32 %v2025_v48, 0.0 }
 0x235   : > { %v13039_v30 = vpop.permute.xlu1 %1274  ;;  %v2091_v34 = vmax.f32 %v2027_v31, 0.0  ;;  %v2090_v11 = vmax.f32 %v2026_v38, 0.0  ;;  %v2092_v32 = vmax.f32 %v2028_v13, 0.0  ;;  %v1547_v47 = vmul.f32 %v1224_v14, %v12913_v52 }
 0x236   : > { %v2299_v49 = vcombine.low %v13058_v23, %v13073_v62  ;;  %v2300_v29 = vcombine.high %v13058_v23, %v13073_v62  ;;  %v2301_v51 = vcombine.low %v13076_v0, %v13079_v3  ;;  %v1548_v56 = vmul.f32 %v1232_v50, %v12913_v52 }
 0x237   : > { %v13055_v60 = vpop.permute.xlu0 %1282  ;;  %v1240_v35 = vrot.slane %v12974_v6, %v12875_v37  ;;  %v1248_v26 = vrot.slane %v12987_v20, %v12875_v37  ;;  %v2093_v33 = vmax.f32 %v2029_v53, 0.0  ;;  %v2095_v21 = vmax.f32 %v2031_v61, 0.0 }
 0x238   : > { %v2094_v57 = vmax.f32 %v2030_v17, 0.0  ;;  %v2096_v58 = vmax.f32 %v2032_v18, 0.0  ;;  %v1264_v23 = vrot.slane %v13012_v55, %v12875_v37  ;;  %v2333_v6 = vcombine.low %v2089_v39, %v2090_v11 }
 0x239   : > { %v13068_v12 = vpop.permute.xlu1 %1290  ;;  %v2334_v9 = vcombine.low %v2091_v34, %v2092_v32  ;;  %v1788_v20 = vrot.slane %v13023_v63, %v12875_v37  ;;  %v1792_v10 = vrot.slane %v13023_v63, %v12882_v40  ;;  %v1796_v16 = vrot.slane %v13023_v63, %v12885_v41 }
 0x23a   : > { %v1800_v48 = vrot.slane %v13023_v63, %v12888_v42  ;;  %v1804_v55 = vrot.slane %v13023_v63, %v12891_v43  ;;  %v1808_v31 = vrot.slane %v13023_v63, %v12894_v44  ;;  %v1812_v38 = vrot.slane %v13023_v63, %v12897_v45 }
 0x23b   : > { %v13085_v5 = vpop.permute.xlu0 %1298  ;;  %v1816_v13 = vrot.slane %v13023_v63, %v12900_v46  ;;  %v1549_v14 = vmul.f32 %v1240_v35, %v12913_v52  ;;  %v1550_v62 = vmul.f32 %v1248_v26, %v12913_v52  ;;  %v2335_v0 = vcombine.low %v2093_v33, %v2094_v57 }
 0x23c   : > { %v2336_v3 = vcombine.low %v2095_v21, %v2096_v58  ;;  %v1551_v50 = vmul.f32 %v1256_v59, %v12913_v52  ;;  %v1552_v53 = vmul.f32 %v1264_v23, %v12913_v52  ;;  %v2343_v17 = vrot.slane %v2333_v6, %v12776_v7 }
 0x23d   : > { %v13089_v19 = vpop.permute.xlu1 %1306  ;;  %v2350_v18 = vrot.slane %v2334_v9, %v12776_v7  ;;  %v2033_v39 = vadd.f32 %v1788_v20, %v1545_v25  ;;  %v2034_v34 = vadd.f32 %v1792_v10, %v1546_v15  ;;  %v2035_v11 = vadd.f32 %v1796_v16, %v1547_v47 }
 0x23e   : > { %v2036_v63 = vadd.f32 %v1800_v48, %v1548_v56  ;;  %v2037_v35 = vadd.f32 %v1804_v55, %v1549_v14  ;;  %v2038_v26 = vadd.f32 %v1808_v31, %v1550_v62  ;;  %v2039_v33 = vadd.f32 %v1812_v38, %v1551_v50 }
 0x23f   : > { %v13103_v4 = vpop.permute.xlu0 %1314  ;;  %v2040_v21 = vadd.f32 %v1816_v13, %v1552_v53  ;;  %v2309_v57 = vrot.slane %v2299_v49, %v12776_v7  ;;  %v2323_v58 = vrot.slane %v2301_v51, %v12776_v7  ;;  %v2357_v59 = vrot.slane %v2335_v0, %v12776_v7 }
 0x240   : > { %v2364_v23 = vrot.slane %v2336_v3, %v12776_v7  ;;  %v2316_v25 = vrot.slane %v2300_v29, %v12776_v7  ;;  %v2330_v15 = vrot.slane %v2302_v8, %v12776_v7  ;;  %v2365_v47 = vcombine.low %v2343_v17, %v2350_v18 }
 0x241   : > { %v13111_v27 = vpop.permute.xlu1 %1322  ;;  %v2366_v56 = vcombine.high %v2343_v17, %v2350_v18  ;;  %v2097_v9 = vmax.f32 %v2033_v39, 0.0  ;;  %v2098_v20 = vmax.f32 %v2034_v34, 0.0  ;;  %v2099_v10 = vmax.f32 %v2035_v11, 0.0 }
 0x242   : > { %v2100_v16 = vmax.f32 %v2036_v63, 0.0  ;;  %v2101_v49 = vmax.f32 %v2037_v35, 0.0  ;;  %v2102_v51 = vmax.f32 %v2038_v26, 0.0  ;;  %v2103_v55 = vmax.f32 %v2039_v33, 0.0 }
 0x243   : > { %v13121_v28 = vpop.permute.xlu0 %1330  ;;  %v2104_v31 = vmax.f32 %v2040_v21, 0.0  ;;  %v13153_v38 = vcombine.low %v13031_v24, %v13037_v36  ;;  %v13155_v13 = vcombine.low %v2309_v57, %v2323_v58  ;;  %v2367_v29 = vcombine.low %v2357_v59, %v2364_v23 }
 0x244   : > { %v2368_v8 = vcombine.high %v2357_v59, %v2364_v23  ;;  %v1272_v14 = vrot.slane %v13027_v22, %v12875_v37  ;;  %v1280_v62 = vrot.slane %v13039_v30, %v12875_v37  ;;  %v1288_v0 = vrot.slane %v13055_v60, %v12875_v37 }
 0x245   : > { %v13135_v61 = vpop.permute.xlu1 %1338  ;;  %v13165_v50 = vcombine.low %v2316_v25, %v2330_v15  ;;  %v1296_v24 = vrot.slane %v13068_v12, %v12875_v37  ;;  %v1304_v36 = vrot.slane %v13085_v5, %v12875_v37  ;;  %v2375_v53 = vrot.slane %v2365_v47, %v12776_v7 }
 0x246   : > { %v2382_v22 = vrot.slane %v2366_v56, %v12776_v7  ;;  %v2399_v30 = vcombine.low %v2097_v9, %v2098_v20  ;;  %v2400_v18 = vcombine.low %v2099_v10, %v2100_v16  ;;  %v2401_v39 = vcombine.low %v2101_v49, %v2102_v51 }
 0x247   : > { %v13139_v32 = vpop.permute.xlu0 %1346  ;;  %v2402_v60 = vcombine.low %v2103_v55, %v2104_v31  ;;  %v1312_v34 = vrot.slane %v13089_v19, %v12875_v37  ;;  %v1320_v11 = vrot.slane %v13103_v4, %v12875_v37  ;;  %v2389_v12 = vrot.slane %v2367_v29, %v12776_v7 }
 0x248   : > { %v2396_v5 = vrot.slane %v2368_v8, %v12776_v7  ;;  %v1553_v63 = vmul.f32 %v1272_v14, %v12913_v52  ;;  %v1328_v35 = vrot.slane %v13111_v27, %v12875_v37  ;;  %v1336_v26 = vrot.slane %v13121_v28, %v12875_v37 }
 0x249   : > { %v13145_v6 = vpop.permute.xlu1 %1354  ;;  %v1344_v33 = vrot.slane %v13135_v61, %v12875_v37  ;;  %v1554_v19 = vmul.f32 %v1280_v62, %v12913_v52  ;;  %v1555_v4 = vmul.f32 %v1288_v0, %v12913_v52  ;;  %v1556_v57 = vmul.f32 %v1296_v24, %v12913_v52 }
 0x24a   : > { %v1557_v58 = vmul.f32 %v1304_v36, %v12913_v52  ;;  %v2409_v23 = vrot.slane %v2399_v30, %v12776_v7  ;;  %v2416_v27 = vrot.slane %v2400_v18, %v12776_v7  ;;  %v13197_v28 = vrot.slane %v2401_v39, %v12776_v7 }
 0x24b   : > { %v13149_v48 = vpop.permute.xlu0 %1362  ;;  %v13200_v61 = vrot.slane %v2402_v60, %v12776_v7  ;;  %v1558_v25 = vmul.f32 %v1312_v34, %v12913_v52  ;;  %v1559_v15 = vmul.f32 %v1320_v11, %v12913_v52  ;;  %v13204_v47 = vcombine.low %v2375_v53, %v2389_v12 }
 0x24c   : > { %v13206_v56 = vcombine.low %v2382_v22, %v2396_v5  ;;  %v1560_v9 = vmul.f32 %v1328_v35, %v12913_v52  ;;  %v13210_v20 = vmul.f32 %v1336_v26, %v12913_v52  ;;  %v13213_v10 = vmul.f32 %v1344_v33, %v12913_v52 }
 0x24d   : > { %v13163_v3 = vpop.permute.xlu1 %1370  ;;  %v1352_v16 = vrot.slane %v13139_v32, %v12875_v37  ;;  %v1360_v8 = vrot.slane %v13145_v6, %v12875_v37  ;;  %v2431_v62 = vcombine.low %v2409_v23, %v2416_v27  ;;  %v2432_v0 = vcombine.high %v2409_v23, %v2416_v27 }
 0x24e   : > { %v2433_v32 = vcombine.low %v13197_v28, %v13200_v61  ;;  %v1368_v6 = vrot.slane %v13149_v48, %v12875_v37  ;;  %v1376_v18 = vrot.slane %v13163_v3, %v12875_v37  ;;  %v2434_v60 = vcombine.high %v13197_v28, %v13200_v61 }
 0x24f   : > { %v13173_v17 = vpop.permute.xlu0 %1378  ;;  %v1563_v30 = vmul.f32 %v1352_v16, %v12913_v52  ;;  %v1564_v35 = vmul.f32 %v1360_v8, %v12913_v52  ;;  %v13246_v33 = vrot.slane %v2431_v62, %v12776_v7  ;;  %v13249_v48 = vrot.slane %v2432_v0, %v12776_v7 }
 0x250   : > { %v13252_v3 = vrot.slane %v2433_v32, %v12776_v7 }
 0x251   : > { %v13188_v21 = vpop.permute.xlu1 %1386 }
 0x252   : > { %v1392_v28 = vrot.slane %v13188_v21, %v12875_v37 }
 0x253   : > { %v1676_v59 = vpop.permute.xlu0 %1675 }
 0x254   : > { %v1820_v51 = vrot.slane %v1676_v59, %v12875_v37  ;;  %v1824_v55 = vrot.slane %v1676_v59, %v12882_v40  ;;  %v1828_v31 = vrot.slane %v1676_v59, %v12885_v41  ;;  %v1832_v29 = vrot.slane %v1676_v59, %v12888_v42 }
 0x255   : > { %v13217_v49 = vpop.permute.xlu1 %1679  ;;  %v1836_v24 = vrot.slane %v1676_v59, %v12891_v43  ;;  %v1840_v36 = vrot.slane %v1676_v59, %v12894_v44  ;;  %v1844_v53 = vrot.slane %v1676_v59, %v12897_v45  ;;  %v1848_v22 = vrot.slane %v1676_v59, %v12900_v46 }
 0x256   : > { %v2041_v34 = vadd.f32 %v1820_v51, %v1553_v63  ;;  %v2043_v11 = vadd.f32 %v1828_v31, %v1555_v4  ;;  %v2042_v12 = vadd.f32 %v1824_v55, %v1554_v19  ;;  %v2044_v5 = vadd.f32 %v1832_v29, %v1556_v57 }
 0x257   : > { %v13225_v14 = vpop.permute.xlu0 %1394  ;;  %v2045_v59 = vadd.f32 %v1836_v24, %v1557_v58  ;;  %v2047_v23 = vadd.f32 %v1844_v53, %v1559_v15  ;;  %v2046_v27 = vadd.f32 %v1840_v36, %v1558_v25  ;;  %v2048_v63 = vadd.f32 %v1848_v22, %v1560_v9 }
 0x258   : > { %v1565_v19 = vmul.f32 %v1368_v6, %v12913_v52  ;;  %v1566_v4 = vmul.f32 %v1376_v18, %v12913_v52  ;;  %v1384_v57 = vrot.slane %v13173_v17, %v12875_v37  ;;  %v2105_v16 = vmax.f32 %v2041_v34, 0.0 }
 0x259   : > { %v13238_v39 = vpop.permute.xlu1 %1402  ;;  %v2107_v51 = vmax.f32 %v2043_v11, 0.0  ;;  %v2106_v55 = vmax.f32 %v2042_v12, 0.0  ;;  %v2108_v31 = vmax.f32 %v2044_v5, 0.0  ;;  %v1852_v25 = vrot.slane %v13217_v49, %v12875_v37 }
 0x25a   : > { %v1856_v15 = vrot.slane %v13217_v49, %v12882_v40  ;;  %v1860_v17 = vrot.slane %v13217_v49, %v12885_v41  ;;  %v1864_v21 = vrot.slane %v13217_v49, %v12888_v42  ;;  %v2109_v9 = vmax.f32 %v2045_v59, 0.0 }
 0x25b   : > { %v13243_v26 = vpop.permute.xlu0 %1410  ;;  %v2111_v29 = vmax.f32 %v2047_v23, 0.0  ;;  %v2110_v8 = vmax.f32 %v2046_v27, 0.0  ;;  %v2112_v62 = vmax.f32 %v2048_v63, 0.0  ;;  %v1868_v32 = vrot.slane %v13217_v49, %v12891_v43 }
 0x25c   : > { %v1872_v24 = vrot.slane %v13217_v49, %v12894_v44  ;;  %v1876_v36 = vrot.slane %v13217_v49, %v12897_v45  ;;  %v1880_v53 = vrot.slane %v13217_v49, %v12900_v46  ;;  %v1567_v22 = vmul.f32 %v1384_v57, %v12913_v52 }
 0x25d   : > { %v13260_v61 = vpop.permute.xlu1 %1418  ;;  %v1568_v6 = vmul.f32 %v1392_v28, %v12913_v52  ;;  %v2465_v18 = vcombine.low %v2105_v16, %v2106_v55  ;;  %v2466_v34 = vcombine.low %v2107_v51, %v2108_v31  ;;  %v2049_v12 = vadd.f32 %v1852_v25, %v13210_v20 }
 0x25e   : > { %v2050_v5 = vadd.f32 %v1856_v15, %v13213_v10  ;;  %v2051_v59 = vadd.f32 %v1860_v17, %v1563_v30  ;;  %v2052_v23 = vadd.f32 %v1864_v21, %v1564_v35  ;;  %v1400_v27 = vrot.slane %v13225_v14, %v12875_v37 }
 0x25f   : > { %v13262_v58 = vpop.permute.xlu0 %1426  ;;  %v2462_v63 = vrot.slane %v2434_v60, %v12776_v7  ;;  %v2467_v49 = vcombine.low %v2109_v9, %v2110_v8  ;;  %v2468_v1 = vcombine.low %v2111_v29, %v2112_v62  ;;  %v2053_v28 = vadd.f32 %v1868_v32, %v1565_v19 }
 0x260   : > { %v2054_v16 = vadd.f32 %v1872_v24, %v1566_v4  ;;  %v2055_v51 = vadd.f32 %v1876_v36, %v1567_v22  ;;  %v2056_v55 = vadd.f32 %v1880_v53, %v1568_v6  ;;  %v2475_v31 = vrot.slane %v2465_v18, %v12776_v7 }
 0x261   : > { %v13272_v0 = vpop.permute.xlu1 %1434  ;;  %v2482_v20 = vrot.slane %v2466_v34, %v12776_v7  ;;  %v2113_v10 = vmax.f32 %v2049_v12, 0.0  ;;  %v2114_v30 = vmax.f32 %v2050_v5, 0.0  ;;  %v2115_v25 = vmax.f32 %v2051_v59, 0.0 }
 0x262   : > { %v2116_v14 = vmax.f32 %v2052_v23, 0.0  ;;  %v2117_v15 = vmax.f32 %v2053_v28, 0.0  ;;  %v2118_v60 = vmax.f32 %v2054_v16, 0.0  ;;  %v2489_v17 = vrot.slane %v2467_v49, %v12776_v7 }
 0x263   : > { %v13284_v11 = vpop.permute.xlu0 %1442  ;;  %v2496_v21 = vrot.slane %v2468_v1, %v12776_v7  ;;  %v2119_v19 = vmax.f32 %v2055_v51, 0.0  ;;  %v2120_v4 = vmax.f32 %v2056_v55, 0.0  ;;  %v1408_v9 = vrot.slane %v13238_v39, %v12875_v37 }
 0x264   : > { %v2531_v8 = vcombine.low %v2113_v10, %v2114_v30  ;;  %v2532_v62 = vcombine.low %v2115_v25, %v2116_v14  ;;  %v2533_v32 = vcombine.low %v2117_v15, %v2118_v60  ;;  %v1416_v24 = vrot.slane %v13243_v26, %v12875_v37 }
 0x265   : > { %v13291_v57 = vpop.permute.xlu1 %1450  ;;  %v1424_v36 = vrot.slane %v13260_v61, %v12875_v37  ;;  %v2497_v53 = vcombine.low %v2475_v31, %v2482_v20  ;;  %v2534_v22 = vcombine.low %v2119_v19, %v2120_v4  ;;  %v2498_v18 = vcombine.high %v2475_v31, %v2482_v20 }
 0x266   : > { %v2541_v1 = vrot.slane %v2531_v8, %v12776_v7  ;;  %v2548_v34 = vrot.slane %v2532_v62, %v12776_v7  ;;  %v2555_v39 = vrot.slane %v2533_v32, %v12776_v7  ;;  %v1432_v12 = vrot.slane %v13262_v58, %v12875_v37 }
 0x267   : > { %v13295_v35 = vpop.permute.xlu0 %1458  ;;  %v2499_v5 = vcombine.low %v2489_v17, %v2496_v21  ;;  %v2500_v59 = vcombine.high %v2489_v17, %v2496_v21  ;;  %v2562_v26 = vrot.slane %v2534_v22, %v12776_v7  ;;  %v1569_v23 = vmul.f32 %v1400_v27, %v12913_v52 }
 0x268   : > { %v1570_v61 = vmul.f32 %v1408_v9, %v12913_v52  ;;  %v13315_v28 = vcombine.low %v13246_v33, %v13252_v3  ;;  %v13318_v16 = vcombine.low %v13249_v48, %v2462_v63  ;;  %v1571_v51 = vmul.f32 %v1416_v24, %v12913_v52 }
 0x269   : > { %v1467_v29 = vpop.permute.xlu1 %1466  ;;  %v1572_v58 = vmul.f32 %v1424_v36, %v12913_v52  ;;  %v2507_v55 = vrot.slane %v2497_v53, %v12776_v7  ;;  %v2563_v31 = vcombine.low %v2541_v1, %v2548_v34  ;;  %v2514_v27 = vrot.slane %v2498_v18, %v12776_v7 }
 0x26a   : > { %v2564_v10 = vcombine.high %v2541_v1, %v2548_v34  ;;  %v2565_v30 = vcombine.low %v2555_v39, %v2562_v26  ;;  %v2566_v25 = vcombine.high %v2555_v39, %v2562_v26  ;;  %v1573_v14 = vmul.f32 %v1432_v12, %v12913_v52 }
 0x26b   : > { %v1475_v6 = vpop.permute.xlu0 %1474  ;;  %v1440_v33 = vrot.slane %v13272_v0, %v12875_v37  ;;  %v2521_v48 = vrot.slane %v2499_v5, %v12776_v7  ;;  %v2528_v3 = vrot.slane %v2500_v59, %v12776_v7  ;;  %v1448_v63 = vrot.slane %v13284_v11, %v12875_v37 }
 0x26c   : > { %v1456_v15 = vrot.slane %v13291_v57, %v12875_v37  ;;  %v1464_v60 = vrot.slane %v13295_v35, %v12875_v37  ;;  %v1472_v17 = vrot.slane %v1467_v29, %v12875_v37  ;;  %v1480_v19 = vrot.slane %v1475_v6, %v12875_v37 }
 0x26d   : > { %v1483_v49 = vpop.permute.xlu1 %1482  ;;  %v2573_v9 = vrot.slane %v2563_v31, %v12776_v7  ;;  %v2580_v62 = vrot.slane %v2564_v10, %v12776_v7  ;;  %v2587_v57 = vrot.slane %v2565_v30, %v12776_v7  ;;  %v2594_v35 = vrot.slane %v2566_v25, %v12776_v7 }
 0x26e   : > { %v1488_v0 = vrot.slane %v1483_v49, %v12875_v37  ;;  %v1574_v29 = vmul.f32 %v1440_v33, %v12913_v52  ;;  %v13346_v24 = vcombine.low %v2507_v55, %v2521_v48  ;;  %v13348_v36 = vcombine.low %v2514_v27, %v2528_v3 }
 0x26f   : > { %v1491_v20 = vpop.permute.xlu0 %1490  ;;  %v1575_v53 = vmul.f32 %v1448_v63, %v12913_v52  ;;  %v1576_v22 = vmul.f32 %v1456_v15, %v12913_v52  ;;  %v13353_v6 = vmul.f32 %v1464_v60, %v12913_v52  ;;  %v13356_v18 = vmul.f32 %v1472_v17, %v12913_v52 }
 0x270   : > { %v1496_v4 = vrot.slane %v1491_v20, %v12875_v37  ;;  %v13359_v34 = vmul.f32 %v1480_v19, %v12913_v52  ;;  %v13362_v39 = vmul.f32 %v1488_v0, %v12913_v52  ;;  %v13374_v55 = vcombine.low %v2573_v9, %v2587_v57 }
 0x271   : > { %v1499_v21 = vpop.permute.xlu1 %1498  ;;  %v13376_v31 = vcombine.low %v2580_v62, %v2594_v35 }
 0x272   : > { %v1504_v8 = vrot.slane %v1499_v21, %v12875_v37  ;;  %v13365_v12 = vmul.f32 %v1496_v4, %v12913_v52 }
 0x273   : > { %v1507_v11 = vpop.permute.xlu0 %1506 }
 0x274   : > { %v1512_v32 = vrot.slane %v1507_v11, %v12875_v37  ;;  %v13369_v59 = vmul.f32 %v1504_v8, %v12913_v52 }
 0x275   : > { %v1515_v1 = vpop.permute.xlu1 %1514 }
 0x276   : > { %v1520_v5 = vrot.slane %v1515_v1, %v12875_v37  ;;  %v13372_v26 = vmul.f32 %v1512_v32, %v12913_v52 }
 0x277   : > { %v1684_v49 = vpop.permute.xlu0 %1683 }
 0x278   : > { %v13379_v20 = vmul.f32 %v1520_v5, %v12913_v52  ;;  %v1884_v27 = vrot.slane %v1684_v49, %v12875_v37  ;;  %v1888_v10 = vrot.slane %v1684_v49, %v12882_v40  ;;  %v1892_v30 = vrot.slane %v1684_v49, %v12885_v41 }
 0x279   : > { %v13384_v25 = vpop.permute.xlu1 %1687  ;;  %v1896_v33 = vrot.slane %v1684_v49, %v12888_v42  ;;  %v1900_v48 = vrot.slane %v1684_v49, %v12891_v43  ;;  %v1904_v3 = vrot.slane %v1684_v49, %v12894_v44  ;;  %v1908_v63 = vrot.slane %v1684_v49, %v12897_v45 }
 0x27a   : > { %v1912_v15 = vrot.slane %v1684_v49, %v12900_v46  ;;  %v2057_v52 = vadd.f32 %v1884_v27, %v1569_v23  ;;  %v2059_v60 = vadd.f32 %v1892_v30, %v1571_v51  ;;  %v2058_v17 = vadd.f32 %v1888_v10, %v1570_v61 }
 0x27b   : > { %v2804_v21 = vpop.permute.xlu0 %2803  ;;  %v2061_v19 = vadd.f32 %v1900_v48, %v1573_v14  ;;  %v2063_v0 = vadd.f32 %v1908_v63, %v1575_v53  ;;  %v2060_v4 = vadd.f32 %v1896_v33, %v1572_v58  ;;  %v2062_v9 = vadd.f32 %v1904_v3, %v1574_v29 }
 0x27c   : > { %v13392_v8 = vadd.f32 %v2804_v21, %v13087_v54  ;;  %v13395_v11 = vadd.f32 %v2804_v21, %v13153_v38  ;;  %v2121_v62 = vmax.f32 %v2057_v52, 0.0  ;;  %v2123_v57 = vmax.f32 %v2059_v60, 0.0 }
 0x27d   : > { %v2809_v35 = vpop.permute.xlu1 %2808  ;;  %v2125_v32 = vmax.f32 %v2061_v19, 0.0  ;;  %v2127_v1 = vmax.f32 %v2063_v0, 0.0  ;;  %v2064_v5 = vadd.f32 %v1912_v15, %v1576_v22  ;;  %v2122_v23 = vmax.f32 %v2058_v17, 0.0 }
 0x27e   : > { %v13398_v61 = vadd.f32 %v2809_v35, %v13155_v13  ;;  %v13401_v51 = vadd.f32 %v2809_v35, %v13165_v50  ;;  %v13405_v58 = vpack.i.bf16 %v13395_v11, %v13392_v8  ;;  %v2124_v14 = vmax.f32 %v2060_v4, 0.0 }
 0x27f   : > { %v2814_v29 = vpop.permute.xlu0 %2813  ;;  %v2126_v53 = vmax.f32 %v2062_v9, 0.0  ;;  %v2128_v49 = vmax.f32 %v2064_v5, 0.0  ;;  %v2597_v27 = vcombine.low %v2121_v62, %v2122_v23  ;;  %v1916_v10 = vrot.slane %v13384_v25, %v12875_v37 }
 0x280   : > { %v13410_v22 = vadd.f32 %v2814_v29, %v13204_v47  ;;  %v13413_v30 = vadd.f32 %v2814_v29, %v13206_v56  ;;  %10894 = vrot.lane.b32.xlu0 %v13405_v58, %s12276_s30  ;;  %v13419_v33 = vpack.i.bf16 %v13401_v51, %v13398_v61  ;;  %v2598_v48 = vcombine.low %v2123_v57, %v2124_v14 }
 0x281   : > { %v2819_v3 = vpop.permute.xlu1 %2818  ;;  %v2599_v63 = vcombine.low %v2125_v32, %v2126_v53  ;;  %v2600_v15 = vcombine.low %v2127_v1, %v2128_v49  ;;  %v2607_v52 = vrot.slane %v2597_v27, %v12776_v7  ;;  %v1920_v60 = vrot.slane %v13384_v25, %v12882_v40 }
 0x282   : > { %v13425_v17 = vadd.f32 %v2819_v3, %v13315_v28  ;;  %v13428_v21 = vadd.f32 %v2819_v3, %v13318_v16  ;;  %10899 = vrot.lane.b32.xlu1 %v13419_v33, %s12276_s30  ;;  %v13434_v19 = vpack.i.bf16 %v13413_v30, %v13410_v22  ;;  %v2614_v0 = vrot.slane %v2598_v48, %v12776_v7 }
 0x283   : > { %v2824_v4 = vpop.permute.xlu0 %2823  ;;  %v2621_v9 = vrot.slane %v2599_v63, %v12776_v7  ;;  %v2628_v40 = vrot.slane %v2600_v15, %v12776_v7  ;;  %v1924_v62 = vrot.slane %v13384_v25, %v12885_v41  ;;  %v1928_v57 = vrot.slane %v13384_v25, %v12888_v42 }
 0x284   : > { %v13444_v35 = vadd.f32 %v2824_v4, %v13346_v24  ;;  %v13447_v32 = vadd.f32 %v2824_v4, %v13348_v36  ;;  %10904 = vrot.lane.b32.xlu0 %v13434_v19, %s12276_s30  ;;  %v13453_v1 = vpack.i.bf16 %v13428_v21, %v13425_v17  ;;  %v2629_v5 = vcombine.low %v2607_v52, %v2614_v0 }
 0x285   : > { %v2829_v23 = vpop.permute.xlu1 %2828  ;;  %v2630_v14 = vcombine.high %v2607_v52, %v2614_v0  ;;  %v2631_v41 = vcombine.low %v2621_v9, %v2628_v40  ;;  %v2632_v29 = vcombine.high %v2621_v9, %v2628_v40  ;;  %v1932_v42 = vrot.slane %v13384_v25, %v12891_v43 }
 0x286   : > { %v13458_v53 = vadd.f32 %v2829_v23, %v13374_v55  ;;  %v13461_v49 = vadd.f32 %v2829_v23, %v13376_v31  ;;  %10909 = vrot.lane.b32.xlu1 %v13453_v1, %s12276_s30  ;;  %v2639_v27 = vrot.slane %v2629_v5, %v12776_v7  ;;  %v13468_v48 = vpack.i.bf16 %v13447_v32, %v13444_v35 }
 0x287   : > { %v2646_v3 = vrot.slane %v2630_v14, %v12776_v7  ;;  %v2653_v63 = vrot.slane %v2631_v41, %v12776_v7  ;;  %v2660_v43 = vrot.slane %v2632_v29, %v12776_v7  ;;  %v1936_v15 = vrot.slane %v13384_v25, %v12894_v44  ;;  %v2834_v52 = vpop.permute.xlu0 %2833 }
 0x288   : > { %10914 = vrot.lane.b32.xlu0 %v13468_v48, %s12276_s30  ;;  %v1940_v0 = vrot.slane %v13384_v25, %v12897_v45  ;;  %v1944_v4 = vrot.slane %v13384_v25, %v12900_v46  ;;  %v2065_v9 = vadd.f32 %v1916_v10, %v13353_v6  ;;  %v2066_v40 = vadd.f32 %v1920_v60, %v13356_v18 }
 0x289   : > { %v13483_v5 = vcombine.low %v2639_v27, %v2653_v63  ;;  %v13485_v23 = vcombine.low %v2646_v3, %v2660_v43  ;;  %v2067_v44 = vadd.f32 %v1924_v62, %v13359_v34  ;;  %v2068_v14 = vadd.f32 %v1928_v57, %v13362_v39 }
 0x28a   : > { %v2069_v41 = vadd.f32 %v1932_v42, %v13365_v12  ;;  %v2070_v29 = vadd.f32 %v1936_v15, %v13369_v59  ;;  %v2071_v45 = vadd.f32 %v1940_v0, %v13372_v26  ;;  %v2072_v46 = vadd.f32 %v1944_v4, %v13379_v20 }
 0x28b   : > { %v13494_v6 = vadd.f32 %v2834_v52, %v13483_v5  ;;  %v13497_v18 = vadd.f32 %v2834_v52, %v13485_v23  ;;  %v2129_v25 = vmax.f32 %v2065_v9, 0.0  ;;  %v2130_v10 = vmax.f32 %v2066_v40, 0.0 }
 0x28c   : > { %v2131_v60 = vmax.f32 %v2067_v44, 0.0  ;;  %v2132_v34 = vmax.f32 %v2068_v14, 0.0  ;;  %v2133_v62 = vmax.f32 %v2069_v41, 0.0  ;;  %v2134_v39 = vmax.f32 %v2070_v29, 0.0 }
 0x28d   : > { %v2135_v57 = vmax.f32 %v2071_v45, 0.0  ;;  %v2136_v12 = vmax.f32 %v2072_v46, 0.0  ;;  %v2663_v42 = vcombine.low %v2129_v25, %v2130_v10  ;;  %v10918_v59 = vpack.i.bf16 %v13461_v49, %v13458_v53 }
 0x28e   : > { %v2664_v26 = vcombine.low %v2131_v60, %v2132_v34  ;;  %v2665_v20 = vcombine.low %v2133_v62, %v2134_v39  ;;  %v10923_v27 = vpack.i.bf16 %v13497_v18, %v13494_v6  ;;  %v10119_v9 = vpack.c.bf16 %v13401_v51, %v13395_v11  ;;  %v2839_v62 = vpop.permute.xlu1 %2838 }
 0x28f   : > { %v2666_v3 = vcombine.low %v2135_v57, %v2136_v12  ;;  %v2673_v63 = vrot.slane %v2663_v42, %v12776_v7  ;;  %10919 = vrot.lane.b32.xlu1 %v10918_v59, %s12276_s30  ;;  %v10121_v40 = vpack.c.bf16 %v13398_v61, %v13392_v8  ;;  %v10123_v41 = vpack.c.bf16 %v13428_v21, %v13413_v30  ;;  %v6200_v30 = vld [vmem:[#allocation13 + $0x348] sm:$0xff] }
 0x290   : > { %v2680_v43 = vrot.slane %v2664_v26, %v12776_v7  ;;  %v2687_v15 = vrot.slane %v2665_v20, %v12776_v7  ;;  %10924 = vrot.lane.b32.xlu0 %v10923_v27, %s12276_s30  ;;  %v10125_v29 = vpack.c.bf16 %v13425_v17, %v13410_v22  ;;  %v10127_v25 = vpack.c.bf16 %v13461_v49, %v13447_v32 }
 0x291   : > { %v2694_v52 = vrot.slane %v2666_v3, %v12776_v7  ;;  %v10129_v10 = vpack.c.bf16 %v13458_v53, %v13444_v35  ;;  %v3037_v3 = vld [vmem:[#allocation14 + $0x10] sm:$0xff] }
 0x292   : > { %v2695_v0 = vcombine.low %v2673_v63, %v2680_v43  ;;  %v2696_v4 = vcombine.high %v2673_v63, %v2680_v43  ;;  %v3043_v63 = vld [vmem:[#allocation14 + $0x40] sm:$0xff]  ;;  %v3036_v43 = vld [vmem:[#allocation14 + $0x8] sm:$0xff] }
 0x293   : > { %v2697_v44 = vcombine.low %v2687_v15, %v2694_v52  ;;  %v2698_v14 = vcombine.high %v2687_v15, %v2694_v52  ;;  %v3038_v15 = vld [vmem:[#allocation14 + $0x18] sm:$0xff]  ;;  %v3044_v52 = vld [vmem:[#allocation14 + $0x48] sm:$0xff] }
 0x294   : > { %v2705_v45 = vrot.slane %v2695_v0, %v12776_v7  ;;  %v2712_v46 = vrot.slane %v2696_v4, %v12776_v7  ;;  %10934 = vrot.lane.b32.xlu0 %v13405_v58, %s12277_s22  ;;  %v3004_v0 = vld [vmem:[#allocation13 + $0x8] sm:$0xff]  ;;  %v3049_v4 = vld [vmem:[#allocation14 + $0x70] sm:$0xff] }
 0x295   : > { %v2719_v60 = vrot.slane %v2697_v44, %v12776_v7  ;;  %v2726_v34 = vrot.slane %v2698_v14, %v12776_v7  ;;  %9770 = vmatprep.mubr.msk.f32.mxu0 %vm3131_vm0, %v3004_v0  ;;  %v3046_v44 = vld [vmem:[#allocation14 + $0x58] sm:$0xff] }
 0x296   : > { %v3042_v14 = vld [vmem:[#allocation14 + $0x38] sm:$0xff] }
 0x297   : > { %v13527_v39 = vcombine.low %v2705_v45, %v2719_v60  ;;  %v13529_v57 = vcombine.low %v2712_v46, %v2726_v34  ;;  %v3048_v45 = vld [vmem:[#allocation14 + $0x68] sm:$0xff]  ;;  %v3050_v46 = vld [vmem:[#allocation14 + $0x78] sm:$0xff] }
 0x298   : > { %10944 = vrot.lane.b32.xlu0 %v13434_v19, %s12277_s22  ;;  %v3035_v19 = vld [vmem:[#allocation14] sm:$0xff]  ;;  %v3454_v60 = vld [vmem:[#allocation17 + $0x8] sm:$0xff]  ;;  %v3456_v34 = vld [vmem:[#allocation17 + $0x18] sm:$0xff] }
 0x299   : > { %v13534_v58 = vadd.f32 %v2839_v62, %v13527_v39  ;;  %v13537_v12 = vadd.f32 %v2839_v62, %v13529_v57 }
 0x29b   : > { %v10928_v42 = vpack.i.bf16 %v13537_v12, %v13534_v58  ;;  %v10131_v26 = vpack.c.bf16 %v13537_v12, %v13497_v18  ;;  %v10133_v20 = vpack.c.bf16 %v13534_v58, %v13494_v6 }
 0x29c   : > { %10954 = vrot.lane.b32.xlu0 %v13468_v48, %s12277_s22  ;;  %v3039_v48 = vld [vmem:[#allocation14 + $0x20] sm:$0xff] }
 0x29d   : > { %10929 = vrot.lane.b32.xlu1 %v10928_v42, %s12276_s30 }
 0x2a0   : > { %10964 = vrot.lane.b32.xlu0 %v10923_v27, %s12277_s22  ;;  %v3045_v27 = vld [vmem:[#allocation14 + $0x50] sm:$0xff] }
 0x2a1   : > { %10939 = vrot.lane.b32.xlu1 %v13419_v33, %s12277_s22  ;;  %v3041_v33 = vld [vmem:[#allocation14 + $0x30] sm:$0xff] }
 0x2a4   : > { %3053 = vperm.xlu0 %10891, %v3035_v19  }
 0x2a5   : > { %10949 = vrot.lane.b32.xlu1 %v13453_v1, %s12277_s22  ;;  %v3047_v1 = vld [vmem:[#allocation14 + $0x60] sm:$0xff] }
 0x2a8   : > { %3063 = vperm.xlu0 %10891, %v3037_v3  }
 0x2a9   : > { %10959 = vrot.lane.b32.xlu1 %v10918_v59, %s12277_s22  ;;  %v3040_v59 = vld [vmem:[#allocation14 + $0x28] sm:$0xff] }
 0x2ac   : > { %3093 = vperm.xlu0 %10891, %v3043_v63  }
 0x2ad   : > { %10969 = vrot.lane.b32.xlu1 %v10928_v42, %s12277_s22 }
 0x2b0   : > { %3073 = vperm.xlu0 %10891, %v3039_v48  }
 0x2b1   : > { %3058 = vperm.xlu1 %10892, %v3036_v43  }
 0x2b4   : > { %3103 = vperm.xlu0 %10891, %v3045_v27  }
 0x2b5   : > { %3068 = vperm.xlu1 %10892, %v3038_v15  }
 0x2b8   : > { %3083 = vperm.xlu0 %10891, %v3041_v33  }
 0x2b9   : > { %3098 = vperm.xlu1 %10892, %v3044_v52  }
 0x2bc   : > { %3113 = vperm.xlu0 %10891, %v3047_v1  }
 0x2bd   : > { %3078 = vperm.xlu1 %10892, %v3040_v59  }
 0x2c0   : > { %3123 = vperm.xlu0 %10891, %v3049_v4  }
 0x2c1   : > { %3108 = vperm.xlu1 %10892, %v3046_v44  }
 0x2c5   : > { %3088 = vperm.xlu1 %10892, %v3042_v14  }
 0x2c9   : > { %3118 = vperm.xlu1 %10892, %v3048_v45  }
 0x2cd   : > { %3128 = vperm.xlu1 %10892, %v3050_v46  }
 0x2d1   : > { %3476 = vperm.xlu1 %10892, %v3454_v60  }
 0x2d5   : > { %3486 = vperm.xlu1 %10892, %v3456_v34  }
 0x2f2   : > { %v10895_v62 = vpop.permute.xlu0 %10894 }
 0x2f3   : > { %v10897_v42 = vunpack.i.h.bf16 %v10895_v62  ;;  %v10896_v19 = vunpack.i.l.bf16 %v10895_v62 }
 0x2f4   : > { %v10900_v3 = vpop.permute.xlu1 %10899 }
 0x2f5   : > { %v10902_v63 = vunpack.i.h.bf16 %v10900_v3  ;;  %v10901_v48 = vunpack.i.l.bf16 %v10900_v3  ;;  %v2906_v33 = vsel %vm2905_vm1, %v10896_v19, %v10897_v42 }
 0x2f6   : > { %v10905_v43 = vpop.permute.xlu0 %10904 }
 0x2f7   : > { %v10907_v27 = vunpack.i.h.bf16 %v10905_v43  ;;  %v10906_v15 = vunpack.i.l.bf16 %v10905_v43  ;;  %v2907_v52 = vsel %vm2905_vm1, %v10901_v48, %v10902_v63  ;;  %v10101_v14 = vpack.c.bf16 %v10901_v48, %v10896_v19 }
 0x2f8   : > { %v10910_v0 = vpop.permute.xlu1 %10909  ;;  %v10099_v1 = vpack.c.bf16 %v2907_v52, %v2906_v33 }
 0x2f9   : > { %v10912_v4 = vunpack.i.h.bf16 %v10910_v0  ;;  %v10911_v44 = vunpack.i.l.bf16 %v10910_v0  ;;  %v2908_v45 = vsel %vm2905_vm1, %v10906_v15, %v10907_v27 }
 0x2fa   : > { %10100 = vmatprep.subr.bf16.mxu0 %v10099_v1  ;;  %v10915_v62 = vpop.permute.xlu0 %10914 }
 0x2fb   : > { %10103 = vmatpush1.bf16.msk.msra.mxu0 %vm13559_vm3, %v10101_v14  ;;  %v2909_v46 = vsel %vm2905_vm1, %v10911_v44, %v10912_v4  ;;  %v10106_v34 = vpack.c.bf16 %v10911_v44, %v10906_v15  ;;  %v10917_v42 = vunpack.i.h.bf16 %v10915_v62  ;;  %v10916_v3 = vunpack.i.l.bf16 %v10915_v62 }
 0x2fc   : > { %v10104_v60 = vpack.c.bf16 %v2909_v46, %v2908_v45 }
 0x2fd   : > { %v2910_v48 = vsel %vm2905_vm1, %v10916_v3, %v10917_v42 }
 0x2fe   : > { %10105 = vmatprep.subr.bf16.mxu0 %v10104_v60 }
 0x2ff   : > { %10108 = vmatpush1.bf16.msk.msra.mxu0 %vm13559_vm3, %v10106_v34 }
 0x301   : > { %v10920_v63 = vpop.permute.xlu1 %10919 }
 0x302   : > { %v10922_v43 = vunpack.i.h.bf16 %v10920_v63  ;;  %v10921_v19 = vunpack.i.l.bf16 %v10920_v63  ;;  %v10925_v15 = vpop.permute.xlu0 %10924 }
 0x303   : > { %v10927_v0 = vunpack.i.h.bf16 %v10925_v15  ;;  %v10926_v1 = vunpack.i.l.bf16 %v10925_v15 }
 0x304   : > { %v2911_v33 = vsel %vm2905_vm1, %v10921_v19, %v10922_v43  ;;  %v10111_v27 = vpack.c.bf16 %v10921_v19, %v10916_v3 }
 0x305   : > { %v10109_v52 = vpack.c.bf16 %v2911_v33, %v2910_v48  ;;  %v2912_v45 = vsel %vm2905_vm1, %v10926_v1, %v10927_v0 }
 0x306   : > { %v10935_v42 = vpop.permute.xlu0 %10934 }
 0x307   : > { %10110 = vmatprep.subr.bf16.mxu0 %v10109_v52  ;;  %v10937_v8 = vunpack.i.h.bf16 %v10935_v42  ;;  %v10936_v61 = vunpack.i.l.bf16 %v10935_v42  ;;  %v3007_v42 = vld [vmem:[#allocation13 + $0x20] sm:$0xff] }
 0x308   : > { %10113 = vmatpush1.bf16.msk.msra.mxu0 %vm13559_vm3, %v10111_v27 }
 0x30a   : > { %v10945_v11 = vpop.permute.xlu0 %10944 }
 0x30b   : > { %v10947_v49 = vunpack.i.h.bf16 %v10945_v11  ;;  %v10946_v18 = vunpack.i.l.bf16 %v10945_v11  ;;  %v3009_v11 = vld [vmem:[#allocation13 + $0x30] sm:$0xff] }
 0x30d   : > { %v2973_v6 = vsel %vm2970_vm4, %v10946_v18, %v10947_v49  ;;  %v3021_v18 = vld [vmem:[#allocation13 + $0x90] sm:$0xff] }
 0x30e   : > { %v10955_v53 = vpop.permute.xlu0 %10954 }
 0x30f   : > { %v10930_v4 = vpop.permute.xlu1 %10929  ;;  %v10957_v63 = vunpack.i.h.bf16 %v10955_v53  ;;  %v10956_v43 = vunpack.i.l.bf16 %v10955_v53  ;;  %v3019_v53 = vld [vmem:[#allocation13 + $0x80] sm:$0xff] }
 0x310   : > { %v10932_v44 = vunpack.i.h.bf16 %v10930_v4  ;;  %v10931_v14 = vunpack.i.l.bf16 %v10930_v4 }
 0x311   : > { %v2975_v0 = vsel %vm2970_vm4, %v10956_v43, %v10957_v63  ;;  %v3032_v43 = vld [vmem:[#allocation13 + $0xe8] sm:$0xff] }
 0x312   : > { %v2913_v46 = vsel %vm2905_vm1, %v10931_v14, %v10932_v44  ;;  %v10116_v34 = vpack.c.bf16 %v10931_v14, %v10926_v1  ;;  %v10965_v58 = vpop.permute.xlu0 %10964 }
 0x313   : > { %v10114_v60 = vpack.c.bf16 %v2913_v46, %v2912_v45  ;;  %v10940_v62 = vpop.permute.xlu1 %10939  ;;  %v10967_v27 = vunpack.i.h.bf16 %v10965_v58  ;;  %v10966_v15 = vunpack.i.l.bf16 %v10965_v58  ;;  %v3003_v46 = vld [vmem:[#allocation13] sm:$0xff]  ;;  %v3034_v58 = vld [vmem:[#allocation13 + $0xf8] sm:$0xff] }
 0x314   : > { %v10942_v51 = vunpack.i.h.bf16 %v10940_v62 }
 0x315   : > { %10115 = vmatprep.subr.bf16.mxu0 %v10114_v60  ;;  %v2977_v14 = vsel %vm2970_vm4, %v10966_v15, %v10967_v27  ;;  %v3006_v60 = vld [vmem:[#allocation13 + $0x18] sm:$0xff]  ;;  %v3457_v15 = vld [vmem:[#allocation17 + $0x20] sm:$0xff] }
 0x316   : > { %10118 = vmatpush1.bf16.msk.msra.mxu0 %vm13559_vm3, %v10116_v34  ;;  %v10135_v17 = vpack.c.bf16 %v10942_v51, %v10937_v8  ;;  %v3005_v34 = vld [vmem:[#allocation13 + $0x10] sm:$0xff] }
 0x317   : > { %10120 = vmatprep.subr.bf16.mxu0 %v10119_v9  ;;  %v10950_v3 = vpop.permute.xlu1 %10949  ;;  %v10941_v9 = vunpack.i.l.bf16 %v10940_v62  ;;  %v3008_v62 = vld [vmem:[#allocation13 + $0x28] sm:$0xff] }
 0x318   : > { %v10952_v21 = vunpack.i.h.bf16 %v10950_v3  ;;  %v10951_v32 = vunpack.i.l.bf16 %v10950_v3  ;;  %v3010_v3 = vld [vmem:[#allocation13 + $0x38] sm:$0xff] }
 0x319   : > { %v2972_v35 = vsel %vm2970_vm4, %v10941_v9, %v10942_v51  ;;  %v3012_v51 = vld [vmem:[#allocation13 + $0x48] sm:$0xff]  ;;  %v3011_v9 = vld [vmem:[#allocation13 + $0x40] sm:$0xff] }
 0x31a   : > { %10122 = vmatpush1.bf16.msra.mxu0 %v10121_v40  ;;  %v2971_v40 = vsel %vm2970_vm4, %v10936_v61, %v10937_v8  ;;  %v2974_v12 = vsel %vm2970_vm4, %v10951_v32, %v10952_v21  ;;  %v3014_v8 = vld [vmem:[#allocation13 + $0x58] sm:$0xff]  ;;  %v3013_v61 = vld [vmem:[#allocation13 + $0x50] sm:$0xff] }
 0x31b   : > { %10124 = vmatprep.subr.bf16.mxu0 %v10123_v41  ;;  %v10960_v22 = vpop.permute.xlu1 %10959  ;;  %v10138_v41 = vpack.c.bf16 %v2972_v35, %v2971_v40  ;;  %v3017_v32 = vld [vmem:[#allocation13 + $0x70] sm:$0xff]  ;;  %v3020_v35 = vld [vmem:[#allocation13 + $0x88] sm:$0xff] }
 0x31c   : > { %v3024_v40 = vld [vmem:[#allocation13 + $0xa8] sm:$0xff] }
 0x31e   : > { %10126 = vmatpush1.bf16.msra.mxu0 %v10125_v29  ;;  %v10140_v29 = vpack.c.bf16 %v10952_v21, %v10947_v49  ;;  %v3018_v21 = vld [vmem:[#allocation13 + $0x78] sm:$0xff] }
 0x31f   : > { %10128 = vmatprep.subr.bf16.mxu0 %v10127_v25  ;;  %v10962_v25 = vunpack.i.h.bf16 %v10960_v22  ;;  %v3022_v49 = vld [vmem:[#allocation13 + $0x98] sm:$0xff] }
 0x321   : > { %v10145_v19 = vpack.c.bf16 %v10962_v25, %v10957_v63  ;;  %v3029_v63 = vld [vmem:[#allocation13 + $0xd0] sm:$0xff] }
 0x322   : > { %10130 = vmatpush1.bf16.msra.mxu0 %v10129_v10  ;;  %v10961_v10 = vunpack.i.l.bf16 %v10960_v22  ;;  %v3016_v22 = vld [vmem:[#allocation13 + $0x68] sm:$0xff] }
 0x323   : > { %10132 = vmatprep.subr.bf16.mxu0 %v10131_v26  ;;  %v10970_v26 = vpop.permute.xlu1 %10969 }
 0x324   : > { %v10972_v48 = vunpack.i.h.bf16 %v10970_v26  ;;  %v10971_v33 = vunpack.i.l.bf16 %v10970_v26  ;;  %v2976_v52 = vsel %vm2970_vm4, %v10961_v10, %v10962_v25  ;;  %v3025_v25 = vld [vmem:[#allocation13 + $0xb0] sm:$0xff]  ;;  %v3028_v10 = vld [vmem:[#allocation13 + $0xc8] sm:$0xff]  ;;  %v3030_v26 = vld [vmem:[#allocation13 + $0xd8] sm:$0xff] }
 0x325   : > { %v10148_v1 = vpack.c.bf16 %v2976_v52, %v2975_v0  ;;  %v11816_v52 = vld [vmem:[%s12744_s27 + $0x8] sm:$0xff]  ;;  %v3455_v0 = vld [vmem:[#allocation17 + $0x10] sm:$0xff] }
 0x326   : > { %10134 = vmatpush1.bf16.msra.mxu0 %v10133_v20  ;;  %v10143_v20 = vpack.c.bf16 %v2974_v12, %v2973_v6  ;;  %v10150_v4 = vpack.c.bf16 %v10972_v48, %v10967_v27  ;;  %v2978_v44 = vsel %vm2970_vm4, %v10971_v33, %v10972_v48  ;;  %v3027_v12 = vld [vmem:[#allocation13 + $0xc0] sm:$0xff]  ;;  %v12279_v48 = vmov 1  }
 0x327   : > { %10137 = vmatprep.subr.msk.bf16.mxu0 %vm13600_vm5, %v10135_v17  ;;  %v10153_v45 = vpack.c.bf16 %v2978_v44, %v2977_v14  ;;  %v3015_v17 = vld [vmem:[#allocation13 + $0x60] sm:$0xff]  ;;  %10973 = vset.pattern.permute.xlu0 %v12279_v48  ;;  %v3459_v44 = vld [vmem:[#allocation17 + $0x30] sm:$0xff]  ;;  %v11818_v14 = vld [vmem:[%s12744_s27 + $0x18] sm:$0xff] }
 0x328   : > { %v3031_v6 = vld [vmem:[#allocation13 + $0xe0] sm:$0xff]  ;;  %10975 = vset.pattern.permute.xlu1 %v12279_v48 }
 0x329   : > { %v11815_v33 = vld [vmem:[%s12744_s27] sm:$0xff]  ;;  %3875 = vperm.xlu1 %10975, %v11816_v52  }
 0x32a   : > { %10139 = vmatpush1.bf16.msra.mxu0 %v10138_v41  ;;  %v3023_v41 = vld [vmem:[#allocation13 + $0xa0] sm:$0xff]  ;;  %3871 = vperm.xlu0 %10973, %v11815_v33  }
 0x32b   : > { %10142 = vmatprep.subr.msk.bf16.mxu0 %vm13600_vm5, %v10140_v29  ;;  %v3026_v29 = vld [vmem:[#allocation13 + $0xb8] sm:$0xff]  ;;  %v3453_v27 = vld [vmem:[#allocation17] sm:$0xff] }
 0x32d   : > { %10976 = vset.pattern.permute.xlu1 %v15126_v2 }
 0x32e   : > { %10144 = vmatpush1.bf16.msra.mxu0 %v10143_v20  ;;  %v3033_v20 = vld [vmem:[#allocation13 + $0xf0] sm:$0xff]  ;;  %10974 = vset.pattern.permute.xlu0 %v15126_v2 }
 0x32f   : > { %10147 = vmatprep.subr.msk.bf16.mxu0 %vm13600_vm5, %v10145_v19  ;;  %v15128_v19 = vmov 0.0   ;;  %3471 = vperm.xlu0 %10974, %v3453_v27  }
 0x330   : > { %3661 = vmatprep.mubr.f32.mxu1 %v15128_v19  ;;  %3491 = vperm.xlu1 %10976, %v3457_v15  }
 0x332   : > { %10149 = vmatpush1.bf16.msra.mxu0 %v10148_v1  ;;  %v3458_v1 = vld [vmem:[#allocation17 + $0x28] sm:$0xff] }
 0x333   : > { %10152 = vmatprep.subr.msk.bf16.mxu0 %vm13600_vm5, %v10150_v4  ;;  %3481 = vperm.xlu0 %10974, %v3455_v0   ;;  %v11817_v4 = vld [vmem:[%s12744_s27 + $0x10] sm:$0xff] }
 0x334   : > { %10977 = vset.pattern.permute.xlu1 %v12279_v48 }
 0x335   : > { %3879 = vperm.xlu1 %10977, %v11817_v4  }
 0x336   : > { %10154 = vmatpush1.bf16.msra.mxu0 %v10153_v45 }
 0x337   : > { %3496 = vperm.xlu0 %10974, %v3458_v1  }
 0x339   : > { %3245 = vmatmul.mubr.f32.vlgmr.msra.gmra.mrb[0].mxu0 %v3003_v46  ;;  %3883 = vperm.xlu1 %10977, %v11818_v14  }
 0x33a   : > { %9771 = vmatprep.mubr.msk.f32.mxu0 %vm3131_vm0, %v3006_v60  ;;  %v3460_v60 = vld [vmem:[#allocation17 + $0x38] sm:$0xff] }
 0x33b   : > { %3501 = vperm.xlu0 %10974, %v3459_v44  }
 0x33d   : > { %3251 = vmatmul.mubr.f32.gmra.mrb[2].mxu0 %v3005_v34  ;;  %10978 = vset.pattern.permute.xlu1 %v15126_v2 }
 0x33e   : > { %9772 = vmatprep.mubr.msk.f32.mxu0 %vm3131_vm0, %v3008_v62  ;;  %3506 = vperm.xlu1 %10978, %v3460_v60  }
 0x33f   : > { %10979 = vset.pattern.permute.xlu0 %v12279_v48 }
 0x341   : > { %3257 = vmatmul.mubr.f32.gmra.mrb[4].mxu0 %v3007_v42  ;;  %v11819_v42 = vld [vmem:[%s12744_s27 + $0x20] sm:$0xff] }
 0x342   : > { %9773 = vmatprep.mubr.msk.f32.mxu0 %vm3131_vm0, %v3010_v3  ;;  %3887 = vperm.xlu0 %10979, %v11819_v42  }
 0x343   : > { %10980 = vset.pattern.permute.xlu1 %v12279_v48 }
 0x345   : > { %3263 = vmatmul.mubr.f32.gmra.mrb[6].mxu0 %v3009_v11 }
 0x346   : > { %9774 = vmatprep.mubr.msk.f32.mxu0 %vm3131_vm0, %v3012_v51  ;;  %v11820_v51 = vld [vmem:[%s12744_s27 + $0x28] sm:$0xff] }
 0x347   : > { %3891 = vperm.xlu1 %10980, %v11820_v51  }
 0x349   : > { %3269 = vmatmul.mubr.f32.gmra.mrb[8].mxu0 %v3011_v9  ;;  %v3054_v9 = vpop.permute.xlu0 %3053 }
 0x34a   : > { %9775 = vmatprep.mubr.msk.f32.mxu0 %vm3131_vm0, %v3014_v8  ;;  %v11821_v8 = vld [vmem:[%s12744_s27 + $0x38] sm:$0xff] }
 0x34b   : > { %3899 = vperm.xlu0 %10979, %v11821_v8  }
 0x34d   : > { %3275 = vmatmul.mubr.f32.gmra.mrb[10].mxu0 %v3013_v61 }
 0x34e   : > { %9776 = vmatprep.mubr.msk.f32.mxu0 %vm3131_vm0, %v3016_v22 }
 0x34f   : > { %11062 = vset.pattern.permute.xlu0 %v15126_v2 }
 0x351   : > { %3281 = vmatmul.mubr.f32.gmra.mrb[12].mxu0 %v3015_v17  ;;  %v11822_v17 = vld [vmem:[%s12744_s27 + $0x30] sm:$0xff] }
 0x352   : > { %9777 = vmatprep.mubr.msk.f32.mxu0 %vm3131_vm0, %v3018_v21  ;;  %3895 = vperm.xlu1 %10980, %v11822_v17   ;;  %v3059_v21 = vpop.permute.xlu1 %3058 }
 0x355   : > { %3287 = vmatmul.mubr.f32.gmra.mrb[14].mxu0 %v3017_v32  ;;  %v3064_v32 = vpop.permute.xlu0 %3063 }
 0x356   : > { %9778 = vmatprep.mubr.msk.f32.mxu0 %vm3131_vm0, %v3020_v35  ;;  %11061 = vset.pattern.permute.xlu1 %v15126_v2 }
 0x359   : > { %3293 = vmatmul.mubr.f32.gmra.mrb[16].mxu0 %v3019_v53 }
 0x35a   : > { %9779 = vmatprep.mubr.msk.f32.mxu0 %vm3131_vm0, %v3022_v49 }
 0x35d   : > { %3299 = vmatmul.mubr.f32.gmra.mrb[18].mxu0 %v3021_v18 }
 0x35e   : > { %9780 = vmatprep.mubr.msk.f32.mxu0 %vm3131_vm0, %v3024_v40  ;;  %v3069_v40 = vpop.permute.xlu1 %3068 }
 0x361   : > { %3305 = vmatmul.mubr.f32.gmra.mrb[20].mxu0 %v3023_v41 }
 0x362   : > { %9781 = vmatprep.mubr.msk.f32.mxu0 %vm3131_vm0, %v3026_v29  ;;  %v3099_v48 = vpop.permute.xlu1 %3098 }
 0x365   : > { %3311 = vmatmul.mubr.f32.gmra.mrb[22].mxu0 %v3025_v25  ;;  %v3094_v25 = vpop.permute.xlu0 %3093 }
 0x366   : > { %9782 = vmatprep.mubr.msk.f32.mxu0 %vm3131_vm0, %v3028_v10  ;;  %v3079_v60 = vpop.permute.xlu1 %3078 }
 0x369   : > { %3317 = vmatmul.mubr.f32.gmra.mrb[24].mxu0 %v3027_v12  ;;  %v3074_v15 = vpop.permute.xlu0 %3073 }
 0x36a   : > { %9783 = vmatprep.mubr.msk.f32.mxu0 %vm3131_vm0, %v3030_v26 }
 0x36d   : > { %3323 = vmatmul.mubr.f32.gmra.mrb[26].mxu0 %v3029_v63  ;;  %v3104_v51 = vpop.permute.xlu0 %3103 }
 0x36e   : > { %9784 = vmatprep.mubr.msk.f32.mxu0 %vm3131_vm0, %v3032_v43 }
 0x371   : > { %3329 = vmatmul.mubr.f32.gmra.mrb[28].mxu0 %v3031_v6 }
 0x372   : > { %9785 = vmatprep.mubr.msk.f32.mxu0 %vm3131_vm0, %v3034_v58 }
 0x375   : > { %3335 = vmatmul.mubr.f32.gmra.mrb[30].mxu0 %v3033_v20 }
 0x40c   : > { %v3246_v45 = vpop.f32.mrb[0].mxu0 }
 0x40d   : > { %v3248_v46 = vpop.f32.mrb[1].mxu0  ;;  %v3247_v49 = vadd.f32 %v3246_v45, %v3054_v9 }
 0x40e   : > { %v3249_v18 = vadd.f32 %v3248_v46, %v3054_v9 }
 0x40f   : > { %v3341_v10 = vmul.f32 0.5, %v3247_v49 }
 0x410   : > { %v3252_v34 = vpop.f32.mrb[2].mxu0  ;;  %v3342_v26 = vmul.f32 0.5, %v3249_v18 }
 0x411   : > { %v3254_v62 = vpop.f32.mrb[3].mxu0  ;;  %v3253_v12 = vadd.f32 %v3252_v34, %v3059_v21  ;;  %11431 = vtanh.f32 %v3341_v10 }
 0x412   : > { %v3255_v63 = vadd.f32 %v3254_v62, %v3059_v21  ;;  %11433 = vtanh.f32 %v3342_v26 }
 0x413   : > { %v3343_v33 = vmul.f32 0.5, %v3253_v12 }
 0x414   : > { %v3258_v3 = vpop.f32.mrb[4].mxu0  ;;  %v3344_v27 = vmul.f32 0.5, %v3255_v63  ;;  %v3084_v63 = vpop.permute.xlu0 %3083 }
 0x415   : > { %v3260_v11 = vpop.f32.mrb[5].mxu0  ;;  %v3259_v43 = vadd.f32 %v3258_v3, %v3064_v32  ;;  %11435 = vtanh.f32 %v3343_v33 }
 0x416   : > { %v3261_v58 = vadd.f32 %v3260_v11, %v3064_v32  ;;  %11437 = vtanh.f32 %v3344_v27 }
 0x417   : > { %v3345_v0 = vmul.f32 0.5, %v3259_v43 }
 0x418   : > { %v3264_v61 = vpop.f32.mrb[6].mxu0  ;;  %v3346_v4 = vmul.f32 0.5, %v3261_v58 }
 0x419   : > { %v3266_v22 = vpop.f32.mrb[7].mxu0  ;;  %v3265_v52 = vadd.f32 %v3264_v61, %v3069_v40  ;;  %11439 = vtanh.f32 %v3345_v0 }
 0x41a   : > { %v3267_v44 = vadd.f32 %v3266_v22, %v3069_v40  ;;  %11441 = vtanh.f32 %v3346_v4  ;;  %v3109_v40 = vpop.permute.xlu1 %3108 }
 0x41b   : > { %v3347_v45 = vmul.f32 0.5, %v3265_v52  ;;  %v11432_v22 = vpop.eup %11431 }
 0x41c   : > { %v3270_v35 = vpop.f32.mrb[8].mxu0  ;;  %v3348_v62 = vmul.f32 0.5, %v3267_v44  ;;  %v11434_v21 = vpop.eup %11433  ;;  %v3373_v12 = vadd.f32 1.0, %v11432_v22 }
 0x41d   : > { %v3272_v53 = vpop.f32.mrb[9].mxu0  ;;  %v3271_v46 = vadd.f32 %v3270_v35, %v3074_v15  ;;  %11443 = vtanh.f32 %v3347_v45 }
 0x41e   : > { %v3273_v42 = vadd.f32 %v3272_v53, %v3074_v15  ;;  %v3389_v44 = vmul.f32 0.5, %v3373_v12  ;;  %v3089_v45 = vpop.permute.xlu1 %3088 }
 0x41f   : > { %v3349_v9 = vmul.f32 0.5, %v3271_v46  ;;  %v11436_v26 = vpop.eup %11435 }
 0x420   : > { %v3276_v41 = vpop.f32.mrb[10].mxu0  ;;  %v3350_v32 = vmul.f32 0.5, %v3273_v42  ;;  %v11438_v43 = vpop.eup %11437  ;;  %v3375_v46 = vadd.f32 1.0, %v11436_v26 }
 0x421   : > { %v3278_v29 = vpop.f32.mrb[11].mxu0  ;;  %v3277_v8 = vadd.f32 %v3276_v41, %v3079_v60  ;;  %v3374_v41 = vadd.f32 1.0, %v11434_v21 }
 0x422   : > { %v3279_v35 = vadd.f32 %v3278_v29, %v3079_v60  ;;  %v3376_v60 = vadd.f32 1.0, %v11438_v43 }
 0x423   : > { %v3351_v53 = vmul.f32 0.5, %v3277_v8  ;;  %v11440_v29 = vpop.eup %11439 }
 0x424   : > { %v3282_v6 = vpop.f32.mrb[12].mxu0  ;;  %v3352_v58 = vmul.f32 0.5, %v3279_v35  ;;  %v11442_v4 = vpop.eup %11441  ;;  %v3377_v21 = vadd.f32 1.0, %v11440_v29 }
 0x425   : > { %v3284_v20 = vpop.f32.mrb[13].mxu0  ;;  %v3283_v33 = vadd.f32 %v3282_v6, %v3084_v63  ;;  %v3119_v29 = vpop.permute.xlu1 %3118 }
 0x426   : > { %v3285_v15 = vadd.f32 %v3284_v20, %v3084_v63 }
 0x428   : > { %v13652_v1 = vpop.f32.mrb[14].mxu0  ;;  %v3354_v20 = vmul.f32 0.5, %v3285_v15 }
 0x429   : > { %v13654_v14 = vpop.f32.mrb[15].mxu0  ;;  %v3289_v6 = vadd.f32 %v13652_v1, %v3089_v45 }
 0x42b   : > { %v3355_v1 = vmul.f32 0.5, %v3289_v6 }
 0x42c   : > { %v3294_v34 = vpop.f32.mrb[16].mxu0 }
 0x42d   : > { %v3295_v3 = vadd.f32 %v3294_v34, %v3094_v25  ;;  %v3296_v11 = vpop.f32.mrb[17].mxu0 }
 0x42e   : > { %v3297_v61 = vadd.f32 %v3296_v11, %v3094_v25 }
 0x42f   : > { %11445 = vtanh.f32 %v3295_v3  ;;  %v3353_v3 = vmul.f32 0.5, %v3283_v33  ;;  %v3393_v33 = vmul.f32 0.5, %v3377_v21 }
 0x430   : > { %11447 = vtanh.f32 %v3297_v61  ;;  %v3300_v17 = vpop.f32.mrb[18].mxu0 }
 0x431   : > { %11449 = vtanh.f32 %v3348_v62  ;;  %v3301_v49 = vadd.f32 %v3300_v17, %v3099_v48  ;;  %v3302_v18 = vpop.f32.mrb[19].mxu0  ;;  %v3390_v62 = vmul.f32 0.5, %v3374_v41  ;;  %v3392_v41 = vmul.f32 0.5, %v3376_v60 }
 0x432   : > { %11451 = vtanh.f32 %v3349_v9  ;;  %v3303_v10 = vadd.f32 %v3302_v18, %v3099_v48  ;;  %v11444_v48 = vpop.eup %11443  ;;  %v3391_v18 = vmul.f32 0.5, %v3375_v46 }
 0x433   : > { %11453 = vtanh.f32 %v3301_v49  ;;  %v3114_v49 = vpop.permute.xlu0 %3113 }
 0x434   : > { %11455 = vtanh.f32 %v3303_v10  ;;  %v3306_v25 = vpop.f32.mrb[20].mxu0 }
 0x435   : > { %11457 = vtanh.f32 %v3350_v32  ;;  %v3307_v52 = vadd.f32 %v3306_v25, %v3104_v51  ;;  %v3308_v27 = vpop.f32.mrb[21].mxu0 }
 0x436   : > { %11459 = vtanh.f32 %v3351_v53  ;;  %v3309_v0 = vadd.f32 %v3308_v27, %v3104_v51  ;;  %v3291_v51 = vadd.f32 %v13654_v14, %v3089_v45  ;;  %v3378_v53 = vadd.f32 1.0, %v11442_v4 }
 0x437   : > { %11461 = vtanh.f32 %v3307_v52 }
 0x438   : > { %11463 = vtanh.f32 %v3309_v0  ;;  %v3312_v34 = vpop.f32.mrb[22].mxu0  ;;  %v3356_v14 = vmul.f32 0.5, %v3291_v51  ;;  %v3394_v15 = vmul.f32 0.5, %v3378_v53  ;;  %v3379_v0 = vadd.f32 1.0, %v11444_v48 }
 0x439   : > { %v11446_v42 = vpop.eup %11445  ;;  %11465 = vtanh.f32 %v3352_v58  ;;  %v3313_v11 = vadd.f32 %v3312_v34, %v3109_v40  ;;  %v3314_v9 = vpop.f32.mrb[23].mxu0 }
 0x43a   : > { %v11448_v8 = vpop.eup %11447  ;;  %v3315_v61 = vadd.f32 %v3314_v9, %v3109_v40  ;;  %v3421_v22 = vmul.f32 %v11446_v42, %v3389_v44 }
 0x43b   : > { %v11450_v17 = vpop.eup %11449  ;;  %11467 = vtanh.f32 %v3313_v11  ;;  %v3422_v32 = vmul.f32 %v11448_v8, %v3390_v62  ;;  %v3124_v8 = vpop.permute.xlu0 %3123 }
 0x43c   : > { %v11452_v35 = vpop.eup %11451  ;;  %11469 = vtanh.f32 %v3315_v61  ;;  %v3318_v10 = vpop.f32.mrb[24].mxu0  ;;  %v3380_v46 = vadd.f32 1.0, %v11450_v17 }
 0x43d   : > { %v11454_v12 = vpop.eup %11453  ;;  %11471 = vtanh.f32 %v3353_v3  ;;  %v3319_v26 = vadd.f32 %v3318_v10, %v3114_v49  ;;  %v3320_v63 = vpop.f32.mrb[25].mxu0  ;;  %v3381_v48 = vadd.f32 1.0, %v11452_v35 }
 0x43e   : > { %v11456_v25 = vpop.eup %11455  ;;  %11473 = vtanh.f32 %v3354_v20  ;;  %v3321_v40 = vadd.f32 %v3320_v63, %v3114_v49  ;;  %v3423_v43 = vmul.f32 %v11454_v12, %v3391_v18  ;;  %v3395_v20 = vmul.f32 0.5, %v3379_v0 }
 0x43f   : > { %v11458_v58 = vpop.eup %11457  ;;  %11475 = vtanh.f32 %v3319_v26  ;;  %v3424_v52 = vmul.f32 %v11456_v25, %v3392_v41  ;;  %v3129_v26 = vpop.permute.xlu1 %3128  ;;  %v3397_v63 = vmul.f32 0.5, %v3381_v48 }
 0x440   : > { %v11460_v27 = vpop.eup %11459  ;;  %11477 = vtanh.f32 %v3321_v40  ;;  %v3324_v4 = vpop.f32.mrb[26].mxu0  ;;  %v10157_v44 = vpack.c.bf16 %v3423_v43, %v3421_v22  ;;  %v3396_v22 = vmul.f32 0.5, %v3380_v46  ;;  %v3382_v17 = vadd.f32 1.0, %v11458_v58 }
 0x441   : > { %v11462_v45 = vpop.eup %11461  ;;  %11479 = vtanh.f32 %v3355_v1  ;;  %v3325_v60 = vadd.f32 %v3324_v4, %v3119_v29  ;;  %v3326_v34 = vpop.f32.mrb[27].mxu0  ;;  %v10155_v62 = vpack.c.bf16 %v3424_v52, %v3422_v32  ;;  %v3383_v41 = vadd.f32 1.0, %v11460_v27 }
 0x442   : > { %v11464_v42 = vpop.eup %11463  ;;  %11481 = vtanh.f32 %v3356_v14  ;;  %v3327_v3 = vadd.f32 %v3326_v34, %v3119_v29  ;;  %v3425_v6 = vmul.f32 %v11462_v45, %v3393_v33  ;;  %v3398_v40 = vmul.f32 0.5, %v3382_v17 }
 0x443   : > { %v11466_v11 = vpop.eup %11465  ;;  %11483 = vtanh.f32 %v3325_v60  ;;  %10156 = vmatprep.subr.bf16.mxu1 %v10155_v62  ;;  %v3426_v9 = vmul.f32 %v11464_v42, %v3394_v15  ;;  %v3399_v46 = vmul.f32 0.5, %v3383_v41  ;;  %v3438_v41 = vld [vmem:[#allocation16 + $0x8] sm:$0xff] }
 0x444   : > { %11485 = vtanh.f32 %v3327_v3  ;;  %v3330_v51 = vpop.f32.mrb[28].mxu0  ;;  %10158 = vmatpush1.bf16.msra.mxu1 %v10157_v44  ;;  %v3384_v43 = vadd.f32 1.0, %v11466_v11 }
 0x445   : > { %v11468_v61 = vpop.eup %11467  ;;  %v3331_v21 = vadd.f32 %v3330_v51, %v3124_v8  ;;  %v3332_v49 = vpop.f32.mrb[29].mxu0 }
 0x446   : > { %v11470_v32 = vpop.eup %11469  ;;  %v3333_v18 = vadd.f32 %v3332_v49, %v3124_v8  ;;  %v3427_v53 = vmul.f32 %v11468_v61, %v3395_v20  ;;  %v3400_v34 = vmul.f32 0.5, %v3384_v43  ;;  %v3443_v43 = vld [vmem:[#allocation16 + $0x30] sm:$0xff] }
 0x447   : > { %v11472_v10 = vpop.eup %11471  ;;  %11487 = vtanh.f32 %v3331_v21  ;;  %v3428_v12 = vmul.f32 %v11470_v32, %v3396_v22 }
 0x448   : > { %v11474_v1 = vpop.eup %11473  ;;  %11489 = vtanh.f32 %v3333_v18  ;;  %v3336_v35 = vpop.f32.mrb[30].mxu0  ;;  %v10161_v25 = vpack.c.bf16 %v3427_v53, %v3425_v6  ;;  %v3385_v60 = vadd.f32 1.0, %v11472_v10 }
 0x449   : > { %v11476_v14 = vpop.eup %11475  ;;  %v3337_v33 = vadd.f32 %v3336_v35, %v3129_v26  ;;  %v3338_v58 = vpop.f32.mrb[31].mxu0  ;;  %v10159_v52 = vpack.c.bf16 %v3428_v12, %v3426_v9  ;;  %v3386_v62 = vadd.f32 1.0, %v11474_v1  ;;  %v3439_v35 = vld [vmem:[#allocation16 + $0x10] sm:$0xff] }
 0x44a   : > { %v11478_v29 = vpop.eup %11477  ;;  %v3339_v15 = vadd.f32 %v3338_v58, %v3129_v26  ;;  %v3429_v0 = vmul.f32 %v11476_v14, %v3397_v63  ;;  %v3401_v11 = vmul.f32 0.5, %v3385_v60  ;;  %v3437_v63 = vld [vmem:[#allocation16] sm:$0xff]  ;;  %v3477_v58 = vpop.permute.xlu1 %3476 }
 0x44b   : > { %v11480_v4 = vpop.eup %11479  ;;  %11491 = vtanh.f32 %v3337_v33  ;;  %10160 = vmatprep.subr.bf16.mxu1 %v10159_v52  ;;  %v3430_v44 = vmul.f32 %v11478_v29, %v3398_v40  ;;  %v3402_v48 = vmul.f32 0.5, %v3386_v62  ;;  %v3441_v14 = vld [vmem:[#allocation16 + $0x20] sm:$0xff]  ;;  %v3442_v40 = vld [vmem:[#allocation16 + $0x28] sm:$0xff]  ;;  %v3444_v33 = vld [vmem:[#allocation16 + $0x38] sm:$0xff]  ;;  %v3872_v29 = vpop.permute.xlu0 %3871 }
 0x44c   : > { %v11482_v45 = vpop.eup %11481  ;;  %11493 = vtanh.f32 %v3339_v15  ;;  %10162 = vmatpush1.bf16.msra.mxu1 %v10161_v25  ;;  %v3387_v9 = vadd.f32 1.0, %v11480_v4  ;;  %v3440_v25 = vld [vmem:[#allocation16 + $0x18] sm:$0xff] }
 0x44d   : > { %v11484_v27 = vpop.eup %11483  ;;  %v3388_v51 = vadd.f32 1.0, %v11482_v45 }
 0x44e   : > { %v11486_v42 = vpop.eup %11485  ;;  %v3431_v3 = vmul.f32 %v11484_v27, %v3399_v46  ;;  %v3403_v49 = vmul.f32 0.5, %v3387_v9  ;;  %v3487_v52 = vpop.permute.xlu1 %3486 }
 0x44f   : > { %v3432_v6 = vmul.f32 %v11486_v42, %v3400_v34  ;;  %v3404_v18 = vmul.f32 0.5, %v3388_v51 }
 0x450   : > { %v10165_v8 = vpack.c.bf16 %v3431_v3, %v3429_v0  ;;  %v3472_v0 = vpop.permute.xlu0 %3471 }
 0x451   : > { %v11488_v20 = vpop.eup %11487  ;;  %v10163_v61 = vpack.c.bf16 %v3432_v6, %v3430_v44 }
 0x452   : > { %v11490_v22 = vpop.eup %11489  ;;  %v3433_v17 = vmul.f32 %v11488_v20, %v3401_v11  ;;  %v3876_v15 = vpop.permute.xlu1 %3875 }
 0x453   : > { %10164 = vmatprep.subr.bf16.mxu1 %v10163_v61  ;;  %v3434_v21 = vmul.f32 %v11490_v22, %v3402_v48 }
 0x454   : > { %10166 = vmatpush1.bf16.msra.mxu1 %v10165_v8  ;;  %v3482_v34 = vpop.permute.xlu0 %3481 }
 0x455   : > { %v11492_v32 = vpop.eup %11491 }
 0x456   : > { %v11494_v53 = vpop.eup %11493  ;;  %v3435_v10 = vmul.f32 %v11492_v32, %v3403_v49  ;;  %v3492_v4 = vpop.permute.xlu1 %3491 }
 0x457   : > { %v3436_v12 = vmul.f32 %v11494_v53, %v3404_v18 }
 0x458   : > { %v10169_v1 = vpack.c.bf16 %v3435_v10, %v3433_v17  ;;  %v3497_v49 = vpop.permute.xlu0 %3496 }
 0x459   : > { %v10167_v26 = vpack.c.bf16 %v3436_v12, %v3434_v21 }
 0x45a   : > { %v3880_v3 = vpop.permute.xlu1 %3879 }
 0x45b   : > { %10168 = vmatprep.subr.bf16.mxu1 %v10167_v26 }
 0x45c   : > { %10170 = vmatpush1.bf16.msra.mxu1 %v10169_v1 }
 0x45e   : > { %v3884_v10 = vpop.permute.xlu1 %3883 }
 0x45f   : > { %9786 = vmatmul.mubr.msk.f32.vlgmr.msra.gmra.mrb[0].mxu1 %vm3131_vm0, %v3437_v63 }
 0x460   : > { %3667 = vmatprep.mubr.f32.mxu1 %v15128_v19 }
 0x463   : > { %9787 = vmatmul.mubr.msk.f32.gmra.mrb[2].mxu1 %vm3131_vm0, %v3438_v41 }
 0x464   : > { %3673 = vmatprep.mubr.f32.mxu1 %v15128_v19 }
 0x467   : > { %9788 = vmatmul.mubr.msk.f32.gmra.mrb[4].mxu1 %vm3131_vm0, %v3439_v35 }
 0x468   : > { %3679 = vmatprep.mubr.f32.mxu1 %v15128_v19 }
 0x46b   : > { %9789 = vmatmul.mubr.msk.f32.gmra.mrb[6].mxu1 %vm3131_vm0, %v3440_v25 }
 0x46c   : > { %3685 = vmatprep.mubr.f32.mxu1 %v15128_v19 }
 0x46f   : > { %9790 = vmatmul.mubr.msk.f32.gmra.mrb[8].mxu1 %vm3131_vm0, %v3441_v14 }
 0x470   : > { %3691 = vmatprep.mubr.f32.mxu1 %v15128_v19 }
 0x473   : > { %9791 = vmatmul.mubr.msk.f32.gmra.mrb[10].mxu1 %vm3131_vm0, %v3442_v40 }
 0x474   : > { %3697 = vmatprep.mubr.f32.mxu1 %v15128_v19 }
 0x477   : > { %9792 = vmatmul.mubr.msk.f32.gmra.mrb[12].mxu1 %vm3131_vm0, %v3443_v43 }
 0x478   : > { %3703 = vmatprep.mubr.f32.mxu1 %v15128_v19 }
 0x47b   : > { %9793 = vmatmul.mubr.msk.f32.gmra.mrb[14].mxu1 %vm3131_vm0, %v3444_v33  ;;  %v3502_v33 = vpop.permute.xlu0 %3501 }
 0x47c   : > { %3709 = vmatprep.mubr.f32.mxu1 %v15128_v19 }
 0x532   : > { %v3663_v44 = vpop.f32.mrb[0].mxu1 }
 0x533   : > { %v3664_v45 = vadd.f32 %v3663_v44, %v3472_v0  ;;  %v3665_v46 = vpop.f32.mrb[1].mxu1 }
 0x534   : > { %v3666_v60 = vadd.f32 %v3665_v46, %v3472_v0 }
 0x535   : > { %v3758_v27 = vadd.f32 %v3664_v45, %v13087_v54 }
 0x536   : > { %v3759_v62 = vadd.f32 %v3666_v60, %v13153_v38  ;;  %v3669_v42 = vpop.f32.mrb[2].mxu1 }
 0x537   : > { %v13676_v6 = vmul.f32 0.70710677, %v3758_v27  ;;  %v3670_v11 = vadd.f32 %v3669_v42, %v3477_v58  ;;  %v3671_v9 = vpop.f32.mrb[3].mxu1 }
 0x538   : > { %v13678_v8 = vmul.f32 0.70710677, %v3759_v62  ;;  %v3672_v20 = vadd.f32 %v3671_v9, %v3477_v58 }
 0x539   : > { %v13681_v48 = vadd.f32 %v3872_v29, %v13676_v6  ;;  %v3760_v51 = vadd.f32 %v3670_v11, %v13155_v13  ;;  %v3888_v11 = vpop.permute.xlu0 %3887 }
 0x53a   : > { %v13685_v61 = vadd.f32 %v3872_v29, %v13678_v8  ;;  %v3761_v54 = vadd.f32 %v3672_v20, %v13165_v50  ;;  %v3675_v38 = vpop.f32.mrb[4].mxu1 }
 0x53b   : > { %v13688_v22 = vmul.f32 0.70710677, %v3760_v51  ;;  %v3676_v17 = vadd.f32 %v3675_v38, %v3482_v34  ;;  %v3677_v21 = vpop.f32.mrb[5].mxu1 }
 0x53c   : > { %v13690_v32 = vmul.f32 0.70710677, %v3761_v54  ;;  %v3678_v18 = vadd.f32 %v3677_v21, %v3482_v34  ;;  %v13694_v53 = vpack.i.bf16 %v13685_v61, %v13681_v48 }
 0x53d   : > { %v13697_v13 = vadd.f32 %v3876_v15, %v13688_v22  ;;  %v3762_v12 = vadd.f32 %v3676_v17, %v13204_v47 }
 0x53e   : > { %v13701_v50 = vadd.f32 %v3876_v15, %v13690_v32  ;;  %v3763_v1 = vadd.f32 %v3678_v18, %v13206_v56  ;;  %v3681_v26 = vpop.f32.mrb[6].mxu1  ;;  %10982 = vrot.lane.b32.xlu1 %v13694_v53, %s12280_s3 }
 0x53f   : > { %v13706_v63 = vmul.f32 0.70710677, %v3762_v12  ;;  %v3682_v41 = vadd.f32 %v3681_v26, %v3487_v52  ;;  %v3683_v35 = vpop.f32.mrb[7].mxu1  ;;  %v10193_v25 = vpack.c.bf16 %v13697_v13, %v13681_v48 }
 0x540   : > { %v13710_v14 = vmul.f32 0.70710677, %v3763_v1  ;;  %v3684_v47 = vadd.f32 %v3683_v35, %v3487_v52  ;;  %v13714_v40 = vpack.i.bf16 %v13701_v50, %v13697_v13  ;;  %v10191_v58 = vpack.c.bf16 %v13701_v50, %v13685_v61  ;;  %v3507_v52 = vpop.permute.xlu1 %3506 }
 0x541   : > { %v3764_v56 = vadd.f32 %v3682_v41, %v13315_v28  ;;  %v13718_v43 = vadd.f32 %v3880_v3, %v13706_v63 }
 0x542   : > { %v13723_v29 = vadd.f32 %v3880_v3, %v13710_v14  ;;  %v3765_v15 = vadd.f32 %v3684_v47, %v13318_v16  ;;  %v3687_v0 = vpop.f32.mrb[8].mxu1  ;;  %10987 = vrot.lane.b32.xlu0 %v13714_v40, %s12280_s3 }
 0x543   : > { %v13728_v44 = vmul.f32 0.70710677, %v3764_v56  ;;  %v3688_v28 = vadd.f32 %v3687_v0, %v3492_v4  ;;  %v3689_v45 = vpop.f32.mrb[9].mxu1 }
 0x544   : > { %v13730_v46 = vmul.f32 0.70710677, %v3765_v15  ;;  %v3690_v60 = vadd.f32 %v3689_v45, %v3492_v4  ;;  %v13734_v27 = vpack.i.bf16 %v13723_v29, %v13718_v43  ;;  %v3892_v17 = vpop.permute.xlu1 %3891 }
 0x545   : > { %v3766_v34 = vadd.f32 %v3688_v28, %v13346_v24  ;;  %v13738_v16 = vadd.f32 %v3884_v10, %v13728_v44 }
 0x546   : > { %v13741_v62 = vadd.f32 %v3884_v10, %v13730_v46  ;;  %v3767_v42 = vadd.f32 %v3690_v60, %v13348_v36  ;;  %v3693_v3 = vpop.f32.mrb[10].mxu1  ;;  %10992 = vrot.lane.b32.xlu1 %v13734_v27, %s12280_s3 }
 0x547   : > { %v13746_v4 = vmul.f32 0.70710677, %v3766_v34  ;;  %v3694_v9 = vadd.f32 %v3693_v3, %v3497_v49  ;;  %v3695_v20 = vpop.f32.mrb[11].mxu1  ;;  %v10197_v24 = vpack.c.bf16 %v13738_v16, %v13718_v43 }
 0x548   : > { %v13750_v51 = vmul.f32 0.70710677, %v3767_v42  ;;  %v3696_v54 = vadd.f32 %v3695_v20, %v3497_v49  ;;  %v10996_v38 = vpack.i.bf16 %v13741_v62, %v13738_v16  ;;  %v10195_v18 = vpack.c.bf16 %v13741_v62, %v13723_v29  ;;  %v3896_v45 = vpop.permute.xlu1 %3895 }
 0x549   : > { %v3768_v36 = vadd.f32 %v3694_v9, %v13374_v55  ;;  %v13756_v21 = vadd.f32 %v3888_v11, %v13746_v4 }
 0x54a   : > { %v3769_v10 = vadd.f32 %v3696_v54, %v13376_v31  ;;  %v13762_v12 = vadd.f32 %v3888_v11, %v13750_v51  ;;  %v3699_v1 = vpop.f32.mrb[12].mxu1  ;;  %10997 = vrot.lane.b32.xlu0 %v10996_v38, %s12280_s3 }
 0x54b   : > { %v13765_v49 = vmul.f32 0.70710677, %v3768_v36  ;;  %v3700_v26 = vadd.f32 %v3699_v1, %v3502_v33  ;;  %v3701_v41 = vpop.f32.mrb[13].mxu1 }
 0x54c   : > { %v13767_v35 = vmul.f32 0.70710677, %v3769_v10  ;;  %v3702_v55 = vadd.f32 %v3701_v41, %v3502_v33  ;;  %v11001_v47 = vpack.i.bf16 %v13762_v12, %v13756_v21  ;;  %v3900_v10 = vpop.permute.xlu0 %3899 }
 0x54d   : > { %v3770_v56 = vadd.f32 %v3700_v26, %v13483_v5  ;;  %v13773_v31 = vadd.f32 %v3892_v17, %v13765_v49 }
 0x54e   : > { %v3771_v15 = vadd.f32 %v3702_v55, %v13485_v23  ;;  %v13777_v0 = vadd.f32 %v3892_v17, %v13767_v35  ;;  %v3705_v28 = vpop.f32.mrb[14].mxu1  ;;  %11002 = vrot.lane.b32.xlu1 %v11001_v47, %s12280_s3 }
 0x54f   : > { %v13780_v60 = vmul.f32 0.70710677, %v3770_v56  ;;  %v3706_v33 = vadd.f32 %v3705_v28, %v3507_v52  ;;  %v3707_v34 = vpop.f32.mrb[15].mxu1  ;;  %v10201_v42 = vpack.c.bf16 %v13773_v31, %v13756_v21  ;;  %v3447_v28 = vld [vmem:[#allocation16 + $0x50] sm:$0xff] }
 0x550   : > { %v13784_v5 = vmul.f32 0.70710677, %v3771_v15  ;;  %v3708_v3 = vadd.f32 %v3707_v34, %v3507_v52  ;;  %v11006_v23 = vpack.i.bf16 %v13777_v0, %v13773_v31  ;;  %v10199_v20 = vpack.c.bf16 %v13777_v0, %v13762_v12  ;;  %v3446_v15 = vld [vmem:[#allocation16 + $0x48] sm:$0xff]  ;;  %v4098_v34 = vld [vmem:[#allocation14 + $0x80] sm:$0xff] }
 0x551   : > { %v3772_v11 = vadd.f32 %v3706_v33, %v13527_v39  ;;  %v13790_v9 = vadd.f32 %v3896_v45, %v13780_v60 }
 0x552   : > { %v3773_v54 = vadd.f32 %v3708_v3, %v13529_v57  ;;  %v13796_v17 = vadd.f32 %v3896_v45, %v13784_v5  ;;  %11007 = vrot.lane.b32.xlu0 %v11006_v23, %s12280_s3  ;;  %v3445_v57 = vld [vmem:[#allocation16 + $0x40] sm:$0xff]  ;;  %v3448_v45 = vld [vmem:[#allocation16 + $0x58] sm:$0xff] }
 0x553   : > { %v13799_v36 = vmul.f32 0.70710677, %v3772_v11  ;;  %9794 = vmatmul.mubr.msk.f32.gmra.mrb[16].mxu1 %vm3131_vm0, %v3445_v57  ;;  %v4099_v11 = vld [vmem:[#allocation14 + $0x88] sm:$0xff] }
 0x554   : > { %v13801_v52 = vmul.f32 0.70710677, %v3773_v54  ;;  %v11011_v39 = vpack.i.bf16 %v13796_v17, %v13790_v9  ;;  %3715 = vmatprep.mubr.f32.mxu1 %v15128_v19 }
 0x555   : > { %v13806_v1 = vadd.f32 %v3900_v10, %v13799_v36 }
 0x556   : > { %v13809_v26 = vadd.f32 %v3900_v10, %v13801_v52  ;;  %11012 = vrot.lane.b32.xlu1 %v11011_v39, %s12280_s3  ;;  %v4100_v10 = vld [vmem:[#allocation14 + $0x90] sm:$0xff] }
 0x557   : > { %v10205_v41 = vpack.c.bf16 %v13806_v1, %v13790_v9  ;;  %9795 = vmatmul.mubr.msk.f32.gmra.mrb[18].mxu1 %vm3131_vm0, %v3446_v15 }
 0x558   : > { %v11016_v55 = vpack.i.bf16 %v13809_v26, %v13806_v1  ;;  %v10203_v56 = vpack.c.bf16 %v13809_v26, %v13796_v17  ;;  %3721 = vmatprep.mubr.f32.mxu1 %v15128_v19 }
 0x55a   : > { %11017 = vrot.lane.b32.xlu0 %v11016_v55, %s12280_s3  ;;  %11022 = vrot.lane.b32.xlu1 %v13694_v53, %s12281_s11  ;;  %v3449_v53 = vld [vmem:[#allocation16 + $0x60] sm:$0xff] }
 0x55b   : > { %9796 = vmatmul.mubr.msk.f32.gmra.mrb[20].mxu1 %vm3131_vm0, %v3447_v28 }
 0x55c   : > { %3727 = vmatprep.mubr.f32.mxu1 %v15128_v19 }
 0x55e   : > { %11027 = vrot.lane.b32.xlu0 %v13714_v40, %s12281_s11  ;;  %11032 = vrot.lane.b32.xlu1 %v13734_v27, %s12281_s11  ;;  %v3450_v40 = vld [vmem:[#allocation16 + $0x68] sm:$0xff]  ;;  %v3451_v27 = vld [vmem:[#allocation16 + $0x70] sm:$0xff] }
 0x55f   : > { %9797 = vmatmul.mubr.msk.f32.gmra.mrb[22].mxu1 %vm3131_vm0, %v3448_v45 }
 0x560   : > { %3733 = vmatprep.mubr.f32.mxu1 %v15128_v19 }
 0x562   : > { %11037 = vrot.lane.b32.xlu0 %v10996_v38, %s12281_s11  ;;  %11042 = vrot.lane.b32.xlu1 %v11001_v47, %s12281_s11  ;;  %v3452_v38 = vld [vmem:[#allocation16 + $0x78] sm:$0xff]  ;;  %v4066_v47 = vld [vmem:[#allocation13 + $0x108] sm:$0xff] }
 0x563   : > { %9798 = vmatmul.mubr.msk.f32.gmra.mrb[24].mxu1 %vm3131_vm0, %v3449_v53 }
 0x564   : > { %3739 = vmatprep.mubr.f32.mxu1 %v15128_v19 }
 0x566   : > { %11047 = vrot.lane.b32.xlu0 %v11006_v23, %s12281_s11  ;;  %11052 = vrot.lane.b32.xlu1 %v11011_v39, %s12281_s11 }
 0x567   : > { %9799 = vmatmul.mubr.msk.f32.gmra.mrb[26].mxu1 %vm3131_vm0, %v3450_v40 }
 0x568   : > { %3745 = vmatprep.mubr.f32.mxu1 %v15128_v19 }
 0x56a   : > { %11057 = vrot.lane.b32.xlu0 %v11016_v55, %s12281_s11  ;;  %4116 = vperm.xlu1 %11061, %v4098_v34   ;;  %v4106_v55 = vld [vmem:[#allocation14 + $0xc0] sm:$0xff] }
 0x56b   : > { %9800 = vmatmul.mubr.msk.f32.gmra.mrb[28].mxu1 %vm3131_vm0, %v3451_v27  ;;  %v4101_v27 = vld [vmem:[#allocation14 + $0x98] sm:$0xff] }
 0x56c   : > { %3751 = vmatprep.mubr.f32.mxu1 %v15128_v19 }
 0x56e   : > { %4121 = vperm.xlu0 %11062, %v4099_v11   ;;  %4126 = vperm.xlu1 %11061, %v4100_v10   ;;  %v4107_v11 = vld [vmem:[#allocation14 + $0xc8] sm:$0xff] }
 0x56f   : > { %9801 = vmatmul.mubr.msk.f32.gmra.mrb[30].mxu1 %vm3131_vm0, %v3452_v38 }
 0x570   : > { %9826 = vmatprep.mubr.msk.f32.mxu1 %vm3131_vm0, %v4066_v47  ;;  %v4102_v47 = vld [vmem:[#allocation14 + $0xa0] sm:$0xff] }
 0x572   : > { %4156 = vperm.xlu0 %11062, %v4106_v55   ;;  %4131 = vperm.xlu1 %11061, %v4101_v27   ;;  %v4103_v55 = vld [vmem:[#allocation14 + $0xa8] sm:$0xff] }
 0x576   : > { %4136 = vperm.xlu0 %11062, %v4102_v47   ;;  %4161 = vperm.xlu1 %11061, %v4107_v11  }
 0x57a   : > { %4141 = vperm.xlu1 %11061, %v4103_v55  }
 0x5b0   : > { %v10983_v33 = vpop.permute.xlu1 %10982 }
 0x5b1   : > { %v10985_v3 = vunpack.i.h.bf16 %v10983_v33  ;;  %v10984_v23 = vunpack.i.l.bf16 %v10983_v33 }
 0x5b3   : > { %v3967_v15 = vsel %vm3966_vm6, %v10984_v23, %v10985_v3 }
 0x5b4   : > { %v10988_v54 = vpop.permute.xlu0 %10987 }
 0x5b5   : > { %v10990_v39 = vunpack.i.h.bf16 %v10988_v54  ;;  %v10989_v57 = vunpack.i.l.bf16 %v10988_v54 }
 0x5b7   : > { %v3968_v28 = vsel %vm3966_vm6, %v10989_v57, %v10990_v39  ;;  %v10173_v38 = vpack.c.bf16 %v10989_v57, %v10984_v23  ;;  %v4108_v39 = vld [vmem:[#allocation14 + $0xd0] sm:$0xff] }
 0x5b8   : > { %v10993_v45 = vpop.permute.xlu1 %10992  ;;  %v10171_v53 = vpack.c.bf16 %v3968_v28, %v3967_v15  ;;  %4166 = vperm.xlu0 %11062, %v4108_v39   ;;  %v4105_v39 = vld [vmem:[#allocation14 + $0xb8] sm:$0xff] }
 0x5b9   : > { %v10995_v33 = vunpack.i.h.bf16 %v10993_v45  ;;  %v10994_v34 = vunpack.i.l.bf16 %v10993_v45 }
 0x5ba   : > { %10172 = vmatprep.subr.bf16.mxu1 %v10171_v53  ;;  %v4104_v53 = vld [vmem:[#allocation14 + $0xb0] sm:$0xff] }
 0x5bb   : > { %10175 = vmatpush1.bf16.msk.msra.mxu1 %vm13849_vm8, %v10173_v38  ;;  %v3969_v15 = vsel %vm3966_vm6, %v10994_v34, %v10995_v33 }
 0x5bc   : > { %v10998_v3 = vpop.permute.xlu0 %10997  ;;  %4146 = vperm.xlu0 %11062, %v4104_v53   ;;  %v4111_v53 = vld [vmem:[#allocation14 + $0xe8] sm:$0xff] }
 0x5bd   : > { %v11000_v54 = vunpack.i.h.bf16 %v10998_v3  ;;  %v10999_v10 = vunpack.i.l.bf16 %v10998_v3  ;;  %v4109_v3 = vld [vmem:[#allocation14 + $0xd8] sm:$0xff] }
 0x5be   : > { %4171 = vperm.xlu1 %11061, %v4109_v3  }
 0x5bf   : > { %v3970_v28 = vsel %vm3966_vm6, %v10999_v10, %v11000_v54  ;;  %v10178_v45 = vpack.c.bf16 %v10999_v10, %v10994_v34  ;;  %v4110_v54 = vld [vmem:[#allocation14 + $0xe0] sm:$0xff] }
 0x5c0   : > { %v11003_v23 = vpop.permute.xlu1 %11002  ;;  %v10176_v57 = vpack.c.bf16 %v3970_v28, %v3969_v15  ;;  %4176 = vperm.xlu0 %11062, %v4110_v54  }
 0x5c1   : > { %v11005_v38 = vunpack.i.h.bf16 %v11003_v23  ;;  %v11004_v27 = vunpack.i.l.bf16 %v11003_v23  ;;  %v4112_v23 = vld [vmem:[#allocation14 + $0xf0] sm:$0xff] }
 0x5c2   : > { %10177 = vmatprep.subr.bf16.mxu1 %v10176_v57  ;;  %4151 = vperm.xlu1 %11061, %v4105_v39  }
 0x5c3   : > { %10180 = vmatpush1.bf16.msk.msra.mxu1 %vm13849_vm8, %v10178_v45  ;;  %v3971_v11 = vsel %vm3966_vm6, %v11004_v27, %v11005_v38 }
 0x5c4   : > { %v11008_v47 = vpop.permute.xlu0 %11007  ;;  %4186 = vperm.xlu0 %11062, %v4112_v23  }
 0x5c5   : > { %v11010_v33 = vunpack.i.h.bf16 %v11008_v47  ;;  %v11009_v2 = vunpack.i.l.bf16 %v11008_v47 }
 0x5c6   : > { %4181 = vperm.xlu1 %11061, %v4111_v53  }
 0x5c7   : > { %v3972_v15 = vsel %vm3966_vm6, %v11009_v2, %v11010_v33  ;;  %v10183_v28 = vpack.c.bf16 %v11009_v2, %v11004_v27  ;;  %v4113_v2 = vld [vmem:[#allocation14 + $0xf8] sm:$0xff] }
 0x5c8   : > { %v11013_v34 = vpop.permute.xlu1 %11012  ;;  %v10181_v10 = vpack.c.bf16 %v3972_v15, %v3971_v11  ;;  %v4518_v11 = vld [vmem:[#allocation17 + $0x88] sm:$0xff] }
 0x5c9   : > { %v11015_v57 = vunpack.i.h.bf16 %v11013_v34  ;;  %v11014_v55 = vunpack.i.l.bf16 %v11013_v34 }
 0x5ca   : > { %10182 = vmatprep.subr.bf16.mxu1 %v10181_v10  ;;  %4191 = vperm.xlu1 %11061, %v4113_v2   ;;  %v4520_v10 = vld [vmem:[#allocation17 + $0x98] sm:$0xff] }
 0x5cb   : > { %10185 = vmatpush1.bf16.msk.msra.mxu1 %vm13849_vm8, %v10183_v28  ;;  %v3973_v3 = vsel %vm3966_vm6, %v11014_v55, %v11015_v57 }
 0x5cc   : > { %v11018_v45 = vpop.permute.xlu0 %11017  ;;  %v11023_v34 = vpop.permute.xlu1 %11022 }
 0x5cd   : > { %v11020_v38 = vunpack.i.h.bf16 %v11018_v45  ;;  %v11019_v47 = vunpack.i.l.bf16 %v11018_v45  ;;  %v11025_v13 = vunpack.i.h.bf16 %v11023_v34 }
 0x5ce   : > { %4540 = vperm.xlu1 %11061, %v4518_v11  }
 0x5cf   : > { %v3974_v33 = vsel %vm3966_vm6, %v11019_v47, %v11020_v38  ;;  %v10188_v27 = vpack.c.bf16 %v11019_v47, %v11014_v55 }
 0x5d0   : > { %v10186_v54 = vpack.c.bf16 %v3974_v33, %v3973_v3  ;;  %v11028_v15 = vpop.permute.xlu0 %11027  ;;  %v11033_v61 = vpop.permute.xlu1 %11032 }
 0x5d1   : > { %v11030_v50 = vunpack.i.h.bf16 %v11028_v15  ;;  %v11029_v48 = vunpack.i.l.bf16 %v11028_v15  ;;  %v11035_v12 = vunpack.i.h.bf16 %v11033_v61  ;;  %v11034_v31 = vunpack.i.l.bf16 %v11033_v61  ;;  %v4065_v15 = vld [vmem:[#allocation13 + $0x100] sm:$0xff] }
 0x5d2   : > { %10187 = vmatprep.subr.bf16.mxu1 %v10186_v54  ;;  %4550 = vperm.xlu1 %11061, %v4520_v10   ;;  %v4067_v10 = vld [vmem:[#allocation13 + $0x110] sm:$0xff]  ;;  %v4069_v61 = vld [vmem:[#allocation13 + $0x120] sm:$0xff] }
 0x5d3   : > { %10190 = vmatpush1.bf16.msk.msra.mxu1 %vm13849_vm8, %v10188_v27  ;;  %v4033_v29 = vsel %vm4031_vm9, %v11029_v48, %v11030_v50  ;;  %v10207_v16 = vpack.c.bf16 %v11030_v50, %v11025_v13  ;;  %v4034_v28 = vsel %vm4031_vm9, %v11034_v31, %v11035_v12  ;;  %v4072_v50 = vld [vmem:[#allocation13 + $0x138] sm:$0xff]  ;;  %v4071_v48 = vld [vmem:[#allocation13 + $0x130] sm:$0xff] }
 0x5d4   : > { %10192 = vmatprep.subr.bf16.mxu1 %v10191_v58  ;;  %v11038_v39 = vpop.permute.xlu0 %11037  ;;  %v11043_v21 = vpop.permute.xlu1 %11042  ;;  %v4084_v31 = vld [vmem:[#allocation13 + $0x198] sm:$0xff]  ;;  %v7262_v58 = vld [vmem:[#allocation13 + $0x448] sm:$0xff] }
 0x5d5   : > { %v11040_v62 = vunpack.i.h.bf16 %v11038_v39  ;;  %v11045_v23 = vunpack.i.h.bf16 %v11043_v21  ;;  %v11044_v9 = vunpack.i.l.bf16 %v11043_v21  ;;  %v4079_v21 = vld [vmem:[#allocation13 + $0x170] sm:$0xff] }
 0x5d7   : > { %10194 = vmatpush1.bf16.msra.mxu1 %v10193_v25  ;;  %v11024_v25 = vunpack.i.l.bf16 %v11023_v34  ;;  %v4036_v38 = vsel %vm4031_vm9, %v11044_v9, %v11045_v23  ;;  %v4068_v34 = vld [vmem:[#allocation13 + $0x118] sm:$0xff]  ;;  %v4091_v9 = vld [vmem:[#allocation13 + $0x1d0] sm:$0xff] }
 0x5d8   : > { %10196 = vmatprep.subr.bf16.mxu1 %v10195_v18  ;;  %v11048_v43 = vpop.permute.xlu0 %11047  ;;  %v11053_v1 = vpop.permute.xlu1 %11052 }
 0x5d9   : > { %v4032_v18 = vsel %vm4031_vm9, %v11024_v25, %v11025_v13  ;;  %v11050_v17 = vunpack.i.h.bf16 %v11048_v43  ;;  %v11049_v26 = vunpack.i.l.bf16 %v11048_v43  ;;  %v11055_v47 = vunpack.i.h.bf16 %v11053_v1  ;;  %v4074_v13 = vld [vmem:[#allocation13 + $0x148] sm:$0xff]  ;;  %v4073_v25 = vld [vmem:[#allocation13 + $0x140] sm:$0xff]  ;;  %v4076_v43 = vld [vmem:[#allocation13 + $0x158] sm:$0xff] }
 0x5da   : > { %v10210_v0 = vpack.c.bf16 %v4033_v29, %v4032_v18  ;;  %v11054_v3 = vunpack.i.l.bf16 %v11053_v1  ;;  %v4075_v29 = vld [vmem:[#allocation13 + $0x150] sm:$0xff]  ;;  %v4082_v18 = vld [vmem:[#allocation13 + $0x188] sm:$0xff] }
 0x5db   : > { %10198 = vmatpush1.bf16.msra.mxu1 %v10197_v24  ;;  %v11039_v24 = vunpack.i.l.bf16 %v11038_v39  ;;  %v4037_v57 = vsel %vm4031_vm9, %v11049_v26, %v11050_v17  ;;  %v10217_v55 = vpack.c.bf16 %v11050_v17, %v11045_v23  ;;  %v4070_v39 = vld [vmem:[#allocation13 + $0x128] sm:$0xff]  ;;  %v4088_v17 = vld [vmem:[#allocation13 + $0x1b8] sm:$0xff]  ;;  %v4087_v26 = vld [vmem:[#allocation13 + $0x1b0] sm:$0xff] }
 0x5dc   : > { %10200 = vmatprep.subr.bf16.mxu1 %v10199_v20  ;;  %v10212_v20 = vpack.c.bf16 %v11040_v62, %v11035_v12  ;;  %v10220_v33 = vpack.c.bf16 %v4037_v57, %v4036_v38  ;;  %v4038_v27 = vsel %vm4031_vm9, %v11054_v3, %v11055_v47  ;;  %v4081_v12 = vld [vmem:[#allocation13 + $0x180] sm:$0xff]  ;;  %v4092_v23 = vld [vmem:[#allocation13 + $0x1d8] sm:$0xff]  ;;  %v4094_v1 = vld [vmem:[#allocation13 + $0x1e8] sm:$0xff] }
 0x5dd   : > { %v4096_v57 = vld [vmem:[#allocation13 + $0x1f8] sm:$0xff]  ;;  %v11824_v38 = vld [vmem:[%s12744_s27 + $0x8] sm:$0xff]  ;;  %v4521_v3 = vld [vmem:[#allocation17 + $0xa0] sm:$0xff] }
 0x5df   : > { %10202 = vmatpush1.bf16.msra.mxu1 %v10201_v42  ;;  %v4035_v42 = vsel %vm4031_vm9, %v11039_v24, %v11040_v62  ;;  %v4077_v62 = vld [vmem:[#allocation13 + $0x160] sm:$0xff]  ;;  %v4080_v24 = vld [vmem:[#allocation13 + $0x178] sm:$0xff] }
 0x5e0   : > { %10204 = vmatprep.subr.bf16.mxu1 %v10203_v56  ;;  %v11058_v56 = vpop.permute.xlu0 %11057 }
 0x5e1   : > { %v11060_v45 = vunpack.i.h.bf16 %v11058_v56  ;;  %v11059_v53 = vunpack.i.l.bf16 %v11058_v56  ;;  %v4090_v56 = vld [vmem:[#allocation13 + $0x1c8] sm:$0xff] }
 0x5e3   : > { %10206 = vmatpush1.bf16.msra.mxu1 %v10205_v41  ;;  %v10215_v41 = vpack.c.bf16 %v4035_v42, %v4034_v28  ;;  %v4039_v54 = vsel %vm4031_vm9, %v11059_v53, %v11060_v45  ;;  %v10222_v2 = vpack.c.bf16 %v11060_v45, %v11055_v47  ;;  %v4086_v42 = vld [vmem:[#allocation13 + $0x1a8] sm:$0xff]  ;;  %v4089_v28 = vld [vmem:[#allocation13 + $0x1c0] sm:$0xff]  ;;  %v12282_v45 = vmov 2  }
 0x5e4   : > { %10209 = vmatprep.subr.msk.bf16.mxu1 %vm13890_vm10, %v10207_v16  ;;  %v10225_v11 = vpack.c.bf16 %v4039_v54, %v4038_v27  ;;  %v4078_v16 = vld [vmem:[#allocation13 + $0x168] sm:$0xff]  ;;  %11063 = vset.pattern.permute.xlu0 %v12282_v45  ;;  %v11823_v53 = vld [vmem:[%s12744_s27] sm:$0xff]  ;;  %v4519_v54 = vld [vmem:[#allocation17 + $0x90] sm:$0xff] }
 0x5e5   : > { %11065 = vset.pattern.permute.xlu1 %v12282_v45  ;;  %4935 = vperm.xlu0 %11063, %v11823_v53   ;;  %v4517_v47 = vld [vmem:[#allocation17 + $0x80] sm:$0xff]  ;;  %v11825_v27 = vld [vmem:[%s12744_s27 + $0x10] sm:$0xff] }
 0x5e6   : > { %4939 = vperm.xlu1 %11065, %v11824_v38  }
 0x5e7   : > { %10211 = vmatpush1.bf16.msra.mxu1 %v10210_v0  ;;  %v4083_v0 = vld [vmem:[#allocation13 + $0x190] sm:$0xff] }
 0x5e8   : > { %10214 = vmatprep.subr.msk.bf16.mxu1 %vm13890_vm10, %v10212_v20  ;;  %v4085_v20 = vld [vmem:[#allocation13 + $0x1a0] sm:$0xff] }
 0x5eb   : > { %10216 = vmatpush1.bf16.msra.mxu1 %v10215_v41  ;;  %v4093_v41 = vld [vmem:[#allocation13 + $0x1e0] sm:$0xff] }
 0x5ec   : > { %10219 = vmatprep.subr.msk.bf16.mxu1 %vm13890_vm10, %v10217_v55  ;;  %v4095_v55 = vld [vmem:[#allocation13 + $0x1f0] sm:$0xff] }
 0x5ef   : > { %10221 = vmatpush1.bf16.msra.mxu1 %v10220_v33  ;;  %v15177_v33 = vmov 0  }
 0x5f0   : > { %10224 = vmatprep.subr.msk.bf16.mxu1 %vm13890_vm10, %v10222_v2  ;;  %11064 = vset.pattern.permute.xlu0 %v15177_v33  ;;  %v4522_v2 = vld [vmem:[#allocation17 + $0xa8] sm:$0xff] }
 0x5f1   : > { %11066 = vset.pattern.permute.xlu1 %v15177_v33  ;;  %4535 = vperm.xlu0 %11064, %v4517_v47  }
 0x5f2   : > { %4555 = vperm.xlu1 %11066, %v4521_v3  }
 0x5f3   : > { %10226 = vmatpush1.bf16.msra.mxu1 %v10225_v11  ;;  %v4523_v11 = vld [vmem:[#allocation17 + $0xb0] sm:$0xff] }
 0x5f5   : > { %4545 = vperm.xlu0 %11064, %v4519_v54  }
 0x5f6   : > { %4307 = vmatmul.mubr.f32.vlgmr.msra.gmra.mrb[32].mxu1 %v4065_v15  ;;  %11067 = vset.pattern.permute.xlu1 %v12282_v45  ;;  %v11826_v15 = vld [vmem:[%s12744_s27 + $0x18] sm:$0xff] }
 0x5f7   : > { %9827 = vmatprep.mubr.msk.f32.mxu1 %vm3131_vm0, %v4068_v34  ;;  %4943 = vperm.xlu1 %11067, %v11825_v27  }
 0x5f9   : > { %4560 = vperm.xlu0 %11064, %v4522_v2  }
 0x5fa   : > { %4313 = vmatmul.mubr.f32.gmra.mrb[34].mxu1 %v4067_v10 }
 0x5fb   : > { %9828 = vmatprep.mubr.msk.f32.mxu1 %vm3131_vm0, %v4070_v39  ;;  %4947 = vperm.xlu1 %11067, %v11826_v15   ;;  %v4524_v39 = vld [vmem:[#allocation17 + $0xb8] sm:$0xff] }
 0x5fd   : > { %4565 = vperm.xlu0 %11064, %v4523_v11  }
 0x5fe   : > { %4319 = vmatmul.mubr.f32.gmra.mrb[36].mxu1 %v4069_v61 }
 0x5ff   : > { %9829 = vmatprep.mubr.msk.f32.mxu1 %vm3131_vm0, %v4072_v50  ;;  %11068 = vset.pattern.permute.xlu1 %v15177_v33 }
 0x600   : > { %4570 = vperm.xlu1 %11068, %v4524_v39  }
 0x601   : > { %11069 = vset.pattern.permute.xlu0 %v12282_v45 }
 0x602   : > { %4325 = vmatmul.mubr.f32.gmra.mrb[38].mxu1 %v4071_v48  ;;  %v4117_v48 = vpop.permute.xlu1 %4116 }
 0x603   : > { %9830 = vmatprep.mubr.msk.f32.mxu1 %vm3131_vm0, %v4074_v13  ;;  %v11827_v13 = vld [vmem:[%s12744_s27 + $0x20] sm:$0xff] }
 0x604   : > { %4951 = vperm.xlu0 %11069, %v11827_v13   ;;  %11070 = vset.pattern.permute.xlu1 %v12282_v45 }
 0x606   : > { %4331 = vmatmul.mubr.f32.gmra.mrb[40].mxu1 %v4073_v25 }
 0x607   : > { %9831 = vmatprep.mubr.msk.f32.mxu1 %vm3131_vm0, %v4076_v43 }
 0x60a   : > { %4337 = vmatmul.mubr.f32.gmra.mrb[42].mxu1 %v4075_v29  ;;  %v11828_v29 = vld [vmem:[%s12744_s27 + $0x28] sm:$0xff] }
 0x60b   : > { %9832 = vmatprep.mubr.msk.f32.mxu1 %vm3131_vm0, %v4078_v16  ;;  %4955 = vperm.xlu1 %11070, %v11828_v29   ;;  %v11829_v16 = vld [vmem:[%s12744_s27 + $0x38] sm:$0xff] }
 0x60c   : > { %4963 = vperm.xlu0 %11069, %v11829_v16  }
 0x60e   : > { %4343 = vmatmul.mubr.f32.gmra.mrb[44].mxu1 %v4077_v62 }
 0x60f   : > { %9833 = vmatprep.mubr.msk.f32.mxu1 %vm3131_vm0, %v4080_v24  ;;  %v4127_v24 = vpop.permute.xlu1 %4126 }
 0x610   : > { %11152 = vset.pattern.permute.xlu0 %v15177_v33 }
 0x612   : > { %4349 = vmatmul.mubr.f32.gmra.mrb[46].mxu1 %v4079_v21 }
 0x613   : > { %9834 = vmatprep.mubr.msk.f32.mxu1 %vm3131_vm0, %v4082_v18  ;;  %v11830_v18 = vld [vmem:[%s12744_s27 + $0x30] sm:$0xff] }
 0x614   : > { %4959 = vperm.xlu1 %11070, %v11830_v18  }
 0x616   : > { %4355 = vmatmul.mubr.f32.gmra.mrb[48].mxu1 %v4081_v12  ;;  %v4122_v12 = vpop.permute.xlu0 %4121 }
 0x617   : > { %9835 = vmatprep.mubr.msk.f32.mxu1 %vm3131_vm0, %v4084_v31 }
 0x618   : > { %11151 = vset.pattern.permute.xlu1 %v15177_v33 }
 0x61a   : > { %4361 = vmatmul.mubr.f32.gmra.mrb[50].mxu1 %v4083_v0 }
 0x61b   : > { %9836 = vmatprep.mubr.msk.f32.mxu1 %vm3131_vm0, %v4086_v42 }
 0x61e   : > { %4367 = vmatmul.mubr.f32.gmra.mrb[52].mxu1 %v4085_v20  ;;  %v4132_v20 = vpop.permute.xlu1 %4131 }
 0x61f   : > { %9837 = vmatprep.mubr.msk.f32.mxu1 %vm3131_vm0, %v4088_v17 }
 0x622   : > { %4373 = vmatmul.mubr.f32.gmra.mrb[54].mxu1 %v4087_v26  ;;  %v4157_v26 = vpop.permute.xlu0 %4156  ;;  %v4162_v45 = vpop.permute.xlu1 %4161 }
 0x623   : > { %9838 = vmatprep.mubr.msk.f32.mxu1 %vm3131_vm0, %v4090_v56 }
 0x626   : > { %4379 = vmatmul.mubr.f32.gmra.mrb[56].mxu1 %v4089_v28  ;;  %v4137_v54 = vpop.permute.xlu0 %4136 }
 0x627   : > { %9839 = vmatprep.mubr.msk.f32.mxu1 %vm3131_vm0, %v4092_v23 }
 0x62a   : > { %4385 = vmatmul.mubr.f32.gmra.mrb[58].mxu1 %v4091_v9 }
 0x62b   : > { %9840 = vmatprep.mubr.msk.f32.mxu1 %vm3131_vm0, %v4094_v1 }
 0x62e   : > { %4391 = vmatmul.mubr.f32.gmra.mrb[60].mxu1 %v4093_v41 }
 0x62f   : > { %9841 = vmatprep.mubr.msk.f32.mxu1 %vm3131_vm0, %v4096_v57 }
 0x632   : > { %4397 = vmatmul.mubr.f32.gmra.mrb[62].mxu1 %v4095_v55 }
 0x633   : > { %4725 = vmatprep.mubr.f32.mxu1 %v15128_v19 }
 0x6c9   : > { %v4308_v34 = vpop.f32.mrb[32].mxu1 }
 0x6ca   : > { %v4310_v10 = vpop.f32.mrb[33].mxu1  ;;  %v4309_v42 = vadd.f32 %v4308_v34, %v4117_v48 }
 0x6cb   : > { %v4311_v17 = vadd.f32 %v4310_v10, %v4117_v48  ;;  %v4167_v48 = vpop.permute.xlu0 %4166 }
 0x6cc   : > { %v4403_v23 = vmul.f32 0.5, %v4309_v42 }
 0x6cd   : > { %v4314_v61 = vpop.f32.mrb[34].mxu1  ;;  %v4404_v1 = vmul.f32 0.5, %v4311_v17 }
 0x6ce   : > { %v4316_v50 = vpop.f32.mrb[35].mxu1  ;;  %v4315_v9 = vadd.f32 %v4314_v61, %v4122_v12  ;;  %11495 = vtanh.f32 %v4403_v23 }
 0x6cf   : > { %v4317_v41 = vadd.f32 %v4316_v50, %v4122_v12  ;;  %11497 = vtanh.f32 %v4404_v1  ;;  %v4142_v50 = vpop.permute.xlu1 %4141 }
 0x6d0   : > { %v4405_v47 = vmul.f32 0.5, %v4315_v9 }
 0x6d1   : > { %v4320_v25 = vpop.f32.mrb[36].mxu1  ;;  %v4406_v2 = vmul.f32 0.5, %v4317_v41 }
 0x6d2   : > { %v4322_v43 = vpop.f32.mrb[37].mxu1  ;;  %v4321_v57 = vadd.f32 %v4320_v25, %v4127_v24  ;;  %11499 = vtanh.f32 %v4405_v47 }
 0x6d3   : > { %v4323_v53 = vadd.f32 %v4322_v43, %v4127_v24  ;;  %11501 = vtanh.f32 %v4406_v2  ;;  %v4172_v9 = vpop.permute.xlu1 %4171 }
 0x6d4   : > { %v4407_v27 = vmul.f32 0.5, %v4321_v57 }
 0x6d5   : > { %v4326_v62 = vpop.f32.mrb[38].mxu1  ;;  %v4408_v15 = vmul.f32 0.5, %v4323_v53 }
 0x6d6   : > { %v4328_v21 = vpop.f32.mrb[39].mxu1  ;;  %v4327_v3 = vadd.f32 %v4326_v62, %v4132_v20  ;;  %11503 = vtanh.f32 %v4407_v27 }
 0x6d7   : > { %v4329_v34 = vadd.f32 %v4328_v21, %v4132_v20  ;;  %11505 = vtanh.f32 %v4408_v15 }
 0x6d8   : > { %v4409_v39 = vmul.f32 0.5, %v4327_v3  ;;  %v11496_v21 = vpop.eup %11495 }
 0x6d9   : > { %v4332_v31 = vpop.f32.mrb[40].mxu1  ;;  %v4410_v25 = vmul.f32 0.5, %v4329_v34  ;;  %v11498_v42 = vpop.eup %11497  ;;  %v4435_v57 = vadd.f32 1.0, %v11496_v21 }
 0x6da   : > { %v4334_v0 = vpop.f32.mrb[41].mxu1  ;;  %v4333_v61 = vadd.f32 %v4332_v31, %v4137_v54  ;;  %11507 = vtanh.f32 %v4409_v39 }
 0x6db   : > { %v4335_v43 = vadd.f32 %v4334_v0, %v4137_v54  ;;  %v4147_v0 = vpop.permute.xlu0 %4146 }
 0x6dc   : > { %v4411_v62 = vmul.f32 0.5, %v4333_v61  ;;  %v11500_v53 = vpop.eup %11499  ;;  %v4451_v61 = vmul.f32 0.5, %v4435_v57 }
 0x6dd   : > { %v4338_v56 = vpop.f32.mrb[42].mxu1  ;;  %v4412_v31 = vmul.f32 0.5, %v4335_v43  ;;  %v11502_v47 = vpop.eup %11501 }
 0x6de   : > { %v4340_v28 = vpop.f32.mrb[43].mxu1  ;;  %v4339_v24 = vadd.f32 %v4338_v56, %v4142_v50  ;;  %v4436_v56 = vadd.f32 1.0, %v11498_v42  ;;  %v4152_v43 = vpop.permute.xlu1 %4151 }
 0x6df   : > { %v4341_v20 = vadd.f32 %v4340_v28, %v4142_v50 }
 0x6e0   : > { %v4413_v1 = vmul.f32 0.5, %v4339_v24  ;;  %v11504_v28 = vpop.eup %11503  ;;  %v4452_v50 = vmul.f32 0.5, %v4436_v56 }
 0x6e1   : > { %v4344_v55 = vpop.f32.mrb[44].mxu1  ;;  %v4414_v3 = vmul.f32 0.5, %v4341_v20  ;;  %v11506_v39 = vpop.eup %11505  ;;  %v4439_v20 = vadd.f32 1.0, %v11504_v28 }
 0x6e2   : > { %v4346_v38 = vpop.f32.mrb[45].mxu1  ;;  %v4345_v54 = vadd.f32 %v4344_v55, %v4147_v0 }
 0x6e3   : > { %v4347_v15 = vadd.f32 %v4346_v38, %v4147_v0  ;;  %v4440_v0 = vadd.f32 1.0, %v11506_v39 }
 0x6e5   : > { %v13942_v11 = vpop.f32.mrb[46].mxu1  ;;  %v4416_v38 = vmul.f32 0.5, %v4347_v15 }
 0x6e6   : > { %v13944_v10 = vpop.f32.mrb[47].mxu1  ;;  %v4351_v55 = vadd.f32 %v13942_v11, %v4152_v43 }
 0x6e8   : > { %v4417_v56 = vmul.f32 0.5, %v4351_v55 }
 0x6e9   : > { %v4356_v13 = vpop.f32.mrb[48].mxu1 }
 0x6ea   : > { %v4357_v29 = vadd.f32 %v4356_v13, %v4157_v26  ;;  %v4358_v16 = vpop.f32.mrb[49].mxu1  ;;  %v4437_v13 = vadd.f32 1.0, %v11500_v53 }
 0x6eb   : > { %v4359_v18 = vadd.f32 %v4358_v16, %v4157_v26 }
 0x6ec   : > { %11509 = vtanh.f32 %v4357_v29 }
 0x6ed   : > { %11511 = vtanh.f32 %v4359_v18  ;;  %v4362_v12 = vpop.f32.mrb[50].mxu1 }
 0x6ee   : > { %11513 = vtanh.f32 %v4410_v25  ;;  %v4363_v17 = vadd.f32 %v4362_v12, %v4162_v45  ;;  %v4364_v23 = vpop.f32.mrb[51].mxu1  ;;  %v4438_v25 = vadd.f32 1.0, %v11502_v47 }
 0x6ef   : > { %11515 = vtanh.f32 %v4411_v62  ;;  %v4365_v41 = vadd.f32 %v4364_v23, %v4162_v45  ;;  %v11508_v45 = vpop.eup %11507  ;;  %v4415_v62 = vmul.f32 0.5, %v4345_v54 }
 0x6f0   : > { %11517 = vtanh.f32 %v4363_v17  ;;  %v4454_v11 = vmul.f32 0.5, %v4438_v25  ;;  %v4441_v39 = vadd.f32 1.0, %v11508_v45 }
 0x6f1   : > { %11519 = vtanh.f32 %v4365_v41  ;;  %v4368_v26 = vpop.f32.mrb[52].mxu1  ;;  %v4177_v41 = vpop.permute.xlu0 %4176 }
 0x6f2   : > { %11521 = vtanh.f32 %v4412_v31  ;;  %v4369_v2 = vadd.f32 %v4368_v26, %v4167_v48  ;;  %v4370_v27 = vpop.f32.mrb[53].mxu1 }
 0x6f3   : > { %11523 = vtanh.f32 %v4413_v1  ;;  %v4371_v34 = vadd.f32 %v4370_v27, %v4167_v48  ;;  %v4353_v48 = vadd.f32 %v13944_v10, %v4152_v43  ;;  %v4453_v1 = vmul.f32 0.5, %v4437_v13 }
 0x6f4   : > { %11525 = vtanh.f32 %v4369_v2  ;;  %v4455_v27 = vmul.f32 0.5, %v4439_v20 }
 0x6f5   : > { %11527 = vtanh.f32 %v4371_v34  ;;  %v4374_v29 = vpop.f32.mrb[54].mxu1  ;;  %v4418_v10 = vmul.f32 0.5, %v4353_v48  ;;  %v4456_v34 = vmul.f32 0.5, %v4440_v0  ;;  %v4457_v48 = vmul.f32 0.5, %v4441_v39 }
 0x6f6   : > { %v11510_v16 = vpop.eup %11509  ;;  %11529 = vtanh.f32 %v4414_v3  ;;  %v4375_v24 = vadd.f32 %v4374_v29, %v4172_v9  ;;  %v4376_v18 = vpop.f32.mrb[55].mxu1 }
 0x6f7   : > { %v11512_v21 = vpop.eup %11511  ;;  %v4377_v12 = vadd.f32 %v4376_v18, %v4172_v9  ;;  %v4483_v42 = vmul.f32 %v11510_v16, %v4451_v61  ;;  %v4182_v61 = vpop.permute.xlu1 %4181 }
 0x6f8   : > { %v11514_v31 = vpop.eup %11513  ;;  %11531 = vtanh.f32 %v4375_v24  ;;  %v4484_v17 = vmul.f32 %v11512_v21, %v4452_v50 }
 0x6f9   : > { %v11516_v23 = vpop.eup %11515  ;;  %11533 = vtanh.f32 %v4377_v12  ;;  %v4380_v57 = vpop.f32.mrb[56].mxu1  ;;  %v4442_v43 = vadd.f32 1.0, %v11514_v31 }
 0x6fa   : > { %v11518_v53 = vpop.eup %11517  ;;  %11535 = vtanh.f32 %v4415_v62  ;;  %v4381_v26 = vadd.f32 %v4380_v57, %v4177_v41  ;;  %v4382_v47 = vpop.f32.mrb[57].mxu1  ;;  %v4443_v45 = vadd.f32 1.0, %v11516_v23 }
 0x6fb   : > { %v11520_v3 = vpop.eup %11519  ;;  %11537 = vtanh.f32 %v4416_v38  ;;  %v4383_v9 = vadd.f32 %v4382_v47, %v4177_v41  ;;  %v4485_v54 = vmul.f32 %v11518_v53, %v4453_v1  ;;  %v4187_v12 = vpop.permute.xlu0 %4186  ;;  %v4458_v31 = vmul.f32 0.5, %v4442_v43 }
 0x6fc   : > { %v11522_v2 = vpop.eup %11521  ;;  %11539 = vtanh.f32 %v4381_v26  ;;  %v4486_v28 = vmul.f32 %v11520_v3, %v4454_v11  ;;  %v4459_v47 = vmul.f32 0.5, %v4443_v45  ;;  %v4192_v3 = vpop.permute.xlu1 %4191 }
 0x6fd   : > { %v11524_v15 = vpop.eup %11523  ;;  %11541 = vtanh.f32 %v4383_v9  ;;  %v4386_v50 = vpop.f32.mrb[58].mxu1  ;;  %v10229_v13 = vpack.c.bf16 %v4485_v54, %v4483_v42  ;;  %v4444_v1 = vadd.f32 1.0, %v11522_v2 }
 0x6fe   : > { %v11526_v25 = vpop.eup %11525  ;;  %11543 = vtanh.f32 %v4417_v56  ;;  %v4387_v29 = vadd.f32 %v4386_v50, %v4182_v61  ;;  %v4388_v16 = vpop.f32.mrb[59].mxu1  ;;  %v10227_v62 = vpack.c.bf16 %v4486_v28, %v4484_v17 }
 0x6ff   : > { %v11528_v55 = vpop.eup %11527  ;;  %11545 = vtanh.f32 %v4418_v10  ;;  %v4389_v24 = vadd.f32 %v4388_v16, %v4182_v61  ;;  %v4487_v18 = vmul.f32 %v11526_v25, %v4455_v27  ;;  %v4445_v10 = vadd.f32 1.0, %v11524_v15 }
 0x700   : > { %v11530_v21 = vpop.eup %11529  ;;  %11547 = vtanh.f32 %v4387_v29  ;;  %10228 = vmatprep.subr.bf16.mxu1 %v10227_v62  ;;  %v4488_v38 = vmul.f32 %v11528_v55, %v4456_v34  ;;  %v4460_v27 = vmul.f32 0.5, %v4444_v1 }
 0x701   : > { %11549 = vtanh.f32 %v4389_v24  ;;  %v4392_v20 = vpop.f32.mrb[60].mxu1  ;;  %10230 = vmatpush1.bf16.msra.mxu1 %v10229_v13  ;;  %v4446_v28 = vadd.f32 1.0, %v11530_v21  ;;  %v4461_v16 = vmul.f32 0.5, %v4445_v10 }
 0x702   : > { %v11532_v42 = vpop.eup %11531  ;;  %v4393_v0 = vadd.f32 %v4392_v20, %v4187_v12  ;;  %v4394_v41 = vpop.f32.mrb[61].mxu1 }
 0x703   : > { %v11534_v17 = vpop.eup %11533  ;;  %v4395_v57 = vadd.f32 %v4394_v41, %v4187_v12  ;;  %v4489_v53 = vmul.f32 %v11532_v42, %v4457_v48  ;;  %v4462_v55 = vmul.f32 0.5, %v4446_v28  ;;  %v4504_v28 = vld [vmem:[#allocation16 + $0xa0] sm:$0xff] }
 0x704   : > { %v11536_v11 = vpop.eup %11535  ;;  %11551 = vtanh.f32 %v4393_v0  ;;  %v4490_v56 = vmul.f32 %v11534_v17, %v4458_v31 }
 0x705   : > { %v11538_v26 = vpop.eup %11537  ;;  %11553 = vtanh.f32 %v4395_v57  ;;  %v4398_v23 = vpop.f32.mrb[62].mxu1  ;;  %v10233_v9 = vpack.c.bf16 %v4489_v53, %v4487_v18  ;;  %v4447_v62 = vadd.f32 1.0, %v11536_v11 }
 0x706   : > { %v11540_v54 = vpop.eup %11539  ;;  %v4399_v34 = vadd.f32 %v4398_v23, %v4192_v3  ;;  %v4400_v2 = vpop.f32.mrb[63].mxu1  ;;  %v10231_v39 = vpack.c.bf16 %v4490_v56, %v4488_v38  ;;  %v4448_v24 = vadd.f32 1.0, %v11538_v26  ;;  %v4500_v23 = vld [vmem:[#allocation16 + $0x80] sm:$0xff] }
 0x707   : > { %v11542_v61 = vpop.eup %11541  ;;  %v4401_v50 = vadd.f32 %v4400_v2, %v4192_v3  ;;  %v4491_v13 = vmul.f32 %v11540_v54, %v4459_v47  ;;  %v4463_v45 = vmul.f32 0.5, %v4447_v62  ;;  %v4502_v54 = vld [vmem:[#allocation16 + $0x90] sm:$0xff] }
 0x708   : > { %v11544_v25 = vpop.eup %11543  ;;  %11555 = vtanh.f32 %v4399_v34  ;;  %10232 = vmatprep.subr.bf16.mxu1 %v10231_v39  ;;  %v4492_v43 = vmul.f32 %v11542_v61, %v4460_v27  ;;  %v4464_v42 = vmul.f32 0.5, %v4448_v24  ;;  %v4503_v27 = vld [vmem:[#allocation16 + $0x98] sm:$0xff]  ;;  %v4505_v34 = vld [vmem:[#allocation16 + $0xa8] sm:$0xff]  ;;  %v4506_v2 = vld [vmem:[#allocation16 + $0xb0] sm:$0xff]  ;;  %v4541_v61 = vpop.permute.xlu1 %4540 }
 0x709   : > { %v11546_v29 = vpop.eup %11545  ;;  %11557 = vtanh.f32 %v4401_v50  ;;  %10234 = vmatpush1.bf16.msra.mxu1 %v10233_v9  ;;  %v4449_v38 = vadd.f32 1.0, %v11544_v25  ;;  %v4501_v9 = vld [vmem:[#allocation16 + $0x88] sm:$0xff]  ;;  %v4507_v39 = vld [vmem:[#allocation16 + $0xb8] sm:$0xff] }
 0x70a   : > { %v11548_v15 = vpop.eup %11547  ;;  %v4450_v31 = vadd.f32 1.0, %v11546_v29 }
 0x70b   : > { %v11550_v18 = vpop.eup %11549  ;;  %v4493_v21 = vmul.f32 %v11548_v15, %v4461_v16  ;;  %v4465_v57 = vmul.f32 0.5, %v4449_v38 }
 0x70c   : > { %v4494_v48 = vmul.f32 %v11550_v18, %v4462_v55  ;;  %v4466_v11 = vmul.f32 0.5, %v4450_v31  ;;  %v4551_v50 = vpop.permute.xlu1 %4550 }
 0x70d   : > { %v10237_v12 = vpack.c.bf16 %v4493_v21, %v4491_v13  ;;  %v4936_v13 = vpop.permute.xlu0 %4935 }
 0x70e   : > { %v11552_v20 = vpop.eup %11551  ;;  %v10235_v1 = vpack.c.bf16 %v4494_v48, %v4492_v43 }
 0x70f   : > { %v11554_v0 = vpop.eup %11553  ;;  %v4495_v41 = vmul.f32 %v11552_v20, %v4463_v45 }
 0x710   : > { %10236 = vmatprep.subr.bf16.mxu1 %v10235_v1  ;;  %v4496_v17 = vmul.f32 %v11554_v0, %v4464_v42  ;;  %v4940_v25 = vpop.permute.xlu1 %4939 }
 0x711   : > { %10238 = vmatpush1.bf16.msra.mxu1 %v10237_v12  ;;  %v4536_v43 = vpop.permute.xlu0 %4535 }
 0x712   : > { %v11556_v53 = vpop.eup %11555 }
 0x713   : > { %v11558_v56 = vpop.eup %11557  ;;  %v4497_v26 = vmul.f32 %v11556_v53, %v4465_v57 }
 0x714   : > { %v4498_v47 = vmul.f32 %v11558_v56, %v4466_v11  ;;  %v4556_v29 = vpop.permute.xlu1 %4555 }
 0x715   : > { %v10241_v3 = vpack.c.bf16 %v4497_v26, %v4495_v41  ;;  %v4546_v18 = vpop.permute.xlu0 %4545 }
 0x716   : > { %v10239_v10 = vpack.c.bf16 %v4498_v47, %v4496_v17 }
 0x718   : > { %10240 = vmatprep.subr.bf16.mxu1 %v10239_v10  ;;  %v4944_v45 = vpop.permute.xlu1 %4943 }
 0x719   : > { %10242 = vmatpush1.bf16.msra.mxu1 %v10241_v3  ;;  %v4561_v11 = vpop.permute.xlu0 %4560 }
 0x71c   : > { %9842 = vmatmul.mubr.msk.f32.vlgmr.msra.gmra.mrb[64].mxu1 %vm3131_vm0, %v4500_v23  ;;  %v4948_v3 = vpop.permute.xlu1 %4947 }
 0x71d   : > { %4731 = vmatprep.mubr.f32.mxu1 %v15128_v19 }
 0x720   : > { %9843 = vmatmul.mubr.msk.f32.gmra.mrb[66].mxu1 %vm3131_vm0, %v4501_v9 }
 0x721   : > { %4737 = vmatprep.mubr.f32.mxu1 %v15128_v19 }
 0x724   : > { %9844 = vmatmul.mubr.msk.f32.gmra.mrb[68].mxu1 %vm3131_vm0, %v4502_v54 }
 0x725   : > { %4743 = vmatprep.mubr.f32.mxu1 %v15128_v19 }
 0x728   : > { %9845 = vmatmul.mubr.msk.f32.gmra.mrb[70].mxu1 %vm3131_vm0, %v4503_v27 }
 0x729   : > { %4749 = vmatprep.mubr.f32.mxu1 %v15128_v19 }
 0x72c   : > { %9846 = vmatmul.mubr.msk.f32.gmra.mrb[72].mxu1 %vm3131_vm0, %v4504_v28 }
 0x72d   : > { %4755 = vmatprep.mubr.f32.mxu1 %v15128_v19 }
 0x730   : > { %9847 = vmatmul.mubr.msk.f32.gmra.mrb[74].mxu1 %vm3131_vm0, %v4505_v34 }
 0x731   : > { %4761 = vmatprep.mubr.f32.mxu1 %v15128_v19 }
 0x734   : > { %9848 = vmatmul.mubr.msk.f32.gmra.mrb[76].mxu1 %vm3131_vm0, %v4506_v2 }
 0x735   : > { %4767 = vmatprep.mubr.f32.mxu1 %v15128_v19 }
 0x738   : > { %9849 = vmatmul.mubr.msk.f32.gmra.mrb[78].mxu1 %vm3131_vm0, %v4507_v39 }
 0x739   : > { %4773 = vmatprep.mubr.f32.mxu1 %v15128_v19 }
 0x7ef   : > { %v4727_v16 = vpop.f32.mrb[64].mxu1 }
 0x7f0   : > { %v4728_v62 = vadd.f32 %v4727_v16, %v4536_v43  ;;  %v4729_v15 = vpop.f32.mrb[65].mxu1 }
 0x7f1   : > { %v4730_v55 = vadd.f32 %v4729_v15, %v4536_v43 }
 0x7f2   : > { %v4822_v24 = vadd.f32 %v4728_v62, %v13676_v6 }
 0x7f3   : > { %v4823_v21 = vadd.f32 %v4730_v55, %v13678_v8  ;;  %v4733_v48 = vpop.f32.mrb[66].mxu1 }
 0x7f4   : > { %v13966_v38 = vmul.f32 0.70710677, %v4822_v24  ;;  %v4734_v12 = vadd.f32 %v4733_v48, %v4541_v61  ;;  %v4735_v20 = vpop.f32.mrb[67].mxu1 }
 0x7f5   : > { %v13968_v42 = vmul.f32 0.70710677, %v4823_v21  ;;  %v4736_v31 = vadd.f32 %v4735_v20, %v4541_v61 }
 0x7f6   : > { %v13971_v1 = vadd.f32 %v4936_v13, %v13966_v38  ;;  %v4824_v0 = vadd.f32 %v4734_v12, %v13688_v22 }
 0x7f7   : > { %v13975_v41 = vadd.f32 %v4936_v13, %v13968_v42  ;;  %v4825_v6 = vadd.f32 %v4736_v31, %v13690_v32  ;;  %v4739_v8 = vpop.f32.mrb[68].mxu1  ;;  %v4566_v13 = vpop.permute.xlu0 %4565 }
 0x7f8   : > { %v13978_v17 = vmul.f32 0.70710677, %v4824_v0  ;;  %v4740_v57 = vadd.f32 %v4739_v8, %v4546_v18  ;;  %v4741_v53 = vpop.f32.mrb[69].mxu1 }
 0x7f9   : > { %v13980_v56 = vmul.f32 0.70710677, %v4825_v6  ;;  %v4742_v26 = vadd.f32 %v4741_v53, %v4546_v18  ;;  %v13984_v47 = vpack.i.bf16 %v13975_v41, %v13971_v1 }
 0x7fa   : > { %v13987_v22 = vadd.f32 %v4940_v25, %v13978_v17  ;;  %v4826_v10 = vadd.f32 %v4740_v57, %v13706_v63 }
 0x7fb   : > { %v13991_v32 = vadd.f32 %v4940_v25, %v13980_v56  ;;  %v4827_v23 = vadd.f32 %v4742_v26, %v13710_v14  ;;  %v4745_v9 = vpop.f32.mrb[70].mxu1  ;;  %11072 = vrot.lane.b32.xlu1 %v13984_v47, %s12283_s20  ;;  %v4952_v31 = vpop.permute.xlu0 %4951 }
 0x7fc   : > { %v13996_v54 = vmul.f32 0.70710677, %v4826_v10  ;;  %v4746_v27 = vadd.f32 %v4745_v9, %v4551_v50  ;;  %v4747_v28 = vpop.f32.mrb[71].mxu1  ;;  %v10265_v34 = vpack.c.bf16 %v13987_v22, %v13971_v1 }
 0x7fd   : > { %v14000_v2 = vmul.f32 0.70710677, %v4827_v23  ;;  %v4748_v63 = vadd.f32 %v4747_v28, %v4551_v50  ;;  %v14004_v39 = vpack.i.bf16 %v13991_v32, %v13987_v22  ;;  %v10263_v25 = vpack.c.bf16 %v13991_v32, %v13975_v41  ;;  %v4571_v50 = vpop.permute.xlu1 %4570 }
 0x7fe   : > { %v4828_v14 = vadd.f32 %v4746_v27, %v13728_v44  ;;  %v14008_v61 = vadd.f32 %v4944_v45, %v13996_v54 }
 0x7ff   : > { %v14013_v43 = vadd.f32 %v4944_v45, %v14000_v2  ;;  %v4829_v16 = vadd.f32 %v4748_v63, %v13730_v46  ;;  %v4751_v62 = vpop.f32.mrb[72].mxu1  ;;  %11077 = vrot.lane.b32.xlu0 %v14004_v39, %s12283_s20 }
 0x800   : > { %v14018_v15 = vmul.f32 0.70710677, %v4828_v14  ;;  %v4752_v44 = vadd.f32 %v4751_v62, %v4556_v29  ;;  %v4753_v55 = vpop.f32.mrb[73].mxu1 }
 0x801   : > { %v14020_v24 = vmul.f32 0.70710677, %v4829_v16  ;;  %v4754_v18 = vadd.f32 %v4753_v55, %v4556_v29  ;;  %v11081_v21 = vpack.i.bf16 %v14013_v43, %v14008_v61  ;;  %v4956_v26 = vpop.permute.xlu1 %4955 }
 0x802   : > { %v4830_v48 = vadd.f32 %v4752_v44, %v13746_v4  ;;  %v14026_v45 = vadd.f32 %v4948_v3, %v14018_v15 }
 0x803   : > { %v14029_v46 = vadd.f32 %v4948_v3, %v14020_v24  ;;  %v4831_v12 = vadd.f32 %v4754_v18, %v13750_v51  ;;  %v4757_v20 = vpop.f32.mrb[74].mxu1  ;;  %11082 = vrot.lane.b32.xlu1 %v11081_v21, %s12283_s20 }
 0x804   : > { %v14033_v0 = vmul.f32 0.70710677, %v4830_v48  ;;  %v4758_v29 = vadd.f32 %v4757_v20, %v4561_v11  ;;  %v4759_v6 = vpop.f32.mrb[75].mxu1  ;;  %v10269_v8 = vpack.c.bf16 %v14026_v45, %v14008_v61 }
 0x805   : > { %v14037_v4 = vmul.f32 0.70710677, %v4831_v12  ;;  %v4760_v57 = vadd.f32 %v4759_v6, %v4561_v11  ;;  %v11086_v53 = vpack.i.bf16 %v14029_v46, %v14026_v45  ;;  %v10267_v10 = vpack.c.bf16 %v14029_v46, %v14013_v43  ;;  %v4960_v48 = vpop.permute.xlu1 %4959  ;;  %v8319_v43 = vld [vmem:[#allocation13 + $0x520] sm:$0xff] }
 0x806   : > { %v4832_v51 = vadd.f32 %v4758_v29, %v13765_v49  ;;  %v14043_v3 = vadd.f32 %v4952_v31, %v14033_v0 }
 0x807   : > { %v4833_v23 = vadd.f32 %v4760_v57, %v13767_v35  ;;  %v14049_v9 = vadd.f32 %v4952_v31, %v14037_v4  ;;  %v4763_v27 = vpop.f32.mrb[76].mxu1  ;;  %11087 = vrot.lane.b32.xlu0 %v11086_v53, %s12283_s20 }
 0x808   : > { %v14052_v11 = vmul.f32 0.70710677, %v4832_v51  ;;  %v4764_v28 = vadd.f32 %v4763_v27, %v4566_v13  ;;  %v4765_v63 = vpop.f32.mrb[77].mxu1 }
 0x809   : > { %v14054_v14 = vmul.f32 0.70710677, %v4833_v23  ;;  %v4766_v49 = vadd.f32 %v4765_v63, %v4566_v13  ;;  %v11091_v16 = vpack.i.bf16 %v14049_v9, %v14043_v3 }
 0x80a   : > { %v4834_v62 = vadd.f32 %v4764_v28, %v13780_v60  ;;  %v14060_v35 = vadd.f32 %v4956_v26, %v14052_v11  ;;  %v4964_v28 = vpop.permute.xlu0 %4963 }
 0x80b   : > { %v4835_v44 = vadd.f32 %v4766_v49, %v13784_v5  ;;  %v14064_v55 = vadd.f32 %v4956_v26, %v14054_v14  ;;  %v4769_v18 = vpop.f32.mrb[78].mxu1  ;;  %11092 = vrot.lane.b32.xlu1 %v11091_v16, %s12283_s20 }
 0x80c   : > { %v14067_v12 = vmul.f32 0.70710677, %v4834_v62  ;;  %v4770_v13 = vadd.f32 %v4769_v18, %v4571_v50  ;;  %v4771_v20 = vpop.f32.mrb[79].mxu1  ;;  %v10273_v31 = vpack.c.bf16 %v14060_v35, %v14043_v3  ;;  %v5130_v18 = vld [vmem:[#allocation13 + $0x208] sm:$0xff] }
 0x80d   : > { %v14071_v60 = vmul.f32 0.70710677, %v4835_v44  ;;  %v4772_v29 = vadd.f32 %v4771_v20, %v4571_v50  ;;  %v11096_v5 = vpack.i.bf16 %v14064_v55, %v14060_v35  ;;  %v10271_v26 = vpack.c.bf16 %v14064_v55, %v14049_v9  ;;  %9882 = vmatprep.mubr.msk.f32.mxu0 %vm3131_vm0, %v5130_v18  ;;  %v5165_v18 = vld [vmem:[#allocation14 + $0x118] sm:$0xff] }
 0x80e   : > { %v4836_v6 = vadd.f32 %v4770_v13, %v13799_v36  ;;  %v14077_v57 = vadd.f32 %v4960_v48, %v14067_v12 }
 0x80f   : > { %v4837_v51 = vadd.f32 %v4772_v29, %v13801_v52  ;;  %v14083_v23 = vadd.f32 %v4960_v48, %v14071_v60  ;;  %11097 = vrot.lane.b32.xlu0 %v11096_v5, %s12283_s20 }
 0x810   : > { %v14086_v27 = vmul.f32 0.70710677, %v4836_v6 }
 0x811   : > { %v14088_v50 = vmul.f32 0.70710677, %v4837_v51  ;;  %v11101_v36 = vpack.i.bf16 %v14083_v23, %v14077_v57 }
 0x812   : > { %v14093_v63 = vadd.f32 %v4964_v28, %v14086_v27 }
 0x813   : > { %v14096_v49 = vadd.f32 %v4964_v28, %v14088_v50  ;;  %11102 = vrot.lane.b32.xlu1 %v11101_v36, %s12283_s20 }
 0x814   : > { %v15183_v9 = vpack.c.bf16 %v14093_v63, %v14077_v57 }
 0x815   : > { %v11106_v62 = vpack.i.bf16 %v14096_v49, %v14093_v63 }
 0x817   : > { %11107 = vrot.lane.b32.xlu0 %v11106_v62, %s12283_s20  ;;  %11112 = vrot.lane.b32.xlu1 %v13984_v47, %s12284_s16  ;;  %v5162_v47 = vld [vmem:[#allocation14 + $0x100] sm:$0xff] }
 0x81b   : > { %11117 = vrot.lane.b32.xlu0 %v14004_v39, %s12284_s16  ;;  %11122 = vrot.lane.b32.xlu1 %v11081_v21, %s12284_s16  ;;  %v5163_v39 = vld [vmem:[#allocation14 + $0x108] sm:$0xff] }
 0x81f   : > { %11127 = vrot.lane.b32.xlu0 %v11086_v53, %s12284_s16  ;;  %11132 = vrot.lane.b32.xlu1 %v11091_v16, %s12284_s16  ;;  %v5164_v53 = vld [vmem:[#allocation14 + $0x110] sm:$0xff] }
 0x823   : > { %11137 = vrot.lane.b32.xlu0 %v11096_v5, %s12284_s16  ;;  %11142 = vrot.lane.b32.xlu1 %v11101_v36, %s12284_s16  ;;  %v5170_v5 = vld [vmem:[#allocation14 + $0x140] sm:$0xff] }
 0x827   : > { %11147 = vrot.lane.b32.xlu0 %v11106_v62, %s12284_s16  ;;  %5180 = vperm.xlu1 %11151, %v5162_v47   ;;  %v5166_v47 = vld [vmem:[#allocation14 + $0x120] sm:$0xff]  ;;  %v7718_v62 = vld [vmem:[#allocation17 + $0x268] sm:$0xff] }
 0x82b   : > { %5185 = vperm.xlu0 %11152, %v5163_v39   ;;  %5190 = vperm.xlu1 %11151, %v5164_v53  }
 0x82f   : > { %5220 = vperm.xlu0 %11152, %v5170_v5   ;;  %5195 = vperm.xlu1 %11151, %v5165_v18   ;;  %v5167_v5 = vld [vmem:[#allocation14 + $0x128] sm:$0xff] }
 0x833   : > { %5200 = vperm.xlu0 %11152, %v5166_v47  }
 0x86d   : > { %v11073_v48 = vpop.permute.xlu1 %11072 }
 0x86e   : > { %v11075_v13 = vunpack.i.h.bf16 %v11073_v48  ;;  %v11074_v20 = vunpack.i.l.bf16 %v11073_v48 }
 0x870   : > { %v5031_v6 = vsel %vm5030_vm11, %v11074_v20, %v11075_v13 }
 0x871   : > { %v11078_v21 = vpop.permute.xlu0 %11077 }
 0x872   : > { %v11080_v16 = vunpack.i.h.bf16 %v11078_v21  ;;  %v11079_v29 = vunpack.i.l.bf16 %v11078_v21 }
 0x874   : > { %v5032_v51 = vsel %vm5030_vm11, %v11079_v29, %v11080_v16  ;;  %v10245_v48 = vpack.c.bf16 %v11079_v29, %v11074_v20  ;;  %v5171_v16 = vld [vmem:[#allocation14 + $0x148] sm:$0xff] }
 0x875   : > { %v11083_v28 = vpop.permute.xlu1 %11082  ;;  %v10243_v36 = vpack.c.bf16 %v5032_v51, %v5031_v6  ;;  %v5172_v51 = vld [vmem:[#allocation14 + $0x150] sm:$0xff]  ;;  %5225 = vperm.xlu1 %11151, %v5171_v16  }
 0x876   : > { %v11085_v39 = vunpack.i.h.bf16 %v11083_v28  ;;  %v11084_v21 = vunpack.i.l.bf16 %v11083_v28  ;;  %5230 = vperm.xlu0 %11152, %v5172_v51  }
 0x877   : > { %10244 = vmatprep.subr.bf16.mxu0 %v10243_v36  ;;  %v5168_v36 = vld [vmem:[#allocation14 + $0x130] sm:$0xff] }
 0x878   : > { %10247 = vmatpush1.bf16.msk.msra.mxu0 %vm14120_vm13, %v10245_v48  ;;  %v5033_v19 = vsel %vm5030_vm11, %v11084_v21, %v11085_v39 }
 0x879   : > { %v11088_v13 = vpop.permute.xlu0 %11087  ;;  %5205 = vperm.xlu1 %11151, %v5167_v5  }
 0x87a   : > { %v11090_v53 = vunpack.i.h.bf16 %v11088_v13  ;;  %v11089_v6 = vunpack.i.l.bf16 %v11088_v13  ;;  %v5173_v13 = vld [vmem:[#allocation14 + $0x158] sm:$0xff]  ;;  %5210 = vperm.xlu0 %11152, %v5168_v36   ;;  %v5175_v36 = vld [vmem:[#allocation14 + $0x168] sm:$0xff] }
 0x87c   : > { %v5034_v52 = vsel %vm5030_vm11, %v11089_v6, %v11090_v53  ;;  %v10250_v28 = vpack.c.bf16 %v11089_v6, %v11084_v21  ;;  %v5174_v53 = vld [vmem:[#allocation14 + $0x160] sm:$0xff]  ;;  %v5169_v6 = vld [vmem:[#allocation14 + $0x138] sm:$0xff] }
 0x87d   : > { %v11093_v20 = vpop.permute.xlu1 %11092  ;;  %v10248_v29 = vpack.c.bf16 %v5034_v52, %v5033_v19  ;;  %5235 = vperm.xlu1 %11151, %v5173_v13  }
 0x87e   : > { %v11095_v48 = vunpack.i.h.bf16 %v11093_v20  ;;  %v11094_v18 = vunpack.i.l.bf16 %v11093_v20  ;;  %5240 = vperm.xlu0 %11152, %v5174_v53   ;;  %v5176_v20 = vld [vmem:[#allocation14 + $0x170] sm:$0xff] }
 0x87f   : > { %10249 = vmatprep.subr.bf16.mxu0 %v10248_v29 }
 0x880   : > { %10252 = vmatpush1.bf16.msk.msra.mxu0 %vm14120_vm13, %v10250_v28  ;;  %v5035_v16 = vsel %vm5030_vm11, %v11094_v18, %v11095_v48 }
 0x881   : > { %v11098_v47 = vpop.permute.xlu0 %11097  ;;  %5215 = vperm.xlu1 %11151, %v5169_v6  }
 0x882   : > { %v11100_v39 = vunpack.i.h.bf16 %v11098_v47  ;;  %v11099_v44 = vunpack.i.l.bf16 %v11098_v47  ;;  %5250 = vperm.xlu0 %11152, %v5176_v20  }
 0x884   : > { %v5036_v19 = vsel %vm5030_vm11, %v11099_v44, %v11100_v39  ;;  %v10255_v51 = vpack.c.bf16 %v11099_v44, %v11094_v18  ;;  %v5177_v44 = vld [vmem:[#allocation14 + $0x178] sm:$0xff] }
 0x885   : > { %v11103_v52 = vpop.permute.xlu1 %11102  ;;  %v10253_v21 = vpack.c.bf16 %v5036_v19, %v5035_v16  ;;  %5245 = vperm.xlu1 %11151, %v5175_v36   ;;  %v5582_v16 = vld [vmem:[#allocation17 + $0x108] sm:$0xff] }
 0x886   : > { %v11105_v29 = vunpack.i.h.bf16 %v11103_v52  ;;  %v11104_v5 = vunpack.i.l.bf16 %v11103_v52 }
 0x887   : > { %10254 = vmatprep.subr.bf16.mxu0 %v10253_v21  ;;  %v5584_v21 = vld [vmem:[#allocation17 + $0x118] sm:$0xff] }
 0x888   : > { %10257 = vmatpush1.bf16.msk.msra.mxu0 %vm14120_vm13, %v10255_v51  ;;  %v5037_v13 = vsel %vm5030_vm11, %v11104_v5, %v11105_v29 }
 0x889   : > { %v11108_v28 = vpop.permute.xlu0 %11107  ;;  %5255 = vperm.xlu1 %11151, %v5177_v44   ;;  %v11113_v52 = vpop.permute.xlu1 %11112 }
 0x88a   : > { %v11110_v48 = vunpack.i.h.bf16 %v11108_v28  ;;  %v11109_v47 = vunpack.i.l.bf16 %v11108_v28  ;;  %v11115_v22 = vunpack.i.h.bf16 %v11113_v52 }
 0x88c   : > { %v5038_v39 = vsel %vm5030_vm11, %v11109_v47, %v11110_v48  ;;  %v10260_v18 = vpack.c.bf16 %v11109_v47, %v11104_v5 }
 0x88d   : > { %v10258_v53 = vpack.c.bf16 %v5038_v39, %v5037_v13  ;;  %v11118_v19 = vpop.permute.xlu0 %11117  ;;  %5604 = vperm.xlu1 %11151, %v5582_v16   ;;  %v11123_v41 = vpop.permute.xlu1 %11122 }
 0x88e   : > { %v11120_v32 = vunpack.i.h.bf16 %v11118_v19  ;;  %v11119_v1 = vunpack.i.l.bf16 %v11118_v19  ;;  %v11125_v55 = vunpack.i.h.bf16 %v11123_v41 }
 0x88f   : > { %10259 = vmatprep.subr.bf16.mxu0 %v10258_v53 }
 0x890   : > { %10262 = vmatpush1.bf16.msk.msra.mxu0 %vm14120_vm13, %v10260_v18  ;;  %v5097_v45 = vsel %vm5095_vm14, %v11119_v1, %v11120_v32  ;;  %v10279_v46 = vpack.c.bf16 %v11120_v32, %v11115_v22  ;;  %v5132_v32 = vld [vmem:[#allocation13 + $0x218] sm:$0xff]  ;;  %v5131_v1 = vld [vmem:[#allocation13 + $0x210] sm:$0xff] }
 0x891   : > { %10264 = vmatprep.subr.bf16.mxu0 %v10263_v25  ;;  %v11128_v6 = vpop.permute.xlu0 %11127  ;;  %5614 = vperm.xlu1 %11151, %v5584_v21   ;;  %v15180_v25 = vpack.c.bf16 %v14096_v49, %v14083_v23 }
 0x892   : > { %v11129_v3 = vunpack.i.l.bf16 %v11128_v6 }
 0x894   : > { %10266 = vmatpush1.bf16.msra.mxu0 %v10265_v34  ;;  %v11114_v34 = vunpack.i.l.bf16 %v11113_v52 }
 0x895   : > { %10268 = vmatprep.subr.bf16.mxu0 %v10267_v10  ;;  %v11138_v61 = vpop.permute.xlu0 %11137  ;;  %v11133_v10 = vpop.permute.xlu1 %11132 }
 0x896   : > { %v5096_v35 = vsel %vm5095_vm14, %v11114_v34, %v11115_v22  ;;  %v11140_v51 = vunpack.i.h.bf16 %v11138_v61  ;;  %v11139_v20 = vunpack.i.l.bf16 %v11138_v61  ;;  %v11135_v28 = vunpack.i.h.bf16 %v11133_v10  ;;  %v5134_v22 = vld [vmem:[#allocation13 + $0x228] sm:$0xff]  ;;  %v5133_v34 = vld [vmem:[#allocation13 + $0x220] sm:$0xff]  ;;  %v5135_v61 = vld [vmem:[#allocation13 + $0x230] sm:$0xff] }
 0x897   : > { %v11134_v57 = vunpack.i.l.bf16 %v11133_v10  ;;  %v5142_v10 = vld [vmem:[#allocation13 + $0x268] sm:$0xff] }
 0x898   : > { %10270 = vmatpush1.bf16.msra.mxu0 %v10269_v8  ;;  %v11130_v8 = vunpack.i.h.bf16 %v11128_v6  ;;  %v5101_v48 = vsel %vm5095_vm14, %v11139_v20, %v11140_v51  ;;  %v10289_v47 = vpack.c.bf16 %v11140_v51, %v11135_v28  ;;  %v5150_v51 = vld [vmem:[#allocation13 + $0x2a8] sm:$0xff]  ;;  %v5149_v20 = vld [vmem:[#allocation13 + $0x2a0] sm:$0xff] }
 0x899   : > { %10272 = vmatprep.subr.bf16.mxu0 %v10271_v26  ;;  %v10282_v26 = vpack.c.bf16 %v5097_v45, %v5096_v35  ;;  %v11148_v29 = vpop.permute.xlu0 %11147  ;;  %v11143_v63 = vpop.permute.xlu1 %11142  ;;  %v5100_v53 = vsel %vm5095_vm14, %v11134_v57, %v11135_v28  ;;  %v5138_v45 = vld [vmem:[#allocation13 + $0x248] sm:$0xff]  ;;  %v5144_v35 = vld [vmem:[#allocation13 + $0x278] sm:$0xff]  ;;  %v5153_v57 = vld [vmem:[#allocation13 + $0x2c0] sm:$0xff] }
 0x89a   : > { %v5099_v23 = vsel %vm5095_vm14, %v11129_v3, %v11130_v8  ;;  %v10284_v49 = vpack.c.bf16 %v11130_v8, %v11125_v55  ;;  %v11150_v13 = vunpack.i.h.bf16 %v11148_v29  ;;  %v11149_v39 = vunpack.i.l.bf16 %v11148_v29  ;;  %v5140_v8 = vld [vmem:[#allocation13 + $0x258] sm:$0xff]  ;;  %v5139_v3 = vld [vmem:[#allocation13 + $0x250] sm:$0xff]  ;;  %v5154_v28 = vld [vmem:[#allocation13 + $0x2c8] sm:$0xff] }
 0x89b   : > { %v11145_v44 = vunpack.i.h.bf16 %v11143_v63  ;;  %v11144_v18 = vunpack.i.l.bf16 %v11143_v63  ;;  %v10292_v16 = vpack.c.bf16 %v5101_v48, %v5100_v53  ;;  %v5152_v29 = vld [vmem:[#allocation13 + $0x2b8] sm:$0xff]  ;;  %v5158_v48 = vld [vmem:[#allocation13 + $0x2e8] sm:$0xff]  ;;  %v4508_v53 = vld [vmem:[#allocation16 + $0xc0] sm:$0xff] }
 0x89c   : > { %10274 = vmatpush1.bf16.msra.mxu0 %v10273_v31  ;;  %v11124_v31 = vunpack.i.l.bf16 %v11123_v41  ;;  %v5103_v19 = vsel %vm5095_vm14, %v11149_v39, %v11150_v13  ;;  %v5129_v41 = vld [vmem:[#allocation13 + $0x200] sm:$0xff]  ;;  %v5156_v63 = vld [vmem:[#allocation13 + $0x2d8] sm:$0xff]  ;;  %v5159_v39 = vld [vmem:[#allocation13 + $0x2f0] sm:$0xff]  ;;  %9850 = vmatmul.mubr.msk.f32.gmra.mrb[16].mxu1 %vm3131_vm0, %v4508_v53 }
 0x89d   : > { %10276 = vmatprep.subr.bf16.mxu0 %v15180_v25  ;;  %v10294_v52 = vpack.c.bf16 %v11150_v13, %v11145_v44  ;;  %v5102_v21 = vsel %vm5095_vm14, %v11144_v18, %v11145_v44  ;;  %v5136_v25 = vld [vmem:[#allocation13 + $0x238] sm:$0xff]  ;;  %v15184_v44 = vmov 0.0   ;;  %v4509_v18 = vld [vmem:[#allocation16 + $0xc8] sm:$0xff] }
 0x89e   : > { %v5098_v5 = vsel %vm5095_vm14, %v11124_v31, %v11125_v55  ;;  %v10297_v6 = vpack.c.bf16 %v5103_v19, %v5102_v21  ;;  %v5143_v55 = vld [vmem:[#allocation13 + $0x270] sm:$0xff]  ;;  %v5146_v31 = vld [vmem:[#allocation13 + $0x288] sm:$0xff]  ;;  %v5160_v13 = vld [vmem:[#allocation13 + $0x2f8] sm:$0xff]  ;;  %4779 = vmatprep.mubr.f32.mxu1 %v15184_v44 }
 0x89f   : > { %v10287_v36 = vpack.c.bf16 %v5099_v23, %v5098_v5  ;;  %v5148_v23 = vld [vmem:[#allocation13 + $0x298] sm:$0xff]  ;;  %v5151_v5 = vld [vmem:[#allocation13 + $0x2b0] sm:$0xff]  ;;  %v4513_v21 = vld [vmem:[#allocation16 + $0xe8] sm:$0xff] }
 0x8a0   : > { %10278 = vmatpush1.bf16.msra.mxu0 %v15183_v9  ;;  %v5141_v9 = vld [vmem:[#allocation13 + $0x260] sm:$0xff]  ;;  %9851 = vmatmul.mubr.msk.f32.gmra.mrb[18].mxu1 %vm3131_vm0, %v4509_v18  ;;  %v4511_v19 = vld [vmem:[#allocation16 + $0xd8] sm:$0xff] }
 0x8a1   : > { %10281 = vmatprep.subr.msk.bf16.mxu0 %vm14161_vm15, %v10279_v46  ;;  %v5137_v46 = vld [vmem:[#allocation13 + $0x240] sm:$0xff]  ;;  %4785 = vmatprep.mubr.f32.mxu1 %v15184_v44 }
 0x8a4   : > { %10283 = vmatpush1.bf16.msra.mxu0 %v10282_v26  ;;  %v5145_v26 = vld [vmem:[#allocation13 + $0x280] sm:$0xff] }
 0x8a5   : > { %10286 = vmatprep.subr.msk.bf16.mxu0 %vm14161_vm15, %v10284_v49  ;;  %v5147_v49 = vld [vmem:[#allocation13 + $0x290] sm:$0xff] }
 0x8a8   : > { %10288 = vmatpush1.bf16.msra.mxu0 %v10287_v36  ;;  %v5155_v36 = vld [vmem:[#allocation13 + $0x2d0] sm:$0xff] }
 0x8a9   : > { %10291 = vmatprep.subr.msk.bf16.mxu0 %vm14161_vm15, %v10289_v47  ;;  %v5157_v47 = vld [vmem:[#allocation13 + $0x2e0] sm:$0xff] }
 0x8ac   : > { %10293 = vmatpush1.bf16.msra.mxu0 %v10292_v16  ;;  %v4510_v16 = vld [vmem:[#allocation16 + $0xd0] sm:$0xff] }
 0x8ad   : > { %10296 = vmatprep.subr.msk.bf16.mxu0 %vm14161_vm15, %v10294_v52  ;;  %9852 = vmatmul.mubr.msk.f32.gmra.mrb[20].mxu1 %vm3131_vm0, %v4510_v16  ;;  %v4512_v52 = vld [vmem:[#allocation16 + $0xe0] sm:$0xff] }
 0x8ae   : > { %4791 = vmatprep.mubr.f32.mxu1 %v15184_v44 }
 0x8b0   : > { %10298 = vmatpush1.bf16.msra.mxu0 %v10297_v6  ;;  %v4514_v6 = vld [vmem:[#allocation16 + $0xf0] sm:$0xff] }
 0x8b1   : > { %9853 = vmatmul.mubr.msk.f32.gmra.mrb[22].mxu1 %vm3131_vm0, %v4511_v19 }
 0x8b2   : > { %4797 = vmatprep.mubr.f32.mxu1 %v15184_v44 }
 0x8b3   : > { %5371 = vmatmul.mubr.f32.vlgmr.msra.gmra.mrb[32].mxu0 %v5129_v41  ;;  %v4515_v41 = vld [vmem:[#allocation16 + $0xf8] sm:$0xff] }
 0x8b4   : > { %9883 = vmatprep.mubr.msk.f32.mxu0 %vm3131_vm0, %v5132_v32  ;;  %v12285_v32 = vmov 3  }
 0x8b5   : > { %9854 = vmatmul.mubr.msk.f32.gmra.mrb[24].mxu1 %vm3131_vm0, %v4512_v52  ;;  %11153 = vset.pattern.permute.xlu0 %v12285_v32 }
 0x8b6   : > { %4803 = vmatprep.mubr.f32.mxu1 %v15184_v44  ;;  %11155 = vset.pattern.permute.xlu1 %v12285_v32 }
 0x8b7   : > { %5377 = vmatmul.mubr.f32.gmra.mrb[34].mxu0 %v5131_v1  ;;  %v11831_v1 = vld [vmem:[%s12744_s27] sm:$0xff] }
 0x8b8   : > { %9884 = vmatprep.mubr.msk.f32.mxu0 %vm3131_vm0, %v5134_v22  ;;  %5999 = vperm.xlu0 %11153, %v11831_v1   ;;  %v11832_v22 = vld [vmem:[%s12744_s27 + $0x8] sm:$0xff] }
 0x8b9   : > { %9855 = vmatmul.mubr.msk.f32.gmra.mrb[26].mxu1 %vm3131_vm0, %v4513_v21  ;;  %6003 = vperm.xlu1 %11155, %v11832_v22  }
 0x8ba   : > { %4809 = vmatprep.mubr.f32.mxu1 %v15184_v44 }
 0x8bb   : > { %5383 = vmatmul.mubr.f32.gmra.mrb[36].mxu0 %v5133_v34  ;;  %v5581_v34 = vld [vmem:[#allocation17 + $0x100] sm:$0xff] }
 0x8bc   : > { %9885 = vmatprep.mubr.msk.f32.mxu0 %vm3131_vm0, %v5136_v25  ;;  %v5585_v25 = vld [vmem:[#allocation17 + $0x120] sm:$0xff]  ;;  %11154 = vset.pattern.permute.xlu0 %v15177_v33 }
 0x8bd   : > { %9856 = vmatmul.mubr.msk.f32.gmra.mrb[28].mxu1 %vm3131_vm0, %v4514_v6  ;;  %11156 = vset.pattern.permute.xlu1 %v15177_v33 }
 0x8be   : > { %4815 = vmatprep.mubr.f32.mxu1 %v15184_v44  ;;  %5599 = vperm.xlu0 %11154, %v5581_v34  }
 0x8bf   : > { %5389 = vmatmul.mubr.f32.gmra.mrb[38].mxu0 %v5135_v61  ;;  %5619 = vperm.xlu1 %11156, %v5585_v25   ;;  %v5583_v61 = vld [vmem:[#allocation17 + $0x110] sm:$0xff] }
 0x8c0   : > { %9886 = vmatprep.mubr.msk.f32.mxu0 %vm3131_vm0, %v5138_v45  ;;  %v5586_v45 = vld [vmem:[#allocation17 + $0x128] sm:$0xff] }
 0x8c1   : > { %9857 = vmatmul.mubr.msk.f32.gmra.mrb[30].mxu1 %vm3131_vm0, %v4515_v41 }
 0x8c2   : > { %5789 = vmatprep.mubr.f32.mxu1 %v15184_v44  ;;  %5609 = vperm.xlu0 %11154, %v5583_v61  }
 0x8c3   : > { %5395 = vmatmul.mubr.f32.gmra.mrb[40].mxu0 %v5137_v46  ;;  %11157 = vset.pattern.permute.xlu1 %v12285_v32  ;;  %v11833_v46 = vld [vmem:[%s12744_s27 + $0x10] sm:$0xff] }
 0x8c4   : > { %9887 = vmatprep.mubr.msk.f32.mxu0 %vm3131_vm0, %v5140_v8  ;;  %6007 = vperm.xlu1 %11157, %v11833_v46   ;;  %v5587_v8 = vld [vmem:[#allocation17 + $0x130] sm:$0xff] }
 0x8c6   : > { %5624 = vperm.xlu0 %11154, %v5586_v45  }
 0x8c7   : > { %5401 = vmatmul.mubr.f32.gmra.mrb[42].mxu0 %v5139_v3  ;;  %v11834_v3 = vld [vmem:[%s12744_s27 + $0x18] sm:$0xff] }
 0x8c8   : > { %9888 = vmatprep.mubr.msk.f32.mxu0 %vm3131_vm0, %v5142_v10  ;;  %6011 = vperm.xlu1 %11157, %v11834_v3  }
 0x8ca   : > { %5629 = vperm.xlu0 %11154, %v5587_v8  }
 0x8cb   : > { %5407 = vmatmul.mubr.f32.gmra.mrb[44].mxu0 %v5141_v9 }
 0x8cc   : > { %9889 = vmatprep.mubr.msk.f32.mxu0 %vm3131_vm0, %v5144_v35  ;;  %v5588_v35 = vld [vmem:[#allocation17 + $0x138] sm:$0xff]  ;;  %11158 = vset.pattern.permute.xlu1 %v15177_v33 }
 0x8cd   : > { %5634 = vperm.xlu1 %11158, %v5588_v35  }
 0x8ce   : > { %11159 = vset.pattern.permute.xlu0 %v12285_v32 }
 0x8cf   : > { %5413 = vmatmul.mubr.f32.gmra.mrb[46].mxu0 %v5143_v55 }
 0x8d0   : > { %9890 = vmatprep.mubr.msk.f32.mxu0 %vm3131_vm0, %v5146_v31 }
 0x8d1   : > { %11160 = vset.pattern.permute.xlu1 %v12285_v32 }
 0x8d3   : > { %5419 = vmatmul.mubr.f32.gmra.mrb[48].mxu0 %v5145_v26  ;;  %v5181_v26 = vpop.permute.xlu1 %5180 }
 0x8d4   : > { %9891 = vmatprep.mubr.msk.f32.mxu0 %vm3131_vm0, %v5148_v23  ;;  %v11835_v23 = vld [vmem:[%s12744_s27 + $0x20] sm:$0xff] }
 0x8d5   : > { %6015 = vperm.xlu0 %11159, %v11835_v23  }
 0x8d7   : > { %5425 = vmatmul.mubr.f32.gmra.mrb[50].mxu0 %v5147_v49 }
 0x8d8   : > { %9892 = vmatprep.mubr.msk.f32.mxu0 %vm3131_vm0, %v5150_v51 }
 0x8db   : > { %5431 = vmatmul.mubr.f32.gmra.mrb[52].mxu0 %v5149_v20  ;;  %v11836_v20 = vld [vmem:[%s12744_s27 + $0x28] sm:$0xff] }
 0x8dc   : > { %9893 = vmatprep.mubr.msk.f32.mxu0 %vm3131_vm0, %v5152_v29  ;;  %6019 = vperm.xlu1 %11160, %v11836_v20   ;;  %v11837_v29 = vld [vmem:[%s12744_s27 + $0x38] sm:$0xff] }
 0x8dd   : > { %6027 = vperm.xlu0 %11159, %v11837_v29  }
 0x8df   : > { %5437 = vmatmul.mubr.f32.gmra.mrb[54].mxu0 %v5151_v5 }
 0x8e0   : > { %9894 = vmatprep.mubr.msk.f32.mxu0 %vm3131_vm0, %v5154_v28  ;;  %v5191_v28 = vpop.permute.xlu1 %5190 }
 0x8e1   : > { %11242 = vset.pattern.permute.xlu0 %v15177_v33 }
 0x8e3   : > { %5443 = vmatmul.mubr.f32.gmra.mrb[56].mxu0 %v5153_v57 }
 0x8e4   : > { %9895 = vmatprep.mubr.msk.f32.mxu0 %vm3131_vm0, %v5156_v63  ;;  %v11838_v63 = vld [vmem:[%s12744_s27 + $0x30] sm:$0xff] }
 0x8e5   : > { %6023 = vperm.xlu1 %11160, %v11838_v63  }
 0x8e7   : > { %5449 = vmatmul.mubr.f32.gmra.mrb[58].mxu0 %v5155_v36  ;;  %v5186_v36 = vpop.permute.xlu0 %5185 }
 0x8e8   : > { %9896 = vmatprep.mubr.msk.f32.mxu0 %vm3131_vm0, %v5158_v48 }
 0x8e9   : > { %11241 = vset.pattern.permute.xlu1 %v15177_v33 }
 0x8eb   : > { %5455 = vmatmul.mubr.f32.gmra.mrb[60].mxu0 %v5157_v47  ;;  %v5221_v18 = vpop.permute.xlu0 %5220 }
 0x8ec   : > { %9897 = vmatprep.mubr.msk.f32.mxu0 %vm3131_vm0, %v5160_v13 }
 0x8ef   : > { %5461 = vmatmul.mubr.f32.gmra.mrb[62].mxu0 %v5159_v39  ;;  %v5196_v39 = vpop.permute.xlu1 %5195  ;;  %v5201_v46 = vpop.permute.xlu0 %5200 }
 0x8f4   : > { %v5226_v22 = vpop.permute.xlu1 %5225 }
 0x8f8   : > { %v5206_v23 = vpop.permute.xlu1 %5205 }
 0x986   : > { %v5372_v10 = vpop.f32.mrb[32].mxu0 }
 0x987   : > { %v5374_v9 = vpop.f32.mrb[33].mxu0  ;;  %v5373_v13 = vadd.f32 %v5372_v10, %v5181_v26 }
 0x988   : > { %v5375_v53 = vadd.f32 %v5374_v9, %v5181_v26 }
 0x989   : > { %v5467_v52 = vmul.f32 0.5, %v5373_v13 }
 0x98a   : > { %v5378_v55 = vpop.f32.mrb[34].mxu0  ;;  %v5468_v6 = vmul.f32 0.5, %v5375_v53 }
 0x98b   : > { %v5380_v31 = vpop.f32.mrb[35].mxu0  ;;  %v5379_v21 = vadd.f32 %v5378_v55, %v5186_v36  ;;  %11559 = vtanh.f32 %v5467_v52 }
 0x98c   : > { %v5381_v41 = vadd.f32 %v5380_v31, %v5186_v36  ;;  %11561 = vtanh.f32 %v5468_v6 }
 0x98d   : > { %v5469_v61 = vmul.f32 0.5, %v5379_v21 }
 0x98e   : > { %v5384_v49 = vpop.f32.mrb[36].mxu0  ;;  %v5470_v8 = vmul.f32 0.5, %v5381_v41  ;;  %v5236_v41 = vpop.permute.xlu1 %5235 }
 0x98f   : > { %v5386_v51 = vpop.f32.mrb[37].mxu0  ;;  %v5385_v32 = vadd.f32 %v5384_v49, %v5191_v28  ;;  %11563 = vtanh.f32 %v5469_v61  ;;  %v5231_v49 = vpop.permute.xlu0 %5230 }
 0x990   : > { %v5387_v34 = vadd.f32 %v5386_v51, %v5191_v28  ;;  %11565 = vtanh.f32 %v5470_v8 }
 0x991   : > { %v5471_v3 = vmul.f32 0.5, %v5385_v32 }
 0x992   : > { %v5390_v5 = vpop.f32.mrb[38].mxu0  ;;  %v5472_v9 = vmul.f32 0.5, %v5387_v34 }
 0x993   : > { %v5392_v57 = vpop.f32.mrb[39].mxu0  ;;  %v5391_v45 = vadd.f32 %v5390_v5, %v5196_v39  ;;  %11567 = vtanh.f32 %v5471_v3 }
 0x994   : > { %v5393_v35 = vadd.f32 %v5392_v57, %v5196_v39  ;;  %11569 = vtanh.f32 %v5472_v9 }
 0x995   : > { %v5473_v55 = vmul.f32 0.5, %v5391_v45  ;;  %v11560_v57 = vpop.eup %11559 }
 0x996   : > { %v5396_v48 = vpop.f32.mrb[40].mxu0  ;;  %v5474_v20 = vmul.f32 0.5, %v5393_v35  ;;  %v11562_v53 = vpop.eup %11561  ;;  %v5499_v61 = vadd.f32 1.0, %v11560_v57 }
 0x997   : > { %v5398_v47 = vpop.f32.mrb[41].mxu0  ;;  %v5397_v31 = vadd.f32 %v5396_v48, %v5201_v46  ;;  %11571 = vtanh.f32 %v5473_v55 }
 0x998   : > { %v5399_v29 = vadd.f32 %v5398_v47, %v5201_v46  ;;  %v5211_v47 = vpop.permute.xlu0 %5210 }
 0x999   : > { %v5475_v63 = vmul.f32 0.5, %v5397_v31  ;;  %v11564_v45 = vpop.eup %11563 }
 0x99a   : > { %v5402_v16 = vpop.f32.mrb[42].mxu0  ;;  %v5476_v48 = vmul.f32 0.5, %v5399_v29  ;;  %v11566_v46 = vpop.eup %11565  ;;  %v5501_v29 = vadd.f32 1.0, %v11564_v45 }
 0x99b   : > { %v5404_v19 = vpop.f32.mrb[43].mxu0  ;;  %v5403_v36 = vadd.f32 %v5402_v16, %v5206_v23  ;;  %v5500_v16 = vadd.f32 1.0, %v11562_v53 }
 0x99c   : > { %v5405_v52 = vadd.f32 %v5404_v19, %v5206_v23  ;;  %v5241_v45 = vpop.permute.xlu0 %5240 }
 0x99d   : > { %v5477_v32 = vmul.f32 0.5, %v5403_v36  ;;  %v11568_v19 = vpop.eup %11567 }
 0x99e   : > { %v5408_v1 = vpop.f32.mrb[44].mxu0  ;;  %v5478_v8 = vmul.f32 0.5, %v5405_v52  ;;  %v11570_v23 = vpop.eup %11569 }
 0x99f   : > { %v5410_v25 = vpop.f32.mrb[45].mxu0  ;;  %v5409_v3 = vadd.f32 %v5408_v1, %v5211_v47 }
 0x9a0   : > { %v5411_v55 = vadd.f32 %v5410_v25, %v5211_v47 }
 0x9a2   : > { %v14228_v10 = vpop.f32.mrb[46].mxu0  ;;  %v5480_v25 = vmul.f32 0.5, %v5411_v55 }
 0x9a3   : > { %v14230_v26 = vpop.f32.mrb[47].mxu0 }
 0x9a6   : > { %v5420_v51 = vpop.f32.mrb[48].mxu0 }
 0x9a7   : > { %v5421_v5 = vadd.f32 %v5420_v51, %v5221_v18  ;;  %v5422_v28 = vpop.f32.mrb[49].mxu0  ;;  %v5515_v51 = vmul.f32 0.5, %v5499_v61  ;;  %v5504_v61 = vadd.f32 1.0, %v11570_v23 }
 0x9a8   : > { %v5423_v13 = vadd.f32 %v5422_v28, %v5221_v18  ;;  %v5216_v28 = vpop.permute.xlu1 %5215 }
 0x9a9   : > { %11573 = vtanh.f32 %v5421_v5  ;;  %v5502_v5 = vadd.f32 1.0, %v11566_v46  ;;  %v5415_v1 = vadd.f32 %v14228_v10, %v5216_v28  ;;  %v5520_v23 = vmul.f32 0.5, %v5504_v61 }
 0x9aa   : > { %11575 = vtanh.f32 %v5423_v13  ;;  %v5426_v39 = vpop.f32.mrb[50].mxu0  ;;  %v5479_v13 = vmul.f32 0.5, %v5409_v3 }
 0x9ab   : > { %11577 = vtanh.f32 %v5474_v20  ;;  %v5427_v21 = vadd.f32 %v5426_v39, %v5226_v22  ;;  %v5428_v6 = vpop.f32.mrb[51].mxu0  ;;  %v5516_v20 = vmul.f32 0.5, %v5500_v16  ;;  %v5518_v10 = vmul.f32 0.5, %v5502_v5 }
 0x9ac   : > { %11579 = vtanh.f32 %v5475_v63  ;;  %v5429_v34 = vadd.f32 %v5428_v6, %v5226_v22  ;;  %v11572_v22 = vpop.eup %11571  ;;  %v5503_v6 = vadd.f32 1.0, %v11568_v19  ;;  %v5481_v46 = vmul.f32 0.5, %v5415_v1 }
 0x9ad   : > { %11581 = vtanh.f32 %v5427_v21 }
 0x9ae   : > { %11583 = vtanh.f32 %v5429_v34  ;;  %v5432_v18 = vpop.f32.mrb[52].mxu0  ;;  %v5517_v34 = vmul.f32 0.5, %v5501_v29  ;;  %v5519_v55 = vmul.f32 0.5, %v5503_v6  ;;  %v5246_v29 = vpop.permute.xlu1 %5245 }
 0x9af   : > { %11585 = vtanh.f32 %v5476_v48  ;;  %v5433_v9 = vadd.f32 %v5432_v18, %v5231_v49  ;;  %v5434_v35 = vpop.f32.mrb[53].mxu0 }
 0x9b0   : > { %11587 = vtanh.f32 %v5477_v32  ;;  %v5435_v31 = vadd.f32 %v5434_v35, %v5231_v49  ;;  %v5417_v49 = vadd.f32 %v14230_v26, %v5216_v28 }
 0x9b1   : > { %11589 = vtanh.f32 %v5433_v9 }
 0x9b2   : > { %11591 = vtanh.f32 %v5435_v31  ;;  %v5438_v63 = vpop.f32.mrb[54].mxu0  ;;  %v5482_v26 = vmul.f32 0.5, %v5417_v49 }
 0x9b3   : > { %v11574_v36 = vpop.eup %11573  ;;  %11593 = vtanh.f32 %v5478_v8  ;;  %v5439_v57 = vadd.f32 %v5438_v63, %v5236_v41  ;;  %v5440_v39 = vpop.f32.mrb[55].mxu0 }
 0x9b4   : > { %v11576_v53 = vpop.eup %11575  ;;  %v5441_v48 = vadd.f32 %v5440_v39, %v5236_v41  ;;  %v5547_v52 = vmul.f32 %v11574_v36, %v5515_v51 }
 0x9b5   : > { %v11578_v21 = vpop.eup %11577  ;;  %11595 = vtanh.f32 %v5439_v57  ;;  %v5548_v32 = vmul.f32 %v11576_v53, %v5516_v20  ;;  %v5505_v20 = vadd.f32 1.0, %v11572_v22 }
 0x9b6   : > { %v11580_v47 = vpop.eup %11579  ;;  %11597 = vtanh.f32 %v5441_v48  ;;  %v5444_v16 = vpop.f32.mrb[56].mxu0  ;;  %v5506_v36 = vadd.f32 1.0, %v11578_v21 }
 0x9b7   : > { %v11582_v18 = vpop.eup %11581  ;;  %11599 = vtanh.f32 %v5479_v13  ;;  %v5445_v8 = vadd.f32 %v5444_v16, %v5241_v45  ;;  %v5446_v3 = vpop.f32.mrb[57].mxu0  ;;  %v5521_v6 = vmul.f32 0.5, %v5505_v20  ;;  %v5507_v22 = vadd.f32 1.0, %v11580_v47 }
 0x9b8   : > { %v11584_v9 = vpop.eup %11583  ;;  %11601 = vtanh.f32 %v5480_v25  ;;  %v5447_v41 = vadd.f32 %v5446_v3, %v5241_v45  ;;  %v5549_v35 = vmul.f32 %v11582_v18, %v5517_v34  ;;  %v5251_v34 = vpop.permute.xlu0 %5250  ;;  %v5522_v21 = vmul.f32 0.5, %v5506_v36 }
 0x9b9   : > { %v11586_v19 = vpop.eup %11585  ;;  %11603 = vtanh.f32 %v5445_v8  ;;  %v5550_v31 = vmul.f32 %v11584_v9, %v5518_v10 }
 0x9ba   : > { %v11588_v51 = vpop.eup %11587  ;;  %11605 = vtanh.f32 %v5447_v41  ;;  %v5450_v28 = vpop.f32.mrb[58].mxu0  ;;  %v10301_v5 = vpack.c.bf16 %v5549_v35, %v5547_v52  ;;  %v5508_v45 = vadd.f32 1.0, %v11586_v19 }
 0x9bb   : > { %v11590_v63 = vpop.eup %11589  ;;  %11607 = vtanh.f32 %v5481_v46  ;;  %v5451_v13 = vadd.f32 %v5450_v28, %v5246_v29  ;;  %v5452_v1 = vpop.f32.mrb[59].mxu0  ;;  %v10299_v57 = vpack.c.bf16 %v5550_v31, %v5548_v32  ;;  %v5509_v35 = vadd.f32 1.0, %v11588_v51 }
 0x9bc   : > { %v11592_v39 = vpop.eup %11591  ;;  %11609 = vtanh.f32 %v5482_v26  ;;  %v5453_v53 = vadd.f32 %v5452_v1, %v5246_v29  ;;  %v5551_v25 = vmul.f32 %v11590_v63, %v5519_v55  ;;  %v5523_v26 = vmul.f32 0.5, %v5507_v22  ;;  %v5256_v41 = vpop.permute.xlu1 %5255 }
 0x9bd   : > { %v11594_v49 = vpop.eup %11593  ;;  %11611 = vtanh.f32 %v5451_v13  ;;  %10300 = vmatprep.subr.bf16.mxu1 %v10299_v57  ;;  %v5552_v48 = vmul.f32 %v11592_v39, %v5520_v23  ;;  %v5524_v23 = vmul.f32 0.5, %v5508_v45  ;;  %v5525_v39 = vmul.f32 0.5, %v5509_v35 }
 0x9be   : > { %11613 = vtanh.f32 %v5453_v53  ;;  %v5456_v61 = vpop.f32.mrb[60].mxu0  ;;  %10302 = vmatpush1.bf16.msra.mxu1 %v10301_v5  ;;  %v5510_v20 = vadd.f32 1.0, %v11594_v49 }
 0x9bf   : > { %v11596_v52 = vpop.eup %11595  ;;  %v5457_v16 = vadd.f32 %v5456_v61, %v5251_v34  ;;  %v5458_v18 = vpop.f32.mrb[61].mxu0 }
 0x9c0   : > { %v11598_v32 = vpop.eup %11597  ;;  %v5459_v10 = vadd.f32 %v5458_v18, %v5251_v34  ;;  %v5553_v46 = vmul.f32 %v11596_v52, %v5521_v6 }
 0x9c1   : > { %v11600_v8 = vpop.eup %11599  ;;  %11615 = vtanh.f32 %v5457_v16  ;;  %v5554_v3 = vmul.f32 %v11598_v32, %v5522_v21 }
 0x9c2   : > { %v11602_v9 = vpop.eup %11601  ;;  %11617 = vtanh.f32 %v5459_v10  ;;  %v5462_v47 = vpop.f32.mrb[62].mxu0  ;;  %v10305_v55 = vpack.c.bf16 %v5553_v46, %v5551_v25  ;;  %v5511_v53 = vadd.f32 1.0, %v11600_v8  ;;  %v5526_v25 = vmul.f32 0.5, %v5510_v20  ;;  %v5566_v20 = vld [vmem:[#allocation16 + $0x110] sm:$0xff] }
 0x9c3   : > { %v11604_v31 = vpop.eup %11603  ;;  %v5463_v29 = vadd.f32 %v5462_v47, %v5256_v41  ;;  %v5464_v19 = vpop.f32.mrb[63].mxu0  ;;  %v10303_v28 = vpack.c.bf16 %v5554_v3, %v5552_v48  ;;  %v5512_v6 = vadd.f32 1.0, %v11602_v9 }
 0x9c4   : > { %v11606_v5 = vpop.eup %11605  ;;  %v5465_v63 = vadd.f32 %v5464_v19, %v5256_v41  ;;  %v5555_v36 = vmul.f32 %v11604_v31, %v5523_v26  ;;  %v5527_v61 = vmul.f32 0.5, %v5511_v53  ;;  %v5564_v31 = vld [vmem:[#allocation16 + $0x100] sm:$0xff] }
 0x9c5   : > { %v11608_v13 = vpop.eup %11607  ;;  %11619 = vtanh.f32 %v5463_v29  ;;  %10304 = vmatprep.subr.bf16.mxu1 %v10303_v28  ;;  %v5556_v1 = vmul.f32 %v11606_v5, %v5524_v23  ;;  %v5528_v45 = vmul.f32 0.5, %v5512_v6  ;;  %v5565_v23 = vld [vmem:[#allocation16 + $0x108] sm:$0xff]  ;;  %v5567_v29 = vld [vmem:[#allocation16 + $0x118] sm:$0xff]  ;;  %v5568_v19 = vld [vmem:[#allocation16 + $0x120] sm:$0xff] }
 0x9c6   : > { %v11610_v57 = vpop.eup %11609  ;;  %11621 = vtanh.f32 %v5465_v63  ;;  %10306 = vmatpush1.bf16.msra.mxu1 %v10305_v55  ;;  %v5513_v48 = vadd.f32 1.0, %v11608_v13  ;;  %v5569_v28 = vld [vmem:[#allocation16 + $0x128] sm:$0xff]  ;;  %v5570_v5 = vld [vmem:[#allocation16 + $0x130] sm:$0xff]  ;;  %v5571_v63 = vld [vmem:[#allocation16 + $0x138] sm:$0xff] }
 0x9c7   : > { %v11612_v51 = vpop.eup %11611  ;;  %v5514_v16 = vadd.f32 1.0, %v11610_v57 }
 0x9c8   : > { %v11614_v22 = vpop.eup %11613  ;;  %v5557_v49 = vmul.f32 %v11612_v51, %v5525_v39  ;;  %v5529_v8 = vmul.f32 0.5, %v5513_v48 }
 0x9c9   : > { %v5558_v34 = vmul.f32 %v11614_v22, %v5526_v25  ;;  %v5530_v26 = vmul.f32 0.5, %v5514_v16 }
 0x9ca   : > { %v10309_v52 = vpack.c.bf16 %v5557_v49, %v5555_v36  ;;  %v5605_v36 = vpop.permute.xlu1 %5604 }
 0x9cb   : > { %v11616_v21 = vpop.eup %11615  ;;  %v10307_v18 = vpack.c.bf16 %v5558_v34, %v5556_v1  ;;  %v6000_v1 = vpop.permute.xlu0 %5999 }
 0x9cc   : > { %v11618_v32 = vpop.eup %11617  ;;  %v5559_v10 = vmul.f32 %v11616_v21, %v5527_v61 }
 0x9cd   : > { %10308 = vmatprep.subr.bf16.mxu1 %v10307_v18  ;;  %v5560_v46 = vmul.f32 %v11618_v32, %v5528_v45 }
 0x9ce   : > { %10310 = vmatpush1.bf16.msra.mxu1 %v10309_v52  ;;  %v5615_v13 = vpop.permute.xlu1 %5614 }
 0x9cf   : > { %v11620_v3 = vpop.eup %11619  ;;  %v5600_v39 = vpop.permute.xlu0 %5599 }
 0x9d0   : > { %v11622_v41 = vpop.eup %11621  ;;  %v5561_v9 = vmul.f32 %v11620_v3, %v5529_v8 }
 0x9d1   : > { %v5562_v35 = vmul.f32 %v11622_v41, %v5530_v26 }
 0x9d2   : > { %v10313_v47 = vpack.c.bf16 %v5561_v9, %v5559_v10  ;;  %v6004_v57 = vpop.permute.xlu1 %6003 }
 0x9d3   : > { %v10311_v55 = vpack.c.bf16 %v5562_v35, %v5560_v46  ;;  %v5610_v34 = vpop.permute.xlu0 %5609 }
 0x9d5   : > { %10312 = vmatprep.subr.bf16.mxu1 %v10311_v55 }
 0x9d6   : > { %10314 = vmatpush1.bf16.msra.mxu1 %v10313_v47  ;;  %v5620_v53 = vpop.permute.xlu1 %5619 }
 0x9d7   : > { %v5625_v9 = vpop.permute.xlu0 %5624 }
 0x9d9   : > { %9898 = vmatmul.mubr.msk.f32.vlgmr.msra.gmra.mrb[80].mxu1 %vm3131_vm0, %v5564_v31 }
 0x9da   : > { %5795 = vmatprep.mubr.f32.mxu1 %v15184_v44  ;;  %v6008_v52 = vpop.permute.xlu1 %6007 }
 0x9dd   : > { %9899 = vmatmul.mubr.msk.f32.gmra.mrb[82].mxu1 %vm3131_vm0, %v5565_v23 }
 0x9de   : > { %5801 = vmatprep.mubr.f32.mxu1 %v15184_v44  ;;  %v6012_v31 = vpop.permute.xlu1 %6011 }
 0x9e1   : > { %9900 = vmatmul.mubr.msk.f32.gmra.mrb[84].mxu1 %vm3131_vm0, %v5566_v20 }
 0x9e2   : > { %5807 = vmatprep.mubr.f32.mxu1 %v15184_v44 }
 0x9e5   : > { %9901 = vmatmul.mubr.msk.f32.gmra.mrb[86].mxu1 %vm3131_vm0, %v5567_v29 }
 0x9e6   : > { %5813 = vmatprep.mubr.f32.mxu1 %v15184_v44 }
 0x9e9   : > { %9902 = vmatmul.mubr.msk.f32.gmra.mrb[88].mxu1 %vm3131_vm0, %v5568_v19 }
 0x9ea   : > { %5819 = vmatprep.mubr.f32.mxu1 %v15184_v44 }
 0x9ed   : > { %9903 = vmatmul.mubr.msk.f32.gmra.mrb[90].mxu1 %vm3131_vm0, %v5569_v28 }
 0x9ee   : > { %5825 = vmatprep.mubr.f32.mxu1 %v15184_v44 }
 0x9f1   : > { %9904 = vmatmul.mubr.msk.f32.gmra.mrb[92].mxu1 %vm3131_vm0, %v5570_v5 }
 0x9f2   : > { %5831 = vmatprep.mubr.f32.mxu1 %v15184_v44 }
 0x9f5   : > { %9905 = vmatmul.mubr.msk.f32.gmra.mrb[94].mxu1 %vm3131_vm0, %v5571_v63 }
 0x9f6   : > { %5837 = vmatprep.mubr.f32.mxu1 %v15184_v44 }
 0xaac   : > { %v5791_v51 = vpop.f32.mrb[80].mxu1 }
 0xaad   : > { %v5792_v25 = vadd.f32 %v5791_v51, %v5600_v39  ;;  %v5793_v6 = vpop.f32.mrb[81].mxu1 }
 0xaae   : > { %v5794_v22 = vadd.f32 %v5793_v6, %v5600_v39  ;;  %v5630_v39 = vpop.permute.xlu0 %5629 }
 0xaaf   : > { %v5886_v49 = vadd.f32 %v5792_v25, %v13966_v38 }
 0xab0   : > { %v5887_v61 = vadd.f32 %v5794_v22, %v13968_v42  ;;  %v5797_v48 = vpop.f32.mrb[82].mxu1 }
 0xab1   : > { %v14252_v21 = vmul.f32 0.70710677, %v5886_v49  ;;  %v5798_v45 = vadd.f32 %v5797_v48, %v5605_v36  ;;  %v5799_v16 = vpop.f32.mrb[83].mxu1 }
 0xab2   : > { %v14254_v18 = vmul.f32 0.70710677, %v5887_v61  ;;  %v5800_v32 = vadd.f32 %v5799_v16, %v5605_v36 }
 0xab3   : > { %v14257_v10 = vadd.f32 %v6000_v1, %v14252_v21  ;;  %v5888_v46 = vadd.f32 %v5798_v45, %v13978_v17 }
 0xab4   : > { %v14261_v8 = vadd.f32 %v6000_v1, %v14254_v18  ;;  %v5889_v38 = vadd.f32 %v5800_v32, %v13980_v56  ;;  %v5803_v42 = vpop.f32.mrb[84].mxu1 }
 0xab5   : > { %v14264_v3 = vmul.f32 0.70710677, %v5888_v46  ;;  %v5804_v26 = vadd.f32 %v5803_v42, %v5610_v34  ;;  %v5805_v41 = vpop.f32.mrb[85].mxu1 }
 0xab6   : > { %v14266_v35 = vmul.f32 0.70710677, %v5889_v38  ;;  %v5806_v47 = vadd.f32 %v5805_v41, %v5610_v34  ;;  %v14270_v55 = vpack.i.bf16 %v14261_v8, %v14257_v10  ;;  %v6016_v38 = vpop.permute.xlu0 %6015 }
 0xab7   : > { %v14273_v17 = vadd.f32 %v6004_v57, %v14264_v3  ;;  %v5890_v23 = vadd.f32 %v5804_v26, %v13996_v54 }
 0xab8   : > { %v14277_v56 = vadd.f32 %v6004_v57, %v14266_v35  ;;  %v5891_v20 = vadd.f32 %v5806_v47, %v14000_v2  ;;  %v5809_v29 = vpop.f32.mrb[86].mxu1  ;;  %11162 = vrot.lane.b32.xlu1 %v14270_v55, %s12276_s30 }
 0xab9   : > { %v14282_v19 = vmul.f32 0.70710677, %v5890_v23  ;;  %v5810_v28 = vadd.f32 %v5809_v29, %v5615_v13  ;;  %v5811_v5 = vpop.f32.mrb[87].mxu1  ;;  %v10337_v63 = vpack.c.bf16 %v14273_v17, %v14257_v10 }
 0xaba   : > { %v14286_v36 = vmul.f32 0.70710677, %v5891_v20  ;;  %v5812_v1 = vadd.f32 %v5811_v5, %v5615_v13  ;;  %v14290_v54 = vpack.i.bf16 %v14277_v56, %v14273_v17  ;;  %v10335_v51 = vpack.c.bf16 %v14277_v56, %v14261_v8  ;;  %v5635_v13 = vpop.permute.xlu1 %5634 }
 0xabb   : > { %v5892_v2 = vadd.f32 %v5810_v28, %v14018_v15  ;;  %v14294_v57 = vadd.f32 %v6008_v52, %v14282_v19 }
 0xabc   : > { %v14299_v25 = vadd.f32 %v6008_v52, %v14286_v36  ;;  %v5893_v6 = vadd.f32 %v5812_v1, %v14020_v24  ;;  %v5815_v22 = vpop.f32.mrb[88].mxu1  ;;  %11167 = vrot.lane.b32.xlu0 %v14290_v54, %s12276_s30 }
 0xabd   : > { %v14304_v49 = vmul.f32 0.70710677, %v5892_v2  ;;  %v5816_v15 = vadd.f32 %v5815_v22, %v5620_v53  ;;  %v5817_v34 = vpop.f32.mrb[89].mxu1 }
 0xabe   : > { %v14306_v61 = vmul.f32 0.70710677, %v5893_v6  ;;  %v5818_v48 = vadd.f32 %v5817_v34, %v5620_v53  ;;  %v11171_v45 = vpack.i.bf16 %v14299_v25, %v14294_v57  ;;  %v6020_v23 = vpop.permute.xlu1 %6019 }
 0xabf   : > { %v5894_v52 = vadd.f32 %v5816_v15, %v14033_v0  ;;  %v14312_v16 = vadd.f32 %v6012_v31, %v14304_v49 }
 0xac0   : > { %v14315_v24 = vadd.f32 %v6012_v31, %v14306_v61  ;;  %v5895_v32 = vadd.f32 %v5818_v48, %v14037_v4  ;;  %v5821_v46 = vpop.f32.mrb[90].mxu1  ;;  %11172 = vrot.lane.b32.xlu1 %v11171_v45, %s12276_s30 }
 0xac1   : > { %v14319_v42 = vmul.f32 0.70710677, %v5894_v52  ;;  %v5822_v53 = vadd.f32 %v5821_v46, %v5625_v9  ;;  %v5823_v26 = vpop.f32.mrb[91].mxu1  ;;  %v10341_v41 = vpack.c.bf16 %v14312_v16, %v14294_v57 }
 0xac2   : > { %v14323_v0 = vmul.f32 0.70710677, %v5895_v32  ;;  %v5824_v47 = vadd.f32 %v5823_v26, %v5625_v9  ;;  %v11176_v31 = vpack.i.bf16 %v14315_v24, %v14312_v16  ;;  %v10339_v29 = vpack.c.bf16 %v14315_v24, %v14299_v25  ;;  %v6024_v46 = vpop.permute.xlu1 %6023  ;;  %v6228_v26 = vld [vmem:[#allocation14 + $0x1a0] sm:$0xff] }
 0xac3   : > { %v5896_v4 = vadd.f32 %v5822_v53, %v14052_v11  ;;  %v14329_v20 = vadd.f32 %v6016_v38, %v14319_v42 }
 0xac4   : > { %v5897_v28 = vadd.f32 %v5824_v47, %v14054_v14  ;;  %v14335_v5 = vadd.f32 %v6016_v38, %v14323_v0  ;;  %v5827_v1 = vpop.f32.mrb[92].mxu1  ;;  %11177 = vrot.lane.b32.xlu0 %v11176_v31, %s12276_s30 }
 0xac5   : > { %v14338_v9 = vmul.f32 0.70710677, %v5896_v4  ;;  %v5828_v2 = vadd.f32 %v5827_v1, %v5630_v39  ;;  %v5829_v6 = vpop.f32.mrb[93].mxu1 }
 0xac6   : > { %v14340_v22 = vmul.f32 0.70710677, %v5897_v28  ;;  %v5830_v11 = vadd.f32 %v5829_v6, %v5630_v39  ;;  %v11181_v15 = vpack.i.bf16 %v14335_v5, %v14329_v20 }
 0xac7   : > { %v5898_v34 = vadd.f32 %v5828_v2, %v14067_v12  ;;  %v14346_v14 = vadd.f32 %v6020_v23, %v14338_v9 }
 0xac8   : > { %v5899_v48 = vadd.f32 %v5830_v11, %v14071_v60  ;;  %v14350_v52 = vadd.f32 %v6020_v23, %v14340_v22  ;;  %v5833_v32 = vpop.f32.mrb[94].mxu1  ;;  %11182 = vrot.lane.b32.xlu1 %v11181_v15, %s12276_s30  ;;  %v6028_v11 = vpop.permute.xlu0 %6027 }
 0xac9   : > { %v14353_v38 = vmul.f32 0.70710677, %v5898_v34  ;;  %v5834_v39 = vadd.f32 %v5833_v32, %v5635_v13  ;;  %v5835_v53 = vpop.f32.mrb[95].mxu1  ;;  %v15186_v17 = vpack.c.bf16 %v14346_v14, %v14329_v20 }
 0xaca   : > { %v14357_v12 = vmul.f32 0.70710677, %v5899_v48  ;;  %v5836_v47 = vadd.f32 %v5835_v53, %v5635_v13  ;;  %v11186_v60 = vpack.i.bf16 %v14350_v52, %v14346_v14  ;;  %v15185_v8 = vpack.c.bf16 %v14350_v52, %v14335_v5 }
 0xacb   : > { %v5900_v23 = vadd.f32 %v5834_v39, %v14086_v27  ;;  %v14363_v4 = vadd.f32 %v6024_v46, %v14353_v38  ;;  %v6192_v39 = vld [vmem:[#allocation13 + $0x308] sm:$0xff] }
 0xacc   : > { %v5901_v1 = vadd.f32 %v5836_v47, %v14088_v50  ;;  %v14369_v2 = vadd.f32 %v6024_v46, %v14357_v12  ;;  %11187 = vrot.lane.b32.xlu0 %v11186_v60, %s12276_s30  ;;  %9938 = vmatprep.mubr.msk.f32.mxu0 %vm3131_vm0, %v6192_v39  ;;  %v6227_v39 = vld [vmem:[#allocation14 + $0x198] sm:$0xff] }
 0xacd   : > { %v14372_v6 = vmul.f32 0.70710677, %v5900_v23 }
 0xace   : > { %v14374_v13 = vmul.f32 0.70710677, %v5901_v1  ;;  %v11191_v27 = vpack.i.bf16 %v14369_v2, %v14363_v4  ;;  %v6226_v1 = vld [vmem:[#allocation14 + $0x190] sm:$0xff] }
 0xacf   : > { %v14379_v34 = vadd.f32 %v6028_v11, %v14372_v6 }
 0xad0   : > { %v14382_v48 = vadd.f32 %v6028_v11, %v14374_v13  ;;  %11192 = vrot.lane.b32.xlu1 %v11191_v27, %s12276_s30  ;;  %v6232_v11 = vld [vmem:[#allocation14 + $0x1c0] sm:$0xff] }
 0xad2   : > { %v11196_v32 = vpack.i.bf16 %v14382_v48, %v14379_v34  ;;  %v15187_v24 = vpack.c.bf16 %v14382_v48, %v14369_v2 }
 0xad4   : > { %11197 = vrot.lane.b32.xlu0 %v11196_v32, %s12276_s30  ;;  %11202 = vrot.lane.b32.xlu1 %v14270_v55, %s12277_s22  ;;  %v6224_v55 = vld [vmem:[#allocation14 + $0x180] sm:$0xff] }
 0xad8   : > { %11207 = vrot.lane.b32.xlu0 %v14290_v54, %s12277_s22  ;;  %11212 = vrot.lane.b32.xlu1 %v11171_v45, %s12277_s22  ;;  %v6225_v54 = vld [vmem:[#allocation14 + $0x188] sm:$0xff] }
 0xadc   : > { %11217 = vrot.lane.b32.xlu0 %v11176_v31, %s12277_s22  ;;  %11222 = vrot.lane.b32.xlu1 %v11181_v15, %s12277_s22 }
 0xae0   : > { %11227 = vrot.lane.b32.xlu0 %v11186_v60, %s12277_s22  ;;  %11232 = vrot.lane.b32.xlu1 %v11191_v27, %s12277_s22 }
 0xae4   : > { %11237 = vrot.lane.b32.xlu0 %v11196_v32, %s12277_s22  ;;  %6242 = vperm.xlu1 %11241, %v6224_v55  }
 0xae8   : > { %6247 = vperm.xlu0 %11242, %v6225_v54   ;;  %6252 = vperm.xlu1 %11241, %v6226_v1  }
 0xaec   : > { %6282 = vperm.xlu0 %11242, %v6232_v11   ;;  %6257 = vperm.xlu1 %11241, %v6227_v39   ;;  %v6235_v39 = vld [vmem:[#allocation14 + $0x1d8] sm:$0xff] }
 0xaf0   : > { %6262 = vperm.xlu0 %11242, %v6228_v26  }
 0xb2a   : > { %v11163_v53 = vpop.permute.xlu1 %11162 }
 0xb2b   : > { %v11165_v47 = vunpack.i.h.bf16 %v11163_v53  ;;  %v11164_v23 = vunpack.i.l.bf16 %v11163_v53 }
 0xb2d   : > { %v6094_v60 = vsel %vm2905_vm1, %v11164_v23, %v11165_v47 }
 0xb2e   : > { %v11168_v45 = vpop.permute.xlu0 %11167 }
 0xb2f   : > { %v11170_v31 = vunpack.i.h.bf16 %v11168_v45  ;;  %v11169_v15 = vunpack.i.l.bf16 %v11168_v45  ;;  %v6233_v45 = vld [vmem:[#allocation14 + $0x1c8] sm:$0xff] }
 0xb30   : > { %6287 = vperm.xlu1 %11241, %v6233_v45  }
 0xb31   : > { %v6095_v27 = vsel %vm2905_vm1, %v11169_v15, %v11170_v31  ;;  %v10317_v46 = vpack.c.bf16 %v11169_v15, %v11164_v23  ;;  %v6234_v31 = vld [vmem:[#allocation14 + $0x1d0] sm:$0xff] }
 0xb32   : > { %v11173_v32 = vpop.permute.xlu1 %11172  ;;  %v10315_v50 = vpack.c.bf16 %v6095_v27, %v6094_v60  ;;  %6292 = vperm.xlu0 %11242, %v6234_v31   ;;  %v6230_v27 = vld [vmem:[#allocation14 + $0x1b0] sm:$0xff]  ;;  %v6231_v31 = vld [vmem:[#allocation14 + $0x1b8] sm:$0xff] }
 0xb33   : > { %v11175_v53 = vunpack.i.h.bf16 %v11173_v32  ;;  %v11174_v55 = vunpack.i.l.bf16 %v11173_v32 }
 0xb34   : > { %10316 = vmatprep.subr.bf16.mxu0 %v10315_v50  ;;  %v6229_v50 = vld [vmem:[#allocation14 + $0x1a8] sm:$0xff] }
 0xb35   : > { %10319 = vmatpush1.bf16.msk.msra.mxu0 %vm13559_vm3, %v10317_v46  ;;  %v6096_v1 = vsel %vm2905_vm1, %v11174_v55, %v11175_v53  ;;  %6267 = vperm.xlu1 %11241, %v6229_v50  }
 0xb36   : > { %v11178_v54 = vpop.permute.xlu0 %11177  ;;  %6272 = vperm.xlu0 %11242, %v6230_v27   ;;  %v6237_v27 = vld [vmem:[#allocation14 + $0x1e8] sm:$0xff] }
 0xb37   : > { %v11180_v47 = vunpack.i.h.bf16 %v11178_v54  ;;  %v11179_v28 = vunpack.i.l.bf16 %v11178_v54 }
 0xb39   : > { %v6097_v60 = vsel %vm2905_vm1, %v11179_v28, %v11180_v47  ;;  %v10322_v11 = vpack.c.bf16 %v11179_v28, %v11174_v55  ;;  %v6236_v47 = vld [vmem:[#allocation14 + $0x1e0] sm:$0xff]  ;;  %6297 = vperm.xlu1 %11241, %v6235_v39  }
 0xb3a   : > { %v11183_v23 = vpop.permute.xlu1 %11182  ;;  %v10320_v15 = vpack.c.bf16 %v6097_v60, %v6096_v1  ;;  %6302 = vperm.xlu0 %11242, %v6236_v47  }
 0xb3b   : > { %v11185_v46 = vunpack.i.h.bf16 %v11183_v23  ;;  %v11184_v32 = vunpack.i.l.bf16 %v11183_v23  ;;  %v6238_v23 = vld [vmem:[#allocation14 + $0x1f0] sm:$0xff] }
 0xb3c   : > { %10321 = vmatprep.subr.bf16.mxu0 %v10320_v15 }
 0xb3d   : > { %10324 = vmatpush1.bf16.msk.msra.mxu0 %vm13559_vm3, %v10322_v11  ;;  %v6098_v45 = vsel %vm2905_vm1, %v11184_v32, %v11185_v46  ;;  %6277 = vperm.xlu1 %11241, %v6231_v31   ;;  %v15188_v31 = vpack.c.bf16 %v14379_v34, %v14363_v4 }
 0xb3e   : > { %v11188_v26 = vpop.permute.xlu0 %11187  ;;  %6312 = vperm.xlu0 %11242, %v6238_v23  }
 0xb3f   : > { %v11190_v53 = vunpack.i.h.bf16 %v11188_v26  ;;  %v11189_v54 = vunpack.i.l.bf16 %v11188_v26 }
 0xb41   : > { %v6099_v1 = vsel %vm2905_vm1, %v11189_v54, %v11190_v53  ;;  %v10327_v60 = vpack.c.bf16 %v11189_v54, %v11184_v32  ;;  %6307 = vperm.xlu1 %11241, %v6237_v27   ;;  %v6239_v32 = vld [vmem:[#allocation14 + $0x1f8] sm:$0xff] }
 0xb42   : > { %v11193_v28 = vpop.permute.xlu1 %11192  ;;  %v10325_v55 = vpack.c.bf16 %v6099_v1, %v6098_v45  ;;  %v6644_v45 = vld [vmem:[#allocation17 + $0x188] sm:$0xff] }
 0xb43   : > { %v11195_v15 = vunpack.i.h.bf16 %v11193_v28  ;;  %v11194_v50 = vunpack.i.l.bf16 %v11193_v28 }
 0xb44   : > { %10326 = vmatprep.subr.bf16.mxu0 %v10325_v55  ;;  %v6646_v55 = vld [vmem:[#allocation17 + $0x198] sm:$0xff] }
 0xb45   : > { %10329 = vmatpush1.bf16.msk.msra.mxu0 %vm13559_vm3, %v10327_v60  ;;  %v6100_v39 = vsel %vm2905_vm1, %v11194_v50, %v11195_v15  ;;  %6317 = vperm.xlu1 %11241, %v6239_v32  }
 0xb46   : > { %v11198_v11 = vpop.permute.xlu0 %11197  ;;  %v11203_v28 = vpop.permute.xlu1 %11202 }
 0xb47   : > { %v11200_v46 = vunpack.i.h.bf16 %v11198_v11  ;;  %v11199_v26 = vunpack.i.l.bf16 %v11198_v11  ;;  %v11204_v25 = vunpack.i.l.bf16 %v11203_v28 }
 0xb49   : > { %v6101_v53 = vsel %vm2905_vm1, %v11199_v26, %v11200_v46  ;;  %v10332_v54 = vpack.c.bf16 %v11199_v26, %v11194_v50  ;;  %6666 = vperm.xlu1 %11241, %v6644_v45  }
 0xb4a   : > { %v10330_v47 = vpack.c.bf16 %v6101_v53, %v6100_v39  ;;  %v11208_v1 = vpop.permute.xlu0 %11207  ;;  %v11213_v56 = vpop.permute.xlu1 %11212 }
 0xb4b   : > { %v11209_v10 = vunpack.i.l.bf16 %v11208_v1  ;;  %v11215_v14 = vunpack.i.h.bf16 %v11213_v56  ;;  %v11214_v60 = vunpack.i.l.bf16 %v11213_v56 }
 0xb4c   : > { %10331 = vmatprep.subr.bf16.mxu0 %v10330_v47 }
 0xb4d   : > { %10334 = vmatpush1.bf16.msk.msra.mxu0 %vm13559_vm3, %v10332_v54  ;;  %6676 = vperm.xlu1 %11241, %v6646_v55   ;;  %v6160_v27 = vsel %vm2970_vm4, %v11214_v60, %v11215_v14  ;;  %v6207_v60 = vld [vmem:[#allocation13 + $0x380] sm:$0xff] }
 0xb4e   : > { %10336 = vmatprep.subr.bf16.mxu0 %v10335_v51  ;;  %v11218_v59 = vpop.permute.xlu0 %11217  ;;  %v11210_v51 = vunpack.i.h.bf16 %v11208_v1  ;;  %v11223_v52 = vpop.permute.xlu1 %11222 }
 0xb4f   : > { %v11219_v5 = vunpack.i.l.bf16 %v11218_v59  ;;  %v11225_v46 = vunpack.i.h.bf16 %v11223_v52  ;;  %v11224_v4 = vunpack.i.l.bf16 %v11223_v52  ;;  %v6203_v52 = vld [vmem:[#allocation13 + $0x360] sm:$0xff] }
 0xb50   : > { %v6159_v16 = vsel %vm2970_vm4, %v11209_v10, %v11210_v51  ;;  %v6194_v10 = vld [vmem:[#allocation13 + $0x318] sm:$0xff] }
 0xb51   : > { %10338 = vmatpush1.bf16.msra.mxu0 %v10337_v63  ;;  %v11205_v63 = vunpack.i.h.bf16 %v11203_v28  ;;  %v6162_v54 = vsel %vm2970_vm4, %v11224_v4, %v11225_v46  ;;  %v6218_v4 = vld [vmem:[#allocation13 + $0x3d8] sm:$0xff] }
 0xb52   : > { %10340 = vmatprep.subr.bf16.mxu0 %v10339_v29  ;;  %v11228_v57 = vpop.permute.xlu0 %11227  ;;  %v11220_v29 = vunpack.i.h.bf16 %v11218_v59  ;;  %v11233_v34 = vpop.permute.xlu1 %11232 }
 0xb53   : > { %v6158_v20 = vsel %vm2970_vm4, %v11204_v25, %v11205_v63  ;;  %v11230_v15 = vunpack.i.h.bf16 %v11228_v57  ;;  %v11229_v50 = vunpack.i.l.bf16 %v11228_v57  ;;  %v11235_v45 = vunpack.i.h.bf16 %v11233_v34  ;;  %v6195_v25 = vld [vmem:[#allocation13 + $0x320] sm:$0xff]  ;;  %v6197_v57 = vld [vmem:[#allocation13 + $0x330] sm:$0xff] }
 0xb54   : > { %v10354_v2 = vpack.c.bf16 %v6159_v16, %v6158_v20  ;;  %v6161_v48 = vsel %vm2970_vm4, %v11219_v5, %v11220_v29  ;;  %v10356_v23 = vpack.c.bf16 %v11220_v29, %v11215_v14  ;;  %v11234_v1 = vunpack.i.l.bf16 %v11233_v34  ;;  %v6199_v16 = vld [vmem:[#allocation13 + $0x340] sm:$0xff]  ;;  %v6201_v29 = vld [vmem:[#allocation13 + $0x350] sm:$0xff]  ;;  %v6204_v5 = vld [vmem:[#allocation13 + $0x368] sm:$0xff] }
 0xb55   : > { %10342 = vmatpush1.bf16.msra.mxu0 %v10341_v41  ;;  %v10351_v41 = vpack.c.bf16 %v11210_v51, %v11205_v63  ;;  %v10359_v26 = vpack.c.bf16 %v6161_v48, %v6160_v27  ;;  %v6163_v39 = vsel %vm2970_vm4, %v11229_v50, %v11230_v15  ;;  %v10361_v53 = vpack.c.bf16 %v11230_v15, %v11225_v46  ;;  %v6191_v51 = vld [vmem:[#allocation13 + $0x300] sm:$0xff]  ;;  %v6196_v63 = vld [vmem:[#allocation13 + $0x328] sm:$0xff]  ;;  %v6205_v20 = vld [vmem:[#allocation13 + $0x370] sm:$0xff] }
 0xb56   : > { %10344 = vmatprep.subr.bf16.mxu0 %v15185_v8  ;;  %v11238_v11 = vpop.permute.xlu0 %11237  ;;  %v10364_v28 = vpack.c.bf16 %v6163_v39, %v6162_v54  ;;  %v6164_v8 = vsel %vm2970_vm4, %v11234_v1, %v11235_v45  ;;  %v6208_v14 = vld [vmem:[#allocation13 + $0x388] sm:$0xff]  ;;  %v6209_v48 = vld [vmem:[#allocation13 + $0x390] sm:$0xff]  ;;  %v6211_v15 = vld [vmem:[#allocation13 + $0x3a0] sm:$0xff] }
 0xb57   : > { %v11240_v47 = vunpack.i.h.bf16 %v11238_v11  ;;  %v11239_v32 = vunpack.i.l.bf16 %v11238_v11  ;;  %v6214_v50 = vld [vmem:[#allocation13 + $0x3b8] sm:$0xff]  ;;  %v6213_v11 = vld [vmem:[#allocation13 + $0x3b0] sm:$0xff]  ;;  %v6216_v27 = vld [vmem:[#allocation13 + $0x3c8] sm:$0xff] }
 0xb58   : > { %v6215_v46 = vld [vmem:[#allocation13 + $0x3c0] sm:$0xff]  ;;  %v6217_v34 = vld [vmem:[#allocation13 + $0x3d0] sm:$0xff]  ;;  %v5573_v54 = vld [vmem:[#allocation16 + $0x148] sm:$0xff] }
 0xb59   : > { %10346 = vmatpush1.bf16.msra.mxu0 %v15186_v17  ;;  %v6165_v55 = vsel %vm2970_vm4, %v11239_v32, %v11240_v47  ;;  %v10366_v59 = vpack.c.bf16 %v11240_v47, %v11235_v45  ;;  %v6193_v17 = vld [vmem:[#allocation13 + $0x310] sm:$0xff]  ;;  %v6219_v39 = vld [vmem:[#allocation13 + $0x3e0] sm:$0xff]  ;;  %v5575_v1 = vld [vmem:[#allocation16 + $0x158] sm:$0xff] }
 0xb5a   : > { %10348 = vmatprep.subr.bf16.mxu0 %v15187_v24  ;;  %v10369_v56 = vpack.c.bf16 %v6165_v55, %v6164_v8  ;;  %v6198_v24 = vld [vmem:[#allocation13 + $0x338] sm:$0xff]  ;;  %v6221_v47 = vld [vmem:[#allocation13 + $0x3f0] sm:$0xff]  ;;  %v5572_v32 = vld [vmem:[#allocation16 + $0x140] sm:$0xff] }
 0xb5b   : > { %9906 = vmatmul.mubr.msk.f32.gmra.mrb[16].mxu1 %vm3131_vm0, %v5572_v32  ;;  %v5574_v45 = vld [vmem:[#allocation16 + $0x150] sm:$0xff]  ;;  %v5577_v55 = vld [vmem:[#allocation16 + $0x168] sm:$0xff]  ;;  %v5579_v8 = vld [vmem:[#allocation16 + $0x178] sm:$0xff] }
 0xb5c   : > { %5843 = vmatprep.mubr.f32.mxu1 %v15184_v44 }
 0xb5d   : > { %10350 = vmatpush1.bf16.msra.mxu0 %v15188_v31  ;;  %v6206_v31 = vld [vmem:[#allocation13 + $0x378] sm:$0xff] }
 0xb5e   : > { %10353 = vmatprep.subr.msk.bf16.mxu0 %vm13600_vm5, %v10351_v41  ;;  %v6202_v41 = vld [vmem:[#allocation13 + $0x358] sm:$0xff] }
 0xb5f   : > { %9907 = vmatmul.mubr.msk.f32.gmra.mrb[18].mxu1 %vm3131_vm0, %v5573_v54 }
 0xb60   : > { %5849 = vmatprep.mubr.f32.mxu1 %v15184_v44 }
 0xb61   : > { %10355 = vmatpush1.bf16.msra.mxu0 %v10354_v2  ;;  %v6210_v2 = vld [vmem:[#allocation13 + $0x398] sm:$0xff] }
 0xb62   : > { %10358 = vmatprep.subr.msk.bf16.mxu0 %vm13600_vm5, %v10356_v23  ;;  %v6212_v23 = vld [vmem:[#allocation13 + $0x3a8] sm:$0xff] }
 0xb63   : > { %9908 = vmatmul.mubr.msk.f32.gmra.mrb[20].mxu1 %vm3131_vm0, %v5574_v45 }
 0xb64   : > { %5855 = vmatprep.mubr.f32.mxu1 %v15184_v44 }
 0xb65   : > { %10360 = vmatpush1.bf16.msra.mxu0 %v10359_v26  ;;  %v6220_v26 = vld [vmem:[#allocation13 + $0x3e8] sm:$0xff] }
 0xb66   : > { %10363 = vmatprep.subr.msk.bf16.mxu0 %vm13600_vm5, %v10361_v53  ;;  %v6222_v53 = vld [vmem:[#allocation13 + $0x3f8] sm:$0xff] }
 0xb67   : > { %9909 = vmatmul.mubr.msk.f32.gmra.mrb[22].mxu1 %vm3131_vm0, %v5575_v1 }
 0xb68   : > { %5861 = vmatprep.mubr.f32.mxu1 %v15184_v44 }
 0xb69   : > { %10365 = vmatpush1.bf16.msra.mxu0 %v10364_v28  ;;  %v5576_v28 = vld [vmem:[#allocation16 + $0x160] sm:$0xff] }
 0xb6a   : > { %10368 = vmatprep.subr.msk.bf16.mxu0 %vm13600_vm5, %v10366_v59  ;;  %v5578_v59 = vld [vmem:[#allocation16 + $0x170] sm:$0xff] }
 0xb6b   : > { %9910 = vmatmul.mubr.msk.f32.gmra.mrb[24].mxu1 %vm3131_vm0, %v5576_v28 }
 0xb6c   : > { %5867 = vmatprep.mubr.f32.mxu1 %v15184_v44 }
 0xb6d   : > { %10370 = vmatpush1.bf16.msra.mxu0 %v10369_v56  ;;  %v12286_v56 = vmov 4  }
 0xb6e   : > { %11243 = vset.pattern.permute.xlu0 %v12286_v56  ;;  %11245 = vset.pattern.permute.xlu1 %v12286_v56 }
 0xb6f   : > { %9911 = vmatmul.mubr.msk.f32.gmra.mrb[26].mxu1 %vm3131_vm0, %v5577_v55 }
 0xb70   : > { %6433 = vmatmul.mubr.f32.vlgmr.msra.gmra.mrb[64].mxu0 %v6191_v51  ;;  %5873 = vmatprep.mubr.f32.mxu1 %v15184_v44  ;;  %v11839_v51 = vld [vmem:[%s12744_s27] sm:$0xff] }
 0xb71   : > { %9939 = vmatprep.mubr.msk.f32.mxu0 %vm3131_vm0, %v6194_v10  ;;  %7061 = vperm.xlu0 %11243, %v11839_v51   ;;  %v11840_v10 = vld [vmem:[%s12744_s27 + $0x8] sm:$0xff] }
 0xb72   : > { %7065 = vperm.xlu1 %11245, %v11840_v10  }
 0xb73   : > { %9912 = vmatmul.mubr.msk.f32.gmra.mrb[28].mxu1 %vm3131_vm0, %v5578_v59 }
 0xb74   : > { %6439 = vmatmul.mubr.f32.gmra.mrb[66].mxu0 %v6193_v17  ;;  %5879 = vmatprep.mubr.f32.mxu1 %v15184_v44  ;;  %v6643_v17 = vld [vmem:[#allocation17 + $0x180] sm:$0xff] }
 0xb75   : > { %9940 = vmatprep.mubr.msk.f32.mxu0 %vm3131_vm0, %v6196_v63  ;;  %v6647_v63 = vld [vmem:[#allocation17 + $0x1a0] sm:$0xff]  ;;  %11244 = vset.pattern.permute.xlu0 %v15177_v33 }
 0xb76   : > { %11246 = vset.pattern.permute.xlu1 %v15177_v33  ;;  %6661 = vperm.xlu0 %11244, %v6643_v17  }
 0xb77   : > { %9913 = vmatmul.mubr.msk.f32.gmra.mrb[30].mxu1 %vm3131_vm0, %v5579_v8  ;;  %6681 = vperm.xlu1 %11246, %v6647_v63  }
 0xb78   : > { %6445 = vmatmul.mubr.f32.gmra.mrb[68].mxu0 %v6195_v25  ;;  %6851 = vmatprep.mubr.f32.mxu1 %v15184_v44  ;;  %v6645_v25 = vld [vmem:[#allocation17 + $0x190] sm:$0xff] }
 0xb79   : > { %9941 = vmatprep.mubr.msk.f32.mxu0 %vm3131_vm0, %v6198_v24  ;;  %v6648_v24 = vld [vmem:[#allocation17 + $0x1a8] sm:$0xff] }
 0xb7a   : > { %6671 = vperm.xlu0 %11244, %v6645_v25  }
 0xb7b   : > { %11247 = vset.pattern.permute.xlu1 %v12286_v56 }
 0xb7c   : > { %6451 = vmatmul.mubr.f32.gmra.mrb[70].mxu0 %v6197_v57  ;;  %v11841_v57 = vld [vmem:[%s12744_s27 + $0x10] sm:$0xff] }
 0xb7d   : > { %9942 = vmatprep.mubr.msk.f32.mxu0 %vm3131_vm0, %v6200_v30  ;;  %7069 = vperm.xlu1 %11247, %v11841_v57   ;;  %v6649_v30 = vld [vmem:[#allocation17 + $0x1b0] sm:$0xff] }
 0xb7e   : > { %6686 = vperm.xlu0 %11244, %v6648_v24  }
 0xb80   : > { %6457 = vmatmul.mubr.f32.gmra.mrb[72].mxu0 %v6199_v16  ;;  %v11842_v16 = vld [vmem:[%s12744_s27 + $0x18] sm:$0xff] }
 0xb81   : > { %9943 = vmatprep.mubr.msk.f32.mxu0 %vm3131_vm0, %v6202_v41  ;;  %7073 = vperm.xlu1 %11247, %v11842_v16  }
 0xb82   : > { %6691 = vperm.xlu0 %11244, %v6649_v30  }
 0xb84   : > { %6463 = vmatmul.mubr.f32.gmra.mrb[74].mxu0 %v6201_v29 }
 0xb85   : > { %9944 = vmatprep.mubr.msk.f32.mxu0 %vm3131_vm0, %v6204_v5  ;;  %v6650_v5 = vld [vmem:[#allocation17 + $0x1b8] sm:$0xff]  ;;  %11248 = vset.pattern.permute.xlu1 %v15177_v33 }
 0xb86   : > { %6696 = vperm.xlu1 %11248, %v6650_v5   ;;  %11249 = vset.pattern.permute.xlu0 %v12286_v56 }
 0xb88   : > { %6469 = vmatmul.mubr.f32.gmra.mrb[76].mxu0 %v6203_v52 }
 0xb89   : > { %9945 = vmatprep.mubr.msk.f32.mxu0 %vm3131_vm0, %v6206_v31 }
 0xb8a   : > { %11250 = vset.pattern.permute.xlu1 %v12286_v56 }
 0xb8c   : > { %6475 = vmatmul.mubr.f32.gmra.mrb[78].mxu0 %v6205_v20  ;;  %v6243_v20 = vpop.permute.xlu1 %6242 }
 0xb8d   : > { %9946 = vmatprep.mubr.msk.f32.mxu0 %vm3131_vm0, %v6208_v14  ;;  %v11843_v14 = vld [vmem:[%s12744_s27 + $0x20] sm:$0xff] }
 0xb8e   : > { %7077 = vperm.xlu0 %11249, %v11843_v14  }
 0xb90   : > { %6481 = vmatmul.mubr.f32.gmra.mrb[80].mxu0 %v6207_v60 }
 0xb91   : > { %9947 = vmatprep.mubr.msk.f32.mxu0 %vm3131_vm0, %v6210_v2 }
 0xb94   : > { %6487 = vmatmul.mubr.f32.gmra.mrb[82].mxu0 %v6209_v48  ;;  %v11844_v48 = vld [vmem:[%s12744_s27 + $0x28] sm:$0xff] }
 0xb95   : > { %9948 = vmatprep.mubr.msk.f32.mxu0 %vm3131_vm0, %v6212_v23  ;;  %7081 = vperm.xlu1 %11250, %v11844_v48   ;;  %v11845_v23 = vld [vmem:[%s12744_s27 + $0x38] sm:$0xff] }
 0xb96   : > { %7089 = vperm.xlu0 %11249, %v11845_v23  }
 0xb98   : > { %6493 = vmatmul.mubr.f32.gmra.mrb[84].mxu0 %v6211_v15 }
 0xb99   : > { %9949 = vmatprep.mubr.msk.f32.mxu0 %vm3131_vm0, %v6214_v50  ;;  %v6253_v50 = vpop.permute.xlu1 %6252 }
 0xb9a   : > { %11332 = vset.pattern.permute.xlu0 %v15177_v33 }
 0xb9c   : > { %6499 = vmatmul.mubr.f32.gmra.mrb[86].mxu0 %v6213_v11 }
 0xb9d   : > { %9950 = vmatprep.mubr.msk.f32.mxu0 %vm3131_vm0, %v6216_v27  ;;  %v11846_v27 = vld [vmem:[%s12744_s27 + $0x30] sm:$0xff] }
 0xb9e   : > { %7085 = vperm.xlu1 %11250, %v11846_v27  }
 0xba0   : > { %6505 = vmatmul.mubr.f32.gmra.mrb[88].mxu0 %v6215_v46  ;;  %v6248_v46 = vpop.permute.xlu0 %6247 }
 0xba1   : > { %9951 = vmatprep.mubr.msk.f32.mxu0 %vm3131_vm0, %v6218_v4 }
 0xba2   : > { %11331 = vset.pattern.permute.xlu1 %v15177_v33 }
 0xba4   : > { %6511 = vmatmul.mubr.f32.gmra.mrb[90].mxu0 %v6217_v34 }
 0xba5   : > { %9952 = vmatprep.mubr.msk.f32.mxu0 %vm3131_vm0, %v6220_v26 }
 0xba8   : > { %6517 = vmatmul.mubr.f32.gmra.mrb[92].mxu0 %v6219_v39  ;;  %v6258_v39 = vpop.permute.xlu1 %6257 }
 0xba9   : > { %9953 = vmatprep.mubr.msk.f32.mxu0 %vm3131_vm0, %v6222_v53 }
 0xbac   : > { %6523 = vmatmul.mubr.f32.gmra.mrb[94].mxu0 %v6221_v47  ;;  %v6283_v47 = vpop.permute.xlu0 %6282 }
 0xbaf   : > { %v6288_v56 = vpop.permute.xlu1 %6287 }
 0xbb0   : > { %v6263_v25 = vpop.permute.xlu0 %6262 }
 0xc43   : > { %v6434_v41 = vpop.f32.mrb[64].mxu0 }
 0xc44   : > { %v6436_v29 = vpop.f32.mrb[65].mxu0  ;;  %v6435_v26 = vadd.f32 %v6434_v41, %v6243_v20 }
 0xc45   : > { %v6437_v53 = vadd.f32 %v6436_v29, %v6243_v20  ;;  %v6293_v20 = vpop.permute.xlu0 %6292 }
 0xc46   : > { %v6529_v45 = vmul.f32 0.5, %v6435_v26 }
 0xc47   : > { %v6440_v52 = vpop.f32.mrb[66].mxu0  ;;  %v6530_v28 = vmul.f32 0.5, %v6437_v53 }
 0xc48   : > { %v6442_v31 = vpop.f32.mrb[67].mxu0  ;;  %v6441_v1 = vadd.f32 %v6440_v52, %v6248_v46  ;;  %11623 = vtanh.f32 %v6529_v45 }
 0xc49   : > { %v6443_v55 = vadd.f32 %v6442_v31, %v6248_v46  ;;  %11625 = vtanh.f32 %v6530_v28  ;;  %v6268_v31 = vpop.permute.xlu1 %6267 }
 0xc4a   : > { %v6531_v17 = vmul.f32 0.5, %v6441_v1 }
 0xc4b   : > { %v6446_v60 = vpop.f32.mrb[68].mxu0  ;;  %v6532_v24 = vmul.f32 0.5, %v6443_v55 }
 0xc4c   : > { %v6448_v2 = vpop.f32.mrb[69].mxu0  ;;  %v6447_v59 = vadd.f32 %v6446_v60, %v6253_v50  ;;  %11627 = vtanh.f32 %v6531_v17 }
 0xc4d   : > { %v6449_v51 = vadd.f32 %v6448_v2, %v6253_v50  ;;  %11629 = vtanh.f32 %v6532_v24  ;;  %v6298_v1 = vpop.permute.xlu1 %6297 }
 0xc4e   : > { %v6533_v57 = vmul.f32 0.5, %v6447_v59 }
 0xc4f   : > { %v6452_v15 = vpop.f32.mrb[70].mxu0  ;;  %v6534_v16 = vmul.f32 0.5, %v6449_v51 }
 0xc50   : > { %v6454_v11 = vpop.f32.mrb[71].mxu0  ;;  %v6453_v63 = vadd.f32 %v6452_v15, %v6258_v39  ;;  %11631 = vtanh.f32 %v6533_v57 }
 0xc51   : > { %v6455_v41 = vadd.f32 %v6454_v11, %v6258_v39  ;;  %11633 = vtanh.f32 %v6534_v16 }
 0xc52   : > { %v6535_v5 = vmul.f32 0.5, %v6453_v63  ;;  %v11624_v11 = vpop.eup %11623 }
 0xc53   : > { %v6458_v4 = vpop.f32.mrb[72].mxu0  ;;  %v6536_v60 = vmul.f32 0.5, %v6455_v41  ;;  %v11626_v26 = vpop.eup %11625  ;;  %v6561_v59 = vadd.f32 1.0, %v11624_v11 }
 0xc54   : > { %v6460_v34 = vpop.f32.mrb[73].mxu0  ;;  %v6459_v52 = vadd.f32 %v6458_v4, %v6263_v25  ;;  %11635 = vtanh.f32 %v6535_v5 }
 0xc55   : > { %v6461_v2 = vadd.f32 %v6460_v34, %v6263_v25  ;;  %v6273_v34 = vpop.permute.xlu0 %6272 }
 0xc56   : > { %v6537_v15 = vmul.f32 0.5, %v6459_v52  ;;  %v11628_v51 = vpop.eup %11627  ;;  %v6577_v52 = vmul.f32 0.5, %v6561_v59 }
 0xc57   : > { %v6464_v32 = vpop.f32.mrb[74].mxu0  ;;  %v6538_v4 = vmul.f32 0.5, %v6461_v2  ;;  %v11630_v17 = vpop.eup %11629 }
 0xc58   : > { %v6466_v54 = vpop.f32.mrb[75].mxu0  ;;  %v6465_v50 = vadd.f32 %v6464_v32, %v6268_v31  ;;  %v6562_v32 = vadd.f32 1.0, %v11626_v26  ;;  %v6278_v2 = vpop.permute.xlu1 %6277 }
 0xc59   : > { %v6467_v39 = vadd.f32 %v6466_v54, %v6268_v31 }
 0xc5a   : > { %v6539_v28 = vmul.f32 0.5, %v6465_v50  ;;  %v11632_v54 = vpop.eup %11631  ;;  %v6578_v31 = vmul.f32 0.5, %v6562_v32 }
 0xc5b   : > { %v6470_v8 = vpop.f32.mrb[76].mxu0  ;;  %v6540_v63 = vmul.f32 0.5, %v6467_v39  ;;  %v11634_v5 = vpop.eup %11633  ;;  %v6565_v39 = vadd.f32 1.0, %v11632_v54 }
 0xc5c   : > { %v6472_v10 = vpop.f32.mrb[77].mxu0  ;;  %v6471_v25 = vadd.f32 %v6470_v8, %v6273_v34 }
 0xc5d   : > { %v6473_v16 = vadd.f32 %v6472_v10, %v6273_v34  ;;  %v6566_v34 = vadd.f32 1.0, %v11634_v5 }
 0xc5f   : > { %v14503_v30 = vpop.f32.mrb[78].mxu0  ;;  %v6542_v10 = vmul.f32 0.5, %v6473_v16 }
 0xc60   : > { %v14505_v29 = vpop.f32.mrb[79].mxu0  ;;  %v6477_v8 = vadd.f32 %v14503_v30, %v6278_v2 }
 0xc62   : > { %v6543_v32 = vmul.f32 0.5, %v6477_v8 }
 0xc63   : > { %v6482_v14 = vpop.f32.mrb[80].mxu0 }
 0xc64   : > { %v6483_v48 = vadd.f32 %v6482_v14, %v6283_v47  ;;  %v6484_v23 = vpop.f32.mrb[81].mxu0  ;;  %v6563_v14 = vadd.f32 1.0, %v11628_v51 }
 0xc65   : > { %v6485_v27 = vadd.f32 %v6484_v23, %v6283_v47 }
 0xc66   : > { %11637 = vtanh.f32 %v6483_v48 }
 0xc67   : > { %11639 = vtanh.f32 %v6485_v27  ;;  %v6488_v46 = vpop.f32.mrb[82].mxu0 }
 0xc68   : > { %11641 = vtanh.f32 %v6536_v60  ;;  %v6489_v53 = vadd.f32 %v6488_v46, %v6288_v56  ;;  %v6490_v45 = vpop.f32.mrb[83].mxu0  ;;  %v6564_v60 = vadd.f32 1.0, %v11630_v17 }
 0xc69   : > { %11643 = vtanh.f32 %v6537_v15  ;;  %v6491_v55 = vadd.f32 %v6490_v45, %v6288_v56  ;;  %v11636_v56 = vpop.eup %11635  ;;  %v6541_v15 = vmul.f32 0.5, %v6471_v25 }
 0xc6a   : > { %11645 = vtanh.f32 %v6489_v53  ;;  %v6580_v30 = vmul.f32 0.5, %v6564_v60  ;;  %v6567_v5 = vadd.f32 1.0, %v11636_v56 }
 0xc6b   : > { %11647 = vtanh.f32 %v6491_v55  ;;  %v6494_v47 = vpop.f32.mrb[84].mxu0  ;;  %v6303_v55 = vpop.permute.xlu0 %6302 }
 0xc6c   : > { %11649 = vtanh.f32 %v6538_v4  ;;  %v6495_v24 = vadd.f32 %v6494_v47, %v6293_v20  ;;  %v6496_v57 = vpop.f32.mrb[85].mxu0 }
 0xc6d   : > { %11651 = vtanh.f32 %v6539_v28  ;;  %v6497_v41 = vadd.f32 %v6496_v57, %v6293_v20  ;;  %v6479_v20 = vadd.f32 %v14505_v29, %v6278_v2  ;;  %v6579_v28 = vmul.f32 0.5, %v6563_v14 }
 0xc6e   : > { %11653 = vtanh.f32 %v6495_v24  ;;  %v6581_v57 = vmul.f32 0.5, %v6565_v39 }
 0xc6f   : > { %11655 = vtanh.f32 %v6497_v41  ;;  %v6500_v48 = vpop.f32.mrb[86].mxu0  ;;  %v6544_v29 = vmul.f32 0.5, %v6479_v20  ;;  %v6582_v41 = vmul.f32 0.5, %v6566_v34  ;;  %v6583_v20 = vmul.f32 0.5, %v6567_v5 }
 0xc70   : > { %v11638_v23 = vpop.eup %11637  ;;  %11657 = vtanh.f32 %v6540_v63  ;;  %v6501_v50 = vadd.f32 %v6500_v48, %v6298_v1  ;;  %v6502_v27 = vpop.f32.mrb[87].mxu0 }
 0xc71   : > { %v11640_v11 = vpop.eup %11639  ;;  %v6503_v46 = vadd.f32 %v6502_v27, %v6298_v1  ;;  %v6609_v26 = vmul.f32 %v11638_v23, %v6577_v52  ;;  %v6308_v52 = vpop.permute.xlu1 %6307 }
 0xc72   : > { %v11642_v4 = vpop.eup %11641  ;;  %11659 = vtanh.f32 %v6501_v50  ;;  %v6610_v53 = vmul.f32 %v11640_v11, %v6578_v31 }
 0xc73   : > { %v11644_v45 = vpop.eup %11643  ;;  %11661 = vtanh.f32 %v6503_v46  ;;  %v6506_v59 = vpop.f32.mrb[88].mxu0  ;;  %v6568_v2 = vadd.f32 1.0, %v11642_v4 }
 0xc74   : > { %v11646_v51 = vpop.eup %11645  ;;  %11663 = vtanh.f32 %v6541_v15  ;;  %v6507_v47 = vadd.f32 %v6506_v59, %v6303_v55  ;;  %v6508_v17 = vpop.f32.mrb[89].mxu0  ;;  %v6569_v56 = vadd.f32 1.0, %v11644_v45 }
 0xc75   : > { %v11648_v63 = vpop.eup %11647  ;;  %11665 = vtanh.f32 %v6542_v10  ;;  %v6509_v1 = vadd.f32 %v6508_v17, %v6303_v55  ;;  %v6611_v25 = vmul.f32 %v11646_v51, %v6579_v28  ;;  %v6313_v46 = vpop.permute.xlu0 %6312  ;;  %v6584_v4 = vmul.f32 0.5, %v6568_v2 }
 0xc76   : > { %v11650_v24 = vpop.eup %11649  ;;  %11667 = vtanh.f32 %v6507_v47  ;;  %v6612_v54 = vmul.f32 %v11648_v63, %v6580_v30  ;;  %v6585_v17 = vmul.f32 0.5, %v6569_v56  ;;  %v6318_v63 = vpop.permute.xlu1 %6317 }
 0xc77   : > { %v11652_v16 = vpop.eup %11651  ;;  %11669 = vtanh.f32 %v6509_v1  ;;  %v6512_v31 = vpop.f32.mrb[90].mxu0  ;;  %v10373_v14 = vpack.c.bf16 %v6611_v25, %v6609_v26  ;;  %v6570_v28 = vadd.f32 1.0, %v11650_v24 }
 0xc78   : > { %v11654_v60 = vpop.eup %11653  ;;  %11671 = vtanh.f32 %v6543_v32  ;;  %v6513_v48 = vadd.f32 %v6512_v31, %v6308_v52  ;;  %v6514_v23 = vpop.f32.mrb[91].mxu0  ;;  %v10371_v15 = vpack.c.bf16 %v6612_v54, %v6610_v53 }
 0xc79   : > { %v11656_v8 = vpop.eup %11655  ;;  %11673 = vtanh.f32 %v6544_v29  ;;  %v6515_v50 = vadd.f32 %v6514_v23, %v6308_v52  ;;  %v6613_v27 = vmul.f32 %v11654_v60, %v6581_v57  ;;  %v6571_v29 = vadd.f32 1.0, %v11652_v16 }
 0xc7a   : > { %v11658_v11 = vpop.eup %11657  ;;  %11675 = vtanh.f32 %v6513_v48  ;;  %10372 = vmatprep.subr.bf16.mxu1 %v10371_v15  ;;  %v6614_v10 = vmul.f32 %v11656_v8, %v6582_v41  ;;  %v6586_v57 = vmul.f32 0.5, %v6570_v28 }
 0xc7b   : > { %11677 = vtanh.f32 %v6515_v50  ;;  %v6518_v39 = vpop.f32.mrb[92].mxu0  ;;  %10374 = vmatpush1.bf16.msra.mxu1 %v10373_v14  ;;  %v6572_v54 = vadd.f32 1.0, %v11658_v11  ;;  %v6587_v23 = vmul.f32 0.5, %v6571_v29 }
 0xc7c   : > { %v11660_v26 = vpop.eup %11659  ;;  %v6519_v34 = vadd.f32 %v6518_v39, %v6313_v46  ;;  %v6520_v55 = vpop.f32.mrb[93].mxu0 }
 0xc7d   : > { %v11662_v53 = vpop.eup %11661  ;;  %v6521_v59 = vadd.f32 %v6520_v55, %v6313_v46  ;;  %v6615_v51 = vmul.f32 %v11660_v26, %v6583_v20  ;;  %v6588_v8 = vmul.f32 0.5, %v6572_v54  ;;  %v6630_v54 = vld [vmem:[#allocation16 + $0x1a0] sm:$0xff] }
 0xc7e   : > { %v11664_v30 = vpop.eup %11663  ;;  %11679 = vtanh.f32 %v6519_v34  ;;  %v6616_v32 = vmul.f32 %v11662_v53, %v6584_v4 }
 0xc7f   : > { %v11666_v47 = vpop.eup %11665  ;;  %11681 = vtanh.f32 %v6521_v59  ;;  %v6524_v45 = vpop.f32.mrb[94].mxu0  ;;  %v10377_v1 = vpack.c.bf16 %v6615_v51, %v6613_v27  ;;  %v6573_v15 = vadd.f32 1.0, %v11664_v30 }
 0xc80   : > { %v11668_v25 = vpop.eup %11667  ;;  %v6525_v41 = vadd.f32 %v6524_v45, %v6318_v63  ;;  %v6526_v24 = vpop.f32.mrb[95].mxu0  ;;  %v10375_v5 = vpack.c.bf16 %v6616_v32, %v6614_v10  ;;  %v6574_v50 = vadd.f32 1.0, %v11666_v47  ;;  %v6626_v45 = vld [vmem:[#allocation16 + $0x180] sm:$0xff] }
 0xc81   : > { %v11670_v52 = vpop.eup %11669  ;;  %v6527_v31 = vadd.f32 %v6526_v24, %v6318_v63  ;;  %v6617_v14 = vmul.f32 %v11668_v25, %v6585_v17  ;;  %v6589_v56 = vmul.f32 0.5, %v6573_v15  ;;  %v6628_v25 = vld [vmem:[#allocation16 + $0x190] sm:$0xff] }
 0xc82   : > { %v11672_v60 = vpop.eup %11671  ;;  %11683 = vtanh.f32 %v6525_v41  ;;  %10376 = vmatprep.subr.bf16.mxu1 %v10375_v5  ;;  %v6618_v2 = vmul.f32 %v11670_v52, %v6586_v57  ;;  %v6590_v26 = vmul.f32 0.5, %v6574_v50  ;;  %v6629_v57 = vld [vmem:[#allocation16 + $0x198] sm:$0xff]  ;;  %v6631_v41 = vld [vmem:[#allocation16 + $0x1a8] sm:$0xff]  ;;  %v6632_v24 = vld [vmem:[#allocation16 + $0x1b0] sm:$0xff]  ;;  %v6667_v52 = vpop.permute.xlu1 %6666 }
 0xc83   : > { %v11674_v48 = vpop.eup %11673  ;;  %11685 = vtanh.f32 %v6527_v31  ;;  %10378 = vmatpush1.bf16.msra.mxu1 %v10377_v1  ;;  %v6575_v10 = vadd.f32 1.0, %v11672_v60  ;;  %v6627_v1 = vld [vmem:[#allocation16 + $0x188] sm:$0xff]  ;;  %v6633_v5 = vld [vmem:[#allocation16 + $0x1b8] sm:$0xff] }
 0xc84   : > { %v11676_v16 = vpop.eup %11675  ;;  %v6576_v4 = vadd.f32 1.0, %v11674_v48 }
 0xc85   : > { %v11678_v27 = vpop.eup %11677  ;;  %v6619_v11 = vmul.f32 %v11676_v16, %v6587_v23  ;;  %v6591_v59 = vmul.f32 0.5, %v6575_v10 }
 0xc86   : > { %v6620_v20 = vmul.f32 %v11678_v27, %v6588_v8  ;;  %v6592_v30 = vmul.f32 0.5, %v6576_v4  ;;  %v6677_v31 = vpop.permute.xlu1 %6676 }
 0xc87   : > { %v10381_v46 = vpack.c.bf16 %v6619_v11, %v6617_v14  ;;  %v7062_v14 = vpop.permute.xlu0 %7061 }
 0xc88   : > { %v11680_v39 = vpop.eup %11679  ;;  %v10379_v28 = vpack.c.bf16 %v6620_v20, %v6618_v2 }
 0xc89   : > { %v11682_v34 = vpop.eup %11681  ;;  %v6621_v55 = vmul.f32 %v11680_v39, %v6589_v56 }
 0xc8a   : > { %10380 = vmatprep.subr.bf16.mxu1 %v10379_v28  ;;  %v6622_v53 = vmul.f32 %v11682_v34, %v6590_v26  ;;  %v7066_v60 = vpop.permute.xlu1 %7065 }
 0xc8b   : > { %10382 = vmatpush1.bf16.msra.mxu1 %v10381_v46  ;;  %v6662_v2 = vpop.permute.xlu0 %6661 }
 0xc8c   : > { %v11684_v51 = vpop.eup %11683 }
 0xc8d   : > { %v11686_v32 = vpop.eup %11685  ;;  %v6623_v47 = vmul.f32 %v11684_v51, %v6591_v59 }
 0xc8e   : > { %v6624_v17 = vmul.f32 %v11686_v32, %v6592_v30  ;;  %v6682_v48 = vpop.permute.xlu1 %6681 }
 0xc8f   : > { %v10385_v63 = vpack.c.bf16 %v6623_v47, %v6621_v55  ;;  %v6672_v27 = vpop.permute.xlu0 %6671 }
 0xc90   : > { %v10383_v29 = vpack.c.bf16 %v6624_v17, %v6622_v53 }
 0xc92   : > { %10384 = vmatprep.subr.bf16.mxu1 %v10383_v29  ;;  %v7070_v56 = vpop.permute.xlu1 %7069 }
 0xc93   : > { %10386 = vmatpush1.bf16.msra.mxu1 %v10385_v63  ;;  %v6687_v30 = vpop.permute.xlu0 %6686 }
 0xc96   : > { %9954 = vmatmul.mubr.msk.f32.vlgmr.msra.gmra.mrb[96].mxu1 %vm3131_vm0, %v6626_v45  ;;  %v7074_v63 = vpop.permute.xlu1 %7073 }
 0xc97   : > { %6857 = vmatprep.mubr.f32.mxu1 %v15184_v44 }
 0xc9a   : > { %9955 = vmatmul.mubr.msk.f32.gmra.mrb[98].mxu1 %vm3131_vm0, %v6627_v1 }
 0xc9b   : > { %6863 = vmatprep.mubr.f32.mxu1 %v15184_v44 }
 0xc9e   : > { %9956 = vmatmul.mubr.msk.f32.gmra.mrb[100].mxu1 %vm3131_vm0, %v6628_v25 }
 0xc9f   : > { %6869 = vmatprep.mubr.f32.mxu1 %v15184_v44 }
 0xca2   : > { %9957 = vmatmul.mubr.msk.f32.gmra.mrb[102].mxu1 %vm3131_vm0, %v6629_v57 }
 0xca3   : > { %6875 = vmatprep.mubr.f32.mxu1 %v15184_v44 }
 0xca6   : > { %9958 = vmatmul.mubr.msk.f32.gmra.mrb[104].mxu1 %vm3131_vm0, %v6630_v54 }
 0xca7   : > { %6881 = vmatprep.mubr.f32.mxu1 %v15184_v44 }
 0xcaa   : > { %9959 = vmatmul.mubr.msk.f32.gmra.mrb[106].mxu1 %vm3131_vm0, %v6631_v41 }
 0xcab   : > { %6887 = vmatprep.mubr.f32.mxu1 %v15184_v44 }
 0xcae   : > { %9960 = vmatmul.mubr.msk.f32.gmra.mrb[108].mxu1 %vm3131_vm0, %v6632_v24 }
 0xcaf   : > { %6893 = vmatprep.mubr.f32.mxu1 %v15184_v44 }
 0xcb2   : > { %9961 = vmatmul.mubr.msk.f32.gmra.mrb[110].mxu1 %vm3131_vm0, %v6633_v5 }
 0xcb3   : > { %6899 = vmatprep.mubr.f32.mxu1 %v15184_v44 }
 0xd69   : > { %v6853_v23 = vpop.f32.mrb[96].mxu1 }
 0xd6a   : > { %v6854_v15 = vadd.f32 %v6853_v23, %v6662_v2  ;;  %v6855_v16 = vpop.f32.mrb[97].mxu1 }
 0xd6b   : > { %v6856_v8 = vadd.f32 %v6855_v16, %v6662_v2 }
 0xd6c   : > { %v6948_v50 = vadd.f32 %v6854_v15, %v14252_v21 }
 0xd6d   : > { %v6949_v11 = vadd.f32 %v6856_v8, %v14254_v18  ;;  %v6859_v20 = vpop.f32.mrb[98].mxu1 }
 0xd6e   : > { %v14527_v10 = vmul.f32 0.70710677, %v6948_v50  ;;  %v6860_v46 = vadd.f32 %v6859_v20, %v6667_v52  ;;  %v6861_v39 = vpop.f32.mrb[99].mxu1 }
 0xd6f   : > { %v14529_v26 = vmul.f32 0.70710677, %v6949_v11  ;;  %v6862_v4 = vadd.f32 %v6861_v39, %v6667_v52 }
 0xd70   : > { %v14532_v28 = vadd.f32 %v7062_v14, %v14527_v10  ;;  %v6950_v34 = vadd.f32 %v6860_v46, %v14264_v3 }
 0xd71   : > { %v14536_v55 = vadd.f32 %v7062_v14, %v14529_v26  ;;  %v6951_v21 = vadd.f32 %v6862_v4, %v14266_v35  ;;  %v6865_v18 = vpop.f32.mrb[100].mxu1  ;;  %v6692_v14 = vpop.permute.xlu0 %6691 }
 0xd72   : > { %v14539_v53 = vmul.f32 0.70710677, %v6950_v34  ;;  %v6866_v59 = vadd.f32 %v6865_v18, %v6672_v27  ;;  %v6867_v51 = vpop.f32.mrb[101].mxu1 }
 0xd73   : > { %v14541_v32 = vmul.f32 0.70710677, %v6951_v21  ;;  %v6868_v47 = vadd.f32 %v6867_v51, %v6672_v27  ;;  %v14545_v17 = vpack.i.bf16 %v14536_v55, %v14532_v28 }
 0xd74   : > { %v14548_v3 = vadd.f32 %v7066_v60, %v14539_v53  ;;  %v6952_v29 = vadd.f32 %v6866_v59, %v14282_v19 }
 0xd75   : > { %v14552_v35 = vadd.f32 %v7066_v60, %v14541_v32  ;;  %v6953_v45 = vadd.f32 %v6868_v47, %v14286_v36  ;;  %v6871_v1 = vpop.f32.mrb[102].mxu1  ;;  %11252 = vrot.lane.b32.xlu1 %v14545_v17, %s12280_s3  ;;  %v7078_v4 = vpop.permute.xlu0 %7077 }
 0xd76   : > { %v14557_v25 = vmul.f32 0.70710677, %v6952_v29  ;;  %v6872_v57 = vadd.f32 %v6871_v1, %v6677_v31  ;;  %v6873_v54 = vpop.f32.mrb[103].mxu1  ;;  %v10409_v41 = vpack.c.bf16 %v14548_v3, %v14532_v28 }
 0xd77   : > { %v14561_v24 = vmul.f32 0.70710677, %v6953_v45  ;;  %v6874_v5 = vadd.f32 %v6873_v54, %v6677_v31  ;;  %v14565_v19 = vpack.i.bf16 %v14552_v35, %v14548_v3  ;;  %v10407_v60 = vpack.c.bf16 %v14552_v35, %v14536_v55  ;;  %v6697_v31 = vpop.permute.xlu1 %6696 }
 0xd78   : > { %v6954_v36 = vadd.f32 %v6872_v57, %v14304_v49  ;;  %v14569_v52 = vadd.f32 %v7070_v56, %v14557_v25 }
 0xd79   : > { %v14574_v2 = vadd.f32 %v7070_v56, %v14561_v24  ;;  %v6955_v23 = vadd.f32 %v6874_v5, %v14306_v61  ;;  %v6877_v15 = vpop.f32.mrb[104].mxu1  ;;  %11257 = vrot.lane.b32.xlu0 %v14565_v19, %s12280_s3 }
 0xd7a   : > { %v14579_v16 = vmul.f32 0.70710677, %v6954_v36  ;;  %v6878_v49 = vadd.f32 %v6877_v15, %v6682_v48  ;;  %v6879_v8 = vpop.f32.mrb[105].mxu1 }
 0xd7b   : > { %v14581_v50 = vmul.f32 0.70710677, %v6955_v23  ;;  %v6880_v27 = vadd.f32 %v6879_v8, %v6682_v48  ;;  %v11261_v11 = vpack.i.bf16 %v14574_v2, %v14569_v52  ;;  %v7082_v47 = vpop.permute.xlu1 %7081 }
 0xd7c   : > { %v6956_v20 = vadd.f32 %v6878_v49, %v14319_v42  ;;  %v14587_v56 = vadd.f32 %v7074_v63, %v14579_v16 }
 0xd7d   : > { %v14590_v61 = vadd.f32 %v7074_v63, %v14581_v50  ;;  %v6957_v46 = vadd.f32 %v6880_v27, %v14323_v0  ;;  %v6883_v39 = vpop.f32.mrb[106].mxu1  ;;  %11262 = vrot.lane.b32.xlu1 %v11261_v11, %s12280_s3 }
 0xd7e   : > { %v14594_v34 = vmul.f32 0.70710677, %v6956_v20  ;;  %v6884_v48 = vadd.f32 %v6883_v39, %v6687_v30  ;;  %v6885_v21 = vpop.f32.mrb[107].mxu1  ;;  %v10413_v18 = vpack.c.bf16 %v14587_v56, %v14569_v52 }
 0xd7f   : > { %v14598_v42 = vmul.f32 0.70710677, %v6957_v46  ;;  %v6886_v59 = vadd.f32 %v6885_v21, %v6687_v30  ;;  %v11266_v51 = vpack.i.bf16 %v14590_v61, %v14587_v56  ;;  %v10411_v29 = vpack.c.bf16 %v14590_v61, %v14574_v2  ;;  %v7086_v20 = vpop.permute.xlu1 %7085 }
 0xd80   : > { %v6958_v0 = vadd.f32 %v6884_v48, %v14338_v9  ;;  %v14604_v63 = vadd.f32 %v7078_v4, %v14594_v34 }
 0xd81   : > { %v6959_v45 = vadd.f32 %v6886_v59, %v14340_v22  ;;  %v14610_v1 = vadd.f32 %v7078_v4, %v14598_v42  ;;  %v6889_v57 = vpop.f32.mrb[108].mxu1  ;;  %11267 = vrot.lane.b32.xlu0 %v11266_v51, %s12280_s3 }
 0xd82   : > { %v14613_v30 = vmul.f32 0.70710677, %v6958_v0  ;;  %v6890_v54 = vadd.f32 %v6889_v57, %v6692_v14  ;;  %v6891_v5 = vpop.f32.mrb[109].mxu1 }
 0xd83   : > { %v14615_v36 = vmul.f32 0.70710677, %v6959_v45  ;;  %v6892_v9 = vadd.f32 %v6891_v5, %v6692_v14  ;;  %v11271_v23 = vpack.i.bf16 %v14610_v1, %v14604_v63 }
 0xd84   : > { %v6960_v15 = vadd.f32 %v6890_v54, %v14353_v38  ;;  %v14621_v22 = vadd.f32 %v7082_v47, %v14613_v30  ;;  %v7090_v54 = vpop.permute.xlu0 %7089 }
 0xd85   : > { %v6961_v49 = vadd.f32 %v6892_v9, %v14357_v12  ;;  %v14625_v8 = vadd.f32 %v7082_v47, %v14615_v36  ;;  %v6895_v27 = vpop.f32.mrb[110].mxu1  ;;  %11272 = vrot.lane.b32.xlu1 %v11271_v23, %s12280_s3 }
 0xd86   : > { %v14628_v46 = vmul.f32 0.70710677, %v6960_v15  ;;  %v6896_v14 = vadd.f32 %v6895_v27, %v6697_v31  ;;  %v6897_v39 = vpop.f32.mrb[111].mxu1  ;;  %v10417_v4 = vpack.c.bf16 %v14621_v22, %v14604_v63  ;;  %v7254_v27 = vld [vmem:[#allocation13 + $0x408] sm:$0xff] }
 0xd87   : > { %v14632_v38 = vmul.f32 0.70710677, %v6961_v49  ;;  %v6898_v48 = vadd.f32 %v6897_v39, %v6697_v31  ;;  %v11276_v12 = vpack.i.bf16 %v14625_v8, %v14621_v22  ;;  %v10415_v47 = vpack.c.bf16 %v14625_v8, %v14610_v1  ;;  %9994 = vmatprep.mubr.msk.f32.mxu0 %vm3131_vm0, %v7254_v27 }
 0xd88   : > { %v6962_v21 = vadd.f32 %v6896_v14, %v14372_v6  ;;  %v14638_v59 = vadd.f32 %v7086_v20, %v14628_v46 }
 0xd89   : > { %v6963_v0 = vadd.f32 %v6898_v48, %v14374_v13  ;;  %v14644_v45 = vadd.f32 %v7086_v20, %v14632_v38  ;;  %11277 = vrot.lane.b32.xlu0 %v11276_v12, %s12280_s3  ;;  %v7288_v48 = vld [vmem:[#allocation14 + $0x210] sm:$0xff]  ;;  %v7290_v13 = vld [vmem:[#allocation14 + $0x220] sm:$0xff] }
 0xd8a   : > { %v14647_v57 = vmul.f32 0.70710677, %v6962_v21  ;;  %v7294_v21 = vld [vmem:[#allocation14 + $0x240] sm:$0xff] }
 0xd8b   : > { %v14649_v31 = vmul.f32 0.70710677, %v6963_v0  ;;  %v11281_v6 = vpack.i.bf16 %v14644_v45, %v14638_v59 }
 0xd8c   : > { %v14654_v5 = vadd.f32 %v7090_v54, %v14647_v57 }
 0xd8d   : > { %v14657_v9 = vadd.f32 %v7090_v54, %v14649_v31  ;;  %11282 = vrot.lane.b32.xlu1 %v11281_v6, %s12280_s3 }
 0xd8e   : > { %v15190_v1 = vpack.c.bf16 %v14654_v5, %v14638_v59 }
 0xd8f   : > { %v11286_v15 = vpack.i.bf16 %v14657_v9, %v14654_v5 }
 0xd91   : > { %11287 = vrot.lane.b32.xlu0 %v11286_v15, %s12280_s3  ;;  %11292 = vrot.lane.b32.xlu1 %v14545_v17, %s12281_s11  ;;  %v7286_v17 = vld [vmem:[#allocation14 + $0x200] sm:$0xff] }
 0xd95   : > { %11297 = vrot.lane.b32.xlu0 %v14565_v19, %s12281_s11  ;;  %11302 = vrot.lane.b32.xlu1 %v11261_v11, %s12281_s11  ;;  %v7287_v19 = vld [vmem:[#allocation14 + $0x208] sm:$0xff] }
 0xd99   : > { %11307 = vrot.lane.b32.xlu0 %v11266_v51, %s12281_s11  ;;  %11312 = vrot.lane.b32.xlu1 %v11271_v23, %s12281_s11 }
 0xd9d   : > { %11317 = vrot.lane.b32.xlu0 %v11276_v12, %s12281_s11  ;;  %11322 = vrot.lane.b32.xlu1 %v11281_v6, %s12281_s11 }
 0xda1   : > { %11327 = vrot.lane.b32.xlu0 %v11286_v15, %s12281_s11  ;;  %7304 = vperm.xlu1 %11331, %v7286_v17   ;;  %v7289_v15 = vld [vmem:[#allocation14 + $0x218] sm:$0xff] }
 0xda5   : > { %7309 = vperm.xlu0 %11332, %v7287_v19   ;;  %7314 = vperm.xlu1 %11331, %v7288_v48  }
 0xda9   : > { %7344 = vperm.xlu0 %11332, %v7294_v21   ;;  %7319 = vperm.xlu1 %11331, %v7289_v15   ;;  %v7291_v21 = vld [vmem:[#allocation14 + $0x228] sm:$0xff] }
 0xdad   : > { %7324 = vperm.xlu0 %11332, %v7290_v13  }
 0xde7   : > { %v11253_v20 = vpop.permute.xlu1 %11252 }
 0xde8   : > { %v11255_v14 = vunpack.i.h.bf16 %v11253_v20  ;;  %v11254_v39 = vunpack.i.l.bf16 %v11253_v20 }
 0xdea   : > { %v7156_v12 = vsel %vm3966_vm6, %v11254_v39, %v11255_v14 }
 0xdeb   : > { %v11258_v11 = vpop.permute.xlu0 %11257 }
 0xdec   : > { %v11260_v51 = vunpack.i.h.bf16 %v11258_v11  ;;  %v11259_v23 = vunpack.i.l.bf16 %v11258_v11  ;;  %v7295_v11 = vld [vmem:[#allocation14 + $0x248] sm:$0xff] }
 0xded   : > { %7349 = vperm.xlu1 %11331, %v7295_v11  }
 0xdee   : > { %v7157_v0 = vsel %vm3966_vm6, %v11259_v23, %v11260_v51  ;;  %v10389_v27 = vpack.c.bf16 %v11259_v23, %v11254_v39  ;;  %v7296_v51 = vld [vmem:[#allocation14 + $0x250] sm:$0xff] }
 0xdef   : > { %v11263_v54 = vpop.permute.xlu1 %11262  ;;  %v10387_v6 = vpack.c.bf16 %v7157_v0, %v7156_v12  ;;  %7354 = vperm.xlu0 %11332, %v7296_v51   ;;  %v7293_v51 = vld [vmem:[#allocation14 + $0x238] sm:$0xff] }
 0xdf0   : > { %v11265_v20 = vunpack.i.h.bf16 %v11263_v54  ;;  %v11264_v17 = vunpack.i.l.bf16 %v11263_v54  ;;  %v7292_v54 = vld [vmem:[#allocation14 + $0x230] sm:$0xff] }
 0xdf1   : > { %10388 = vmatprep.subr.bf16.mxu0 %v10387_v6  ;;  %7329 = vperm.xlu1 %11331, %v7291_v21  }
 0xdf2   : > { %10391 = vmatpush1.bf16.msk.msra.mxu0 %vm13849_vm8, %v10389_v27  ;;  %v7158_v48 = vsel %vm3966_vm6, %v11264_v17, %v11265_v20  ;;  %v7297_v27 = vld [vmem:[#allocation14 + $0x258] sm:$0xff] }
 0xdf3   : > { %v11268_v19 = vpop.permute.xlu0 %11267  ;;  %7334 = vperm.xlu0 %11332, %v7292_v54   ;;  %v7299_v54 = vld [vmem:[#allocation14 + $0x268] sm:$0xff] }
 0xdf4   : > { %v11270_v14 = vunpack.i.h.bf16 %v11268_v19  ;;  %v11269_v49 = vunpack.i.l.bf16 %v11268_v19 }
 0xdf5   : > { %7359 = vperm.xlu1 %11331, %v7297_v27  }
 0xdf6   : > { %v7159_v12 = vsel %vm3966_vm6, %v11269_v49, %v11270_v14  ;;  %v10394_v0 = vpack.c.bf16 %v11269_v49, %v11264_v17  ;;  %v7298_v14 = vld [vmem:[#allocation14 + $0x260] sm:$0xff] }
 0xdf7   : > { %v11273_v39 = vpop.permute.xlu1 %11272  ;;  %v10392_v23 = vpack.c.bf16 %v7159_v12, %v7158_v48  ;;  %7364 = vperm.xlu0 %11332, %v7298_v14  }
 0xdf8   : > { %v11275_v6 = vunpack.i.h.bf16 %v11273_v39  ;;  %v11274_v15 = vunpack.i.l.bf16 %v11273_v39  ;;  %v7300_v39 = vld [vmem:[#allocation14 + $0x270] sm:$0xff] }
 0xdf9   : > { %10393 = vmatprep.subr.bf16.mxu0 %v10392_v23  ;;  %7339 = vperm.xlu1 %11331, %v7293_v51  }
 0xdfa   : > { %10396 = vmatpush1.bf16.msk.msra.mxu0 %vm13849_vm8, %v10394_v0  ;;  %v7160_v11 = vsel %vm3966_vm6, %v11274_v15, %v11275_v6 }
 0xdfb   : > { %v11278_v13 = vpop.permute.xlu0 %11277  ;;  %7374 = vperm.xlu0 %11332, %v7300_v39  }
 0xdfc   : > { %v11280_v20 = vunpack.i.h.bf16 %v11278_v13  ;;  %v11279_v19 = vunpack.i.l.bf16 %v11278_v13 }
 0xdfd   : > { %7369 = vperm.xlu1 %11331, %v7299_v54  }
 0xdfe   : > { %v7161_v48 = vsel %vm3966_vm6, %v11279_v19, %v11280_v20  ;;  %v10399_v12 = vpack.c.bf16 %v11279_v19, %v11274_v15  ;;  %v7301_v15 = vld [vmem:[#allocation14 + $0x278] sm:$0xff] }
 0xdff   : > { %v11283_v49 = vpop.permute.xlu1 %11282  ;;  %v10397_v17 = vpack.c.bf16 %v7161_v48, %v7160_v11  ;;  %v7706_v11 = vld [vmem:[#allocation17 + $0x208] sm:$0xff] }
 0xe00   : > { %v11285_v23 = vunpack.i.h.bf16 %v11283_v49  ;;  %v11284_v21 = vunpack.i.l.bf16 %v11283_v49 }
 0xe01   : > { %10398 = vmatprep.subr.bf16.mxu0 %v10397_v17  ;;  %7379 = vperm.xlu1 %11331, %v7301_v15   ;;  %v7708_v17 = vld [vmem:[#allocation17 + $0x218] sm:$0xff] }
 0xe02   : > { %10401 = vmatpush1.bf16.msk.msra.mxu0 %vm13849_vm8, %v10399_v12  ;;  %v7162_v27 = vsel %vm3966_vm6, %v11284_v21, %v11285_v23 }
 0xe03   : > { %v11288_v0 = vpop.permute.xlu0 %11287  ;;  %v11293_v49 = vpop.permute.xlu1 %11292 }
 0xe04   : > { %v11290_v6 = vunpack.i.h.bf16 %v11288_v0  ;;  %v11289_v13 = vunpack.i.l.bf16 %v11288_v0  ;;  %v11295_v3 = vunpack.i.h.bf16 %v11293_v49 }
 0xe05   : > { %7728 = vperm.xlu1 %11331, %v7706_v11  }
 0xe06   : > { %v7163_v20 = vsel %vm3966_vm6, %v11289_v13, %v11290_v6  ;;  %v10404_v19 = vpack.c.bf16 %v11289_v13, %v11284_v21 }
 0xe07   : > { %v10402_v14 = vpack.c.bf16 %v7163_v20, %v7162_v27  ;;  %v11298_v48 = vpop.permute.xlu0 %11297  ;;  %v11303_v55 = vpop.permute.xlu1 %11302 }
 0xe08   : > { %v11300_v35 = vunpack.i.h.bf16 %v11298_v48  ;;  %v11299_v28 = vunpack.i.l.bf16 %v11298_v48  ;;  %v11305_v22 = vunpack.i.h.bf16 %v11303_v55  ;;  %v11304_v8 = vunpack.i.l.bf16 %v11303_v55  ;;  %v7255_v55 = vld [vmem:[#allocation13 + $0x410] sm:$0xff] }
 0xe09   : > { %10403 = vmatprep.subr.bf16.mxu0 %v10402_v14  ;;  %7738 = vperm.xlu1 %11331, %v7708_v17   ;;  %v7253_v17 = vld [vmem:[#allocation13 + $0x400] sm:$0xff] }
 0xe0a   : > { %10406 = vmatpush1.bf16.msk.msra.mxu0 %vm13849_vm8, %v10404_v19  ;;  %v7221_v2 = vsel %vm4031_vm9, %v11299_v28, %v11300_v35  ;;  %v10423_v56 = vpack.c.bf16 %v11300_v35, %v11295_v3  ;;  %v7222_v39 = vsel %vm4031_vm9, %v11304_v8, %v11305_v22  ;;  %v7258_v35 = vld [vmem:[#allocation13 + $0x428] sm:$0xff]  ;;  %v7257_v28 = vld [vmem:[#allocation13 + $0x420] sm:$0xff]  ;;  %v7271_v8 = vld [vmem:[#allocation13 + $0x490] sm:$0xff] }
 0xe0b   : > { %10408 = vmatprep.subr.bf16.mxu0 %v10407_v60  ;;  %v11308_v40 = vpop.permute.xlu0 %11307  ;;  %v15189_v60 = vpack.c.bf16 %v14657_v9, %v14644_v45 }
 0xe0c   : > { %v11310_v61 = vunpack.i.h.bf16 %v11308_v40 }
 0xe0e   : > { %10410 = vmatpush1.bf16.msra.mxu0 %v10409_v41  ;;  %v11294_v41 = vunpack.i.l.bf16 %v11293_v49  ;;  %v10428_v45 = vpack.c.bf16 %v11310_v61, %v11305_v22  ;;  %v7272_v22 = vld [vmem:[#allocation13 + $0x498] sm:$0xff] }
 0xe0f   : > { %10412 = vmatprep.subr.bf16.mxu0 %v10411_v29  ;;  %v11318_v52 = vpop.permute.xlu0 %11317  ;;  %v11313_v29 = vpop.permute.xlu1 %11312 }
 0xe10   : > { %v7220_v63 = vsel %vm4031_vm9, %v11294_v41, %v11295_v3  ;;  %v11320_v9 = vunpack.i.h.bf16 %v11318_v52  ;;  %v11319_v51 = vunpack.i.l.bf16 %v11318_v52  ;;  %v11315_v23 = vunpack.i.h.bf16 %v11313_v29  ;;  %v7260_v3 = vld [vmem:[#allocation13 + $0x438] sm:$0xff]  ;;  %v7259_v41 = vld [vmem:[#allocation13 + $0x430] sm:$0xff] }
 0xe11   : > { %v11314_v59 = vunpack.i.l.bf16 %v11313_v29  ;;  %v7264_v52 = vld [vmem:[#allocation13 + $0x458] sm:$0xff]  ;;  %v7267_v29 = vld [vmem:[#allocation13 + $0x470] sm:$0xff] }
 0xe12   : > { %10414 = vmatpush1.bf16.msra.mxu0 %v10413_v18  ;;  %v11309_v18 = vunpack.i.l.bf16 %v11308_v40  ;;  %v7225_v0 = vsel %vm4031_vm9, %v11319_v51, %v11320_v9  ;;  %v10433_v54 = vpack.c.bf16 %v11320_v9, %v11315_v23  ;;  %v7256_v40 = vld [vmem:[#allocation13 + $0x418] sm:$0xff]  ;;  %v7275_v9 = vld [vmem:[#allocation13 + $0x4b0] sm:$0xff]  ;;  %v7278_v51 = vld [vmem:[#allocation13 + $0x4c8] sm:$0xff] }
 0xe13   : > { %10416 = vmatprep.subr.bf16.mxu0 %v10415_v47  ;;  %v11328_v12 = vpop.permute.xlu0 %11327  ;;  %v11323_v5 = vpop.permute.xlu1 %11322  ;;  %v7224_v27 = vsel %vm4031_vm9, %v11314_v59, %v11315_v23  ;;  %v7279_v23 = vld [vmem:[#allocation13 + $0x4d0] sm:$0xff]  ;;  %v7282_v59 = vld [vmem:[#allocation13 + $0x4e8] sm:$0xff] }
 0xe14   : > { %v7223_v47 = vsel %vm4031_vm9, %v11309_v18, %v11310_v61  ;;  %v11330_v6 = vunpack.i.h.bf16 %v11328_v12  ;;  %v11329_v13 = vunpack.i.l.bf16 %v11328_v12  ;;  %v11325_v20 = vunpack.i.h.bf16 %v11323_v5  ;;  %v7265_v61 = vld [vmem:[#allocation13 + $0x460] sm:$0xff]  ;;  %v7268_v18 = vld [vmem:[#allocation13 + $0x478] sm:$0xff] }
 0xe15   : > { %v10431_v21 = vpack.c.bf16 %v7223_v47, %v7222_v39  ;;  %v11324_v14 = vunpack.i.l.bf16 %v11323_v5  ;;  %v10436_v15 = vpack.c.bf16 %v7225_v0, %v7224_v27  ;;  %v7273_v47 = vld [vmem:[#allocation13 + $0x4a0] sm:$0xff]  ;;  %v7280_v39 = vld [vmem:[#allocation13 + $0x4d8] sm:$0xff]  ;;  %v7283_v0 = vld [vmem:[#allocation13 + $0x4f0] sm:$0xff] }
 0xe16   : > { %10418 = vmatpush1.bf16.msra.mxu0 %v10417_v4  ;;  %v10426_v4 = vpack.c.bf16 %v7221_v2, %v7220_v63  ;;  %v7227_v19 = vsel %vm4031_vm9, %v11329_v13, %v11330_v6  ;;  %v10438_v11 = vpack.c.bf16 %v11330_v6, %v11325_v20  ;;  %v7263_v2 = vld [vmem:[#allocation13 + $0x450] sm:$0xff]  ;;  %v7269_v63 = vld [vmem:[#allocation13 + $0x480] sm:$0xff]  ;;  %v6635_v6 = vld [vmem:[#allocation16 + $0x1c8] sm:$0xff] }
 0xe17   : > { %10420 = vmatprep.subr.bf16.mxu0 %v15189_v60  ;;  %v7226_v48 = vsel %vm4031_vm9, %v11324_v14, %v11325_v20  ;;  %v7261_v60 = vld [vmem:[#allocation13 + $0x440] sm:$0xff]  ;;  %v6636_v13 = vld [vmem:[#allocation16 + $0x1d0] sm:$0xff]  ;;  %v6637_v27 = vld [vmem:[#allocation16 + $0x1d8] sm:$0xff] }
 0xe18   : > { %v10441_v49 = vpack.c.bf16 %v7227_v19, %v7226_v48  ;;  %v7277_v12 = vld [vmem:[#allocation13 + $0x4c0] sm:$0xff]  ;;  %v6639_v14 = vld [vmem:[#allocation16 + $0x1e8] sm:$0xff]  ;;  %v6641_v19 = vld [vmem:[#allocation16 + $0x1f8] sm:$0xff] }
 0xe19   : > { %v7281_v5 = vld [vmem:[#allocation13 + $0x4e0] sm:$0xff] }
 0xe1a   : > { %10422 = vmatpush1.bf16.msra.mxu0 %v15190_v1  ;;  %v7270_v1 = vld [vmem:[#allocation13 + $0x488] sm:$0xff]  ;;  %v6638_v20 = vld [vmem:[#allocation16 + $0x1e0] sm:$0xff] }
 0xe1b   : > { %10425 = vmatprep.subr.msk.bf16.mxu0 %vm13890_vm10, %v10423_v56  ;;  %v7266_v56 = vld [vmem:[#allocation13 + $0x468] sm:$0xff]  ;;  %v11847_v48 = vld [vmem:[%s12744_s27] sm:$0xff] }
 0xe1e   : > { %10427 = vmatpush1.bf16.msra.mxu0 %v10426_v4  ;;  %v7274_v4 = vld [vmem:[#allocation13 + $0x4a8] sm:$0xff] }
 0xe1f   : > { %10430 = vmatprep.subr.msk.bf16.mxu0 %vm13890_vm10, %v10428_v45  ;;  %v7276_v45 = vld [vmem:[#allocation13 + $0x4b8] sm:$0xff] }
 0xe22   : > { %10432 = vmatpush1.bf16.msra.mxu0 %v10431_v21  ;;  %v7284_v21 = vld [vmem:[#allocation13 + $0x4f8] sm:$0xff] }
 0xe23   : > { %10435 = vmatprep.subr.msk.bf16.mxu0 %vm13890_vm10, %v10433_v54  ;;  %v6634_v54 = vld [vmem:[#allocation16 + $0x1c0] sm:$0xff] }
 0xe24   : > { %9962 = vmatmul.mubr.msk.f32.gmra.mrb[16].mxu1 %vm3131_vm0, %v6634_v54 }
 0xe25   : > { %6905 = vmatprep.mubr.f32.mxu1 %v15184_v44 }
 0xe26   : > { %10437 = vmatpush1.bf16.msra.mxu0 %v10436_v15  ;;  %v6640_v15 = vld [vmem:[#allocation16 + $0x1f0] sm:$0xff] }
 0xe27   : > { %10440 = vmatprep.subr.msk.bf16.mxu0 %vm13890_vm10, %v10438_v11  ;;  %v12287_v11 = vmov 5  }
 0xe28   : > { %9963 = vmatmul.mubr.msk.f32.gmra.mrb[18].mxu1 %vm3131_vm0, %v6635_v6  ;;  %11333 = vset.pattern.permute.xlu0 %v12287_v11 }
 0xe29   : > { %6911 = vmatprep.mubr.f32.mxu1 %v15184_v44  ;;  %11335 = vset.pattern.permute.xlu1 %v12287_v11 }
 0xe2a   : > { %10442 = vmatpush1.bf16.msra.mxu0 %v10441_v49  ;;  %8123 = vperm.xlu0 %11333, %v11847_v48   ;;  %v11848_v49 = vld [vmem:[%s12744_s27 + $0x8] sm:$0xff] }
 0xe2b   : > { %8127 = vperm.xlu1 %11335, %v11848_v49  }
 0xe2c   : > { %9964 = vmatmul.mubr.msk.f32.gmra.mrb[20].mxu1 %vm3131_vm0, %v6636_v13 }
 0xe2d   : > { %7495 = vmatmul.mubr.f32.vlgmr.msra.gmra.mrb[96].mxu0 %v7253_v17  ;;  %6917 = vmatprep.mubr.f32.mxu1 %v15184_v44  ;;  %v7705_v17 = vld [vmem:[#allocation17 + $0x200] sm:$0xff] }
 0xe2e   : > { %9995 = vmatprep.mubr.msk.f32.mxu0 %vm3131_vm0, %v7256_v40  ;;  %v7709_v40 = vld [vmem:[#allocation17 + $0x220] sm:$0xff]  ;;  %11334 = vset.pattern.permute.xlu0 %v15177_v33 }
 0xe2f   : > { %11336 = vset.pattern.permute.xlu1 %v15177_v33  ;;  %7723 = vperm.xlu0 %11334, %v7705_v17  }
 0xe30   : > { %9965 = vmatmul.mubr.msk.f32.gmra.mrb[22].mxu1 %vm3131_vm0, %v6637_v27  ;;  %7743 = vperm.xlu1 %11336, %v7709_v40  }
 0xe31   : > { %7501 = vmatmul.mubr.f32.gmra.mrb[98].mxu0 %v7255_v55  ;;  %6923 = vmatprep.mubr.f32.mxu1 %v15184_v44  ;;  %v7707_v55 = vld [vmem:[#allocation17 + $0x210] sm:$0xff] }
 0xe32   : > { %9996 = vmatprep.mubr.msk.f32.mxu0 %vm3131_vm0, %v7258_v35  ;;  %v7710_v35 = vld [vmem:[#allocation17 + $0x228] sm:$0xff] }
 0xe33   : > { %7733 = vperm.xlu0 %11334, %v7707_v55  }
 0xe34   : > { %9966 = vmatmul.mubr.msk.f32.gmra.mrb[24].mxu1 %vm3131_vm0, %v6638_v20  ;;  %11337 = vset.pattern.permute.xlu1 %v12287_v11 }
 0xe35   : > { %7507 = vmatmul.mubr.f32.gmra.mrb[100].mxu0 %v7257_v28  ;;  %6929 = vmatprep.mubr.f32.mxu1 %v15184_v44  ;;  %v11849_v28 = vld [vmem:[%s12744_s27 + $0x10] sm:$0xff] }
 0xe36   : > { %9997 = vmatprep.mubr.msk.f32.mxu0 %vm3131_vm0, %v7260_v3  ;;  %8131 = vperm.xlu1 %11337, %v11849_v28   ;;  %v7711_v3 = vld [vmem:[#allocation17 + $0x230] sm:$0xff] }
 0xe37   : > { %7748 = vperm.xlu0 %11334, %v7710_v35  }
 0xe38   : > { %9967 = vmatmul.mubr.msk.f32.gmra.mrb[26].mxu1 %vm3131_vm0, %v6639_v14 }
 0xe39   : > { %7513 = vmatmul.mubr.f32.gmra.mrb[102].mxu0 %v7259_v41  ;;  %6935 = vmatprep.mubr.f32.mxu1 %v15184_v44  ;;  %v11850_v41 = vld [vmem:[%s12744_s27 + $0x18] sm:$0xff] }
 0xe3a   : > { %9998 = vmatprep.mubr.msk.f32.mxu0 %vm3131_vm0, %v7262_v58  ;;  %8135 = vperm.xlu1 %11337, %v11850_v41  }
 0xe3b   : > { %7753 = vperm.xlu0 %11334, %v7711_v3  }
 0xe3c   : > { %9968 = vmatmul.mubr.msk.f32.gmra.mrb[28].mxu1 %vm3131_vm0, %v6640_v15 }
 0xe3d   : > { %7519 = vmatmul.mubr.f32.gmra.mrb[104].mxu0 %v7261_v60  ;;  %6941 = vmatprep.mubr.f32.mxu1 %v15184_v44 }
 0xe3e   : > { %9999 = vmatprep.mubr.msk.f32.mxu0 %vm3131_vm0, %v7264_v52  ;;  %v7712_v52 = vld [vmem:[#allocation17 + $0x238] sm:$0xff]  ;;  %11338 = vset.pattern.permute.xlu1 %v15177_v33 }
 0xe3f   : > { %7758 = vperm.xlu1 %11338, %v7712_v52   ;;  %11339 = vset.pattern.permute.xlu0 %v12287_v11 }
 0xe40   : > { %9969 = vmatmul.mubr.msk.f32.gmra.mrb[30].mxu1 %vm3131_vm0, %v6641_v19 }
 0xe41   : > { %7525 = vmatmul.mubr.f32.gmra.mrb[106].mxu0 %v7263_v2  ;;  %7913 = vmatprep.mubr.f32.mxu1 %v15184_v44 }
 0xe42   : > { %10000 = vmatprep.mubr.msk.f32.mxu0 %vm3131_vm0, %v7266_v56 }
 0xe43   : > { %11340 = vset.pattern.permute.xlu1 %v12287_v11 }
 0xe45   : > { %7531 = vmatmul.mubr.f32.gmra.mrb[108].mxu0 %v7265_v61  ;;  %v7305_v61 = vpop.permute.xlu1 %7304 }
 0xe46   : > { %10001 = vmatprep.mubr.msk.f32.mxu0 %vm3131_vm0, %v7268_v18  ;;  %v11851_v18 = vld [vmem:[%s12744_s27 + $0x20] sm:$0xff] }
 0xe47   : > { %8139 = vperm.xlu0 %11339, %v11851_v18  }
 0xe49   : > { %7537 = vmatmul.mubr.f32.gmra.mrb[110].mxu0 %v7267_v29 }
 0xe4a   : > { %10002 = vmatprep.mubr.msk.f32.mxu0 %vm3131_vm0, %v7270_v1 }
 0xe4d   : > { %7543 = vmatmul.mubr.f32.gmra.mrb[112].mxu0 %v7269_v63  ;;  %v11852_v63 = vld [vmem:[%s12744_s27 + $0x28] sm:$0xff] }
 0xe4e   : > { %10003 = vmatprep.mubr.msk.f32.mxu0 %vm3131_vm0, %v7272_v22  ;;  %8143 = vperm.xlu1 %11340, %v11852_v63   ;;  %v11853_v22 = vld [vmem:[%s12744_s27 + $0x38] sm:$0xff] }
 0xe4f   : > { %8151 = vperm.xlu0 %11339, %v11853_v22  }
 0xe51   : > { %7549 = vmatmul.mubr.f32.gmra.mrb[114].mxu0 %v7271_v8 }
 0xe52   : > { %10004 = vmatprep.mubr.msk.f32.mxu0 %vm3131_vm0, %v7274_v4  ;;  %v7315_v4 = vpop.permute.xlu1 %7314 }
 0xe53   : > { %11422 = vset.pattern.permute.xlu0 %v15177_v33 }
 0xe55   : > { %7555 = vmatmul.mubr.f32.gmra.mrb[116].mxu0 %v7273_v47 }
 0xe56   : > { %10005 = vmatprep.mubr.msk.f32.mxu0 %vm3131_vm0, %v7276_v45  ;;  %v11854_v45 = vld [vmem:[%s12744_s27 + $0x30] sm:$0xff]  ;;  %s12171_s27 = sshll.u32 %s12288_s17, 4  ;;  %s12172_s27 = int_to_ptr.vmem [resolvable:$false] %s12171_s27 }
 0xe57   : > { %8147 = vperm.xlu1 %11340, %v11854_v45   ;;  %s12173_s30 = scalar_lea.vmem %s12172_s27, 64  ;;  %p12174_p11 = scmp.lt.s32.totalorder %s15061_s19, %s12172_s27 }
 0xe58   : > { %p12175_p3 = scmp.lt.s32.totalorder %s12173_s30, %s12167_s15 }
 0xe59   : > { %7561 = vmatmul.mubr.f32.gmra.mrb[118].mxu0 %v7275_v9  ;;  %v7310_v9 = vpop.permute.xlu0 %7309 }
 0xe5a   : > { %10006 = vmatprep.mubr.msk.f32.mxu0 %vm3131_vm0, %v7278_v51  ;;  %p12176_p12 = por %p12175_p3, %p12174_p11 }
 0xe5b   : > { %11421 = vset.pattern.permute.xlu1 %v15177_v33 }
 0xe5c   : > { %p12177_p1 = pnand %p12176_p12, %p12170_p8 }
 0xe5d   : > { %7567 = vmatmul.mubr.f32.gmra.mrb[120].mxu0 %v7277_v12 }
 0xe5e   : > { %10007 = vmatprep.mubr.msk.f32.mxu0 %vm3131_vm0, %v7280_v39 }
 0xe61   : > { %7573 = vmatmul.mubr.f32.gmra.mrb[122].mxu0 %v7279_v23  ;;  %v7320_v23 = vpop.permute.xlu1 %7319 }
 0xe62   : > { %10008 = vmatprep.mubr.msk.f32.mxu0 %vm3131_vm0, %v7282_v59 }
 0xe65   : > { %7579 = vmatmul.mubr.f32.gmra.mrb[124].mxu0 %v7281_v5  ;;  %v7345_v5 = vpop.permute.xlu0 %7344 }
 0xe66   : > { %10009 = vmatprep.mubr.msk.f32.mxu0 %vm3131_vm0, %v7284_v21 }
 0xe69   : > { %7585 = vmatmul.mubr.f32.gmra.mrb[126].mxu0 %v7283_v0  ;;  %v7325_v17 = vpop.permute.xlu0 %7324 }
 0xe6c   : > { %v7350_v15 = vpop.permute.xlu1 %7349 }
 0xe6e   : > { %v7355_v52 = vpop.permute.xlu0 %7354 }
 0xf00   : > { %v7496_v58 = vpop.f32.mrb[96].mxu0 }
 0xf01   : > { %v7498_v60 = vpop.f32.mrb[97].mxu0  ;;  %v7497_v39 = vadd.f32 %v7496_v58, %v7305_v61 }
 0xf02   : > { %v7499_v59 = vadd.f32 %v7498_v60, %v7305_v61  ;;  %v7330_v60 = vpop.permute.xlu1 %7329 }
 0xf03   : > { %v7591_v54 = vmul.f32 0.5, %v7497_v39 }
 0xf04   : > { %v7502_v2 = vpop.f32.mrb[98].mxu0  ;;  %v7592_v13 = vmul.f32 0.5, %v7499_v59 }
 0xf05   : > { %v7504_v56 = vpop.f32.mrb[99].mxu0  ;;  %v7503_v6 = vadd.f32 %v7502_v2, %v7310_v9  ;;  %11687 = vtanh.f32 %v7591_v54 }
 0xf06   : > { %v7505_v27 = vadd.f32 %v7504_v56, %v7310_v9  ;;  %11689 = vtanh.f32 %v7592_v13 }
 0xf07   : > { %v7593_v48 = vmul.f32 0.5, %v7503_v6 }
 0xf08   : > { %v7508_v29 = vpop.f32.mrb[100].mxu0  ;;  %v7594_v33 = vmul.f32 0.5, %v7505_v27 }
 0xf09   : > { %v7510_v1 = vpop.f32.mrb[101].mxu0  ;;  %v7509_v20 = vadd.f32 %v7508_v29, %v7315_v4  ;;  %11691 = vtanh.f32 %v7593_v48 }
 0xf0a   : > { %v7511_v19 = vadd.f32 %v7510_v1, %v7315_v4  ;;  %11693 = vtanh.f32 %v7594_v33 }
 0xf0b   : > { %v7595_v40 = vmul.f32 0.5, %v7509_v20 }
 0xf0c   : > { %v7514_v8 = vpop.f32.mrb[102].mxu0  ;;  %v7596_v35 = vmul.f32 0.5, %v7511_v19 }
 0xf0d   : > { %v7516_v47 = vpop.f32.mrb[103].mxu0  ;;  %v7515_v49 = vadd.f32 %v7514_v8, %v7320_v23  ;;  %11695 = vtanh.f32 %v7595_v40 }
 0xf0e   : > { %v7517_v28 = vadd.f32 %v7516_v47, %v7320_v23  ;;  %11697 = vtanh.f32 %v7596_v35  ;;  %v7360_v23 = vpop.permute.xlu1 %7359 }
 0xf0f   : > { %v7597_v41 = vmul.f32 0.5, %v7515_v49  ;;  %v11688_v8 = vpop.eup %11687 }
 0xf10   : > { %v7520_v51 = vpop.f32.mrb[104].mxu0  ;;  %v7598_v56 = vmul.f32 0.5, %v7517_v28  ;;  %v11690_v47 = vpop.eup %11689  ;;  %v7623_v6 = vadd.f32 1.0, %v11688_v8 }
 0xf11   : > { %v7522_v12 = vpop.f32.mrb[105].mxu0  ;;  %v7521_v58 = vadd.f32 %v7520_v51, %v7325_v17  ;;  %11699 = vtanh.f32 %v7597_v41 }
 0xf12   : > { %v7523_v61 = vadd.f32 %v7522_v12, %v7325_v17  ;;  %v7335_v12 = vpop.permute.xlu0 %7334  ;;  %v7639_v35 = vmul.f32 0.5, %v7623_v6 }
 0xf13   : > { %v7599_v1 = vmul.f32 0.5, %v7521_v58  ;;  %v11692_v13 = vpop.eup %11691 }
 0xf14   : > { %v7526_v21 = vpop.f32.mrb[106].mxu0  ;;  %v7600_v45 = vmul.f32 0.5, %v7523_v61  ;;  %v11694_v27 = vpop.eup %11693  ;;  %v7625_v41 = vadd.f32 1.0, %v11692_v13 }
 0xf15   : > { %v7528_v0 = vpop.f32.mrb[107].mxu0  ;;  %v7527_v63 = vadd.f32 %v7526_v21, %v7330_v60  ;;  %v7624_v21 = vadd.f32 1.0, %v11690_v47  ;;  %v7626_v58 = vadd.f32 1.0, %v11694_v27 }
 0xf16   : > { %v7529_v9 = vadd.f32 %v7528_v0, %v7330_v60  ;;  %v7340_v60 = vpop.permute.xlu1 %7339 }
 0xf17   : > { %v7601_v59 = vmul.f32 0.5, %v7527_v63  ;;  %v11696_v0 = vpop.eup %11695  ;;  %v7640_v28 = vmul.f32 0.5, %v7624_v21 }
 0xf18   : > { %v7532_v14 = vpop.f32.mrb[108].mxu0  ;;  %v7602_v20 = vmul.f32 0.5, %v7529_v9  ;;  %v11698_v40 = vpop.eup %11697  ;;  %v7641_v9 = vmul.f32 0.5, %v7625_v41 }
 0xf19   : > { %v7534_v11 = vpop.f32.mrb[109].mxu0  ;;  %v7533_v19 = vadd.f32 %v7532_v14, %v7335_v12 }
 0xf1a   : > { %v7535_v17 = vadd.f32 %v7534_v11, %v7335_v12 }
 0xf1b   : > { %v7603_v61 = vmul.f32 0.5, %v7533_v19 }
 0xf1c   : > { %v14778_v55 = vpop.f32.mrb[110].mxu0  ;;  %v7604_v11 = vmul.f32 0.5, %v7535_v17  ;;  %v7370_v17 = vpop.permute.xlu1 %7369 }
 0xf1d   : > { %v14780_v3 = vpop.f32.mrb[111].mxu0  ;;  %v7539_v14 = vadd.f32 %v14778_v55, %v7340_v60  ;;  %v7642_v55 = vmul.f32 0.5, %v7626_v58 }
 0xf20   : > { %v7544_v2 = vpop.f32.mrb[112].mxu0 }
 0xf21   : > { %v7545_v18 = vadd.f32 %v7544_v2, %v7345_v5  ;;  %v7546_v29 = vpop.f32.mrb[113].mxu0 }
 0xf22   : > { %v7547_v22 = vadd.f32 %v7546_v29, %v7345_v5 }
 0xf23   : > { %11701 = vtanh.f32 %v7545_v18 }
 0xf24   : > { %11703 = vtanh.f32 %v7547_v22  ;;  %v7550_v4 = vpop.f32.mrb[114].mxu0 }
 0xf25   : > { %11705 = vtanh.f32 %v7598_v56  ;;  %v7551_v51 = vadd.f32 %v7550_v4, %v7350_v15  ;;  %v7552_v39 = vpop.f32.mrb[115].mxu0  ;;  %v7627_v4 = vadd.f32 1.0, %v11696_v0 }
 0xf26   : > { %11707 = vtanh.f32 %v7599_v1  ;;  %v7553_v54 = vadd.f32 %v7552_v39, %v7350_v15  ;;  %v11700_v15 = vpop.eup %11699  ;;  %v7365_v39 = vpop.permute.xlu0 %7364 }
 0xf27   : > { %11709 = vtanh.f32 %v7551_v51  ;;  %v7628_v51 = vadd.f32 1.0, %v11698_v40  ;;  %v7629_v0 = vadd.f32 1.0, %v11700_v15 }
 0xf28   : > { %11711 = vtanh.f32 %v7553_v54  ;;  %v7556_v5 = vpop.f32.mrb[116].mxu0  ;;  %v7605_v54 = vmul.f32 0.5, %v7539_v14 }
 0xf29   : > { %11713 = vtanh.f32 %v7600_v45  ;;  %v7557_v48 = vadd.f32 %v7556_v5, %v7355_v52  ;;  %v7558_v49 = vpop.f32.mrb[117].mxu0 }
 0xf2a   : > { %11715 = vtanh.f32 %v7601_v59  ;;  %v7559_v33 = vadd.f32 %v7558_v49, %v7355_v52  ;;  %v7541_v52 = vadd.f32 %v14780_v3, %v7340_v60  ;;  %v7644_v49 = vmul.f32 0.5, %v7628_v51 }
 0xf2b   : > { %11717 = vtanh.f32 %v7557_v48 }
 0xf2c   : > { %11719 = vtanh.f32 %v7559_v33  ;;  %v7562_v2 = vpop.f32.mrb[118].mxu0  ;;  %v7606_v3 = vmul.f32 0.5, %v7541_v52 }
 0xf2d   : > { %v11702_v56 = vpop.eup %11701  ;;  %11721 = vtanh.f32 %v7602_v20  ;;  %v7563_v18 = vadd.f32 %v7562_v2, %v7360_v23  ;;  %v7564_v29 = vpop.f32.mrb[119].mxu0  ;;  %v7643_v20 = vmul.f32 0.5, %v7627_v4 }
 0xf2e   : > { %v11704_v1 = vpop.eup %11703  ;;  %v7565_v63 = vadd.f32 %v7564_v29, %v7360_v23  ;;  %v7671_v22 = vmul.f32 %v11702_v56, %v7639_v35  ;;  %v7645_v29 = vmul.f32 0.5, %v7629_v0 }
 0xf2f   : > { %v11706_v8 = vpop.eup %11705  ;;  %11723 = vtanh.f32 %v7563_v18  ;;  %v7672_v47 = vmul.f32 %v11704_v1, %v7640_v28  ;;  %v7375_v1 = vpop.permute.xlu0 %7374 }
 0xf30   : > { %v11708_v45 = vpop.eup %11707  ;;  %11725 = vtanh.f32 %v7565_v63  ;;  %v7568_v59 = vpop.f32.mrb[120].mxu0  ;;  %v7630_v28 = vadd.f32 1.0, %v11706_v8 }
 0xf31   : > { %v11710_v12 = vpop.eup %11709  ;;  %11727 = vtanh.f32 %v7603_v61  ;;  %v7569_v6 = vadd.f32 %v7568_v59, %v7365_v39  ;;  %v7570_v13 = vpop.f32.mrb[121].mxu0  ;;  %v7631_v15 = vadd.f32 1.0, %v11708_v45 }
 0xf32   : > { %v11712_v21 = vpop.eup %11711  ;;  %11729 = vtanh.f32 %v7604_v11  ;;  %v7571_v23 = vadd.f32 %v7570_v13, %v7365_v39  ;;  %v7673_v5 = vmul.f32 %v11710_v12, %v7641_v9  ;;  %v7646_v63 = vmul.f32 0.5, %v7630_v28 }
 0xf33   : > { %v11714_v27 = vpop.eup %11713  ;;  %11731 = vtanh.f32 %v7569_v6  ;;  %v7674_v19 = vmul.f32 %v11712_v21, %v7642_v55  ;;  %v7647_v55 = vmul.f32 0.5, %v7631_v15 }
 0xf34   : > { %v11716_v48 = vpop.eup %11715  ;;  %11733 = vtanh.f32 %v7571_v23  ;;  %v7574_v33 = vpop.f32.mrb[122].mxu0  ;;  %v10445_v40 = vpack.c.bf16 %v7673_v5, %v7671_v22  ;;  %v7632_v22 = vadd.f32 1.0, %v11714_v27 }
 0xf35   : > { %v11718_v35 = vpop.eup %11717  ;;  %11735 = vtanh.f32 %v7605_v54  ;;  %v7575_v41 = vadd.f32 %v7574_v33, %v7370_v17  ;;  %v7576_v58 = vpop.f32.mrb[123].mxu0  ;;  %v10443_v60 = vpack.c.bf16 %v7674_v19, %v7672_v47  ;;  %v7633_v6 = vadd.f32 1.0, %v11716_v48 }
 0xf36   : > { %v11720_v2 = vpop.eup %11719  ;;  %11737 = vtanh.f32 %v7606_v3  ;;  %v7577_v56 = vadd.f32 %v7576_v58, %v7370_v17  ;;  %v7675_v61 = vmul.f32 %v11718_v35, %v7643_v20  ;;  %v7380_v54 = vpop.permute.xlu1 %7379  ;;  %v7648_v3 = vmul.f32 0.5, %v7632_v22 }
 0xf37   : > { %v11722_v14 = vpop.eup %11721  ;;  %11739 = vtanh.f32 %v7575_v41  ;;  %10444 = vmatprep.subr.bf16.mxu1 %v10443_v60  ;;  %v7676_v18 = vmul.f32 %v11720_v2, %v7644_v49  ;;  %v7649_v35 = vmul.f32 0.5, %v7633_v6  ;;  %v7690_v6 = vld [vmem:[#allocation16 + $0x210] sm:$0xff] }
 0xf38   : > { %11741 = vtanh.f32 %v7577_v56  ;;  %v7580_v11 = vpop.f32.mrb[124].mxu0  ;;  %10446 = vmatpush1.bf16.msra.mxu1 %v10445_v40  ;;  %v7634_v23 = vadd.f32 1.0, %v11722_v14 }
 0xf39   : > { %v11724_v52 = vpop.eup %11723  ;;  %v7581_v8 = vadd.f32 %v7580_v11, %v7375_v1  ;;  %v7582_v4 = vpop.f32.mrb[125].mxu0 }
 0xf3a   : > { %v11726_v47 = vpop.eup %11725  ;;  %v7583_v9 = vadd.f32 %v7582_v4, %v7375_v1  ;;  %v7677_v51 = vmul.f32 %v11724_v52, %v7645_v29  ;;  %v7650_v41 = vmul.f32 0.5, %v7634_v23  ;;  %v7695_v23 = vld [vmem:[#allocation16 + $0x238] sm:$0xff] }
 0xf3b   : > { %v11728_v39 = vpop.eup %11727  ;;  %11743 = vtanh.f32 %v7581_v8  ;;  %v7678_v59 = vmul.f32 %v11726_v47, %v7646_v63 }
 0xf3c   : > { %v11730_v12 = vpop.eup %11729  ;;  %11745 = vtanh.f32 %v7583_v9  ;;  %v7586_v45 = vpop.f32.mrb[126].mxu0  ;;  %v10449_v13 = vpack.c.bf16 %v7677_v51, %v7675_v61  ;;  %v7635_v28 = vadd.f32 1.0, %v11728_v39 }
 0xf3d   : > { %v11732_v21 = vpop.eup %11731  ;;  %v7587_v5 = vadd.f32 %v7586_v45, %v7380_v54  ;;  %v7588_v27 = vpop.f32.mrb[127].mxu0  ;;  %v10447_v20 = vpack.c.bf16 %v7678_v59, %v7676_v18  ;;  %v7636_v58 = vadd.f32 1.0, %v11730_v12  ;;  %v7691_v45 = vld [vmem:[#allocation16 + $0x218] sm:$0xff] }
 0xf3e   : > { %v11734_v19 = vpop.eup %11733  ;;  %v7589_v49 = vadd.f32 %v7588_v27, %v7380_v54  ;;  %v7679_v0 = vmul.f32 %v11732_v21, %v7647_v55  ;;  %v7651_v61 = vmul.f32 0.5, %v7635_v28  ;;  %v7688_v55 = vld [vmem:[#allocation16 + $0x200] sm:$0xff]  ;;  %v7689_v54 = vld [vmem:[#allocation16 + $0x208] sm:$0xff] }
 0xf3f   : > { %v11736_v17 = vpop.eup %11735  ;;  %11747 = vtanh.f32 %v7587_v5  ;;  %10448 = vmatprep.subr.bf16.mxu1 %v10447_v20  ;;  %v7680_v33 = vmul.f32 %v11734_v19, %v7648_v3  ;;  %v7652_v15 = vmul.f32 0.5, %v7636_v58  ;;  %v7693_v21 = vld [vmem:[#allocation16 + $0x228] sm:$0xff]  ;;  %v7694_v3 = vld [vmem:[#allocation16 + $0x230] sm:$0xff]  ;;  %v7729_v5 = vpop.permute.xlu1 %7728 }
 0xf40   : > { %v11738_v40 = vpop.eup %11737  ;;  %11749 = vtanh.f32 %v7589_v49  ;;  %10450 = vmatpush1.bf16.msra.mxu1 %v10449_v13  ;;  %v7637_v14 = vadd.f32 1.0, %v11736_v17  ;;  %v7692_v13 = vld [vmem:[#allocation16 + $0x220] sm:$0xff]  ;;  %v8124_v20 = vpop.permute.xlu0 %8123 }
 0xf41   : > { %v11740_v48 = vpop.eup %11739  ;;  %v7638_v1 = vadd.f32 1.0, %v11738_v40 }
 0xf42   : > { %v11742_v60 = vpop.eup %11741  ;;  %v7681_v2 = vmul.f32 %v11740_v48, %v7649_v35  ;;  %v7653_v8 = vmul.f32 0.5, %v7637_v14 }
 0xf43   : > { %v7682_v56 = vmul.f32 %v11742_v60, %v7650_v41  ;;  %v7654_v47 = vmul.f32 0.5, %v7638_v1  ;;  %v7739_v27 = vpop.permute.xlu1 %7738 }
 0xf44   : > { %v10453_v18 = vpack.c.bf16 %v7681_v2, %v7679_v0  ;;  %v7724_v49 = vpop.permute.xlu0 %7723 }
 0xf45   : > { %v11744_v29 = vpop.eup %11743  ;;  %v10451_v11 = vpack.c.bf16 %v7682_v56, %v7680_v33 }
 0xf46   : > { %v11746_v52 = vpop.eup %11745  ;;  %v7683_v63 = vmul.f32 %v11744_v29, %v7651_v61 }
 0xf47   : > { %10452 = vmatprep.subr.bf16.mxu1 %v10451_v11  ;;  %v7684_v22 = vmul.f32 %v11746_v52, %v7652_v15  ;;  %v8128_v19 = vpop.permute.xlu1 %8127 }
 0xf48   : > { %10454 = vmatpush1.bf16.msra.mxu1 %v10453_v18  ;;  %v7734_v48 = vpop.permute.xlu0 %7733 }
 0xf49   : > { %v11748_v4 = vpop.eup %11747 }
 0xf4a   : > { %v11750_v9 = vpop.eup %11749  ;;  %v7685_v51 = vmul.f32 %v11748_v4, %v7653_v8 }
 0xf4b   : > { %v7686_v39 = vmul.f32 %v11750_v9, %v7654_v47  ;;  %v7744_v0 = vpop.permute.xlu1 %7743 }
 0xf4c   : > { %v10457_v59 = vpack.c.bf16 %v7685_v51, %v7683_v63 }
 0xf4d   : > { %v10455_v12 = vpack.c.bf16 %v7686_v39, %v7684_v22 }
 0xf4f   : > { %10456 = vmatprep.subr.bf16.mxu1 %v10455_v12  ;;  %v8132_v60 = vpop.permute.xlu1 %8131 }
 0xf50   : > { %10458 = vmatpush1.bf16.msra.mxu1 %v10457_v59 }
 0xf53   : > { %10010 = vmatmul.mubr.msk.f32.vlgmr.msra.gmra.mrb[112].mxu1 %vm3131_vm0, %v7688_v55  ;;  %v8136_v9 = vpop.permute.xlu1 %8135 }
 0xf54   : > { %7919 = vmatprep.mubr.f32.mxu1 %v15184_v44 }
 0xf57   : > { %10011 = vmatmul.mubr.msk.f32.gmra.mrb[114].mxu1 %vm3131_vm0, %v7689_v54 }
 0xf58   : > { %7925 = vmatprep.mubr.f32.mxu1 %v15184_v44 }
 0xf5b   : > { %10012 = vmatmul.mubr.msk.f32.gmra.mrb[116].mxu1 %vm3131_vm0, %v7690_v6 }
 0xf5c   : > { %7931 = vmatprep.mubr.f32.mxu1 %v15184_v44 }
 0xf5f   : > { %10013 = vmatmul.mubr.msk.f32.gmra.mrb[118].mxu1 %vm3131_vm0, %v7691_v45 }
 0xf60   : > { %7937 = vmatprep.mubr.f32.mxu1 %v15184_v44 }
 0xf63   : > { %10014 = vmatmul.mubr.msk.f32.gmra.mrb[120].mxu1 %vm3131_vm0, %v7692_v13 }
 0xf64   : > { %7943 = vmatprep.mubr.f32.mxu1 %v15184_v44 }
 0xf67   : > { %10015 = vmatmul.mubr.msk.f32.gmra.mrb[122].mxu1 %vm3131_vm0, %v7693_v21 }
 0xf68   : > { %7949 = vmatprep.mubr.f32.mxu1 %v15184_v44 }
 0xf6b   : > { %10016 = vmatmul.mubr.msk.f32.gmra.mrb[124].mxu1 %vm3131_vm0, %v7694_v3 }
 0xf6c   : > { %7955 = vmatprep.mubr.f32.mxu1 %v15184_v44 }
 0xf6f   : > { %10017 = vmatmul.mubr.msk.f32.gmra.mrb[126].mxu1 %vm3131_vm0, %v7695_v23 }
 0xf70   : > { %7961 = vmatprep.mubr.f32.mxu1 %v15184_v44 }
0x1026   : > { %v7915_v17 = vpop.f32.mrb[112].mxu1 }
0x1027   : > { %v7916_v33 = vadd.f32 %v7915_v17, %v7724_v49  ;;  %v7917_v40 = vpop.f32.mrb[113].mxu1 }
0x1028   : > { %v7918_v35 = vadd.f32 %v7917_v40, %v7724_v49 }
0x1029   : > { %v8010_v28 = vadd.f32 %v7916_v33, %v14527_v10 }
0x102a   : > { %v8011_v41 = vadd.f32 %v7918_v35, %v14529_v26  ;;  %v7921_v58 = vpop.f32.mrb[114].mxu1  ;;  %v7749_v26 = vpop.permute.xlu0 %7748 }
0x102b   : > { %v8026_v2 = vmul.f32 0.70710677, %v8010_v28  ;;  %v7922_v56 = vadd.f32 %v7921_v58, %v7729_v5  ;;  %v7923_v61 = vpop.f32.mrb[115].mxu1 }
0x102c   : > { %v8027_v14 = vmul.f32 0.70710677, %v8011_v41  ;;  %v7924_v18 = vadd.f32 %v7923_v61, %v7729_v5 }
0x102d   : > { %v14802_v29 = vadd.f32 %v8124_v20, %v8026_v2  ;;  %v8012_v15 = vadd.f32 %v7922_v56, %v14539_v53 }
0x102e   : > { %v14805_v1 = vadd.f32 %v8124_v20, %v8027_v14  ;;  %v8013_v11 = vadd.f32 %v7924_v18, %v14541_v32  ;;  %v7927_v52 = vpop.f32.mrb[116].mxu1 }
0x102f   : > { %v8028_v10 = vmul.f32 0.70710677, %v8012_v15  ;;  %v7928_v63 = vadd.f32 %v7927_v52, %v7734_v48  ;;  %v7929_v22 = vpop.f32.mrb[117].mxu1 }
0x1030   : > { %v8029_v8 = vmul.f32 0.70710677, %v8013_v11  ;;  %v7930_v4 = vadd.f32 %v7929_v22, %v7734_v48  ;;  %v14810_v47 = vpack.i.bf16 %v14805_v1, %v14802_v29 }
0x1031   : > { %v14812_v51 = vadd.f32 %v8128_v19, %v8028_v10  ;;  %v8014_v53 = vadd.f32 %v7928_v63, %v14557_v25 }
0x1032   : > { %v14815_v39 = vadd.f32 %v8128_v19, %v8029_v8  ;;  %v8015_v32 = vadd.f32 %v7930_v4, %v14561_v24  ;;  %v7933_v59 = vpop.f32.mrb[118].mxu1  ;;  %11342 = vrot.lane.b32.xlu1 %v14810_v47, %s12283_s20  ;;  %v7754_v24 = vpop.permute.xlu0 %7753 }
0x1033   : > { %v8030_v12 = vmul.f32 0.70710677, %v8014_v53  ;;  %v7934_v55 = vadd.f32 %v7933_v59, %v7739_v27  ;;  %v7935_v54 = vpop.f32.mrb[119].mxu1  ;;  %v10481_v6 = vpack.c.bf16 %v14812_v51, %v14802_v29  ;;  %v6658_v29 = vld [vmem:[#allocation17 + $0x1f8] sm:$0xff] }
0x1034   : > { %v8031_v45 = vmul.f32 0.70710677, %v8015_v32  ;;  %v7936_v13 = vadd.f32 %v7935_v54, %v7739_v27  ;;  %v14824_v21 = vpack.i.bf16 %v14815_v39, %v14812_v51  ;;  %v10479_v23 = vpack.c.bf16 %v14815_v39, %v14805_v1  ;;  %v7759_v27 = vpop.permute.xlu1 %7758  ;;  %v8779_v1 = vld [vmem:[#allocation17 + $0x2e0] sm:$0xff] }
0x1035   : > { %v8016_v25 = vadd.f32 %v7934_v55, %v14579_v16  ;;  %v14827_v3 = vadd.f32 %v8132_v60, %v8030_v12 }
0x1036   : > { %v14831_v5 = vadd.f32 %v8132_v60, %v8031_v45  ;;  %v8017_v20 = vadd.f32 %v7936_v13, %v14581_v50  ;;  %v7939_v19 = vpop.f32.mrb[120].mxu1  ;;  %11347 = vrot.lane.b32.xlu0 %v14824_v21, %s12283_s20  ;;  %v8140_v60 = vpop.permute.xlu0 %8139 }
0x1037   : > { %v8032_v49 = vmul.f32 0.70710677, %v8016_v25  ;;  %v7940_v17 = vadd.f32 %v7939_v19, %v7744_v0  ;;  %v7941_v33 = vpop.f32.mrb[121].mxu1 }
0x1038   : > { %v8033_v40 = vmul.f32 0.70710677, %v8017_v20  ;;  %v7942_v16 = vadd.f32 %v7941_v33, %v7744_v0  ;;  %v11351_v35 = vpack.i.bf16 %v14831_v5, %v14827_v3  ;;  %v8144_v15 = vpop.permute.xlu1 %8143 }
0x1039   : > { %v8018_v28 = vadd.f32 %v7940_v17, %v14594_v34  ;;  %v14839_v48 = vadd.f32 %v8136_v9, %v8032_v49 }
0x103a   : > { %v14841_v41 = vadd.f32 %v8136_v9, %v8033_v40  ;;  %v8019_v50 = vadd.f32 %v7942_v16, %v14598_v42  ;;  %v7945_v58 = vpop.f32.mrb[122].mxu1  ;;  %11352 = vrot.lane.b32.xlu1 %v11351_v35, %s12283_s20 }
0x103b   : > { %v8034_v2 = vmul.f32 0.70710677, %v8018_v28  ;;  %v7946_v56 = vadd.f32 %v7945_v58, %v7749_v26  ;;  %v7947_v61 = vpop.f32.mrb[123].mxu1  ;;  %v10485_v0 = vpack.c.bf16 %v14839_v48, %v14827_v3 }
0x103c   : > { %v8035_v14 = vmul.f32 0.70710677, %v8019_v50  ;;  %v7948_v18 = vadd.f32 %v7947_v61, %v7749_v26  ;;  %v11356_v34 = vpack.i.bf16 %v14841_v41, %v14839_v48  ;;  %v10483_v42 = vpack.c.bf16 %v14841_v41, %v14831_v5  ;;  %v8148_v54 = vpop.permute.xlu1 %8147  ;;  %v8152_v50 = vpop.permute.xlu0 %8151  ;;  %v8349_v61 = vld [vmem:[#allocation14 + $0x288] sm:$0xff] }
0x103d   : > { %v8020_v11 = vadd.f32 %v7946_v56, %v14613_v30  ;;  %v14850_v52 = vadd.f32 %v8140_v60, %v8034_v2  ;;  %v8348_v56 = vld [vmem:[#allocation14 + $0x280] sm:$0xff]  ;;  %v8780_v48 = vld [vmem:[#allocation17 + $0x2e8] sm:$0xff] }
0x103e   : > { %v8021_v10 = vadd.f32 %v7948_v18, %v14615_v36  ;;  %v14855_v63 = vadd.f32 %v8140_v60, %v8035_v14  ;;  %v7951_v22 = vpop.f32.mrb[124].mxu1  ;;  %11357 = vrot.lane.b32.xlu0 %v11356_v34, %s12283_s20  ;;  %v8350_v14 = vld [vmem:[#allocation14 + $0x290] sm:$0xff]  ;;  %v8357_v18 = vld [vmem:[#allocation14 + $0x2c8] sm:$0xff] }
0x103f   : > { %v8036_v8 = vmul.f32 0.70710677, %v8020_v11  ;;  %v7952_v26 = vadd.f32 %v7951_v22, %v7754_v24  ;;  %v7953_v4 = vpop.f32.mrb[125].mxu1  ;;  %v8353_v11 = vld [vmem:[#allocation14 + $0x2a8] sm:$0xff]  ;;  %v8359_v22 = vld [vmem:[#allocation14 + $0x2d8] sm:$0xff] }
0x1040   : > { %v8037_v9 = vmul.f32 0.70710677, %v8021_v10  ;;  %v7954_v53 = vadd.f32 %v7953_v4, %v7754_v24  ;;  %v11361_v30 = vpack.i.bf16 %v14855_v63, %v14850_v52  ;;  %v8354_v10 = vld [vmem:[#allocation14 + $0x2b0] sm:$0xff] }
0x1041   : > { %v8022_v32 = vadd.f32 %v7952_v26, %v14628_v46  ;;  %v14861_v59 = vadd.f32 %v8144_v15, %v8036_v8  ;;  %v8360_v8 = vld [vmem:[#allocation14 + $0x2e0] sm:$0xff]  ;;  %v8355_v26 = vld [vmem:[#allocation14 + $0x2b8] sm:$0xff]  ;;  %v8362_v4 = vld [vmem:[#allocation14 + $0x2f0] sm:$0xff] }
0x1042   : > { %v8023_v12 = vadd.f32 %v7954_v53, %v14632_v38  ;;  %v14864_v36 = vadd.f32 %v8144_v15, %v8037_v9  ;;  %v7957_v55 = vpop.f32.mrb[126].mxu1  ;;  %11362 = vrot.lane.b32.xlu1 %v11361_v30, %s12283_s20  ;;  %v8358_v15 = vld [vmem:[#allocation14 + $0x2d0] sm:$0xff]  ;;  %v8361_v9 = vld [vmem:[#allocation14 + $0x2e8] sm:$0xff]  ;;  %v3461_v53 = vld [vmem:[#allocation17 + $0x40] sm:$0xff] }
0x1043   : > { %v8038_v45 = vmul.f32 0.70710677, %v8022_v32  ;;  %v7958_v13 = vadd.f32 %v7957_v55, %v7759_v27  ;;  %v7959_v25 = vpop.f32.mrb[127].mxu1  ;;  %v10489_v24 = vpack.c.bf16 %v14861_v59, %v14850_v52  ;;  %v4525_v32 = vld [vmem:[#allocation17 + $0xc0] sm:$0xff]  ;;  %v8781_v52 = vld [vmem:[#allocation17 + $0x2f0] sm:$0xff] }
0x1044   : > { %v8039_v20 = vmul.f32 0.70710677, %v8023_v12  ;;  %v7960_v19 = vadd.f32 %v7959_v25, %v7759_v27  ;;  %v11366_v46 = vpack.i.bf16 %v14864_v36, %v14861_v59  ;;  %v10487_v17 = vpack.c.bf16 %v14864_v36, %v14855_v63  ;;  %v3462_v12 = vld [vmem:[#allocation17 + $0x48] sm:$0xff]  ;;  %v5589_v55 = vld [vmem:[#allocation17 + $0x140] sm:$0xff]  ;;  %v4527_v25 = vld [vmem:[#allocation17 + $0xd0] sm:$0xff] }
0x1045   : > { %v8024_v49 = vadd.f32 %v7958_v13, %v14647_v57  ;;  %v14872_v38 = vadd.f32 %v8148_v54, %v8038_v45  ;;  %v3463_v45 = vld [vmem:[#allocation17 + $0x50] sm:$0xff]  ;;  %v5590_v13 = vld [vmem:[#allocation17 + $0x148] sm:$0xff] }
0x1046   : > { %v8025_v33 = vadd.f32 %v7960_v19, %v14649_v31  ;;  %v14877_v40 = vadd.f32 %v8148_v54, %v8039_v20  ;;  %11367 = vrot.lane.b32.xlu0 %v11366_v46, %s12283_s20  ;;  %v4526_v54 = vld [vmem:[#allocation17 + $0xc8] sm:$0xff]  ;;  %v3464_v20 = vld [vmem:[#allocation17 + $0x58] sm:$0xff]  ;;  %v6651_v19 = vld [vmem:[#allocation17 + $0x1c0] sm:$0xff] }
0x1047   : > { %v8040_v16 = vmul.f32 0.70710677, %v8024_v49  ;;  %v5591_v49 = vld [vmem:[#allocation17 + $0x150] sm:$0xff] }
0x1048   : > { %v8041_v28 = vmul.f32 0.70710677, %v8025_v33  ;;  %v11371_v27 = vpack.i.bf16 %v14877_v40, %v14872_v38  ;;  %v6652_v33 = vld [vmem:[#allocation17 + $0x1c8] sm:$0xff] }
0x1049   : > { %v14882_v58 = vadd.f32 %v8152_v50, %v8040_v16  ;;  %v7713_v16 = vld [vmem:[#allocation17 + $0x240] sm:$0xff] }
0x104a   : > { %v14884_v57 = vadd.f32 %v8152_v50, %v8041_v28  ;;  %11372 = vrot.lane.b32.xlu1 %v11371_v27, %s12283_s20  ;;  %v5592_v28 = vld [vmem:[#allocation17 + $0x158] sm:$0xff]  ;;  %v3465_v50 = vld [vmem:[#allocation17 + $0x60] sm:$0xff] }
0x104b   : > { %v10493_v60 = vpack.c.bf16 %v14882_v58, %v14872_v38  ;;  %v9208_v38 = vld [vmem:[#allocation20] sm:$0xff] }
0x104c   : > { %v11416_v31 = vpack.i.bf16 %v14884_v57, %v14882_v58  ;;  %v10491_v2 = vpack.c.bf16 %v14884_v57, %v14877_v40  ;;  %v7720_v57 = vld [vmem:[#allocation17 + $0x278] sm:$0xff] }
0x104e   : > { %11377 = vrot.lane.b32.xlu0 %v11416_v31, %s12283_s20  ;;  %11382 = vrot.lane.b32.xlu1 %v14810_v47, %s12284_s16  ;;  %v8356_v47 = vld [vmem:[#allocation14 + $0x2c0] sm:$0xff] }
0x1052   : > { %11387 = vrot.lane.b32.xlu0 %v14824_v21, %s12284_s16  ;;  %11392 = vrot.lane.b32.xlu1 %v11351_v35, %s12284_s16  ;;  %v8351_v21 = vld [vmem:[#allocation14 + $0x298] sm:$0xff]  ;;  %v8352_v35 = vld [vmem:[#allocation14 + $0x2a0] sm:$0xff] }
0x1056   : > { %11397 = vrot.lane.b32.xlu0 %v11356_v34, %s12284_s16  ;;  %11402 = vrot.lane.b32.xlu1 %v11361_v30, %s12284_s16  ;;  %v8316_v34 = vld [vmem:[#allocation13 + $0x508] sm:$0xff]  ;;  %v8363_v30 = vld [vmem:[#allocation14 + $0x2f8] sm:$0xff] }
0x1057   : > { %10050 = vmatprep.mubr.msk.f32.mxu0 %vm3131_vm0, %v8316_v34  ;;  %v6654_v34 = vld [vmem:[#allocation17 + $0x1d8] sm:$0xff] }
0x105a   : > { %11407 = vrot.lane.b32.xlu0 %v11366_v46, %s12284_s16  ;;  %11412 = vrot.lane.b32.xlu1 %v11371_v27, %s12284_s16  ;;  %v4528_v46 = vld [vmem:[#allocation17 + $0xd8] sm:$0xff]  ;;  %v7714_v27 = vld [vmem:[#allocation17 + $0x248] sm:$0xff] }
0x105e   : > { %11417 = vrot.lane.b32.xlu0 %v11416_v31, %s12284_s16  ;;  %8366 = vperm.xlu1 %11421, %v8348_v56   ;;  %v4529_v31 = vld [vmem:[#allocation17 + $0xe0] sm:$0xff]  ;;  %v3466_v56 = vld [vmem:[#allocation17 + $0x68] sm:$0xff] }
0x1062   : > { %8371 = vperm.xlu0 %11422, %v8349_v61   ;;  %8376 = vperm.xlu1 %11421, %v8350_v14   ;;  %v6653_v61 = vld [vmem:[#allocation17 + $0x1d0] sm:$0xff]  ;;  %v4530_v14 = vld [vmem:[#allocation17 + $0xe8] sm:$0xff] }
0x1066   : > { %8406 = vperm.xlu0 %11422, %v8356_v47   ;;  %8381 = vperm.xlu1 %11421, %v8351_v21  }
0x106a   : > { %8386 = vperm.xlu0 %11422, %v8352_v35   ;;  %8411 = vperm.xlu1 %11421, %v8357_v18   ;;  %v8775_v18 = vld [vmem:[#allocation17 + $0x2c0] sm:$0xff] }
0x106e   : > { %8416 = vperm.xlu0 %11422, %v8358_v15   ;;  %8391 = vperm.xlu1 %11421, %v8353_v11  }
0x1072   : > { %8396 = vperm.xlu0 %11422, %v8354_v10   ;;  %8421 = vperm.xlu1 %11421, %v8359_v22  }
0x1076   : > { %8426 = vperm.xlu0 %11422, %v8360_v8   ;;  %8401 = vperm.xlu1 %11421, %v8355_v26   ;;  %v5593_v26 = vld [vmem:[#allocation17 + $0x160] sm:$0xff] }
0x107a   : > { %8436 = vperm.xlu0 %11422, %v8362_v4   ;;  %8431 = vperm.xlu1 %11421, %v8361_v9  }
0x107e   : > { %3511 = vperm.xlu0 %11422, %v3461_v53   ;;  %8441 = vperm.xlu1 %11421, %v8363_v30   ;;  %v8776_v53 = vld [vmem:[#allocation17 + $0x2c8] sm:$0xff] }
0x1082   : > { %4575 = vperm.xlu0 %11422, %v4525_v32   ;;  %3516 = vperm.xlu1 %11421, %v3462_v12  }
0x1086   : > { %5639 = vperm.xlu0 %11422, %v5589_v55   ;;  %4580 = vperm.xlu1 %11421, %v4526_v54   ;;  %v7715_v55 = vld [vmem:[#allocation17 + $0x250] sm:$0xff] }
0x108a   : > { %3521 = vperm.xlu0 %11422, %v3463_v45   ;;  %5644 = vperm.xlu1 %11421, %v5590_v13   ;;  %v5594_v45 = vld [vmem:[#allocation17 + $0x168] sm:$0xff] }
0x108e   : > { %4585 = vperm.xlu0 %11422, %v4527_v25   ;;  %3526 = vperm.xlu1 %11421, %v3464_v20  }
0x1092   : > { %6701 = vperm.xlu0 %11422, %v6651_v19   ;;  %4590 = vperm.xlu1 %11421, %v4528_v46   ;;  %v3467_v46 = vld [vmem:[#allocation17 + $0x70] sm:$0xff] }
0x1096   : > { %5649 = vperm.xlu0 %11422, %v5591_v49   ;;  %6706 = vperm.xlu1 %11421, %v6652_v33  }
0x109a   : > { %7763 = vperm.xlu0 %11422, %v7713_v16   ;;  %5654 = vperm.xlu1 %11421, %v5592_v28   ;;  %v7716_v16 = vld [vmem:[#allocation17 + $0x258] sm:$0xff] }
0x109e   : > { %3531 = vperm.xlu0 %11422, %v3465_v50   ;;  %7768 = vperm.xlu1 %11421, %v7714_v27  }
0x10a2   : > { %4595 = vperm.xlu0 %11422, %v4529_v31   ;;  %3536 = vperm.xlu1 %11421, %v3466_v56   ;;  %v4531_v31 = vld [vmem:[#allocation17 + $0xf0] sm:$0xff] }
0x10a4   : > { %v11343_v47 = vpop.permute.xlu1 %11342 }
0x10a5   : > { %v11345_v21 = vunpack.i.h.bf16 %v11343_v47  ;;  %v11344_v35 = vunpack.i.l.bf16 %v11343_v47 }
0x10a6   : > { %6711 = vperm.xlu0 %11422, %v6653_v61   ;;  %4600 = vperm.xlu1 %11421, %v4530_v14   ;;  %v3468_v61 = vld [vmem:[#allocation17 + $0x78] sm:$0xff] }
0x10a7   : > { %v8218_v22 = vsel %vm5030_vm11, %v11344_v35, %v11345_v21 }
0x10a8   : > { %v11348_v15 = vpop.permute.xlu0 %11347 }
0x10a9   : > { %v11350_v11 = vunpack.i.h.bf16 %v11348_v15  ;;  %v11349_v10 = vunpack.i.l.bf16 %v11348_v15 }
0x10aa   : > { %8825 = vperm.xlu0 %11422, %v8775_v18   ;;  %6716 = vperm.xlu1 %11421, %v6654_v34   ;;  %v6655_v18 = vld [vmem:[#allocation17 + $0x1e0] sm:$0xff] }
0x10ab   : > { %v8219_v8 = vsel %vm5030_vm11, %v11349_v10, %v11350_v11  ;;  %v10461_v30 = vpack.c.bf16 %v11349_v10, %v11344_v35  ;;  %v4532_v11 = vld [vmem:[#allocation17 + $0xf8] sm:$0xff] }
0x10ac   : > { %v11353_v4 = vpop.permute.xlu1 %11352  ;;  %v10459_v9 = vpack.c.bf16 %v8219_v8, %v8218_v22 }
0x10ad   : > { %v11355_v32 = vunpack.i.h.bf16 %v11353_v4  ;;  %v11354_v12 = vunpack.i.l.bf16 %v11353_v4 }
0x10ae   : > { %10460 = vmatprep.subr.bf16.mxu0 %v10459_v9  ;;  %5659 = vperm.xlu0 %11422, %v5593_v26   ;;  %v8777_v26 = vld [vmem:[#allocation17 + $0x2d0] sm:$0xff]  ;;  %v6656_v9 = vld [vmem:[#allocation17 + $0x1e8] sm:$0xff] }
0x10af   : > { %10463 = vmatpush1.bf16.msk.msra.mxu0 %vm14120_vm13, %v10461_v30  ;;  %8830 = vperm.xlu1 %11421, %v8776_v53   ;;  %v8220_v20 = vsel %vm5030_vm11, %v11354_v12, %v11355_v32 }
0x10b0   : > { %v11358_v54 = vpop.permute.xlu0 %11357 }
0x10b1   : > { %v11360_v13 = vunpack.i.h.bf16 %v11358_v54  ;;  %v11359_v25 = vunpack.i.l.bf16 %v11358_v54 }
0x10b2   : > { %7773 = vperm.xlu0 %11422, %v7715_v55   ;;  %v5595_v55 = vld [vmem:[#allocation17 + $0x170] sm:$0xff] }
0x10b3   : > { %v8221_v19 = vsel %vm5030_vm11, %v11359_v25, %v11360_v13  ;;  %5664 = vperm.xlu1 %11421, %v5594_v45   ;;  %v10466_v28 = vpack.c.bf16 %v11359_v25, %v11354_v12  ;;  %v8778_v45 = vld [vmem:[#allocation17 + $0x2d8] sm:$0xff]  ;;  %v7717_v25 = vld [vmem:[#allocation17 + $0x260] sm:$0xff] }
0x10b4   : > { %v11363_v49 = vpop.permute.xlu1 %11362  ;;  %v10464_v33 = vpack.c.bf16 %v8221_v19, %v8220_v20  ;;  %v5596_v20 = vld [vmem:[#allocation17 + $0x178] sm:$0xff] }
0x10b5   : > { %v11365_v50 = vunpack.i.h.bf16 %v11363_v49  ;;  %v11364_v27 = vunpack.i.l.bf16 %v11363_v49  ;;  %v6657_v49 = vld [vmem:[#allocation17 + $0x1f0] sm:$0xff] }
0x10b6   : > { %10465 = vmatprep.subr.bf16.mxu0 %v10464_v33  ;;  %3541 = vperm.xlu0 %11422, %v3467_v46  }
0x10b7   : > { %10468 = vmatpush1.bf16.msk.msra.mxu0 %vm14120_vm13, %v10466_v28  ;;  %7778 = vperm.xlu1 %11421, %v7716_v16   ;;  %v8222_v21 = vsel %vm5030_vm11, %v11364_v27, %v11365_v50 }
0x10b8   : > { %v11368_v56 = vpop.permute.xlu0 %11367 }
0x10b9   : > { %v11370_v14 = vunpack.i.h.bf16 %v11368_v56  ;;  %v11369_v47 = vunpack.i.l.bf16 %v11368_v56 }
0x10ba   : > { %4605 = vperm.xlu0 %11422, %v4531_v31  }
0x10bb   : > { %v8223_v35 = vsel %vm5030_vm11, %v11369_v47, %v11370_v14  ;;  %3546 = vperm.xlu1 %11421, %v3468_v61   ;;  %v10471_v10 = vpack.c.bf16 %v11369_v47, %v11364_v27  ;;  %v8782_v61 = vld [vmem:[#allocation17 + $0x2f8] sm:$0xff] }
0x10bc   : > { %v11373_v34 = vpop.permute.xlu1 %11372  ;;  %v10469_v15 = vpack.c.bf16 %v8223_v35, %v8222_v21 }
0x10bd   : > { %v11375_v22 = vunpack.i.h.bf16 %v11373_v34  ;;  %v11374_v8 = vunpack.i.l.bf16 %v11373_v34 }
0x10be   : > { %10470 = vmatprep.subr.bf16.mxu0 %v10469_v15  ;;  %6721 = vperm.xlu0 %11422, %v6655_v18   ;;  %v9210_v15 = vld [vmem:[#allocation20 + $0x10] sm:$0xff] }
0x10bf   : > { %10473 = vmatpush1.bf16.msk.msra.mxu0 %vm14120_vm13, %v10471_v10  ;;  %4610 = vperm.xlu1 %11421, %v4532_v11   ;;  %v8224_v32 = vsel %vm5030_vm11, %v11374_v8, %v11375_v22 }
0x10c0   : > { %v11378_v4 = vpop.permute.xlu0 %11377  ;;  %v11383_v46 = vpop.permute.xlu1 %11382 }
0x10c1   : > { %v11380_v53 = vunpack.i.h.bf16 %v11378_v4  ;;  %v11379_v30 = vunpack.i.l.bf16 %v11378_v4  ;;  %v11385_v5 = vunpack.i.h.bf16 %v11383_v46  ;;  %v11384_v3 = vunpack.i.l.bf16 %v11383_v46  ;;  %v8322_v46 = vld [vmem:[#allocation13 + $0x538] sm:$0xff] }
0x10c2   : > { %8835 = vperm.xlu0 %11422, %v8777_v26  }
0x10c3   : > { %v8225_v12 = vsel %vm5030_vm11, %v11379_v30, %v11380_v53  ;;  %6726 = vperm.xlu1 %11421, %v6656_v9   ;;  %v10476_v13 = vpack.c.bf16 %v11379_v30, %v11374_v8  ;;  %v8282_v59 = vsel %vm5095_vm14, %v11384_v3, %v11385_v5  ;;  %v9209_v8 = vld [vmem:[#allocation20 + $0x8] sm:$0xff]  ;;  %v9212_v53 = vld [vmem:[#allocation20 + $0x20] sm:$0xff]  ;;  %v8329_v3 = vld [vmem:[#allocation13 + $0x570] sm:$0xff] }
0x10c4   : > { %v10474_v54 = vpack.c.bf16 %v8225_v12, %v8224_v32  ;;  %v11388_v19 = vpop.permute.xlu0 %11387  ;;  %v11393_v51 = vpop.permute.xlu1 %11392  ;;  %v9211_v32 = vld [vmem:[#allocation20 + $0x18] sm:$0xff] }
0x10c5   : > { %v11390_v39 = vunpack.i.h.bf16 %v11388_v19  ;;  %v11394_v40 = vunpack.i.l.bf16 %v11393_v51 }
0x10c6   : > { %10475 = vmatprep.subr.bf16.mxu0 %v10474_v54  ;;  %5669 = vperm.xlu0 %11422, %v5595_v55   ;;  %v8315_v55 = vld [vmem:[#allocation13 + $0x500] sm:$0xff]  ;;  %v9214_v54 = vld [vmem:[#allocation20 + $0x30] sm:$0xff] }
0x10c7   : > { %10478 = vmatpush1.bf16.msk.msra.mxu0 %vm14120_vm13, %v10476_v13  ;;  %8840 = vperm.xlu1 %11421, %v8778_v45   ;;  %v8318_v45 = vld [vmem:[#allocation13 + $0x518] sm:$0xff]  ;;  %v9213_v13 = vld [vmem:[#allocation20 + $0x28] sm:$0xff] }
0x10c8   : > { %10480 = vmatprep.subr.bf16.mxu0 %v10479_v23  ;;  %v11398_v33 = vpop.permute.xlu0 %11397  ;;  %v7719_v23 = vld [vmem:[#allocation17 + $0x270] sm:$0xff] }
0x10c9   : > { %v11400_v63 = vunpack.i.h.bf16 %v11398_v33  ;;  %v11399_v36 = vunpack.i.l.bf16 %v11398_v33  ;;  %v8324_v33 = vld [vmem:[#allocation13 + $0x548] sm:$0xff] }
0x10ca   : > { %7783 = vperm.xlu0 %11422, %v7717_v25   ;;  %v8317_v25 = vld [vmem:[#allocation13 + $0x510] sm:$0xff] }
0x10cb   : > { %10482 = vmatpush1.bf16.msra.mxu0 %v10481_v6  ;;  %5674 = vperm.xlu1 %11421, %v5596_v20   ;;  %v11389_v6 = vunpack.i.l.bf16 %v11388_v19  ;;  %v8285_v16 = vsel %vm5095_vm14, %v11399_v36, %v11400_v63  ;;  %v10090_v20 = vld [vmem:[#allocation22] ss:$0 sm:$0xff]  ;;  %v8320_v19 = vld [vmem:[#allocation13 + $0x528] sm:$0xff] }
0x10cc   : > { %10484 = vmatprep.subr.bf16.mxu0 %v10483_v42  ;;  %v11408_v41 = vpop.permute.xlu0 %11407  ;;  %v10495_v42 = vpack.c.bf16 %v11390_v39, %v11385_v5  ;;  %v8330_v5 = vld [vmem:[#allocation13 + $0x578] sm:$0xff]  ;;  %v8335_v36 = vld [vmem:[#allocation13 + $0x5a0] sm:$0xff] }
0x10cd   : > { %v11410_v50 = vunpack.i.h.bf16 %v11408_v41  ;;  %v11409_v27 = vunpack.i.l.bf16 %v11408_v41  ;;  %v8331_v41 = vld [vmem:[#allocation13 + $0x580] sm:$0xff] }
0x10ce   : > { %6731 = vperm.xlu0 %11422, %v6657_v49   ;;  %v9215_v49 = vld [vmem:[#allocation20 + $0x38] sm:$0xff] }
0x10cf   : > { %10486 = vmatpush1.bf16.msra.mxu0 %v10485_v0  ;;  %7788 = vperm.xlu1 %11421, %v7718_v62   ;;  %v8283_v0 = vsel %vm5095_vm14, %v11389_v6, %v11390_v39  ;;  %v8287_v21 = vsel %vm5095_vm14, %v11409_v27, %v11410_v50  ;;  %v8321_v62 = vld [vmem:[#allocation13 + $0x530] sm:$0xff]  ;;  %v9487_v39 = vld [vmem:[#allocation4] sm:$0x1]  ;;  %v8328_v6 = vld [vmem:[#allocation13 + $0x568] sm:$0xff] }
0x10d0   : > { %10488 = vmatprep.subr.bf16.mxu0 %v10487_v17  ;;  %v11403_v17 = vpop.permute.xlu1 %11402  ;;  %v11418_v31 = vpop.permute.xlu0 %11417  ;;  %v7696_v27 = vld [vmem:[#allocation16 + $0x240] sm:$0xff] }
0x10d1   : > { %v11404_v56 = vunpack.i.l.bf16 %v11403_v17  ;;  %v11420_v18 = vunpack.i.h.bf16 %v11418_v31  ;;  %v11419_v34 = vunpack.i.l.bf16 %v11418_v31  ;;  %10018 = vmatmul.mubr.msk.f32.gmra.mrb[16].mxu1 %vm3131_vm0, %v7696_v27  ;;  %v7697_v31 = vld [vmem:[#allocation16 + $0x248] sm:$0xff] }
0x10d2   : > { %8845 = vperm.xlu0 %11422, %v8779_v1   ;;  %v8323_v1 = vld [vmem:[#allocation13 + $0x540] sm:$0xff]  ;;  %7967 = vmatprep.mubr.f32.mxu1 %v15184_v44 }
0x10d3   : > { %10490 = vmatpush1.bf16.msra.mxu0 %v10489_v24  ;;  %6736 = vperm.xlu1 %11421, %v6658_v29   ;;  %v11395_v24 = vunpack.i.h.bf16 %v11393_v51  ;;  %v8289_v4 = vsel %vm5095_vm14, %v11419_v34, %v11420_v18  ;;  %v8326_v29 = vld [vmem:[#allocation13 + $0x558] sm:$0xff]  ;;  %v8325_v51 = vld [vmem:[#allocation13 + $0x550] sm:$0xff] }
0x10d4   : > { %10492 = vmatprep.subr.bf16.mxu0 %v10491_v2  ;;  %v10498_v2 = vpack.c.bf16 %v8283_v0, %v8282_v59  ;;  %v11413_v47 = vpop.permute.xlu1 %11412  ;;  %v8334_v0 = vld [vmem:[#allocation13 + $0x598] sm:$0xff]  ;;  %v8340_v59 = vld [vmem:[#allocation13 + $0x5c8] sm:$0xff] }
0x10d5   : > { %v10500_v28 = vpack.c.bf16 %v11400_v63, %v11395_v24  ;;  %v8284_v58 = vsel %vm5095_vm14, %v11394_v40, %v11395_v24  ;;  %v11415_v10 = vunpack.i.h.bf16 %v11413_v47  ;;  %v11414_v22 = vunpack.i.l.bf16 %v11413_v47  ;;  %v8336_v63 = vld [vmem:[#allocation13 + $0x5a8] sm:$0xff]  ;;  %v8339_v24 = vld [vmem:[#allocation13 + $0x5c0] sm:$0xff]  ;;  %v8342_v40 = vld [vmem:[#allocation13 + $0x5d8] sm:$0xff]  ;;  %10019 = vmatmul.mubr.msk.f32.gmra.mrb[18].mxu1 %vm3131_vm0, %v7697_v31 }
0x10d6   : > { %7793 = vperm.xlu0 %11422, %v7719_v23   ;;  %v10503_v14 = vpack.c.bf16 %v8285_v16, %v8284_v58  ;;  %v8327_v23 = vld [vmem:[#allocation13 + $0x560] sm:$0xff]  ;;  %7973 = vmatprep.mubr.f32.mxu1 %v15184_v44  ;;  %v7699_v58 = vld [vmem:[#allocation16 + $0x258] sm:$0xff] }
0x10d7   : > { %10494 = vmatpush1.bf16.msra.mxu0 %v10493_v60  ;;  %8850 = vperm.xlu1 %11421, %v8780_v48   ;;  %v11405_v60 = vunpack.i.h.bf16 %v11403_v17  ;;  %v10510_v9 = vpack.c.bf16 %v11420_v18, %v11415_v10  ;;  %v8288_v30 = vsel %vm5095_vm14, %v11414_v22, %v11415_v10  ;;  %v8332_v48 = vld [vmem:[#allocation13 + $0x588] sm:$0xff]  ;;  %v8338_v17 = vld [vmem:[#allocation13 + $0x5b8] sm:$0xff]  ;;  %v8343_v16 = vld [vmem:[#allocation13 + $0x5e0] sm:$0xff] }
0x10d8   : > { %10497 = vmatprep.subr.msk.bf16.mxu0 %vm14161_vm15, %v10495_v42  ;;  %v10513_v12 = vpack.c.bf16 %v8289_v4, %v8288_v30  ;;  %v8333_v42 = vld [vmem:[#allocation13 + $0x590] sm:$0xff] }
0x10d9   : > { %v10505_v35 = vpack.c.bf16 %v11410_v50, %v11405_v60  ;;  %v8286_v11 = vsel %vm5095_vm14, %v11404_v56, %v11405_v60  ;;  %v8345_v50 = vld [vmem:[#allocation13 + $0x5f0] sm:$0xff]  ;;  %v7700_v60 = vld [vmem:[#allocation16 + $0x260] sm:$0xff]  ;;  %v7701_v56 = vld [vmem:[#allocation16 + $0x268] sm:$0xff] }
0x10da   : > { %8855 = vperm.xlu0 %11422, %v8781_v52   ;;  %v10508_v26 = vpack.c.bf16 %v8287_v21, %v8286_v11  ;;  %v8337_v52 = vld [vmem:[#allocation13 + $0x5b0] sm:$0xff] }
0x10db   : > { %10499 = vmatpush1.bf16.msra.mxu0 %v10498_v2  ;;  %7798 = vperm.xlu1 %11421, %v7720_v57   ;;  %v8341_v57 = vld [vmem:[#allocation13 + $0x5d0] sm:$0xff]  ;;  %v8344_v2 = vld [vmem:[#allocation13 + $0x5e8] sm:$0xff] }
0x10dc   : > { %10502 = vmatprep.subr.msk.bf16.mxu0 %vm14161_vm15, %v10500_v28  ;;  %v8346_v28 = vld [vmem:[#allocation13 + $0x5f8] sm:$0xff] }
0x10dd   : > { %v8367_v34 = vpop.permute.xlu1 %8366 }
0x10de   : > { %9218 = vperm.xlu0 %11422, %v9208_v38   ;;  %v7698_v38 = vld [vmem:[#allocation16 + $0x250] sm:$0xff] }
0x10df   : > { %10504 = vmatpush1.bf16.msra.mxu0 %v10503_v14  ;;  %8860 = vperm.xlu1 %11421, %v8782_v61   ;;  %v7702_v61 = vld [vmem:[#allocation16 + $0x270] sm:$0xff]  ;;  %v7703_v14 = vld [vmem:[#allocation16 + $0x278] sm:$0xff] }
0x10e0   : > { %10507 = vmatprep.subr.msk.bf16.mxu0 %vm14161_vm15, %v10505_v35  ;;  %10020 = vmatmul.mubr.msk.f32.gmra.mrb[20].mxu1 %vm3131_vm0, %v7698_v38 }
0x10e1   : > { %7979 = vmatprep.mubr.f32.mxu1 %v15184_v44 }
0x10e2   : > { %9228 = vperm.xlu0 %11422, %v9210_v15  }
0x10e3   : > { %10509 = vmatpush1.bf16.msra.mxu0 %v10508_v26  ;;  %9223 = vperm.xlu1 %11421, %v9209_v8   ;;  %v8377_v8 = vpop.permute.xlu1 %8376  ;;  %v8372_v26 = vpop.permute.xlu0 %8371 }
0x10e4   : > { %10512 = vmatprep.subr.msk.bf16.mxu0 %vm14161_vm15, %v10510_v9  ;;  %10021 = vmatmul.mubr.msk.f32.gmra.mrb[22].mxu1 %vm3131_vm0, %v7699_v58 }
0x10e5   : > { %7985 = vmatprep.mubr.f32.mxu1 %v15184_v44 }
0x10e6   : > { %9238 = vperm.xlu0 %11422, %v9212_v53  }
0x10e7   : > { %10514 = vmatpush1.bf16.msra.mxu0 %v10513_v12  ;;  %9233 = vperm.xlu1 %11421, %v9211_v32   ;;  %v8382_v32 = vpop.permute.xlu1 %8381 }
0x10e8   : > { %10022 = vmatmul.mubr.msk.f32.gmra.mrb[24].mxu1 %vm3131_vm0, %v7700_v60 }
0x10e9   : > { %7991 = vmatprep.mubr.f32.mxu1 %v15184_v44 }
0x10ea   : > { %8557 = vmatmul.mubr.f32.vlgmr.msra.gmra.mrb[128].mxu0 %v8315_v55  ;;  %9248 = vperm.xlu0 %11422, %v9214_v54   ;;  %v8407_v54 = vpop.permute.xlu0 %8406 }
0x10eb   : > { %10051 = vmatprep.mubr.msk.f32.mxu0 %vm3131_vm0, %v8318_v45  ;;  %9243 = vperm.xlu1 %11421, %v9213_v13  }
0x10ec   : > { %10023 = vmatmul.mubr.msk.f32.gmra.mrb[26].mxu1 %vm3131_vm0, %v7701_v56 }
0x10ed   : > { %7997 = vmatprep.mubr.f32.mxu1 %v15184_v44 }
0x10ee   : > { %8563 = vmatmul.mubr.f32.gmra.mrb[130].mxu0 %v8317_v25  ;;  %9419 = vbcast.lane.b32.xlu0 %v10090_v20, 264 }
0x10ef   : > { %10052 = vmatprep.mubr.msk.f32.mxu0 %vm3131_vm0, %v8320_v19  ;;  %9415 = vbcast.lane.b32.xlu1 %v10090_v20, 256 }
0x10f0   : > { %10024 = vmatmul.mubr.msk.f32.gmra.mrb[28].mxu1 %vm3131_vm0, %v7702_v61 }
0x10f1   : > { %8003 = vmatprep.mubr.f32.mxu1 %v15184_v44 }
0x10f2   : > { %8569 = vmatmul.mubr.f32.gmra.mrb[132].mxu0 %v8319_v43  ;;  %9423 = vbcast.lane.b32.xlu0 %v10090_v20, 272 }
0x10f3   : > { %10053 = vmatprep.mubr.msk.f32.mxu0 %vm3131_vm0, %v8322_v46  ;;  %9253 = vperm.xlu1 %11421, %v9215_v49  }
0x10f4   : > { %10025 = vmatmul.mubr.msk.f32.gmra.mrb[30].mxu1 %vm3131_vm0, %v7703_v14 }
0x10f5   : > { %9023 = vmatprep.mubr.f32.mxu1 %v15184_v44 }
0x10f6   : > { %8575 = vmatmul.mubr.f32.gmra.mrb[134].mxu0 %v8321_v62  ;;  %9431 = vbcast.lane.b32.xlu0 %v10090_v20, 288  ;;  %v8412_v62 = vpop.permute.xlu1 %8411 }
0x10f7   : > { %10054 = vmatprep.mubr.msk.f32.mxu0 %vm3131_vm0, %v8324_v33  ;;  %9427 = vbcast.lane.b32.xlu1 %v10090_v20, 280 }
0x10fa   : > { %8581 = vmatmul.mubr.f32.gmra.mrb[136].mxu0 %v8323_v1  ;;  %9439 = vbcast.lane.b32.xlu0 %v10090_v20, 304 }
0x10fb   : > { %10055 = vmatprep.mubr.msk.f32.mxu0 %vm3131_vm0, %v8326_v29  ;;  %9435 = vbcast.lane.b32.xlu1 %v10090_v20, 296 }
0x10fe   : > { %8587 = vmatmul.mubr.f32.gmra.mrb[138].mxu0 %v8325_v51  ;;  %9490 = vperm.xlu0 %11422, %v9487_v39   ;;  %v8387_v51 = vpop.permute.xlu0 %8386 }
0x10ff   : > { %10056 = vmatprep.mubr.msk.f32.mxu0 %vm3131_vm0, %v8328_v6  ;;  %9443 = vbcast.lane.b32.xlu1 %v10090_v20, 312 }
0x1102   : > { %8593 = vmatmul.mubr.f32.gmra.mrb[140].mxu0 %v8327_v23 }
0x1103   : > { %10057 = vmatprep.mubr.msk.f32.mxu0 %vm3131_vm0, %v8330_v5 }
0x1106   : > { %8599 = vmatmul.mubr.f32.gmra.mrb[142].mxu0 %v8329_v3 }
0x1107   : > { %10058 = vmatprep.mubr.msk.f32.mxu0 %vm3131_vm0, %v8332_v48 }
0x110a   : > { %8605 = vmatmul.mubr.f32.gmra.mrb[144].mxu0 %v8331_v41 }
0x110b   : > { %10059 = vmatprep.mubr.msk.f32.mxu0 %vm3131_vm0, %v8334_v0  ;;  %v8392_v0 = vpop.permute.xlu1 %8391 }
0x110e   : > { %8611 = vmatmul.mubr.f32.gmra.mrb[146].mxu0 %v8333_v42 }
0x110f   : > { %10060 = vmatprep.mubr.msk.f32.mxu0 %vm3131_vm0, %v8336_v63  ;;  %v8422_v58 = vpop.permute.xlu1 %8421 }
0x1112   : > { %8617 = vmatmul.mubr.f32.gmra.mrb[148].mxu0 %v8335_v36 }
0x1113   : > { %10061 = vmatprep.mubr.msk.f32.mxu0 %vm3131_vm0, %v8338_v17 }
0x1116   : > { %8623 = vmatmul.mubr.f32.gmra.mrb[150].mxu0 %v8337_v52 }
0x1117   : > { %10062 = vmatprep.mubr.msk.f32.mxu0 %vm3131_vm0, %v8340_v59  ;;  %v8417_v59 = vpop.permute.xlu0 %8416 }
0x111a   : > { %8629 = vmatmul.mubr.f32.gmra.mrb[152].mxu0 %v8339_v24 }
0x111b   : > { %10063 = vmatprep.mubr.msk.f32.mxu0 %vm3131_vm0, %v8342_v40 }
0x111e   : > { %8635 = vmatmul.mubr.f32.gmra.mrb[154].mxu0 %v8341_v57 }
0x111f   : > { %10064 = vmatprep.mubr.msk.f32.mxu0 %vm3131_vm0, %v8344_v2 }
0x1122   : > { %8641 = vmatmul.mubr.f32.gmra.mrb[156].mxu0 %v8343_v16 }
0x1123   : > { %10065 = vmatprep.mubr.msk.f32.mxu0 %vm3131_vm0, %v8346_v28 }
0x1126   : > { %8647 = vmatmul.mubr.f32.gmra.mrb[158].mxu0 %v8345_v50 }
0x1127   : > { %8975 = vmatprep.mubr.f32.mxu0 %v15184_v44 }
0x11bd   : > { %v8558_v47 = vpop.f32.mrb[128].mxu0 }
0x11be   : > { %v8560_v21 = vpop.f32.mrb[129].mxu0  ;;  %v8559_v53 = vadd.f32 %v8558_v47, %v8367_v34  ;;  %v8397_v47 = vpop.permute.xlu0 %8396 }
0x11bf   : > { %v8561_v30 = vadd.f32 %v8560_v21, %v8367_v34 }
0x11c0   : > { %v8653_v45 = vmul.f32 0.5, %v8559_v53 }
0x11c1   : > { %v8564_v35 = vpop.f32.mrb[130].mxu0  ;;  %v8654_v25 = vmul.f32 0.5, %v8561_v30  ;;  %v8402_v30 = vpop.permute.xlu1 %8401 }
0x11c2   : > { %v8566_v18 = vpop.f32.mrb[131].mxu0  ;;  %v8565_v13 = vadd.f32 %v8564_v35, %v8372_v26  ;;  %11751 = vtanh.f32 %v8653_v45 }
0x11c3   : > { %v8567_v20 = vadd.f32 %v8566_v18, %v8372_v26  ;;  %11753 = vtanh.f32 %v8654_v25 }
0x11c4   : > { %v8655_v33 = vmul.f32 0.5, %v8565_v13 }
0x11c5   : > { %v8570_v15 = vpop.f32.mrb[132].mxu0  ;;  %v8656_v29 = vmul.f32 0.5, %v8567_v20 }
0x11c6   : > { %v8572_v11 = vpop.f32.mrb[133].mxu0  ;;  %v8571_v19 = vadd.f32 %v8570_v15, %v8377_v8  ;;  %11755 = vtanh.f32 %v8655_v33 }
0x11c7   : > { %v8573_v46 = vadd.f32 %v8572_v11, %v8377_v8  ;;  %11757 = vtanh.f32 %v8656_v29 }
0x11c8   : > { %v8657_v39 = vmul.f32 0.5, %v8571_v19 }
0x11c9   : > { %v8576_v10 = vpop.f32.mrb[134].mxu0  ;;  %v8658_v23 = vmul.f32 0.5, %v8573_v46 }
0x11ca   : > { %v8578_v22 = vpop.f32.mrb[135].mxu0  ;;  %v8577_v1 = vadd.f32 %v8576_v10, %v8382_v32  ;;  %11759 = vtanh.f32 %v8657_v39 }
0x11cb   : > { %v8579_v5 = vadd.f32 %v8578_v22, %v8382_v32  ;;  %11761 = vtanh.f32 %v8658_v23  ;;  %v8427_v23 = vpop.permute.xlu0 %8426 }
0x11cc   : > { %v8659_v48 = vmul.f32 0.5, %v8577_v1  ;;  %v11752_v2 = vpop.eup %11751 }
0x11cd   : > { %v8582_v4 = vpop.f32.mrb[136].mxu0  ;;  %v8660_v63 = vmul.f32 0.5, %v8579_v5  ;;  %v11754_v28 = vpop.eup %11753  ;;  %v8685_v61 = vadd.f32 1.0, %v11752_v2 }
0x11ce   : > { %v8584_v9 = vpop.f32.mrb[137].mxu0  ;;  %v8583_v41 = vadd.f32 %v8582_v4, %v8387_v51  ;;  %11763 = vtanh.f32 %v8659_v48  ;;  %v8686_v21 = vadd.f32 1.0, %v11754_v28 }
0x11cf   : > { %v8585_v36 = vadd.f32 %v8584_v9, %v8387_v51  ;;  %v8701_v9 = vmul.f32 0.5, %v8685_v61 }
0x11d0   : > { %v8661_v24 = vmul.f32 0.5, %v8583_v41  ;;  %v11756_v14 = vpop.eup %11755  ;;  %v8702_v32 = vmul.f32 0.5, %v8686_v21 }
0x11d1   : > { %v8588_v12 = vpop.f32.mrb[138].mxu0  ;;  %v8662_v50 = vmul.f32 0.5, %v8585_v36  ;;  %v11758_v18 = vpop.eup %11757 }
0x11d2   : > { %v8590_v55 = vpop.f32.mrb[139].mxu0  ;;  %v8589_v40 = vadd.f32 %v8588_v12, %v8392_v0  ;;  %v8687_v12 = vadd.f32 1.0, %v11756_v14 }
0x11d3   : > { %v8591_v27 = vadd.f32 %v8590_v55, %v8392_v0  ;;  %v8688_v55 = vadd.f32 1.0, %v11758_v18 }
0x11d4   : > { %v8663_v60 = vmul.f32 0.5, %v8589_v40  ;;  %v11760_v22 = vpop.eup %11759  ;;  %v8703_v5 = vmul.f32 0.5, %v8687_v12 }
0x11d5   : > { %v8594_v43 = vpop.f32.mrb[140].mxu0  ;;  %v8664_v34 = vmul.f32 0.5, %v8591_v27  ;;  %v11762_v4 = vpop.eup %11761  ;;  %v8689_v29 = vadd.f32 1.0, %v11760_v22 }
0x11d6   : > { %v8596_v49 = vpop.f32.mrb[141].mxu0  ;;  %v8595_v15 = vadd.f32 %v8594_v43, %v8397_v47  ;;  %v8690_v48 = vadd.f32 1.0, %v11762_v4 }
0x11d7   : > { %v8597_v8 = vadd.f32 %v8596_v49, %v8397_v47  ;;  %v8705_v40 = vmul.f32 0.5, %v8689_v29 }
0x11d8   : > { %v11764_v53 = vpop.eup %11763  ;;  %v8665_v13 = vmul.f32 0.5, %v8595_v15  ;;  %v8706_v28 = vmul.f32 0.5, %v8690_v48 }
0x11d9   : > { %v14993_v6 = vpop.f32.mrb[142].mxu0  ;;  %v8666_v46 = vmul.f32 0.5, %v8597_v8 }
0x11da   : > { %v14995_v3 = vpop.f32.mrb[143].mxu0  ;;  %v8601_v25 = vadd.f32 %v14993_v6, %v8402_v30  ;;  %v8704_v6 = vmul.f32 0.5, %v8688_v55 }
0x11db   : > { %v8603_v49 = vadd.f32 %v14995_v3, %v8402_v30 }
0x11dd   : > { %v8606_v42 = vpop.f32.mrb[144].mxu0  ;;  %v8668_v3 = vmul.f32 0.5, %v8603_v49 }
0x11de   : > { %v8607_v17 = vadd.f32 %v8606_v42, %v8407_v54  ;;  %v8608_v52 = vpop.f32.mrb[145].mxu0  ;;  %v8667_v42 = vmul.f32 0.5, %v8601_v25 }
0x11df   : > { %v8609_v57 = vadd.f32 %v8608_v52, %v8407_v54 }
0x11e0   : > { %11765 = vtanh.f32 %v8607_v17 }
0x11e1   : > { %11767 = vtanh.f32 %v8609_v57  ;;  %v8612_v16 = vpop.f32.mrb[146].mxu0 }
0x11e2   : > { %11769 = vtanh.f32 %v8660_v63  ;;  %v8613_v31 = vadd.f32 %v8612_v16, %v8412_v62  ;;  %v8614_v38 = vpop.f32.mrb[147].mxu0  ;;  %v8432_v16 = vpop.permute.xlu1 %8431 }
0x11e3   : > { %11771 = vtanh.f32 %v8661_v24  ;;  %v8615_v56 = vadd.f32 %v8614_v38, %v8412_v62 }
0x11e4   : > { %11773 = vtanh.f32 %v8613_v31 }
0x11e5   : > { %11775 = vtanh.f32 %v8615_v56  ;;  %v8618_v35 = vpop.f32.mrb[148].mxu0 }
0x11e6   : > { %11777 = vtanh.f32 %v8662_v50  ;;  %v8619_v11 = vadd.f32 %v8618_v35, %v8417_v59  ;;  %v8620_v10 = vpop.f32.mrb[149].mxu0  ;;  %v8691_v50 = vadd.f32 1.0, %v11764_v53 }
0x11e7   : > { %11779 = vtanh.f32 %v8663_v60  ;;  %v8621_v26 = vadd.f32 %v8620_v10, %v8417_v59 }
0x11e8   : > { %11781 = vtanh.f32 %v8619_v11  ;;  %v8707_v15 = vmul.f32 0.5, %v8691_v50 }
0x11e9   : > { %11783 = vtanh.f32 %v8621_v26  ;;  %v8624_v54 = vpop.f32.mrb[150].mxu0 }
0x11ea   : > { %v11766_v45 = vpop.eup %11765  ;;  %11785 = vtanh.f32 %v8664_v34  ;;  %v8625_v20 = vadd.f32 %v8624_v54, %v8422_v58  ;;  %v8626_v19 = vpop.f32.mrb[151].mxu0 }
0x11eb   : > { %v11768_v43 = vpop.eup %11767  ;;  %v8627_v62 = vadd.f32 %v8626_v19, %v8422_v58  ;;  %v8733_v33 = vmul.f32 %v11766_v45, %v8701_v9  ;;  %v8437_v34 = vpop.permute.xlu0 %8436 }
0x11ec   : > { %v11770_v1 = vpop.eup %11769  ;;  %11787 = vtanh.f32 %v8625_v20  ;;  %v8734_v51 = vmul.f32 %v11768_v43, %v8702_v32  ;;  %v8442_v45 = vpop.permute.xlu1 %8441 }
0x11ed   : > { %v11772_v39 = vpop.eup %11771  ;;  %11789 = vtanh.f32 %v8627_v62  ;;  %v8630_v41 = vpop.f32.mrb[152].mxu0  ;;  %v8692_v58 = vadd.f32 1.0, %v11770_v1 }
0x11ee   : > { %v11774_v0 = vpop.eup %11773  ;;  %11791 = vtanh.f32 %v8665_v13  ;;  %v8631_v63 = vadd.f32 %v8630_v41, %v8427_v23  ;;  %v8632_v36 = vpop.f32.mrb[153].mxu0  ;;  %v8693_v11 = vadd.f32 1.0, %v11772_v39 }
0x11ef   : > { %v11776_v17 = vpop.eup %11775  ;;  %11793 = vtanh.f32 %v8666_v46  ;;  %v8633_v52 = vadd.f32 %v8632_v36, %v8427_v23  ;;  %v8735_v59 = vmul.f32 %v11774_v0, %v8703_v5  ;;  %v8708_v8 = vmul.f32 0.5, %v8692_v58 }
0x11f0   : > { %v11778_v24 = vpop.eup %11777  ;;  %11795 = vtanh.f32 %v8631_v63  ;;  %v8736_v57 = vmul.f32 %v11776_v17, %v8704_v6  ;;  %v8709_v13 = vmul.f32 0.5, %v8693_v11  ;;  %v8763_v11 = vld [vmem:[#allocation16 + $0x2e8] sm:$0xff] }
0x11f1   : > { %v11780_v2 = vpop.eup %11779  ;;  %11797 = vtanh.f32 %v8633_v52  ;;  %v8636_v27 = vpop.f32.mrb[154].mxu0  ;;  %v10517_v31 = vpack.c.bf16 %v8735_v59, %v8733_v33  ;;  %v8694_v26 = vadd.f32 1.0, %v11778_v24 }
0x11f2   : > { %v11782_v38 = vpop.eup %11781  ;;  %11799 = vtanh.f32 %v8667_v42  ;;  %v8637_v60 = vadd.f32 %v8636_v27, %v8432_v16  ;;  %v8638_v56 = vpop.f32.mrb[155].mxu0  ;;  %v10515_v61 = vpack.c.bf16 %v8736_v57, %v8734_v51  ;;  %v8695_v25 = vadd.f32 1.0, %v11780_v2 }
0x11f3   : > { %v11784_v14 = vpop.eup %11783  ;;  %11801 = vtanh.f32 %v8668_v3  ;;  %v8639_v47 = vadd.f32 %v8638_v56, %v8432_v16  ;;  %v8737_v21 = vmul.f32 %v11782_v38, %v8705_v40  ;;  %v8710_v46 = vmul.f32 0.5, %v8694_v26  ;;  %v8751_v26 = vld [vmem:[#allocation16 + $0x288] sm:$0xff] }
0x11f4   : > { %v11786_v35 = vpop.eup %11785  ;;  %11803 = vtanh.f32 %v8637_v60  ;;  %10516 = vmatprep.subr.bf16.mxu0 %v10515_v61  ;;  %10547 = vmatprep.subr.bf16.mxu1 %v10515_v61  ;;  %v8738_v18 = vmul.f32 %v11784_v14, %v8706_v28  ;;  %v8711_v41 = vmul.f32 0.5, %v8695_v25 }
0x11f5   : > { %11805 = vtanh.f32 %v8639_v47  ;;  %v8642_v10 = vpop.f32.mrb[156].mxu0  ;;  %10518 = vmatpush1.bf16.msra.mxu0 %v10517_v31  ;;  %10551 = vmatpush1.bf16.msra.mxu1 %v10517_v31  ;;  %v8696_v49 = vadd.f32 1.0, %v11786_v35  ;;  %v8759_v35 = vld [vmem:[#allocation16 + $0x2c8] sm:$0xff] }
0x11f6   : > { %v11788_v22 = vpop.eup %11787  ;;  %v8643_v4 = vadd.f32 %v8642_v10, %v8437_v34  ;;  %v8644_v9 = vpop.f32.mrb[157].mxu0  ;;  %v8764_v10 = vld [vmem:[#allocation16 + $0x2f0] sm:$0xff] }
0x11f7   : > { %v11790_v53 = vpop.eup %11789  ;;  %v8645_v30 = vadd.f32 %v8644_v9, %v8437_v34  ;;  %v8739_v32 = vmul.f32 %v11788_v22, %v8707_v15  ;;  %v8712_v42 = vmul.f32 0.5, %v8696_v49  ;;  %v8761_v34 = vld [vmem:[#allocation16 + $0x2d8] sm:$0xff]  ;;  %v8762_v15 = vld [vmem:[#allocation16 + $0x2e0] sm:$0xff]  ;;  %v3517_v9 = vpop.permute.xlu1 %3516 }
0x11f8   : > { %v11792_v12 = vpop.eup %11791  ;;  %11807 = vtanh.f32 %v8643_v4  ;;  %v8740_v55 = vmul.f32 %v11790_v53, %v8708_v8  ;;  %v8765_v22 = vld [vmem:[#allocation16 + $0x2f8] sm:$0xff]  ;;  %v8750_v8 = vld [vmem:[#allocation16 + $0x280] sm:$0xff]  ;;  %v3512_v4 = vpop.permute.xlu0 %3511  ;;  %v8752_v53 = vld [vmem:[#allocation16 + $0x290] sm:$0xff] }
0x11f9   : > { %v11794_v54 = vpop.eup %11793  ;;  %11809 = vtanh.f32 %v8645_v30  ;;  %v8648_v20 = vpop.f32.mrb[158].mxu0  ;;  %v10521_v19 = vpack.c.bf16 %v8739_v32, %v8737_v21  ;;  %v8697_v0 = vadd.f32 1.0, %v11792_v12  ;;  %v8758_v21 = vld [vmem:[#allocation16 + $0x2c0] sm:$0xff]  ;;  %v8753_v32 = vld [vmem:[#allocation16 + $0x298] sm:$0xff] }
0x11fa   : > { %v11796_v43 = vpop.eup %11795  ;;  %v8649_v62 = vadd.f32 %v8648_v20, %v8442_v45  ;;  %v8650_v33 = vpop.f32.mrb[159].mxu0  ;;  %v10519_v1 = vpack.c.bf16 %v8740_v55, %v8738_v18  ;;  %v8698_v63 = vadd.f32 1.0, %v11794_v54  ;;  %v8760_v18 = vld [vmem:[#allocation16 + $0x2d0] sm:$0xff]  ;;  %v8754_v55 = vld [vmem:[#allocation16 + $0x2a0] sm:$0xff] }
0x11fb   : > { %v11798_v29 = vpop.eup %11797  ;;  %v8651_v51 = vadd.f32 %v8650_v33, %v8442_v45  ;;  %v8741_v39 = vmul.f32 %v11796_v43, %v8709_v13  ;;  %v8713_v52 = vmul.f32 0.5, %v8697_v0  ;;  %v4581_v12 = vpop.permute.xlu1 %4580  ;;  %v8755_v13 = vld [vmem:[#allocation16 + $0x2a8] sm:$0xff]  ;;  %v8756_v20 = vld [vmem:[#allocation16 + $0x2b0] sm:$0xff]  ;;  %v8757_v43 = vld [vmem:[#allocation16 + $0x2b8] sm:$0xff] }
0x11fc   : > { %v11800_v23 = vpop.eup %11799  ;;  %11811 = vtanh.f32 %v8649_v62  ;;  %10520 = vmatprep.subr.bf16.mxu0 %v10519_v1  ;;  %10548 = vmatprep.subr.bf16.mxu1 %v10519_v1  ;;  %v8742_v5 = vmul.f32 %v11798_v29, %v8710_v46  ;;  %v8714_v57 = vmul.f32 0.5, %v8698_v63  ;;  %v4576_v30 = vpop.permute.xlu0 %4575 }
0x11fd   : > { %v11802_v48 = vpop.eup %11801  ;;  %11813 = vtanh.f32 %v8651_v51  ;;  %10522 = vmatpush1.bf16.msra.mxu0 %v10521_v19  ;;  %10552 = vmatpush1.bf16.msra.mxu1 %v10521_v19  ;;  %v8699_v59 = vadd.f32 1.0, %v11800_v23 }
0x11fe   : > { %v11804_v6 = vpop.eup %11803  ;;  %v8700_v2 = vadd.f32 1.0, %v11802_v48 }
0x11ff   : > { %v11806_v36 = vpop.eup %11805  ;;  %v8743_v17 = vmul.f32 %v11804_v6, %v8711_v41  ;;  %v8715_v31 = vmul.f32 0.5, %v8699_v59  ;;  %v5645_v45 = vpop.permute.xlu1 %5644 }
0x1200   : > { %v8744_v3 = vmul.f32 %v11806_v36, %v8712_v42  ;;  %v8716_v58 = vmul.f32 0.5, %v8700_v2  ;;  %v5640_v54 = vpop.permute.xlu0 %5639 }
0x1201   : > { %v10525_v24 = vpack.c.bf16 %v8743_v17, %v8741_v39 }
0x1202   : > { %v11808_v40 = vpop.eup %11807  ;;  %v10523_v16 = vpack.c.bf16 %v8744_v3, %v8742_v5 }
0x1203   : > { %v11810_v28 = vpop.eup %11809  ;;  %v8745_v50 = vmul.f32 %v11808_v40, %v8713_v52  ;;  %v3527_v19 = vpop.permute.xlu1 %3526 }
0x1204   : > { %10524 = vmatprep.subr.bf16.mxu0 %v10523_v16  ;;  %10549 = vmatprep.subr.bf16.mxu1 %v10523_v16  ;;  %v8746_v27 = vmul.f32 %v11810_v28, %v8714_v57  ;;  %v3522_v25 = vpop.permute.xlu0 %3521  ;;  %v10555_v28 = vadd.f32 %v4576_v30, %v3512_v4 }
0x1205   : > { %10526 = vmatpush1.bf16.msra.mxu0 %v10525_v24  ;;  %10553 = vmatpush1.bf16.msra.mxu1 %v10525_v24 }
0x1206   : > { %v11812_v38 = vpop.eup %11811 }
0x1207   : > { %v11814_v60 = vpop.eup %11813  ;;  %v8747_v56 = vmul.f32 %v11812_v38, %v8715_v31  ;;  %v4591_v49 = vpop.permute.xlu1 %4590  ;;  %v10556_v31 = vadd.f32 %v10555_v28, %v5640_v54 }
0x1208   : > { %v8748_v61 = vmul.f32 %v11814_v60, %v8716_v58  ;;  %v4586_v46 = vpop.permute.xlu0 %4585 }
0x1209   : > { %v10529_v14 = vpack.c.bf16 %v8747_v56, %v8745_v50  ;;  %v10567_v50 = vadd.f32 %v4581_v12, %v3517_v9  ;;  %v10579_v60 = vadd.f32 %v4586_v46, %v3522_v25 }
0x120a   : > { %v10527_v47 = vpack.c.bf16 %v8748_v61, %v8746_v27 }
0x120b   : > { %v6707_v33 = vpop.permute.xlu1 %6706  ;;  %v10568_v58 = vadd.f32 %v10567_v50, %v5645_v45 }
0x120c   : > { %10528 = vmatprep.subr.bf16.mxu0 %v10527_v47  ;;  %10550 = vmatprep.subr.bf16.mxu1 %v10527_v47  ;;  %v6702_v62 = vpop.permute.xlu0 %6701 }
0x120d   : > { %10530 = vmatpush1.bf16.msra.mxu0 %v10529_v14  ;;  %10554 = vmatpush1.bf16.msra.mxu1 %v10529_v14  ;;  %v10557_v56 = vadd.f32 %v10556_v31, %v6702_v62  ;;  %v10591_v14 = vadd.f32 %v4591_v49, %v3527_v19  ;;  %v10569_v47 = vadd.f32 %v10568_v58, %v6707_v33 }
0x120f   : > { %v5655_v29 = vpop.permute.xlu1 %5654 }
0x1210   : > { %10074 = vmatmul.mubr.msk.f32.vlgmr.msra.gmra.mrb[16].mxu1 %vm3131_vm0, %v8758_v21  ;;  %10066 = vmatmul.mubr.msk.f32.vlgmr.msra.gmra.mrb[160].mxu0 %vm3131_vm0, %v8750_v8  ;;  %v5650_v1 = vpop.permute.xlu0 %5649 }
0x1211   : > { %9029 = vmatprep.mubr.f32.mxu1 %v15184_v44  ;;  %8981 = vmatprep.mubr.f32.mxu0 %v15184_v44 }
0x1213   : > { %v7769_v39 = vpop.permute.xlu1 %7768 }
0x1214   : > { %10075 = vmatmul.mubr.msk.f32.gmra.mrb[18].mxu1 %vm3131_vm0, %v8759_v35  ;;  %10067 = vmatmul.mubr.msk.f32.gmra.mrb[162].mxu0 %vm3131_vm0, %v8751_v26  ;;  %v7764_v51 = vpop.permute.xlu0 %7763  ;;  %v10580_v35 = vadd.f32 %v10579_v60, %v5650_v1 }
0x1215   : > { %9035 = vmatprep.mubr.f32.mxu1 %v15184_v44  ;;  %8987 = vmatprep.mubr.f32.mxu0 %v15184_v44 }
0x1217   : > { %v3537_v5 = vpop.permute.xlu1 %3536 }
0x1218   : > { %10076 = vmatmul.mubr.msk.f32.gmra.mrb[20].mxu1 %vm3131_vm0, %v8760_v18  ;;  %10068 = vmatmul.mubr.msk.f32.gmra.mrb[164].mxu0 %vm3131_vm0, %v8752_v53  ;;  %v3532_v23 = vpop.permute.xlu0 %3531  ;;  %v10558_v18 = vadd.f32 %v10557_v56, %v7764_v51 }
0x1219   : > { %9041 = vmatprep.mubr.f32.mxu1 %v15184_v44  ;;  %8993 = vmatprep.mubr.f32.mxu0 %v15184_v44 }
0x121b   : > { %v4601_v41 = vpop.permute.xlu1 %4600 }
0x121c   : > { %10077 = vmatmul.mubr.msk.f32.gmra.mrb[22].mxu1 %vm3131_vm0, %v8761_v34  ;;  %10069 = vmatmul.mubr.msk.f32.gmra.mrb[166].mxu0 %vm3131_vm0, %v8753_v32  ;;  %v4596_v48 = vpop.permute.xlu0 %4595  ;;  %v10592_v34 = vadd.f32 %v10591_v14, %v5655_v29  ;;  %v10615_v53 = vadd.f32 %v4601_v41, %v3537_v5 }
0x121d   : > { %9047 = vmatprep.mubr.f32.mxu1 %v15184_v44  ;;  %8999 = vmatprep.mubr.f32.mxu0 %v15184_v44 }
0x121f   : > { %v6717_v6 = vpop.permute.xlu1 %6716 }
0x1220   : > { %10078 = vmatmul.mubr.msk.f32.gmra.mrb[24].mxu1 %vm3131_vm0, %v8762_v15  ;;  %10070 = vmatmul.mubr.msk.f32.gmra.mrb[168].mxu0 %vm3131_vm0, %v8754_v55  ;;  %v6712_v0 = vpop.permute.xlu0 %6711  ;;  %v10570_v15 = vadd.f32 %v10569_v47, %v7769_v39  ;;  %v10593_v30 = vadd.f32 %v10592_v34, %v6717_v6 }
0x1221   : > { %9053 = vmatprep.mubr.f32.mxu1 %v15184_v44  ;;  %9005 = vmatprep.mubr.f32.mxu0 %v15184_v44  ;;  %v10581_v8 = vadd.f32 %v10580_v35, %v6712_v0 }
0x1223   : > { %v8831_v63 = vpop.permute.xlu1 %8830 }
0x1224   : > { %10079 = vmatmul.mubr.msk.f32.gmra.mrb[26].mxu1 %vm3131_vm0, %v8763_v11  ;;  %10071 = vmatmul.mubr.msk.f32.gmra.mrb[170].mxu0 %vm3131_vm0, %v8755_v13  ;;  %v8826_v42 = vpop.permute.xlu0 %8825  ;;  %v10571_v32 = vadd.f32 %v10570_v15, %v8831_v63 }
0x1225   : > { %9059 = vmatprep.mubr.f32.mxu1 %v15184_v44  ;;  %9011 = vmatprep.mubr.f32.mxu0 %v15184_v44  ;;  %v10559_v26 = vadd.f32 %v10558_v18, %v8826_v42 }
0x1227   : > { %v5665_v17 = vpop.permute.xlu1 %5664 }
0x1228   : > { %10080 = vmatmul.mubr.msk.f32.gmra.mrb[28].mxu1 %vm3131_vm0, %v8764_v10  ;;  %10072 = vmatmul.mubr.msk.f32.gmra.mrb[172].mxu0 %vm3131_vm0, %v8756_v20  ;;  %v5660_v36 = vpop.permute.xlu0 %5659  ;;  %v10616_v46 = vadd.f32 %v10615_v53, %v5665_v17 }
0x1229   : > { %9065 = vmatprep.mubr.f32.mxu1 %v15184_v44  ;;  %9017 = vmatprep.mubr.f32.mxu0 %v15184_v44 }
0x122b   : > { %v7779_v52 = vpop.permute.xlu1 %7778 }
0x122c   : > { %10081 = vmatmul.mubr.msk.f32.gmra.mrb[30].mxu1 %vm3131_vm0, %v8765_v22  ;;  %10073 = vmatmul.mubr.msk.f32.gmra.mrb[174].mxu0 %vm3131_vm0, %v8757_v43  ;;  %v7774_v3 = vpop.permute.xlu0 %7773  ;;  %v10603_v22 = vadd.f32 %v4596_v48, %v3532_v23  ;;  %v10594_v49 = vadd.f32 %v10593_v30, %v7779_v52 }
0x122d   : > { %9344 = vmatprep.mubr.f32.mxu0 %v15184_v44  ;;  %v10582_v13 = vadd.f32 %v10581_v8, %v7774_v3 }
0x122e   : > { %v10604_v45 = vadd.f32 %v10603_v22, %v5660_v36 }
0x122f   : > { %v3547_v24 = vpop.permute.xlu1 %3546 }
0x1230   : > { %v3542_v59 = vpop.permute.xlu0 %3541 }
0x1233   : > { %v4611_v57 = vpop.permute.xlu1 %4610 }
0x1234   : > { %v4606_v40 = vpop.permute.xlu0 %4605  ;;  %v10639_v42 = vadd.f32 %v4611_v57, %v3547_v24 }
0x1235   : > { %v10627_v23 = vadd.f32 %v4606_v40, %v3542_v59 }
0x1237   : > { %v6727_v16 = vpop.permute.xlu1 %6726 }
0x1238   : > { %v6722_v2 = vpop.permute.xlu0 %6721  ;;  %v10617_v63 = vadd.f32 %v10616_v46, %v6727_v16 }
0x1239   : > { %v10605_v5 = vadd.f32 %v10604_v45, %v6722_v2 }
0x123b   : > { %v8841_v38 = vpop.permute.xlu1 %8840 }
0x123c   : > { %v8836_v27 = vpop.permute.xlu0 %8835  ;;  %v10595_v36 = vadd.f32 %v10594_v49, %v8841_v38 }
0x123d   : > { %v10583_v48 = vadd.f32 %v10582_v13, %v8836_v27 }
0x123f   : > { %v5675_v21 = vpop.permute.xlu1 %5674 }
0x1240   : > { %v5670_v61 = vpop.permute.xlu0 %5669  ;;  %v10640_v40 = vadd.f32 %v10639_v42, %v5675_v21  ;;  %v9200_v42 = vld [vmem:[#allocation19] sm:$0xff] }
0x1241   : > { %v10628_v52 = vadd.f32 %v10627_v23, %v5670_v61 }
0x1243   : > { %v7789_v9 = vpop.permute.xlu1 %7788 }
0x1244   : > { %v7784_v11 = vpop.permute.xlu0 %7783  ;;  %v10618_v2 = vadd.f32 %v10617_v63, %v7789_v9  ;;  %v9201_v63 = vld [vmem:[#allocation19 + $0x8] sm:$0xff] }
0x1245   : > { %v10606_v31 = vadd.f32 %v10605_v5, %v7784_v11 }
0x1247   : > { %v6737_v1 = vpop.permute.xlu1 %6736 }
0x1248   : > { %v6732_v19 = vpop.permute.xlu0 %6731  ;;  %v10641_v61 = vadd.f32 %v10640_v40, %v6737_v1 }
0x1249   : > { %v10629_v16 = vadd.f32 %v10628_v52, %v6732_v19  ;;  %v9207_v52 = vld [vmem:[#allocation19 + $0x38] sm:$0xff] }
0x124b   : > { %v8851_v56 = vpop.permute.xlu1 %8850 }
0x124c   : > { %v8846_v28 = vpop.permute.xlu0 %8845  ;;  %v10619_v11 = vadd.f32 %v10618_v2, %v8851_v56 }
0x124d   : > { %v10607_v38 = vadd.f32 %v10606_v31, %v8846_v28  ;;  %v9204_v28 = vld [vmem:[#allocation19 + $0x20] sm:$0xff] }
0x124f   : > { %v7799_v22 = vpop.permute.xlu1 %7798 }
0x1250   : > { %v7794_v34 = vpop.permute.xlu0 %7793  ;;  %v10642_v30 = vadd.f32 %v10641_v61, %v7799_v22 }
0x1251   : > { %v10630_v21 = vadd.f32 %v10629_v16, %v7794_v34 }
0x12e3   : > { %v9025_v10 = vpop.f32.mrb[16].mxu1  ;;  %v8977_v31 = vpop.f32.mrb[160].mxu0 }
0x12e4   : > { %v9027_v4 = vpop.f32.mrb[17].mxu1  ;;  %v10560_v12 = vadd.f32 %v10559_v26, %v9025_v10 }
0x12e5   : > { %v10566_v55 = vadd.f32 %v10559_v26, %v9027_v4 }
0x12e6   : > { %v9184_v62 = vmul.f32 0.4082483, %v10560_v12 }
0x12e7   : > { %v9031_v54 = vpop.f32.mrb[18].mxu1  ;;  %v9185_v29 = vmul.f32 0.4082483, %v10566_v55  ;;  %v8856_v55 = vpop.permute.xlu0 %8855 }
0x12e8   : > { %v10572_v25 = vadd.f32 %v10571_v32, %v9031_v54  ;;  %v9033_v20 = vpop.f32.mrb[19].mxu1 }
0x12e9   : > { %v10578_v43 = vadd.f32 %v10571_v32, %v9033_v20 }
0x12ea   : > { %v9186_v33 = vmul.f32 0.4082483, %v10572_v25  ;;  %v10631_v25 = vadd.f32 %v10630_v21, %v8856_v55 }
0x12eb   : > { %v9187_v51 = vmul.f32 0.4082483, %v10578_v43  ;;  %v9037_v39 = vpop.f32.mrb[20].mxu1  ;;  %v8861_v43 = vpop.permute.xlu1 %8860 }
0x12ec   : > { %v10533_v41 = vpack.c.bf16 %v9186_v33, %v9184_v62  ;;  %v9039_v0 = vpop.f32.mrb[21].mxu1  ;;  %v10584_v3 = vadd.f32 %v10583_v48, %v9037_v39  ;;  %v10643_v49 = vadd.f32 %v10642_v30, %v8861_v43 }
0x12ed   : > { %v10531_v6 = vpack.c.bf16 %v9187_v51, %v9185_v29  ;;  %v10590_v50 = vadd.f32 %v10583_v48, %v9039_v0 }
0x12ee   : > { %v9188_v27 = vmul.f32 0.4082483, %v10584_v3  ;;  %v9203_v3 = vld [vmem:[#allocation19 + $0x18] sm:$0xff] }
0x12ef   : > { %v9043_v17 = vpop.f32.mrb[22].mxu1  ;;  %10532 = vmatprep.subr.bf16.mxu0 %v10531_v6  ;;  %v9189_v47 = vmul.f32 0.4082483, %v10590_v50  ;;  %v9205_v50 = vld [vmem:[#allocation19 + $0x28] sm:$0xff]  ;;  %v9224_v34 = vpop.permute.xlu1 %9223 }
0x12f0   : > { %v10596_v58 = vadd.f32 %v10595_v36, %v9043_v17  ;;  %v9045_v60 = vpop.f32.mrb[23].mxu1  ;;  %10534 = vmatpush1.bf16.msra.mxu0 %v10533_v41  ;;  %v9206_v17 = vld [vmem:[#allocation19 + $0x30] sm:$0xff] }
0x12f1   : > { %v10602_v59 = vadd.f32 %v10595_v36, %v9045_v60  ;;  %v9202_v36 = vld [vmem:[#allocation19 + $0x10] sm:$0xff] }
0x12f2   : > { %v9190_v14 = vmul.f32 0.4082483, %v10596_v58  ;;  %v8979_v58 = vpop.f32.mrb[161].mxu0 }
0x12f3   : > { %v9191_v24 = vmul.f32 0.4082483, %v10602_v59  ;;  %v9049_v57 = vpop.f32.mrb[24].mxu1  ;;  %v8983_v60 = vpop.f32.mrb[162].mxu0 }
0x12f4   : > { %v10537_v35 = vpack.c.bf16 %v9190_v14, %v9188_v27  ;;  %v9051_v18 = vpop.f32.mrb[25].mxu1  ;;  %v10608_v10 = vadd.f32 %v10607_v38, %v9049_v57  ;;  %v8985_v56 = vpop.f32.mrb[163].mxu0 }
0x12f5   : > { %v10535_v15 = vpack.c.bf16 %v9191_v24, %v9189_v47  ;;  %v10614_v8 = vadd.f32 %v10607_v38, %v9051_v18  ;;  %v8989_v59 = vpop.f32.mrb[164].mxu0  ;;  %v9234_v61 = vpop.permute.xlu1 %9233 }
0x12f6   : > { %v9192_v32 = vmul.f32 0.4082483, %v10608_v10  ;;  %v8991_v40 = vpop.f32.mrb[165].mxu0 }
0x12f7   : > { %v9055_v26 = vpop.f32.mrb[26].mxu1  ;;  %10536 = vmatprep.subr.bf16.mxu0 %v10535_v15  ;;  %v9193_v54 = vmul.f32 0.4082483, %v10614_v8  ;;  %v8995_v2 = vpop.f32.mrb[166].mxu0 }
0x12f8   : > { %v10620_v4 = vadd.f32 %v10619_v11, %v9055_v26  ;;  %v9057_v9 = vpop.f32.mrb[27].mxu1  ;;  %10538 = vmatpush1.bf16.msra.mxu0 %v10537_v35  ;;  %v8997_v27 = vpop.f32.mrb[167].mxu0 }
0x12f9   : > { %v10626_v53 = vadd.f32 %v10619_v11, %v9057_v9  ;;  %v9001_v14 = vpop.f32.mrb[168].mxu0  ;;  %v9244_v10 = vpop.permute.xlu1 %9243 }
0x12fa   : > { %v9194_v12 = vmul.f32 0.4082483, %v10620_v4  ;;  %v9003_v47 = vpop.f32.mrb[169].mxu0 }
0x12fb   : > { %v9195_v45 = vmul.f32 0.4082483, %v10626_v53  ;;  %v9061_v13 = vpop.f32.mrb[28].mxu1  ;;  %v9007_v24 = vpop.f32.mrb[170].mxu0 }
0x12fc   : > { %v10541_v20 = vpack.c.bf16 %v9194_v12, %v9192_v32  ;;  %v9063_v19 = vpop.f32.mrb[29].mxu1  ;;  %v10632_v62 = vadd.f32 %v10631_v25, %v9061_v13  ;;  %v9009_v57 = vpop.f32.mrb[171].mxu0 }
0x12fd   : > { %v10539_v46 = vpack.c.bf16 %v9195_v45, %v9193_v54  ;;  %v10638_v33 = vadd.f32 %v10631_v25, %v9063_v19  ;;  %v9013_v16 = vpop.f32.mrb[172].mxu0  ;;  %v9416_v9 = vpop.permute.xlu1 %9415 }
0x12fe   : > { %v9196_v23 = vmul.f32 0.4082483, %v10632_v62  ;;  %v9015_v38 = vpop.f32.mrb[173].mxu0 }
0x12ff   : > { %v9067_v1 = vpop.f32.mrb[30].mxu1  ;;  %10540 = vmatprep.subr.bf16.mxu0 %v10539_v46  ;;  %v9197_v48 = vmul.f32 0.4082483, %v10638_v33  ;;  %v9019_v35 = vpop.f32.mrb[174].mxu0 }
0x1300   : > { %v10644_v29 = vadd.f32 %v10643_v49, %v9067_v1  ;;  %v9069_v51 = vpop.f32.mrb[31].mxu1  ;;  %10542 = vmatpush1.bf16.msra.mxu0 %v10541_v20  ;;  %v9021_v18 = vpop.f32.mrb[175].mxu0 }
0x1301   : > { %v10650_v39 = vadd.f32 %v10643_v49, %v9069_v51  ;;  %v9254_v62 = vpop.permute.xlu1 %9253 }
0x1302   : > { %v9198_v5 = vmul.f32 0.4082483, %v10644_v29 }
0x1303   : > { %v9199_v41 = vmul.f32 0.4082483, %v10650_v39 }
0x1304   : > { %v10545_v0 = vpack.c.bf16 %v9198_v5, %v9196_v23 }
0x1305   : > { %v10543_v6 = vpack.c.bf16 %v9199_v41, %v9197_v48 }
0x1307   : > { %10544 = vmatprep.subr.bf16.mxu0 %v10543_v6 }
0x1308   : > { %10546 = vmatpush1.bf16.msra.mxu0 %v10545_v0 }
0x130b   : > { %10082 = vmatmul.mubr.msk.f32.vlgmr.msra.gmra.mrb[176].mxu0 %vm3131_vm0, %v9200_v42 }
0x130c   : > { %9350 = vmatprep.mubr.f32.mxu0 %v15184_v44 }
0x130f   : > { %10083 = vmatmul.mubr.msk.f32.gmra.mrb[178].mxu0 %vm3131_vm0, %v9201_v63 }
0x1310   : > { %9356 = vmatprep.mubr.f32.mxu0 %v15184_v44 }
0x1313   : > { %10084 = vmatmul.mubr.msk.f32.gmra.mrb[180].mxu0 %vm3131_vm0, %v9202_v36 }
0x1314   : > { %9362 = vmatprep.mubr.f32.mxu0 %v15184_v44 }
0x1317   : > { %10085 = vmatmul.mubr.msk.f32.gmra.mrb[182].mxu0 %vm3131_vm0, %v9203_v3  ;;  %v9428_v3 = vpop.permute.xlu1 %9427 }
0x1318   : > { %9368 = vmatprep.mubr.f32.mxu0 %v15184_v44 }
0x131b   : > { %10086 = vmatmul.mubr.msk.f32.gmra.mrb[184].mxu0 %vm3131_vm0, %v9204_v28 }
0x131c   : > { %9374 = vmatprep.mubr.f32.mxu0 %v15184_v44 }
0x131f   : > { %10087 = vmatmul.mubr.msk.f32.gmra.mrb[186].mxu0 %vm3131_vm0, %v9205_v50 }
0x1320   : > { %9380 = vmatprep.mubr.f32.mxu0 %v15184_v44 }
0x1323   : > { %10088 = vmatmul.mubr.msk.f32.gmra.mrb[188].mxu0 %vm3131_vm0, %v9206_v17 }
0x1324   : > { %9386 = vmatprep.mubr.f32.mxu0 %v15184_v44  ;;  %v9219_v44 = vpop.permute.xlu0 %9218 }
0x1327   : > { %10089 = vmatmul.mubr.msk.f32.gmra.mrb[190].mxu0 %vm3131_vm0, %v9207_v52 }
0x1328   : > { %v9229_v15 = vpop.permute.xlu0 %9228 }
0x132c   : > { %v9239_v11 = vpop.permute.xlu0 %9238 }
0x1330   : > { %v15045_v22 = vpop.permute.xlu0 %9248 }
0x1334   : > { %v9420_v55 = vpop.permute.xlu0 %9419 }
0x1338   : > { %v9424_v23 = vpop.permute.xlu0 %9423 }
0x133c   : > { %v9432_v14 = vpop.permute.xlu0 %9431 }
0x13de   : > { %v9346_v8 = vpop.f32.mrb[176].mxu0 }
0x13df   : > { %v9347_v26 = vadd.f32 %v9346_v8, %v9219_v44  ;;  %v9348_v21 = vpop.f32.mrb[177].mxu0 }
0x13e0   : > { %v9349_v4 = vadd.f32 %v9348_v21, %v9219_v44 }
0x13e1   : > { %v9393_v30 = vmax.f32 %v9347_v26, 0.0 }
0x13e2   : > { %v9352_v53 = vpop.f32.mrb[178].mxu0  ;;  %v9394_v54 = vmax.f32 %v9349_v4, 0.0 }
0x13e3   : > { %v9353_v32 = vadd.f32 %v9352_v53, %v9224_v34  ;;  %v9354_v12 = vpop.f32.mrb[179].mxu0  ;;  %v9445_v19 = vmul.f32 %v9416_v9, %v9393_v30 }
0x13e4   : > { %v9355_v45 = vadd.f32 %v9354_v12, %v9224_v34  ;;  %v9446_v33 = vmul.f32 %v9416_v9, %v9394_v54  ;;  %v9436_v34 = vpop.permute.xlu1 %9435 }
0x13e5   : > { %v9395_v13 = vmax.f32 %v9353_v32, 0.0 }
0x13e6   : > { %v9396_v25 = vmax.f32 %v9355_v45, 0.0  ;;  %v9358_v20 = vpop.f32.mrb[180].mxu0 }
0x13e7   : > { %v9447_v43 = vmul.f32 %v9420_v55, %v9395_v13  ;;  %v9359_v46 = vadd.f32 %v9358_v20, %v9229_v15  ;;  %v9360_v49 = vpop.f32.mrb[181].mxu0 }
0x13e8   : > { %v9448_v1 = vmul.f32 %v9420_v55, %v9396_v25  ;;  %v9361_v29 = vadd.f32 %v9360_v49, %v9229_v15  ;;  %v9440_v55 = vpop.permute.xlu0 %9439 }
0x13e9   : > { %v9461_v51 = vadd.f32 %v9447_v43, %v9445_v19  ;;  %v9397_v39 = vmax.f32 %v9359_v46, 0.0  ;;  %v9444_v46 = vpop.permute.xlu1 %9443 }
0x13ea   : > { %v9474_v5 = vadd.f32 %v9448_v1, %v9446_v33  ;;  %v9398_v48 = vmax.f32 %v9361_v29, 0.0  ;;  %v9364_v41 = vpop.f32.mrb[182].mxu0 }
0x13eb   : > { %v9449_v0 = vmul.f32 %v9424_v23, %v9397_v39  ;;  %v9365_v6 = vadd.f32 %v9364_v41, %v9234_v61  ;;  %v9366_v42 = vpop.f32.mrb[183].mxu0 }
0x13ec   : > { %v9450_v63 = vmul.f32 %v9424_v23, %v9398_v48  ;;  %v9367_v36 = vadd.f32 %v9366_v42, %v9234_v61 }
0x13ed   : > { %v9462_v28 = vadd.f32 %v9461_v51, %v9449_v0  ;;  %v9399_v50 = vmax.f32 %v9365_v6, 0.0 }
0x13ee   : > { %v9475_v17 = vadd.f32 %v9474_v5, %v9450_v63  ;;  %v9400_v52 = vmax.f32 %v9367_v36, 0.0  ;;  %v9370_v31 = vpop.f32.mrb[184].mxu0  ;;  %v9491_v36 = vpop.permute.xlu0 %9490 }
0x13ef   : > { %v9451_v58 = vmul.f32 %v9428_v3, %v9399_v50  ;;  %v9371_v60 = vadd.f32 %v9370_v31, %v9239_v11  ;;  %v9372_v56 = vpop.f32.mrb[185].mxu0  ;;  %v9496_v50 = vrot.slane %v9491_v36, %v12875_v37 }
0x13f0   : > { %v9452_v59 = vmul.f32 %v9428_v3, %v9400_v52  ;;  %v9373_v40 = vadd.f32 %v9372_v56, %v9239_v11 }
0x13f1   : > { %v9463_v2 = vadd.f32 %v9462_v28, %v9451_v58  ;;  %v9401_v27 = vmax.f32 %v9371_v60, 0.0 }
0x13f2   : > { %v9476_v47 = vadd.f32 %v9475_v17, %v9452_v59  ;;  %v9402_v24 = vmax.f32 %v9373_v40, 0.0  ;;  %v9376_v57 = vpop.f32.mrb[186].mxu0  ;;  %v15191_v59 = vlaneseq }
0x13f3   : > { %v9453_v16 = vmul.f32 %v9432_v14, %v9401_v27  ;;  %v9377_v38 = vadd.f32 %v9376_v57, %v9244_v10  ;;  %v9378_v35 = vpop.f32.mrb[187].mxu0 }
0x13f4   : > { %v9454_v18 = vmul.f32 %v9432_v14, %v9402_v24  ;;  %v9379_v44 = vadd.f32 %v9378_v35, %v9244_v10  ;;  %vm9519_vm0 = vcmp.lt.s32.totalorder %v15191_v59, 256 }
0x13f5   : > { %v9464_v15 = vadd.f32 %v9463_v2, %v9453_v16  ;;  %v9403_v61 = vmax.f32 %v9377_v38, 0.0 }
0x13f6   : > { %v9477_v8 = vadd.f32 %v9476_v47, %v9454_v18  ;;  %v9404_v26 = vmax.f32 %v9379_v44, 0.0  ;;  %v9382_v21 = vpop.f32.mrb[188].mxu0 }
0x13f7   : > { %v9455_v4 = vmul.f32 %v9436_v34, %v9403_v61  ;;  %v9383_v11 = vadd.f32 %v9382_v21, %v15045_v22  ;;  %v9384_v9 = vpop.f32.mrb[189].mxu0 }
0x13f8   : > { %v9456_v53 = vmul.f32 %v9436_v34, %v9404_v26  ;;  %v9385_v30 = vadd.f32 %v9384_v9, %v15045_v22 }
0x13f9   : > { %v9465_v32 = vadd.f32 %v9464_v15, %v9455_v4  ;;  %v9405_v12 = vmax.f32 %v9383_v11, 0.0 }
0x13fa   : > { %v9478_v54 = vadd.f32 %v9477_v8, %v9456_v53  ;;  %v9406_v45 = vmax.f32 %v9385_v30, 0.0  ;;  %v9388_v13 = vpop.f32.mrb[190].mxu0 }
0x13fb   : > { %v9457_v10 = vmul.f32 %v9440_v55, %v9405_v12  ;;  %v9389_v25 = vadd.f32 %v9388_v13, %v9254_v62  ;;  %v9390_v20 = vpop.f32.mrb[191].mxu0 }
0x13fc   : > { %v9458_v19 = vmul.f32 %v9440_v55, %v9406_v45  ;;  %v9391_v43 = vadd.f32 %v9390_v20, %v9254_v62 }
0x13fd   : > { %v9407_v49 = vmax.f32 %v9389_v25, 0.0  ;;  %v9466_v33 = vadd.f32 %v9465_v32, %v9457_v10 }
0x13fe   : > { %v9408_v1 = vmax.f32 %v9391_v43, 0.0  ;;  %v9479_v29 = vadd.f32 %v9478_v54, %v9458_v19 }
0x13ff   : > { %v9459_v51 = vmul.f32 %v9444_v46, %v9407_v49 }
0x1400   : > { %v9460_v39 = vmul.f32 %v9444_v46, %v9408_v1 }
0x1401   : > { %v9467_v23 = vadd.f32 %v9466_v33, %v9459_v51 }
0x1402   : > { %v9480_v22 = vadd.f32 %v9479_v29, %v9460_v39 }
0x1403   : > { %v9468_v5 = vrot.slane %v9467_v23, 4 }
0x1404   : > { %v9481_v48 = vrot.slane %v9480_v22, 4 }
0x1405   : > { %v9469_v41 = vadd.f32 %v9468_v5, %v9467_v23 }
0x1406   : > { %v9482_v0 = vadd.f32 %v9481_v48, %v9480_v22 }
0x1407   : > { %v9470_v6 = vrot.slane %v9469_v41, 2 }
0x1408   : > { %v9483_v42 = vrot.slane %v9482_v0, 2 }
0x1409   : > { %v9471_v63 = vadd.f32 %v9470_v6, %v9469_v41 }
0x140a   : > { %v9484_v62 = vadd.f32 %v9483_v42, %v9482_v0 }
0x140b   : > { %v9472_v3 = vrot.slane %v9471_v63, 1 }
0x140c   : > { %v9485_v28 = vrot.slane %v9484_v62, 1 }
0x140d   : > { %v9473_v17 = vadd.f32 %v9472_v3, %v9471_v63 }
0x140e   : > { %v9486_v52 = vadd.f32 %v9485_v28, %v9484_v62 }
0x140f   : > { %v9497_v31 = vadd.f32 %v9496_v50, %v9473_v17 }
0x1410   : > { %v9498_v58 = vadd.f32 %v9496_v50, %v9486_v52 }
0x1412   : > { %v9501_v60 = vcombine.low %v9497_v31, %v9498_v58 }
0x1414   : > { %v9508_v56 = vrot.slane %v9501_v60, %v12776_v7 }
0x1416   : > { %v9515_v40 = vrot.slane %v9508_v56, %v12776_v7 }
0x1418   : > { %9521 = vst.msk [vmem:[%s599_s6] sm:$0x3] %vm9519_vm0, %v9515_v40 }
0x1419   : > { %12180 = shalt.err (!%p12177_p1)
}
0x141a   : > { %s12181_s18 = scalar_lea.hbm %s15059_s5, 32  ;;  %s12185_s11 = scalar_lea.hbm %s15192_s4, 64 }
0x141b   : > { %p12182_p13 = scmp.ne.s32.totalorder %s15059_s5, %s12181_s18  ;;  %p12186_p2 = scmp.lt.u32.totalorder %s15059_s5, %s15192_s4 }
0x141c   : > { %p12187_p6 = scmp.lt.u32.totalorder %s12185_s11, %s12181_s18  ;;  %p12189_p5 = scmp.lt.u32.totalorder %s12181_s18, %s15059_s5 }
0x141d   : > { %p12183_p0 = pnand %p12182_p13, %p15193_p9 }
0x141e   : > { %p12188_p10 = por %p12187_p6, %p12186_p2 }
0x141f   : > { %p12184_p7 = pneg %p12183_p0 }
0x1420   : > { %p12190_p4 = por %p12189_p5, %p12188_p10 }
0x1422   : > { %p12191_p8 = pnand %p12190_p4, %p12184_p7 }
0x1424   : > { %12194 = shalt.err (!%p12191_p8)
}
0x1425   : > { %10771 = dma.vmem_to_hbm [thread:$0]  (%p15193_p9), %s15061_s19, 32, %s15059_s5, %s9523_s28  }
0x1426 PF: > { %s9549_s12 = sand.u32 1, %s12245_s23   ;;  %p15194_p11 = scmp.ne.s32.totalorder %s15151_s13, 0 }
0x1427   : > { %p15195_p3 = scmp.ge.s32.totalorder %s12257_s26, 2  ;;  %s9550_s6 = scalar_lea.sflag [#allocation7], %s9549_s12 }
0x1429   : > { %p10809_p12 = pnand %p15195_p3, %p15194_p11 }
0x142b   : > { %12240 = dma.done.wait (!%p10809_p12), %s9550_s6, 32  }
0x142c   : > { %12242 = vsyncadd (!%p10809_p12), %s9550_s6, 4294967264  ;;  %p34_p1 = scmp.ge.s32.totalorder %s12615_s14, 4   ;;  %s15196_s23 = smov %s12249_s24 }
0x142d   : > { %s15197_s24 = smov %s12253_s25  ;;  %s15198_s25 = smov %s12627_s21 }
0x142e   : > { %s15199_s26 = smov %s12615_s14  ;;  %36 = sbr.rel (!%p34_p1) target bundleno = 20 (0x14), region = 182 }
0x1435   :  { %9555 = vsyncpa [#allocation6], 1 }
0x1436   :  { %9557 = vsyncpa [#allocation6 + $0x1], 1 }
0x1437   :  { %9558 = vsyncpa [#allocation9], 1 }
0x1438   :  { %9560 = vsyncpa [#allocation9 + $0x1], 1 }
0x1439   :  { %9561 = vsyncpa [#allocation12], 1 }
0x143a   :  { %9562 = vsyncpa [#allocation15], 1 }
0x143b   :  { %9563 = vsyncpa [#allocation18], 1 }
0x143c   :  { %9564 = vsyncpa [#allocation21], 1 }
0x143d   :  { %9565 = vsyncpa [#allocation7], 1 }
0x143e   :  { %9567 = vsyncpa [#allocation7 + $0x1], 1 }

</bundles_post_ra>
